<compile_context>
chip_gen: v6e
topology: v6e:2x2x1
jax: 0.10.0
libtpu: 0.0.40
codegen_flags: <defaults>
</compile_context>

<pallas_src>
import numpy as np
import jax
import jax.numpy as jnp
from jax.experimental import pallas as pl
from jax.experimental.pallas import tpu as pltpu

# Make every f32 matmul (reference and kernel) true-f32 accurate on TPU.
jax.config.update("jax_default_matmul_precision", "highest")
HIGHEST = jax.lax.Precision.HIGHEST

# ----------------------------- configuration --------------------------------
DIM = 32                       # channels C
NUM_HEADS = 2
HEAD_DIM = DIM // NUM_HEADS
WINDOW_SIZE = 4
N = WINDOW_SIZE * WINDOW_SIZE  # tokens per window (16)
H = W = 8                      # resolution used to build the SW-MSA mask
SHIFT_SIZE = 2                 # exercises the mask path of forward()
NW = (H // WINDOW_SIZE) * (W // WINDOW_SIZE)   # windows per image (4)


# ------------------------------ parameters -----------------------------------
def init_params(key):
    ks = jax.random.split(key, 12)
    n = lambda k, shape: 0.02 * jax.random.normal(k, shape, jnp.float32)
    return {
        "w_qkv": n(ks[0], (3 * DIM, DIM)),
        "q_bias": n(ks[1], (DIM,)),
        "v_bias": n(ks[2], (DIM,)),
        "logit_scale": jnp.log(10.0) * jnp.ones((NUM_HEADS, 1, 1), jnp.float32),
        "cpb_w1": n(ks[3], (512, 2)),
        "cpb_b1": jnp.zeros((512,), jnp.float32),
        "cpb_w2": n(ks[4], (NUM_HEADS, 512)),
        "w_proj": n(ks[5], (DIM, DIM)),
        "b_proj": n(ks[6], (DIM,)),
    }


def compute_relative_position_bias(p):
    """cpb_mlp(relative_coords_table) gathered by relative_position_index,
    16*sigmoid applied -> (num_heads, N, N).  Parameter-only (no x dependence)."""
    ws = WINDOW_SIZE
    rc = jnp.arange(-(ws - 1), ws, dtype=jnp.float32)
    gy, gx = jnp.meshgrid(rc, rc, indexing="ij")
    table = jnp.stack([gy, gx], axis=-1)                     # (2ws-1, 2ws-1, 2)
    table = table / (ws - 1)
    table = table * 8.0
    table = jnp.sign(table) * jnp.log2(jnp.abs(table) + 1.0) / np.log2(8.0)
    flat = table.reshape(-1, 2)
    hid = jax.nn.relu(jnp.matmul(flat, p["cpb_w1"].T, precision=HIGHEST) + p["cpb_b1"])
    bias_table = jnp.matmul(hid, p["cpb_w2"].T, precision=HIGHEST)  # (M, nh)

    c = jnp.arange(ws)
    cy, cx = jnp.meshgrid(c, c, indexing="ij")
    coords = jnp.stack([cy, cx]).reshape(2, -1)               # (2, N)
    rel = coords[:, :, None] - coords[:, None, :]             # (2, N, N)
    rel = rel.transpose(1, 2, 0)
    rel = rel.at[..., 0].add(ws - 1)
    rel = rel.at[..., 1].add(ws - 1)
    rel = rel.at[..., 0].multiply(2 * ws - 1)
    idx = rel.sum(-1).reshape(-1)                             # (N*N,)

    rpb = bias_table[idx].reshape(N, N, NUM_HEADS).transpose(2, 0, 1)
    return 16.0 * jax.nn.sigmoid(rpb)                         # (nh, N, N)


def compute_attn_mask():
    """Shifted-window attention mask (nW, N, N) with 0 / -100 entries."""
    if SHIFT_SIZE == 0:
        return None
    img_mask = np.zeros((1, H, W, 1), np.float32)
    slices = (slice(0, -WINDOW_SIZE), slice(-WINDOW_SIZE, -SHIFT_SIZE),
              slice(-SHIFT_SIZE, None))
    cnt = 0
    for hs in slices:
        for wsl in slices:
            img_mask[:, hs, wsl, :] = cnt
            cnt += 1
    m = img_mask.reshape(1, H // WINDOW_SIZE, WINDOW_SIZE,
                         W // WINDOW_SIZE, WINDOW_SIZE, 1)
    m = m.transpose(0, 1, 3, 2, 4, 5).reshape(-1, N)          # (nW, N)
    diff = m[:, None, :] - m[:, :, None]
    return jnp.asarray(np.where(diff != 0, -100.0, 0.0).astype(np.float32))


def prepare_inputs(params, mask):
    """One-time host-side parameter prep (hoisted out of the per-forward path)."""
    WqT = params["w_qkv"][0 * DIM:1 * DIM].T                  # (C, C)
    WkT = params["w_qkv"][1 * DIM:2 * DIM].T
    WvT = params["w_qkv"][2 * DIM:3 * DIM].T
    per_head_cols = lambda Wt: jnp.stack(
        [Wt[:, h * HEAD_DIM:(h + 1) * HEAD_DIM] for h in range(NUM_HEADS)])
    wq, wk, wv = per_head_cols(WqT), per_head_cols(WkT), per_head_cols(WvT)

    qb = jnp.stack([params["q_bias"][h * HEAD_DIM:(h + 1) * HEAD_DIM]
                    .reshape(1, HEAD_DIM) for h in range(NUM_HEADS)])
    vb = jnp.stack([params["v_bias"][h * HEAD_DIM:(h + 1) * HEAD_DIM]
                    .reshape(1, HEAD_DIM) for h in range(NUM_HEADS)])

    WpT = params["w_proj"].T                                  # (C, C)
    wph = jnp.stack([WpT[h * HEAD_DIM:(h + 1) * HEAD_DIM, :]
                     for h in range(NUM_HEADS)])              # (nh, hd, C)

    scale = jnp.exp(jnp.minimum(params["logit_scale"],
                                jnp.log(jnp.float32(100.0)))).reshape(NUM_HEADS)

    rpb = compute_relative_position_bias(params)              # (nh, N, N)
    if mask is None:
        bias = jnp.broadcast_to(rpb[:, None], (NUM_HEADS, NW, N, N))
    else:
        bias = rpb[:, None] + mask[None]                      # (nh, nW, N, N)
    bias = jnp.asarray(bias, jnp.float32)

    return {
        "wq": wq, "wk": wk, "wv": wv, "qb": qb, "vb": vb,
        "wph": wph, "bproj": params["b_proj"].reshape(1, DIM),
        "bias": bias, "scale": scale,
    }


# ------------------------------ fused Pallas kernel ---------------------------
def window_attention_kernel(x_ref, wq_ref, wk_ref, wv_ref, qb_ref, vb_ref,
                            wph_ref, bproj_ref, bias_ref, scale_ref, o_ref):
    # x_ref: (NW*N, C) = (64, 32) -- one mask-group of nW windows.
    x = x_ref[...]

    acc = jnp.zeros((NW * N, DIM), jnp.float32)
    for h in range(NUM_HEADS):                                # unrolled (2 heads)
        q = jnp.dot(x, wq_ref[h], preferred_element_type=jnp.float32,
                    precision=HIGHEST) + qb_ref[h]
        k = jnp.dot(x, wk_ref[h], preferred_element_type=jnp.float32,
                    precision=HIGHEST)
        v = jnp.dot(x, wv_ref[h], preferred_element_type=jnp.float32,
                    precision=HIGHEST) + vb_ref[h]

        # cosine attention: F.normalize(q), F.normalize(k)  (exact formula).
        qn = q / jnp.maximum(jnp.sqrt(jnp.sum(q * q, -1, keepdims=True)), 1e-12)
        kn = k / jnp.maximum(jnp.sqrt(jnp.sum(k * k, -1, keepdims=True)), 1e-12)

        q3 = qn.reshape(NW, N, HEAD_DIM)
        k3 = kn.reshape(NW, N, HEAD_DIM)
        v3 = v.reshape(NW, N, HEAD_DIM)

        s = jnp.einsum("bnd,bmd->bnm", q3, k3,
                       preferred_element_type=jnp.float32,
                       precision=HIGHEST)                     # (nW, N, N)
        # clipped logit scale (SMEM scalar) + rel-pos bias (+ shift mask).
        s = s * scale_ref[h] + bias_ref[h]

        # numerically-stable softmax with exact division (correctness fix).
        s = s - jnp.max(s, axis=-1, keepdims=True)
        p = jnp.exp(s)
        attn = p / jnp.sum(p, axis=-1, keepdims=True)

        o3 = jnp.einsum("bnm,bmd->bnd", attn, v3,
                        preferred_element_type=jnp.float32,
                        precision=HIGHEST)                    # (nW, N, hd)
        # head merge folded into the output projection (no lane-axis concat).
        acc = acc + jnp.dot(o3.reshape(NW * N, HEAD_DIM), wph_ref[h],
                            preferred_element_type=jnp.float32,
                            precision=HIGHEST)

    o_ref[...] = (acc + bproj_ref[0]).astype(o_ref.dtype)
    # TODO(synk): attn_drop / proj_drop are p=0.0 (identity) and are omitted.


# ------------------------------ pallas wrapper --------------------------------
def _cspec(shape):
    nd = len(shape)
    return pl.BlockSpec(shape, lambda b, _nd=nd: (0,) * _nd)


def fused_forward(x, prep):
    """x: (num_windows*B, N, C) -> (num_windows*B, N, C)."""
    B_, Nn, C = x.shape
    B = B_ // NW                                  # mask-group count
    x2d = x.reshape(B_ * Nn, C)
    out = pl.pallas_call(
        window_attention_kernel,
        out_shape=jax.ShapeDtypeStruct((B_ * Nn, C), x.dtype),
        grid=(B,),
        in_specs=[
            pl.BlockSpec((NW * N, DIM), lambda b: (b, 0)),    # x (per-group block)
            _cspec((NUM_HEADS, DIM, HEAD_DIM)),               # wq
            _cspec((NUM_HEADS, DIM, HEAD_DIM)),               # wk
            _cspec((NUM_HEADS, DIM, HEAD_DIM)),               # wv
            _cspec((NUM_HEADS, 1, HEAD_DIM)),                 # q bias
            _cspec((NUM_HEADS, 1, HEAD_DIM)),                 # v bias
            _cspec((NUM_HEADS, HEAD_DIM, DIM)),               # proj weight (per head)
            _cspec((1, DIM)),                                 # proj bias
            _cspec((NUM_HEADS, NW, N, N)),                    # rel-pos bias + mask
            pl.BlockSpec((NUM_HEADS,), lambda b: (0,),
                         memory_space=pltpu.MemorySpace.SMEM),  # logit scale
        ],
        out_specs=pl.BlockSpec((NW * N, DIM), lambda b: (b, 0)),
        compiler_params=pltpu.CompilerParams(dimension_semantics=("parallel",)),
    )(x2d, prep["wq"], prep["wk"], prep["wv"], prep["qb"], prep["vb"],
      prep["wph"], prep["bproj"], prep["bias"], prep["scale"])
    return out.reshape(B_, Nn, C)


# ------------------------------ pure-JAX reference ----------------------------
def reference_forward(x, params, mask):
    """Faithful JAX port of WindowAttention.forward (f32-accurate matmuls)."""
    mm = lambda a, b: jnp.matmul(a, b, precision=HIGHEST)
    B_, Nn, C = x.shape
    qkv_bias = jnp.concatenate(
        [params["q_bias"], jnp.zeros_like(params["v_bias"]), params["v_bias"]])
    qkv = mm(x, params["w_qkv"].T) + qkv_bias
    qkv = qkv.reshape(B_, Nn, 3, NUM_HEADS, HEAD_DIM).transpose(2, 0, 3, 1, 4)
    q, k, v = qkv[0], qkv[1], qkv[2]
    qn = q / jnp.maximum(jnp.linalg.norm(q, axis=-1, keepdims=True), 1e-12)
    kn = k / jnp.maximum(jnp.linalg.norm(k, axis=-1, keepdims=True), 1e-12)
    attn = mm(qn, jnp.swapaxes(kn, -2, -1))
    scale = jnp.exp(jnp.minimum(params["logit_scale"], jnp.log(100.0)))
    attn = attn * scale[None]
    rpb = compute_relative_position_bias(params)
    attn = attn + rpb[None]
    if mask is not None:
        nW = mask.shape[0]
        attn = attn.reshape(B_ // nW, nW, NUM_HEADS, Nn, Nn) + mask[None, :, None]
        attn = attn.reshape(-1, NUM_HEADS, Nn, Nn)
    attn = jax.nn.softmax(attn, axis=-1)
    out = mm(attn, v).transpose(0, 2, 1, 3).reshape(B_, Nn, C)
    return mm(out, params["w_proj"].T) + params["b_proj"]


# ----------------------------------- main -------------------------------------
if __name__ == "__main__":
    key = jax.random.PRNGKey(0)
    kx, kp = jax.random.split(key)
    params = init_params(kp)

    B = 2                                   # images
    B_ = B * NW                             # num_windows * B = 8
    x = jax.random.normal(kx, (B_, N, DIM), jnp.float32)   # (8, 16, 32)

    mask = compute_attn_mask()              # (nW, N, N) shifted-window mask
    prep = prepare_inputs(params, mask)     # one-time host prep (hoisted)

    fwd = jax.jit(fused_forward)
    out = jax.block_until_ready(fwd(x, prep))

    ref = reference_forward(x, params, mask)
    np.testing.assert_allclose(np.asarray(out), np.asarray(ref),
                               rtol=2e-3, atol=2e-3)

    print("KERNEL_OK")
</pallas_src>

<mosaic_0001>
module attributes {stable_mosaic.version = 11 : i64} {
  func.func @window_attention_kernel(%arg0: i32, %arg1: memref<64x32xf32, #tpu.memory_space<vmem>>, %arg2: memref<2x32x16xf32, #tpu.memory_space<vmem>>, %arg3: memref<2x32x16xf32, #tpu.memory_space<vmem>>, %arg4: memref<2x32x16xf32, #tpu.memory_space<vmem>>, %arg5: memref<2x1x16xf32, #tpu.memory_space<vmem>>, %arg6: memref<2x1x16xf32, #tpu.memory_space<vmem>>, %arg7: memref<2x16x32xf32, #tpu.memory_space<vmem>>, %arg8: memref<1x32xf32, #tpu.memory_space<vmem>>, %arg9: memref<2x4x16x16xf32, #tpu.memory_space<vmem>>, %arg10: memref<2xf32, #tpu.memory_space<smem>>, %arg11: memref<64x32xf32, #tpu.memory_space<vmem>>) attributes {dimension_semantics = [#tpu.dimension_semantics<parallel>], iteration_bounds = array<i64: 2>, scalar_prefetch = 0 : i64, scratch_operands = 0 : i64, tpu.core_type = #tpu.core_type<tc>, window_params = [{transform_indices = @transform_0, window_bounds = array<i64: 64, 32>}, {pipeline_mode = #tpu.pipeline_mode<synchronous>, transform_indices = @transform_1, window_bounds = array<i64: 2, 32, 16>}, {pipeline_mode = #tpu.pipeline_mode<synchronous>, transform_indices = @transform_2, window_bounds = array<i64: 2, 32, 16>}, {pipeline_mode = #tpu.pipeline_mode<synchronous>, transform_indices = @transform_3, window_bounds = array<i64: 2, 32, 16>}, {pipeline_mode = #tpu.pipeline_mode<synchronous>, transform_indices = @transform_4, window_bounds = array<i64: 2, 1, 16>}, {pipeline_mode = #tpu.pipeline_mode<synchronous>, transform_indices = @transform_5, window_bounds = array<i64: 2, 1, 16>}, {pipeline_mode = #tpu.pipeline_mode<synchronous>, transform_indices = @transform_6, window_bounds = array<i64: 2, 16, 32>}, {pipeline_mode = #tpu.pipeline_mode<synchronous>, transform_indices = @transform_7, window_bounds = array<i64: 1, 32>}, {pipeline_mode = #tpu.pipeline_mode<synchronous>, transform_indices = @transform_8, window_bounds = array<i64: 2, 4, 16, 16>}, {transform_indices = @transform_9, window_bounds = array<i64: 2>}, {transform_indices = @transform_10, window_bounds = array<i64: 64, 32>}]} {
    %c0 = arith.constant 0 : index
    %c0_0 = arith.constant 0 : index
    %0 = vector.load %arg1[%c0, %c0_0] : memref<64x32xf32, #tpu.memory_space<vmem>>, vector<64x32xf32>
    %cst = arith.constant 0.000000e+00 : f32
    %1 = vector.broadcast %cst : f32 to vector<64x32xf32>
    %c0_1 = arith.constant 0 : index
    %c0_2 = arith.constant 0 : index
    %c0_3 = arith.constant 0 : index
    %2 = vector.load %arg2[%c0_1, %c0_2, %c0_3] : memref<2x32x16xf32, #tpu.memory_space<vmem>>, vector<1x32x16xf32>
    %3 = vector.shape_cast %2 : vector<1x32x16xf32> to vector<32x16xf32>
    %cst_4 = arith.constant dense<0.000000e+00> : vector<64x16xf32>
    %4 = tpu.matmul %0, %3, %cst_4 {dimension_numbers = #tpu.dot_dimension_numbers<[1], [0], [0], [1], [0, 0, 1, 1], [], []>, precision = #tpu.contract_precision<fp32>} : vector<64x32xf32>, vector<32x16xf32>, vector<64x16xf32> -> vector<64x16xf32>
    %c0_5 = arith.constant 0 : index
    %c0_6 = arith.constant 0 : index
    %c0_7 = arith.constant 0 : index
    %5 = vector.load %arg5[%c0_5, %c0_6, %c0_7] : memref<2x1x16xf32, #tpu.memory_space<vmem>>, vector<1x1x16xf32>
    %6 = vector.shape_cast %5 : vector<1x1x16xf32> to vector<1x16xf32>
    %7 = vector.broadcast %6 : vector<1x16xf32> to vector<64x16xf32>
    %8 = arith.addf %4, %7 : vector<64x16xf32>
    %c0_8 = arith.constant 0 : index
    %c0_9 = arith.constant 0 : index
    %c0_10 = arith.constant 0 : index
    %9 = vector.load %arg3[%c0_8, %c0_9, %c0_10] : memref<2x32x16xf32, #tpu.memory_space<vmem>>, vector<1x32x16xf32>
    %10 = vector.shape_cast %9 : vector<1x32x16xf32> to vector<32x16xf32>
    %cst_11 = arith.constant dense<0.000000e+00> : vector<64x16xf32>
    %11 = tpu.matmul %0, %10, %cst_11 {dimension_numbers = #tpu.dot_dimension_numbers<[1], [0], [0], [1], [0, 0, 1, 1], [], []>, precision = #tpu.contract_precision<fp32>} : vector<64x32xf32>, vector<32x16xf32>, vector<64x16xf32> -> vector<64x16xf32>
    %c0_12 = arith.constant 0 : index
    %c0_13 = arith.constant 0 : index
    %c0_14 = arith.constant 0 : index
    %12 = vector.load %arg4[%c0_12, %c0_13, %c0_14] : memref<2x32x16xf32, #tpu.memory_space<vmem>>, vector<1x32x16xf32>
    %13 = vector.shape_cast %12 : vector<1x32x16xf32> to vector<32x16xf32>
    %cst_15 = arith.constant dense<0.000000e+00> : vector<64x16xf32>
    %14 = tpu.matmul %0, %13, %cst_15 {dimension_numbers = #tpu.dot_dimension_numbers<[1], [0], [0], [1], [0, 0, 1, 1], [], []>, precision = #tpu.contract_precision<fp32>} : vector<64x32xf32>, vector<32x16xf32>, vector<64x16xf32> -> vector<64x16xf32>
    %c0_16 = arith.constant 0 : index
    %c0_17 = arith.constant 0 : index
    %c0_18 = arith.constant 0 : index
    %15 = vector.load %arg6[%c0_16, %c0_17, %c0_18] : memref<2x1x16xf32, #tpu.memory_space<vmem>>, vector<1x1x16xf32>
    %16 = vector.shape_cast %15 : vector<1x1x16xf32> to vector<1x16xf32>
    %17 = vector.broadcast %16 : vector<1x16xf32> to vector<64x16xf32>
    %18 = arith.addf %14, %17 : vector<64x16xf32>
    %19 = arith.mulf %8, %8 : vector<64x16xf32>
    %cst_19 = arith.constant dense<0.000000e+00> : vector<64xf32>
    %20 = vector.multi_reduction <add>, %19, %cst_19 [1] : vector<64x16xf32> to vector<64xf32>
    %21 = vector.shape_cast %20 : vector<64xf32> to vector<64x1xf32>
    %22 = math.sqrt %21 : vector<64x1xf32>
    %cst_20 = arith.constant 9.99999996E-13 : f32
    %23 = vector.broadcast %cst_20 : f32 to vector<64x1xf32>
    %24 = arith.maximumf %22, %23 : vector<64x1xf32>
    %25 = vector.broadcast %24 : vector<64x1xf32> to vector<64x16xf32>
    %26 = arith.divf %8, %25 : vector<64x16xf32>
    %27 = arith.mulf %11, %11 : vector<64x16xf32>
    %cst_21 = arith.constant dense<0.000000e+00> : vector<64xf32>
    %28 = vector.multi_reduction <add>, %27, %cst_21 [1] : vector<64x16xf32> to vector<64xf32>
    %29 = vector.shape_cast %28 : vector<64xf32> to vector<64x1xf32>
    %30 = math.sqrt %29 : vector<64x1xf32>
    %cst_22 = arith.constant 9.99999996E-13 : f32
    %31 = vector.broadcast %cst_22 : f32 to vector<64x1xf32>
    %32 = arith.maximumf %30, %31 : vector<64x1xf32>
    %33 = vector.broadcast %32 : vector<64x1xf32> to vector<64x16xf32>
    %34 = arith.divf %11, %33 : vector<64x16xf32>
    %35 = vector.shape_cast %26 : vector<64x16xf32> to vector<4x16x16xf32>
    %36 = vector.shape_cast %34 : vector<64x16xf32> to vector<4x16x16xf32>
    %37 = vector.shape_cast %18 : vector<64x16xf32> to vector<4x16x16xf32>
    "tpu.trace_start"() <{level = 10 : i32, message = "bnd,bmd->bnm"}> : () -> ()
    %cst_23 = arith.constant dense<0.000000e+00> : vector<4x16x16xf32>
    %38 = tpu.matmul %35, %36, %cst_23 {dimension_numbers = #tpu.dot_dimension_numbers<[2], [2], [1], [1], [0, 0, 0, 1, 1, 1], [0], [0]>, precision = #tpu.contract_precision<fp32>} : vector<4x16x16xf32>, vector<4x16x16xf32>, vector<4x16x16xf32> -> vector<4x16x16xf32>
    "tpu.trace_stop"() : () -> ()
    %c0_24 = arith.constant 0 : index
    %39 = memref.load %arg10[%c0_24] : memref<2xf32, #tpu.memory_space<smem>>
    %40 = vector.broadcast %39 : f32 to vector<4x16x16xf32>
    %41 = arith.mulf %38, %40 : vector<4x16x16xf32>
    %c0_25 = arith.constant 0 : index
    %c0_26 = arith.constant 0 : index
    %c0_27 = arith.constant 0 : index
    %c0_28 = arith.constant 0 : index
    %42 = vector.load %arg9[%c0_25, %c0_26, %c0_27, %c0_28] : memref<2x4x16x16xf32, #tpu.memory_space<vmem>>, vector<1x4x16x16xf32>
    %43 = vector.shape_cast %42 : vector<1x4x16x16xf32> to vector<4x16x16xf32>
    %44 = arith.addf %41, %43 : vector<4x16x16xf32>
    %cst_29 = arith.constant dense<0xFF800000> : vector<4x16xf32>
    %45 = vector.multi_reduction <maximumf>, %44, %cst_29 [2] : vector<4x16x16xf32> to vector<4x16xf32>
    %46 = vector.shape_cast %45 : vector<4x16xf32> to vector<4x16x1xf32>
    %47 = vector.broadcast %46 : vector<4x16x1xf32> to vector<4x16x16xf32>
    %48 = arith.subf %44, %47 : vector<4x16x16xf32>
    %49 = math.exp %48 : vector<4x16x16xf32>
    %cst_30 = arith.constant dense<0.000000e+00> : vector<4x16xf32>
    %50 = vector.multi_reduction <add>, %49, %cst_30 [2] : vector<4x16x16xf32> to vector<4x16xf32>
    %51 = vector.shape_cast %50 : vector<4x16xf32> to vector<4x16x1xf32>
    %52 = vector.broadcast %51 : vector<4x16x1xf32> to vector<4x16x16xf32>
    %53 = arith.divf %49, %52 : vector<4x16x16xf32>
    "tpu.trace_start"() <{level = 10 : i32, message = "bnm,bmd->bnd"}> : () -> ()
    %cst_31 = arith.constant dense<0.000000e+00> : vector<4x16x16xf32>
    %54 = tpu.matmul %53, %37, %cst_31 {dimension_numbers = #tpu.dot_dimension_numbers<[2], [1], [1], [2], [0, 0, 0, 1, 1, 2], [0], [0]>, precision = #tpu.contract_precision<fp32>} : vector<4x16x16xf32>, vector<4x16x16xf32>, vector<4x16x16xf32> -> vector<4x16x16xf32>
    "tpu.trace_stop"() : () -> ()
    %55 = vector.shape_cast %54 : vector<4x16x16xf32> to vector<64x16xf32>
    %c0_32 = arith.constant 0 : index
    %c0_33 = arith.constant 0 : index
    %c0_34 = arith.constant 0 : index
    %56 = vector.load %arg7[%c0_32, %c0_33, %c0_34] : memref<2x16x32xf32, #tpu.memory_space<vmem>>, vector<1x16x32xf32>
    %57 = vector.shape_cast %56 : vector<1x16x32xf32> to vector<16x32xf32>
    %cst_35 = arith.constant dense<0.000000e+00> : vector<64x32xf32>
    %58 = tpu.matmul %55, %57, %cst_35 {dimension_numbers = #tpu.dot_dimension_numbers<[1], [0], [0], [1], [0, 0, 1, 1], [], []>, precision = #tpu.contract_precision<fp32>} : vector<64x16xf32>, vector<16x32xf32>, vector<64x32xf32> -> vector<64x32xf32>
    %59 = arith.addf %1, %58 : vector<64x32xf32>
    %c1 = arith.constant 1 : index
    %c0_36 = arith.constant 0 : index
    %c0_37 = arith.constant 0 : index
    %60 = vector.load %arg2[%c1, %c0_36, %c0_37] : memref<2x32x16xf32, #tpu.memory_space<vmem>>, vector<1x32x16xf32>
    %61 = vector.shape_cast %60 : vector<1x32x16xf32> to vector<32x16xf32>
    %cst_38 = arith.constant dense<0.000000e+00> : vector<64x16xf32>
    %62 = tpu.matmul %0, %61, %cst_38 {dimension_numbers = #tpu.dot_dimension_numbers<[1], [0], [0], [1], [0, 0, 1, 1], [], []>, precision = #tpu.contract_precision<fp32>} : vector<64x32xf32>, vector<32x16xf32>, vector<64x16xf32> -> vector<64x16xf32>
    %c1_39 = arith.constant 1 : index
    %c0_40 = arith.constant 0 : index
    %c0_41 = arith.constant 0 : index
    %63 = vector.load %arg5[%c1_39, %c0_40, %c0_41] : memref<2x1x16xf32, #tpu.memory_space<vmem>>, vector<1x1x16xf32>
    %64 = vector.shape_cast %63 : vector<1x1x16xf32> to vector<1x16xf32>
    %65 = vector.broadcast %64 : vector<1x16xf32> to vector<64x16xf32>
    %66 = arith.addf %62, %65 : vector<64x16xf32>
    %c1_42 = arith.constant 1 : index
    %c0_43 = arith.constant 0 : index
    %c0_44 = arith.constant 0 : index
    %67 = vector.load %arg3[%c1_42, %c0_43, %c0_44] : memref<2x32x16xf32, #tpu.memory_space<vmem>>, vector<1x32x16xf32>
    %68 = vector.shape_cast %67 : vector<1x32x16xf32> to vector<32x16xf32>
    %cst_45 = arith.constant dense<0.000000e+00> : vector<64x16xf32>
    %69 = tpu.matmul %0, %68, %cst_45 {dimension_numbers = #tpu.dot_dimension_numbers<[1], [0], [0], [1], [0, 0, 1, 1], [], []>, precision = #tpu.contract_precision<fp32>} : vector<64x32xf32>, vector<32x16xf32>, vector<64x16xf32> -> vector<64x16xf32>
    %c1_46 = arith.constant 1 : index
    %c0_47 = arith.constant 0 : index
    %c0_48 = arith.constant 0 : index
    %70 = vector.load %arg4[%c1_46, %c0_47, %c0_48] : memref<2x32x16xf32, #tpu.memory_space<vmem>>, vector<1x32x16xf32>
    %71 = vector.shape_cast %70 : vector<1x32x16xf32> to vector<32x16xf32>
    %cst_49 = arith.constant dense<0.000000e+00> : vector<64x16xf32>
    %72 = tpu.matmul %0, %71, %cst_49 {dimension_numbers = #tpu.dot_dimension_numbers<[1], [0], [0], [1], [0, 0, 1, 1], [], []>, precision = #tpu.contract_precision<fp32>} : vector<64x32xf32>, vector<32x16xf32>, vector<64x16xf32> -> vector<64x16xf32>
    %c1_50 = arith.constant 1 : index
    %c0_51 = arith.constant 0 : index
    %c0_52 = arith.constant 0 : index
    %73 = vector.load %arg6[%c1_50, %c0_51, %c0_52] : memref<2x1x16xf32, #tpu.memory_space<vmem>>, vector<1x1x16xf32>
    %74 = vector.shape_cast %73 : vector<1x1x16xf32> to vector<1x16xf32>
    %75 = vector.broadcast %74 : vector<1x16xf32> to vector<64x16xf32>
    %76 = arith.addf %72, %75 : vector<64x16xf32>
    %77 = arith.mulf %66, %66 : vector<64x16xf32>
    %cst_53 = arith.constant dense<0.000000e+00> : vector<64xf32>
    %78 = vector.multi_reduction <add>, %77, %cst_53 [1] : vector<64x16xf32> to vector<64xf32>
    %79 = vector.shape_cast %78 : vector<64xf32> to vector<64x1xf32>
    %80 = math.sqrt %79 : vector<64x1xf32>
    %cst_54 = arith.constant 9.99999996E-13 : f32
    %81 = vector.broadcast %cst_54 : f32 to vector<64x1xf32>
    %82 = arith.maximumf %80, %81 : vector<64x1xf32>
    %83 = vector.broadcast %82 : vector<64x1xf32> to vector<64x16xf32>
    %84 = arith.divf %66, %83 : vector<64x16xf32>
    %85 = arith.mulf %69, %69 : vector<64x16xf32>
    %cst_55 = arith.constant dense<0.000000e+00> : vector<64xf32>
    %86 = vector.multi_reduction <add>, %85, %cst_55 [1] : vector<64x16xf32> to vector<64xf32>
    %87 = vector.shape_cast %86 : vector<64xf32> to vector<64x1xf32>
    %88 = math.sqrt %87 : vector<64x1xf32>
    %cst_56 = arith.constant 9.99999996E-13 : f32
    %89 = vector.broadcast %cst_56 : f32 to vector<64x1xf32>
    %90 = arith.maximumf %88, %89 : vector<64x1xf32>
    %91 = vector.broadcast %90 : vector<64x1xf32> to vector<64x16xf32>
    %92 = arith.divf %69, %91 : vector<64x16xf32>
    %93 = vector.shape_cast %84 : vector<64x16xf32> to vector<4x16x16xf32>
    %94 = vector.shape_cast %92 : vector<64x16xf32> to vector<4x16x16xf32>
    %95 = vector.shape_cast %76 : vector<64x16xf32> to vector<4x16x16xf32>
    "tpu.trace_start"() <{level = 10 : i32, message = "bnd,bmd->bnm"}> : () -> ()
    %cst_57 = arith.constant dense<0.000000e+00> : vector<4x16x16xf32>
    %96 = tpu.matmul %93, %94, %cst_57 {dimension_numbers = #tpu.dot_dimension_numbers<[2], [2], [1], [1], [0, 0, 0, 1, 1, 1], [0], [0]>, precision = #tpu.contract_precision<fp32>} : vector<4x16x16xf32>, vector<4x16x16xf32>, vector<4x16x16xf32> -> vector<4x16x16xf32>
    "tpu.trace_stop"() : () -> ()
    %c1_58 = arith.constant 1 : index
    %97 = memref.load %arg10[%c1_58] : memref<2xf32, #tpu.memory_space<smem>>
    %98 = vector.broadcast %97 : f32 to vector<4x16x16xf32>
    %99 = arith.mulf %96, %98 : vector<4x16x16xf32>
    %c1_59 = arith.constant 1 : index
    %c0_60 = arith.constant 0 : index
    %c0_61 = arith.constant 0 : index
    %c0_62 = arith.constant 0 : index
    %100 = vector.load %arg9[%c1_59, %c0_60, %c0_61, %c0_62] : memref<2x4x16x16xf32, #tpu.memory_space<vmem>>, vector<1x4x16x16xf32>
    %101 = vector.shape_cast %100 : vector<1x4x16x16xf32> to vector<4x16x16xf32>
    %102 = arith.addf %99, %101 : vector<4x16x16xf32>
    %cst_63 = arith.constant dense<0xFF800000> : vector<4x16xf32>
    %103 = vector.multi_reduction <maximumf>, %102, %cst_63 [2] : vector<4x16x16xf32> to vector<4x16xf32>
    %104 = vector.shape_cast %103 : vector<4x16xf32> to vector<4x16x1xf32>
    %105 = vector.broadcast %104 : vector<4x16x1xf32> to vector<4x16x16xf32>
    %106 = arith.subf %102, %105 : vector<4x16x16xf32>
    %107 = math.exp %106 : vector<4x16x16xf32>
    %cst_64 = arith.constant dense<0.000000e+00> : vector<4x16xf32>
    %108 = vector.multi_reduction <add>, %107, %cst_64 [2] : vector<4x16x16xf32> to vector<4x16xf32>
    %109 = vector.shape_cast %108 : vector<4x16xf32> to vector<4x16x1xf32>
    %110 = vector.broadcast %109 : vector<4x16x1xf32> to vector<4x16x16xf32>
    %111 = arith.divf %107, %110 : vector<4x16x16xf32>
    "tpu.trace_start"() <{level = 10 : i32, message = "bnm,bmd->bnd"}> : () -> ()
    %cst_65 = arith.constant dense<0.000000e+00> : vector<4x16x16xf32>
    %112 = tpu.matmul %111, %95, %cst_65 {dimension_numbers = #tpu.dot_dimension_numbers<[2], [1], [1], [2], [0, 0, 0, 1, 1, 2], [0], [0]>, precision = #tpu.contract_precision<fp32>} : vector<4x16x16xf32>, vector<4x16x16xf32>, vector<4x16x16xf32> -> vector<4x16x16xf32>
    "tpu.trace_stop"() : () -> ()
    %113 = vector.shape_cast %112 : vector<4x16x16xf32> to vector<64x16xf32>
    %c1_66 = arith.constant 1 : index
    %c0_67 = arith.constant 0 : index
    %c0_68 = arith.constant 0 : index
    %114 = vector.load %arg7[%c1_66, %c0_67, %c0_68] : memref<2x16x32xf32, #tpu.memory_space<vmem>>, vector<1x16x32xf32>
    %115 = vector.shape_cast %114 : vector<1x16x32xf32> to vector<16x32xf32>
    %cst_69 = arith.constant dense<0.000000e+00> : vector<64x32xf32>
    %116 = tpu.matmul %113, %115, %cst_69 {dimension_numbers = #tpu.dot_dimension_numbers<[1], [0], [0], [1], [0, 0, 1, 1], [], []>, precision = #tpu.contract_precision<fp32>} : vector<64x16xf32>, vector<16x32xf32>, vector<64x32xf32> -> vector<64x32xf32>
    %117 = arith.addf %59, %116 : vector<64x32xf32>
    %c0_70 = arith.constant 0 : index
    %c0_71 = arith.constant 0 : index
    %118 = vector.load %arg8[%c0_70, %c0_71] : memref<1x32xf32, #tpu.memory_space<vmem>>, vector<1x32xf32>
    %119 = vector.shape_cast %118 : vector<1x32xf32> to vector<32xf32>
    %120 = vector.shape_cast %119 : vector<32xf32> to vector<1x32xf32>
    %121 = vector.broadcast %120 : vector<1x32xf32> to vector<64x32xf32>
    %122 = arith.addf %117, %121 : vector<64x32xf32>
    %c0_72 = arith.constant 0 : index
    %c0_73 = arith.constant 0 : index
    %123 = vector.load %arg11[%c0_72, %c0_73] : memref<64x32xf32, #tpu.memory_space<vmem>>, vector<64x32xf32>
    tpu.vector_store %arg11[%c0_72, %c0_73], %122 {strides = array<i32>} : memref<64x32xf32, #tpu.memory_space<vmem>>, vector<64x32xf32>,
    return
  }
  func.func @transform_0(%arg0: i32) -> (i32, i32) {
    %c0_i32 = arith.constant 0 : i32
    %c0_i32_0 = arith.constant 0 : i32
    return %arg0, %c0_i32 : i32, i32
  }
  func.func @transform_1(%arg0: i32) -> (i32, i32, i32) {
    %c0_i32 = arith.constant 0 : i32
    %c0_i32_0 = arith.constant 0 : i32
    %c0_i32_1 = arith.constant 0 : i32
    %c0_i32_2 = arith.constant 0 : i32
    return %c0_i32, %c0_i32_0, %c0_i32_1 : i32, i32, i32
  }
  func.func @transform_2(%arg0: i32) -> (i32, i32, i32) {
    %c0_i32 = arith.constant 0 : i32
    %c0_i32_0 = arith.constant 0 : i32
    %c0_i32_1 = arith.constant 0 : i32
    %c0_i32_2 = arith.constant 0 : i32
    return %c0_i32, %c0_i32_0, %c0_i32_1 : i32, i32, i32
  }
  func.func @transform_3(%arg0: i32) -> (i32, i32, i32) {
    %c0_i32 = arith.constant 0 : i32
    %c0_i32_0 = arith.constant 0 : i32
    %c0_i32_1 = arith.constant 0 : i32
    %c0_i32_2 = arith.constant 0 : i32
    return %c0_i32, %c0_i32_0, %c0_i32_1 : i32, i32, i32
  }
  func.func @transform_4(%arg0: i32) -> (i32, i32, i32) {
    %c0_i32 = arith.constant 0 : i32
    %c0_i32_0 = arith.constant 0 : i32
    %c0_i32_1 = arith.constant 0 : i32
    %c0_i32_2 = arith.constant 0 : i32
    return %c0_i32, %c0_i32_0, %c0_i32_1 : i32, i32, i32
  }
  func.func @transform_5(%arg0: i32) -> (i32, i32, i32) {
    %c0_i32 = arith.constant 0 : i32
    %c0_i32_0 = arith.constant 0 : i32
    %c0_i32_1 = arith.constant 0 : i32
    %c0_i32_2 = arith.constant 0 : i32
    return %c0_i32, %c0_i32_0, %c0_i32_1 : i32, i32, i32
  }
  func.func @transform_6(%arg0: i32) -> (i32, i32, i32) {
    %c0_i32 = arith.constant 0 : i32
    %c0_i32_0 = arith.constant 0 : i32
    %c0_i32_1 = arith.constant 0 : i32
    %c0_i32_2 = arith.constant 0 : i32
    return %c0_i32, %c0_i32_0, %c0_i32_1 : i32, i32, i32
  }
  func.func @transform_7(%arg0: i32) -> (i32, i32) {
    %c0_i32 = arith.constant 0 : i32
    %c0_i32_0 = arith.constant 0 : i32
    %c0_i32_1 = arith.constant 0 : i32
    return %c0_i32, %c0_i32_0 : i32, i32
  }
  func.func @transform_8(%arg0: i32) -> (i32, i32, i32, i32) {
    %c0_i32 = arith.constant 0 : i32
    %c0_i32_0 = arith.constant 0 : i32
    %c0_i32_1 = arith.constant 0 : i32
    %c0_i32_2 = arith.constant 0 : i32
    %c0_i32_3 = arith.constant 0 : i32
    return %c0_i32, %c0_i32_0, %c0_i32_1, %c0_i32_2 : i32, i32, i32, i32
  }
  func.func @transform_9(%arg0: i32) -> i32 {
    %c0_i32 = arith.constant 0 : i32
    %c0_i32_0 = arith.constant 0 : i32
    return %c0_i32 : i32
  }
  func.func @transform_10(%arg0: i32) -> (i32, i32) {
    %c0_i32 = arith.constant 0 : i32
    %c0_i32_0 = arith.constant 0 : i32
    return %arg0, %c0_i32 : i32, i32
  }
}

</mosaic_0001>

<bundles_post_ra>
// kernel: fused_forward.1
= control target key start
LH: loop header
LB: loop body
LE: loop exit
PB: predicated region body
PF: predicated region fallthrough
CT: control target
= control target key end

     0   :  { %15 = vsyncpa [#allocation3], 0  ;;  %s22385_s0 = inlined_call_operand.vmem [shape: f32[128,32], index: 0, kind: input, shape index: {}]   ;;  %s22386_s1 = inlined_call_operand.vmem [shape: f32[2,32,16], index: 1, kind: input, shape index: {}]   ;;  %s22387_s2 = inlined_call_operand.vmem [shape: f32[2,32,16], index: 2, kind: input, shape index: {}]   ;;  %s22388_s3 = inlined_call_operand.vmem [shape: f32[2,32,16], index: 3, kind: input, shape index: {}]   ;;  %s22389_s4 = inlined_call_operand.vmem [shape: f32[2,1,16], index: 4, kind: input, shape index: {}]   ;;  %s22390_s5 = inlined_call_operand.vmem [shape: f32[2,1,16], index: 5, kind: input, shape index: {}]   ;;  %s22391_s6 = inlined_call_operand.hbm [shape: f32[2,16,32], index: 6, kind: input, shape index: {}]   ;;  %s22392_s7 = inlined_call_operand.vmem [shape: f32[1,32], index: 7, kind: input, shape index: {}]   ;;  %s22393_s8 = inlined_call_operand.vmem [shape: f32[2,4,16,16], index: 8, kind: input, shape index: {}]   ;;  %s22394_s9 = inlined_call_operand.vmem [shape: f32[2], index: 9, kind: input, shape index: {}]   ;;  %s22395_s10 = inlined_call_operand.hbm [shape: f32[128,32], index: 10, kind: output, shape index: {}]  }
   0x1   :  { %16 = vsyncpa [#allocation5], 0 }
   0x2   :  { %17 = vsyncpa [#allocation4], 0 }
   0x3   :  { %19 = vsyncpa [#allocation4 + $0x1], 0  ;;  %s18741_s13 = smov 0   ;;  %s18743_s14 = smov 0  }
   0x4   :  { %s18745_s15 = smov 0   ;;  %s18747_s16 = smov 0  }
   0x5 LB: > { %s18762_s17 = sadd.s32 4294967295, %s18677_s16   ;;  %s15746_s18 = sadd.s32 4294967294, %s18677_s16   ;;  %s18677_s16 = sphi %s18747_s16, %s22727_s16   ;;  %s18673_s15 = sphi %s18745_s15, %s22726_s15   ;;  %s18669_s14 = sphi %s18743_s14, %s22725_s14   ;;  %s18665_s13 = sphi %s18741_s13, %s22724_s13  }
   0x6   : > { %s18766_s19 = sadd.s32 1, %s18677_s16   ;;  %s247_s20 = sadd.s32 1, %s18673_s15 }
   0x7   : > { %s244_s21 = ssub.s32 %s18677_s16, %s18766_s19  ;;  %p257_p0 = scmp.ne.s32.totalorder %s18673_s15, %s18669_s14 }
   0x8   : > { %p245_p1 = scmp.eq.s32.totalorder %s244_s21, 0  ;;  %p258_p2 = scmp.eq.s32.totalorder %s18762_s17, 1 }
   0x9   : > { %p263_p3 = scmp.ne.s32.totalorder %s18669_s14, %s18665_s13  ;;  %p264_p4 = scmp.eq.s32.totalorder %s15746_s18, 1 }
   0xa   : > { %s18777_s22 = scalar_select %p245_p1, %s18673_s15, %s247_s20  }
   0xb   : > { %p18779_p5 = por %p258_p2, %p257_p0  ;;  %p18783_p6 = por %p264_p4, %p263_p3 }
   0xc   : > { %p15747_p7 = scmp.ge.s32.totalorder %s18677_s16, 1  ;;  %p271_p8 = scmp.lt.s32.totalorder %s18677_s16, 3 }
   0xd   : > { %s22473_s24 = scalar_select %p18783_p6, 1, 0 }
   0xe   : > { %p22396_p9 = scmp.eq.s32.totalorder %s18762_s17, 0  ;;  %p18790_p10 = pnand %p15747_p7, %p271_p8 }
   0xf   : > { %s18679_s26 = smov [#allocation2]   ;;  %s318_s30 = sshll.u32 %s22394_s9, 4  ;;  %s319_s30 = int_to_ptr.vmem [resolvable:$true] %s318_s30 }
  0x10   : > { %s298_s27 = sshll.u32 %s18679_s26, 4  ;;  %p18321_p11 = pneg %p18790_p10  ;;  %s299_s27 = int_to_ptr.vmem [resolvable:$true] %s298_s27 }
  0x11   : > { %s18579_s12 = scalar_lea.vmem %s299_s27, 512  ;;  %p18587_p3 = scmp.lt.s32.totalorder %s299_s27, %s299_s27 }
  0x12   : > { %p18801_p12 = pnand %p22396_p9, %p18321_p11  ;;  %p18580_p0 = scmp.ne.s32.totalorder %s299_s27, %s18579_s12 }
  0x13   : > { %p18588_p4 = scmp.lt.s32.totalorder %s18579_s12, %s18579_s12 }
  0x14   : > { %p18570_p13 = pneg %p18801_p12 }
  0x15   : > { %p18589_p7 = por %p18588_p4, %p18587_p3 }
  0x16   : > { %p18582_p1 = pnand %p18580_p0, %p18570_p13 }
  0x18   : > { %p18583_p2 = pneg %p18582_p1 }
  0x1a   : > { %p18590_p8 = pnand %p18589_p7, %p18583_p2 }
  0x1c   : > { %18593 = shalt.err (!%p18590_p8)
}
  0x1d   : > { %s18680_s18 = smov 128   ;;  %s18681_s20 = smov 8  }
  0x1e   : > { %18324 = dma.hbm_to_vmem [thread:$0]  (!%p18801_p12), %s22391_s6, 512, %s299_s27, [#allocation3], %s18680_s18, %s18680_s18, %s18681_s20  }
  0x1f   : > { %s18594_s28 = scalar_lea.vmem %s319_s30, 16  ;;  %p18602_p9 = scmp.lt.s32.totalorder %s319_s30, %s319_s30 }
  0x20   : > { %p18595_p11 = scmp.ne.s32.totalorder %s319_s30, %s18594_s28  ;;  %p18603_p6 = scmp.lt.s32.totalorder %s18594_s28, %s18594_s28 }
  0x22   : > { %p18597_p0 = pnand %p18595_p11, %p18570_p13  ;;  %p18604_p3 = por %p18603_p6, %p18602_p9 }
  0x24   : > { %p18598_p1 = pneg %p18597_p0 }
  0x26   : > { %p18605_p2 = pnand %p18604_p3, %p18598_p1 }
  0x28   : > { %18608 = shalt.err (!%p18605_p2)
}
  0x29   : > { %s18682_s29 = smov [#allocation6]   ;;  %340 = sbr.rel (%p18790_p10) target bundleno = 2777 (0xad9), region = 60 }
  0x2a   : > { %18327 = dma.vmem_to_smem (!%p18801_p12), %s319_s30, 16, %s18682_s29, [#allocation5]  }
  0x2e   : > { %p22476_p4 = scmp.eq.s32.totalorder %s18762_s17, 0 }
  0x30   : > { %18652 = dma.done.wait (%p22476_p4), [#allocation3], 512   ;;  %p22477_p7 = pmov %p22476_p4 }
  0x31   : > { %p22478_p13 = pmov %p22476_p4 }
  0x32   : > { %18654 = vsyncadd (%p22477_p7), [#allocation3], 4294966784 }
  0x33   : > { %18656 = dma.done.wait (%p22478_p13), [#allocation5], 16   ;;  %p22479_p6 = pmov %p22476_p4 }
  0x35   : > { %18658 = vsyncadd (%p22479_p6), [#allocation5], 4294967280 }
  0x36   : > { %350 = sfence }
  0x37   : > { %v401_v0 = vld [vmem:[%s22386_s1 + $0x18] sm:$0xff]  ;;  %v400_v1 = vld [vmem:[%s22386_s1 + $0x10] sm:$0xff]  ;;  %v399_v2 = vld [vmem:[%s22386_s1 + $0x8] sm:$0xff]  ;;  %s15755_s20 = sshll.u32 %s18762_s17, 3  ;;  %vm409_vm0 = vcmask 261120   ;;  %vm2815_vm1 = vcmask 130048  }
  0x38   : > { %v18840_v3 = vand.u32 4294901760, %v401_v0  ;;  %v18842_v4 = vand.u32 4294901760, %v400_v1  ;;  %v18844_v5 = vand.u32 4294901760, %v399_v2  ;;  %v398_v6 = vld [vmem:[%s22386_s1] sm:$0xff]  ;;  %p384_p9 = scmp.lt.s32.totalorder %s15755_s20, 15  ;;  %s5088_s27 = sld [smem:[#allocation6]] }
  0x39   : > { %v18849_v7 = vand.u32 4294901760, %v398_v6  ;;  %s15775_s30 = sld [smem:[#allocation6 + $0x1]] }
  0x3a   : > { %16727 = vmatprep.subr.mxu0 %v18840_v3  ;;  %v18853_v8 = vsub.f32 %v401_v0, %v18840_v3  ;;  %v18856_v9 = vsub.f32 %v400_v1, %v18842_v4  ;;  %v18859_v10 = vsub.f32 %v399_v2, %v18844_v5  ;;  %s22729_s20 = smov (!%p384_p9, %s15755_s20), 15 }
  0x3b   : > { %16728 = vmatpush3.msra.mxu0 %v18840_v3  ;;  %v18863_v11 = vsub.f32 %v398_v6, %v18849_v7  ;;  %s15756_s28 = sshll.u32 %s22729_s20, 3 }
  0x3c   : > { %v18866_v12 = vand.u32 4294901760, %v18853_v8  ;;  %16729 = vmatprep.subr.mxu0 %v18842_v4  ;;  %v18870_v13 = vand.u32 4294901760, %v18856_v9  ;;  %v18873_v14 = vand.u32 4294901760, %v18859_v10  ;;  %s387_s12 = scalar_lea.vmem %s22385_s0, %s15756_s28  ;;  %s380_s28 = sand.u32 1, %s18669_s14  }
  0x3d   : > { %16730 = vmatpush3.msra.mxu0 %v18842_v4  ;;  %v18877_v15 = vand.u32 4294901760, %v18863_v11  ;;  %v390_v19 = vld [vmem:[%s387_s12] sm:$0xff]  ;;  %v391_v20 = vld [vmem:[%s387_s12 + $0x8] sm:$0xff]  ;;  %v392_v21 = vld [vmem:[%s387_s12 + $0x10] sm:$0xff]  ;;  %s15754_s29 = sshll.u32 %s380_s28, 6 }
  0x3e   : > { %v611_v16 = vsub.f32 %v18853_v8, %v18866_v12  ;;  %v618_v17 = vsub.f32 %v18856_v9, %v18870_v13  ;;  %16731 = vmatprep.subr.mxu0 %v18844_v5  ;;  %v625_v18 = vsub.f32 %v18859_v10, %v18873_v14  ;;  %v411_v23 = vsel %vm409_vm0, %v390_v19, 0  ;;  %v393_v26 = vld [vmem:[%s387_s12 + $0x18] sm:$0xff]  ;;  %v394_v27 = vld [vmem:[%s387_s12 + $0x20] sm:$0xff]  ;;  %v395_v28 = vld [vmem:[%s387_s12 + $0x28] sm:$0xff]  ;;  %s22313_s25 = scalar_lea.vmem [#allocation7], %s15754_s29  ;;  %s18683_s29 = smov [#allocation7]  }
  0x3f   : > { %16732 = vmatpush3.msra.mxu0 %v18844_v5  ;;  %v632_v22 = vsub.f32 %v18863_v11, %v18877_v15  ;;  %v414_v24 = vsel %vm409_vm0, %v391_v20, 0  ;;  %v417_v25 = vsel %vm409_vm0, %v392_v21, 0  ;;  %v18896_v32 = vand.u32 4294901760, %v411_v23  ;;  %v396_v37 = vld [vmem:[%s387_s12 + $0x30] sm:$0xff]  ;;  %v397_v38 = vld [vmem:[%s387_s12 + $0x38] sm:$0xff]  ;;  %s15660_s11 = sshll.u32 %s22313_s25, 4  ;;  %s22337_s11 = int_to_ptr.vmem [resolvable:$true] %s15660_s11 }
  0x40   : > { %v612_v29 = vand.u32 4294901760, %v611_v16  ;;  %v619_v30 = vand.u32 4294901760, %v618_v17  ;;  %v626_v31 = vand.u32 4294901760, %v625_v18  ;;  %16733 = vmatprep.subr.mxu0 %v18849_v7  ;;  %v18899_v34 = vand.u32 4294901760, %v414_v24  ;;  %s18609_s26 = scalar_lea.vmem %s22337_s11, 1024 }
  0x41   : > { %22480 = vst [vmem:[#allocation11_spill] sm:$0xff] %v18896_v32  ;;  %v633_v33 = vand.u32 4294901760, %v632_v22  ;;  %16734 = vmatpush3.msra.mxu0 %v18849_v7  ;;  %v18901_v35 = vand.u32 4294901760, %v417_v25  ;;  %v420_v36 = vsel %vm409_vm0, %v393_v26, 0  ;;  %v18905_v39 = vsub.f32 %v411_v23, %v18896_v32  ;;  %16755 = vmatprep.mubr.f32.mxu1 %v18896_v32  ;;  %p18610_p10 = scmp.ne.s32.totalorder %s22337_s11, %s18609_s26 }
  0x42   : > { %22481 = vst [vmem:[#allocation12_spill] sm:$0xff] %v18899_v34  ;;  %16747 = vmatprep.subr.mxu1 %v612_v29  ;;  %v18908_v40 = vand.u32 4294901760, %v420_v36  ;;  %v423_v41 = vsel %vm409_vm0, %v394_v27, 0  ;;  %v426_v42 = vsel %vm409_vm0, %v395_v28, 0  ;;  %v18913_v43 = vsub.f32 %v414_v24, %v18899_v34  ;;  %16767 = vmatprep.subr.mxu0 %v18853_v8 }
  0x43   : > { %22482 = vst [vmem:[#allocation13_spill] sm:$0xff] %v18901_v35  ;;  %22483 = vst [vmem:[#allocation14_spill] sm:$0xff] %v18905_v39  ;;  %16748 = vmatpush3.msra.mxu1 %v612_v29  ;;  %v18916_v44 = vsub.f32 %v417_v25, %v18901_v35  ;;  %v18918_v45 = vand.u32 4294901760, %v423_v41  ;;  %v18921_v46 = vand.u32 4294901760, %v426_v42  ;;  %v18924_v47 = vand.u32 4294901760, %v18905_v39  ;;  %v1221_v29 = vld [vmem:[%s22387_s2 + $0x8] sm:$0xff]  ;;  %p18611_p12 = pnand %p18610_p10, %p18779_p5 }
  0x44   : > { %22484 = vst [vmem:[#allocation15_spill] sm:$0xff] %v18908_v40  ;;  %22485 = vst [vmem:[#allocation16_spill] sm:$0xff] %v18913_v43  ;;  %16749 = vmatprep.subr.mxu1 %v619_v30  ;;  %v18927_v48 = vsub.f32 %v420_v36, %v18908_v40  ;;  %v429_v49 = vsel %vm409_vm0, %v396_v37, 0  ;;  %v432_v50 = vsel %vm409_vm0, %v397_v38, 0  ;;  %v18932_v51 = vand.u32 4294901760, %v18913_v43 }
  0x45   : > { %22486 = vst [vmem:[#allocation17_spill] sm:$0xff] %v18916_v44  ;;  %22487 = vst [vmem:[#allocation18_spill] sm:$0xff] %v18918_v45  ;;  %16750 = vmatpush3.msra.mxu1 %v619_v30  ;;  %v18935_v52 = vand.u32 4294901760, %v18916_v44  ;;  %v18938_v53 = vsub.f32 %v423_v41, %v18918_v45  ;;  %v18941_v54 = vsub.f32 %v426_v42, %v18921_v46  ;;  %v18948_v57 = vand.u32 4294901760, %v429_v49  ;;  %p18612_p8 = pneg %p18611_p12 }
  0x46   : > { %22488 = vst [vmem:[#allocation19_spill] sm:$0xff] %v18921_v46  ;;  %22489 = vst [vmem:[#allocation20_spill] sm:$0xff] %v18924_v47  ;;  %16751 = vmatprep.subr.mxu1 %v626_v31  ;;  %v506_v55 = vsub.f32 %v18905_v39, %v18924_v47  ;;  %v18946_v56 = vand.u32 4294901760, %v18927_v48  ;;  %v18950_v58 = vand.u32 4294901760, %v432_v50  ;;  %v516_v59 = vsub.f32 %v18913_v43, %v18932_v51 }
  0x47   : > { %22490 = vst [vmem:[#allocation21_spill] sm:$0xff] %v18927_v48  ;;  %22491 = vst [vmem:[#allocation22_spill] sm:$0xff] %v18932_v51  ;;  %16752 = vmatpush3.msra.mxu1 %v626_v31  ;;  %v526_v60 = vsub.f32 %v18916_v44, %v18935_v52  ;;  %v18957_v61 = vand.u32 4294901760, %v18938_v53  ;;  %v18960_v62 = vand.u32 4294901760, %v18941_v54  ;;  %v18967_v1 = vsub.f32 %v429_v49, %v18948_v57  ;;  %v1220_v31 = vld [vmem:[%s22387_s2] sm:$0xff] }
  0x48   : > { %22492 = vst [vmem:[#allocation23_spill] sm:$0xff] %v18935_v52  ;;  %22493 = vst [vmem:[#allocation24_spill] sm:$0xff] %v18938_v53  ;;  %16753 = vmatprep.subr.mxu1 %v633_v33  ;;  %v18962_v63 = vand.u32 4294901760, %v506_v55  ;;  %v536_v0 = vsub.f32 %v18927_v48, %v18946_v56  ;;  %v18970_v2 = vsub.f32 %v432_v50, %v18950_v58  ;;  %v18972_v6 = vand.u32 4294901760, %v516_v59  ;;  %v2013_v55 = vld [vmem:[%s22388_s3 + $0x18] sm:$0xff]  ;;  %v2012_v59 = vld [vmem:[%s22388_s3 + $0x10] sm:$0xff] }
  0x49   : > { %22494 = vst [vmem:[#allocation25_spill] sm:$0xff] %v18941_v54  ;;  %22495 = vst [vmem:[#allocation26_spill] sm:$0xff] %v18946_v56  ;;  %16754 = vmatpush3.msra.mxu1 %v633_v33  ;;  %v18974_v16 = vand.u32 4294901760, %v526_v60  ;;  %v546_v17 = vsub.f32 %v18938_v53, %v18957_v61  ;;  %v18981_v18 = vand.u32 4294901760, %v18967_v1  ;;  %v556_v20 = vsub.f32 %v18941_v54, %v18960_v62  ;;  %v2011_v60 = vld [vmem:[%s22388_s3 + $0x8] sm:$0xff] }
  0x4a   : > { %22496 = vst [vmem:[#allocation27_spill] sm:$0xff] %v18948_v57  ;;  %22497 = vst [vmem:[#allocation28_spill] sm:$0xff] %v18950_v58  ;;  %16735 = vmatprep.mubr.f32.mxu0 %v18962_v63  ;;  %16756 = vmatmul.mubr.f32.vlgmr.msra.gmra.mxu1 %v18899_v34  ;;  %v18985_v19 = vand.u32 4294901760, %v536_v0  ;;  %v18990_v21 = vand.u32 4294901760, %v18970_v2  ;;  %v19070_v30 = vand.u32 4294901760, %v1221_v29  ;;  %v19229_v0 = vand.u32 4294901760, %v2013_v55 }
  0x4b   : > { %22498 = vst [vmem:[#allocation29_spill] sm:$0xff] %v18957_v61  ;;  %22499 = vst [vmem:[#allocation30_spill] sm:$0xff] %v18960_v62  ;;  %16736 = vmatmul.mubr.f32.vlgmr.msra.gmra.mxu0 %v18972_v6  ;;  %16758 = vmatprep.mubr.f32.mxu1 %v18901_v35  ;;  %v18993_v22 = vand.u32 4294901760, %v546_v17  ;;  %v566_v23 = vsub.f32 %v18967_v1, %v18981_v18  ;;  %v19004_v24 = vand.u32 4294901760, %v556_v20  ;;  %v19231_v17 = vand.u32 4294901760, %v2012_v59 }
  0x4c   : > { %22500 = vst [vmem:[#allocation31_spill] sm:$0xff] %v18962_v63  ;;  %22501 = vst [vmem:[#allocation32_spill] sm:$0xff] %v18967_v1  ;;  %16738 = vmatprep.mubr.f32.mxu0 %v18974_v16  ;;  %16768 = vmatpush3.msra.mxu0 %v18853_v8  ;;  %v576_v8 = vsub.f32 %v18970_v2, %v18990_v21  ;;  %v19233_v20 = vand.u32 4294901760, %v2011_v60 }
  0x4d   : > { %22502 = vst [vmem:[#allocation33_spill] sm:$0xff] %v18970_v2  ;;  %22503 = vst [vmem:[#allocation34_spill] sm:$0xff] %v18972_v6  ;;  %16787 = vmatprep.subr.mxu1 %v18840_v3  ;;  %16769 = vmatprep.subr.mxu0 %v18856_v9  ;;  %v19010_v25 = vand.u32 4294901760, %v566_v23  ;;  %v2010_v23 = vld [vmem:[%s22388_s3] sm:$0xff] }
  0x4e   : > { %22504 = vst [vmem:[#allocation35_spill] sm:$0xff] %v18974_v16  ;;  %22505 = vst [vmem:[#allocation36_spill] sm:$0xff] %v18981_v18  ;;  %16759 = vmatmul.mubr.f32.gmra.mxu1 %v18908_v40  ;;  %16770 = vmatpush3.msra.mxu0 %v18856_v9  ;;  %v19018_v9 = vand.u32 4294901760, %v576_v8  ;;  %v19238_v8 = vand.u32 4294901760, %v2010_v23 }
  0x4f   : > { %22506 = vst [vmem:[#allocation37_spill] sm:$0xff] %v18985_v19  ;;  %22507 = vst [vmem:[#allocation38_spill] sm:$0xff] %v18990_v21  ;;  %16739 = vmatmul.mubr.f32.gmra.mxu0 %v18985_v19  ;;  %16761 = vmatprep.mubr.f32.mxu1 %v18918_v45 }
  0x50   : > { %22508 = vst [vmem:[#allocation39_spill] sm:$0xff] %v18993_v22  ;;  %22509 = vst [vmem:[#allocation40_spill] sm:$0xff] %v19004_v24  ;;  %16741 = vmatprep.mubr.f32.mxu0 %v18993_v22  ;;  %16788 = vmatpush3.msra.mxu1 %v18840_v3 }
  0x51   : > { %22510 = vst [vmem:[#allocation41_spill] sm:$0xff] %v19010_v25  ;;  %16789 = vmatprep.subr.mxu1 %v18842_v4  ;;  %16771 = vmatprep.subr.mxu0 %v18859_v10  ;;  %22511 = vst [vmem:[#allocation42_spill] sm:$0xff] %v19018_v9 }
  0x52   : > { %16762 = vmatmul.mubr.f32.gmra.mxu1 %v18921_v46  ;;  %16772 = vmatpush3.msra.mxu0 %v18859_v10  ;;  %v1223_v10 = vld [vmem:[%s22387_s2 + $0x18] sm:$0xff] }
  0x53   : > { %16742 = vmatmul.mubr.f32.gmra.mxu0 %v19004_v24  ;;  %16764 = vmatprep.mubr.f32.mxu1 %v18948_v57  ;;  %v19035_v26 = vand.u32 4294901760, %v1223_v10 }
  0x54   : > { %16744 = vmatprep.mubr.f32.mxu0 %v19010_v25  ;;  %16790 = vmatpush3.msra.mxu1 %v18842_v4 }
  0x55   : > { %16791 = vmatprep.subr.mxu1 %v18844_v5  ;;  %16773 = vmatprep.subr.mxu0 %v18863_v11  ;;  %v19049_v27 = vsub.f32 %v1223_v10, %v19035_v26  ;;  %v2196_v10 = vsub.f32 %v2013_v55, %v19229_v0 }
  0x56   : > { %16765 = vmatmul.mubr.f32.gmra.mxu1 %v18950_v58  ;;  %16774 = vmatpush3.msra.mxu0 %v18863_v11  ;;  %v1222_v11 = vld [vmem:[%s22387_s2 + $0x10] sm:$0xff] }
  0x57   : > { %16745 = vmatmul.mubr.f32.gmra.mxu0 %v19018_v9  ;;  %16792 = vmatpush3.msra.mxu1 %v18844_v5  ;;  %v19051_v28 = vand.u32 4294901760, %v1222_v11 }
  0x58   : > { %16793 = vmatprep.subr.mxu1 %v18849_v7  ;;  %16775 = vmatprep.mubr.f32.mxu0 %v18905_v39 }
  0x59   : > { %16794 = vmatpush3.msra.mxu1 %v18849_v7  ;;  %16795 = vmatprep.mubr.f32.mxu1 %v18924_v47 }
  0x5a   : > { %16796 = vmatmul.mubr.f32.vlgmr.msra.gmra.mxu1 %v18932_v51  ;;  %16807 = vmatprep.subr.mxu0 %v18866_v12 }
  0x5b   : > { %16776 = vmatmul.mubr.f32.vlgmr.msra.gmra.mxu0 %v18913_v43  ;;  %16798 = vmatprep.mubr.f32.mxu1 %v18935_v52 }
  0x5c   : > { %16778 = vmatprep.mubr.f32.mxu0 %v18916_v44  ;;  %16808 = vmatpush3.msra.mxu0 %v18866_v12  ;;  %v19065_v12 = vand.u32 4294901760, %v19049_v27 }
  0x5d   : > { %16827 = vmatprep.subr.mxu1 %v18840_v3  ;;  %16809 = vmatprep.subr.mxu0 %v18870_v13 }
  0x5e   : > { %16799 = vmatmul.mubr.f32.gmra.mxu1 %v18946_v56  ;;  %16810 = vmatpush3.msra.mxu0 %v18870_v13  ;;  %v19068_v13 = vsub.f32 %v1222_v11, %v19051_v28  ;;  %v1401_v33 = vsub.f32 %v19049_v27, %v19065_v12  ;;  %v19243_v11 = vsub.f32 %v2011_v60, %v19233_v20 }
  0x5f   : > { %16779 = vmatmul.mubr.f32.gmra.mxu0 %v18927_v48  ;;  %16801 = vmatprep.mubr.f32.mxu1 %v18957_v61 }
  0x60   : > { %16781 = vmatprep.mubr.f32.mxu0 %v18938_v53  ;;  %16828 = vmatpush3.msra.mxu1 %v18840_v3  ;;  %v19081_v3 = vand.u32 4294901760, %v1220_v31  ;;  %v19088_v36 = vand.u32 4294901760, %v19068_v13  ;;  %v1402_v37 = vand.u32 4294901760, %v1401_v33 }
  0x61   : > { %16829 = vmatprep.subr.mxu1 %v18842_v4  ;;  %16811 = vmatprep.subr.mxu0 %v18873_v14 }
  0x62   : > { %16802 = vmatmul.mubr.f32.gmra.mxu1 %v18960_v62  ;;  %16812 = vmatpush3.msra.mxu0 %v18873_v14  ;;  %v19091_v14 = vsub.f32 %v1221_v29, %v19070_v30  ;;  %v1408_v38 = vsub.f32 %v19068_v13, %v19088_v36 }
  0x63   : > { %16782 = vmatmul.mubr.f32.gmra.mxu0 %v18941_v54  ;;  %16804 = vmatprep.mubr.f32.mxu1 %v18981_v18 }
  0x64   : > { %16784 = vmatprep.mubr.f32.mxu0 %v18967_v1  ;;  %16830 = vmatpush3.msra.mxu1 %v18842_v4  ;;  %v19100_v4 = vsub.f32 %v1220_v31, %v19081_v3 }
  0x65   : > { %16831 = vmatprep.subr.mxu1 %v18844_v5  ;;  %16813 = vmatprep.subr.mxu0 %v18877_v15 }
  0x66   : > { %16805 = vmatmul.mubr.f32.gmra.mxu1 %v18990_v21  ;;  %16814 = vmatpush3.msra.mxu0 %v18877_v15  ;;  %v19107_v15 = vand.u32 4294901760, %v19091_v14 }
  0x67   : > { %16785 = vmatmul.mubr.f32.gmra.mxu0 %v18970_v2  ;;  %16832 = vmatpush3.msra.mxu1 %v18844_v5  ;;  %v19116_v5 = vand.u32 4294901760, %v19100_v4 }
  0x68   : > { %16833 = vmatprep.subr.mxu1 %v18849_v7  ;;  %16815 = vmatprep.mubr.f32.mxu0 %v18896_v32  ;;  %v1415_v41 = vsub.f32 %v19091_v14, %v19107_v15 }
  0x69   : > { %16834 = vmatpush3.msra.mxu1 %v18849_v7  ;;  %16835 = vmatprep.mubr.f32.mxu1 %v18896_v32  ;;  %v1409_v7 = vand.u32 4294901760, %v1408_v38  ;;  %v1422_v42 = vsub.f32 %v19100_v4, %v19116_v5 }
  0x6a   : > { %16836 = vmatmul.mubr.f32.vlgmr.msra.gmra.mxu1 %v18899_v34  ;;  %16847 = vmatprep.subr.mxu0 %v19035_v26  ;;  %v1416_v49 = vand.u32 4294901760, %v1415_v41 }
  0x6b   : > { %16816 = vmatmul.mubr.f32.vlgmr.msra.gmra.mxu0 %v18899_v34  ;;  %16838 = vmatprep.mubr.f32.mxu1 %v18901_v35  ;;  %v1423_v50 = vand.u32 4294901760, %v1422_v42  ;;  %v19286_v42 = vld [vmem:[%s22389_s4] ss:$0 sm:$0xff] }
  0x6c   : > { %16818 = vmatprep.mubr.f32.mxu0 %v18901_v35  ;;  %16848 = vmatpush3.msra.mxu0 %v19035_v26 }
  0x6d   : > { %16867 = vmatprep.subr.mxu1 %v1402_v37  ;;  %16849 = vmatprep.subr.mxu0 %v19051_v28 }
  0x6e   : > { %16839 = vmatmul.mubr.f32.gmra.mxu1 %v18908_v40  ;;  %16850 = vmatpush3.msra.mxu0 %v19051_v28 }
  0x6f   : > { %16819 = vmatmul.mubr.f32.gmra.mxu0 %v18908_v40  ;;  %16841 = vmatprep.mubr.f32.mxu1 %v18918_v45 }
  0x70   : > { %16821 = vmatprep.mubr.f32.mxu0 %v18918_v45  ;;  %16868 = vmatpush3.msra.mxu1 %v1402_v37 }
  0x71   : > { %16869 = vmatprep.subr.mxu1 %v1409_v7  ;;  %16851 = vmatprep.subr.mxu0 %v19070_v30 }
  0x72   : > { %16842 = vmatmul.mubr.f32.gmra.mxu1 %v18921_v46  ;;  %16852 = vmatpush3.msra.mxu0 %v19070_v30 }
  0x73   : > { %16822 = vmatmul.mubr.f32.gmra.mxu0 %v18921_v46  ;;  %16844 = vmatprep.mubr.f32.mxu1 %v18948_v57 }
  0x74   : > { %16824 = vmatprep.mubr.f32.mxu0 %v18948_v57  ;;  %16870 = vmatpush3.msra.mxu1 %v1409_v7 }
  0x75   : > { %16871 = vmatprep.subr.mxu1 %v1416_v49  ;;  %16853 = vmatprep.subr.mxu0 %v19081_v3 }
  0x76   : > { %16845 = vmatmul.mubr.f32.gmra.mxu1 %v18950_v58  ;;  %16854 = vmatpush3.msra.mxu0 %v19081_v3 }
  0x77   : > { %16825 = vmatmul.mubr.f32.gmra.mxu0 %v18950_v58  ;;  %16872 = vmatpush3.msra.mxu1 %v1416_v49 }
  0x78   : > { %16873 = vmatprep.subr.mxu1 %v1423_v50  ;;  %16855 = vmatprep.mubr.f32.mxu0 %v18962_v63 }
  0x79   : > { %16874 = vmatpush3.msra.mxu1 %v1423_v50  ;;  %16875 = vmatprep.mubr.f32.mxu1 %v18896_v32 }
  0x7a   : > { %16876 = vmatmul.mubr.f32.vlgmr.msra.gmra.mxu1 %v18899_v34  ;;  %16887 = vmatprep.subr.mxu0 %v19049_v27 }
  0x7b   : > { %16856 = vmatmul.mubr.f32.vlgmr.msra.gmra.mxu0 %v18972_v6  ;;  %16878 = vmatprep.mubr.f32.mxu1 %v18901_v35 }
  0x7c   : > { %16858 = vmatprep.mubr.f32.mxu0 %v18974_v16  ;;  %16888 = vmatpush3.msra.mxu0 %v19049_v27  ;;  %v19247_v27 = vsub.f32 %v2010_v23, %v19238_v8 }
  0x7d   : > { %16907 = vmatprep.subr.mxu1 %v19035_v26  ;;  %16889 = vmatprep.subr.mxu0 %v19068_v13 }
  0x7e   : > { %16879 = vmatmul.mubr.f32.gmra.mxu1 %v18908_v40  ;;  %16890 = vmatpush3.msra.mxu0 %v19068_v13  ;;  %v19259_v13 = vand.u32 4294901760, %v19247_v27 }
  0x7f   : > { %16859 = vmatmul.mubr.f32.gmra.mxu0 %v18985_v19  ;;  %16881 = vmatprep.mubr.f32.mxu1 %v18918_v45 }
  0x80   : > { %16861 = vmatprep.mubr.f32.mxu0 %v18993_v22  ;;  %16908 = vmatpush3.msra.mxu1 %v19035_v26 }
  0x81   : > { %16909 = vmatprep.subr.mxu1 %v19051_v28  ;;  %16891 = vmatprep.subr.mxu0 %v19091_v14 }
  0x82   : > { %16882 = vmatmul.mubr.f32.gmra.mxu1 %v18921_v46  ;;  %16892 = vmatpush3.msra.mxu0 %v19091_v14  ;;  %v2219_v14 = vsub.f32 %v19247_v27, %v19259_v13 }
  0x83   : > { %16862 = vmatmul.mubr.f32.gmra.mxu0 %v19004_v24  ;;  %16884 = vmatprep.mubr.f32.mxu1 %v18948_v57 }
  0x84   : > { %16864 = vmatprep.mubr.f32.mxu0 %v19010_v25  ;;  %16910 = vmatpush3.msra.mxu1 %v19051_v28 }
  0x85   : > { %16911 = vmatprep.subr.mxu1 %v19070_v30  ;;  %16893 = vmatprep.subr.mxu0 %v19100_v4 }
  0x86   : > { %16885 = vmatmul.mubr.f32.gmra.mxu1 %v18950_v58  ;;  %16894 = vmatpush3.msra.mxu0 %v19100_v4 }
  0x87   : > { %16865 = vmatmul.mubr.f32.gmra.mxu0 %v19018_v9  ;;  %16912 = vmatpush3.msra.mxu1 %v19070_v30 }
  0x88   : > { %16913 = vmatprep.subr.mxu1 %v19081_v3  ;;  %16895 = vmatprep.mubr.f32.mxu0 %v18905_v39 }
  0x89   : > { %16914 = vmatpush3.msra.mxu1 %v19081_v3  ;;  %16915 = vmatprep.mubr.f32.mxu1 %v18924_v47 }
  0x8a   : > { %16916 = vmatmul.mubr.f32.vlgmr.msra.gmra.mxu1 %v18932_v51  ;;  %16927 = vmatprep.subr.mxu0 %v19065_v12 }
  0x8b   : > { %16896 = vmatmul.mubr.f32.vlgmr.msra.gmra.mxu0 %v18913_v43  ;;  %16918 = vmatprep.mubr.f32.mxu1 %v18935_v52 }
  0x8c   : > { %16898 = vmatprep.mubr.f32.mxu0 %v18916_v44  ;;  %16928 = vmatpush3.msra.mxu0 %v19065_v12  ;;  %v19255_v12 = vand.u32 4294901760, %v19243_v11 }
  0x8d   : > { %16947 = vmatprep.subr.mxu1 %v19035_v26  ;;  %16929 = vmatprep.subr.mxu0 %v19088_v36 }
  0x8e   : > { %16919 = vmatmul.mubr.f32.gmra.mxu1 %v18946_v56  ;;  %16930 = vmatpush3.msra.mxu0 %v19088_v36 }
  0x8f   : > { %16899 = vmatmul.mubr.f32.gmra.mxu0 %v18927_v48  ;;  %16921 = vmatprep.mubr.f32.mxu1 %v18957_v61 }
  0x90   : > { %16901 = vmatprep.mubr.f32.mxu0 %v18938_v53  ;;  %16948 = vmatpush3.msra.mxu1 %v19035_v26  ;;  %v2203_v26 = vsub.f32 %v2012_v59, %v19231_v17 }
  0x91   : > { %16949 = vmatprep.subr.mxu1 %v19051_v28  ;;  %16931 = vmatprep.subr.mxu0 %v19107_v15 }
  0x92   : > { %16922 = vmatmul.mubr.f32.gmra.mxu1 %v18960_v62  ;;  %16932 = vmatpush3.msra.mxu0 %v19107_v15  ;;  %v19252_v29 = vand.u32 4294901760, %v2203_v26 }
  0x93   : > { %16902 = vmatmul.mubr.f32.gmra.mxu0 %v18941_v54  ;;  %16924 = vmatprep.mubr.f32.mxu1 %v18981_v18 }
  0x94   : > { %16904 = vmatprep.mubr.f32.mxu0 %v18967_v1  ;;  %16950 = vmatpush3.msra.mxu1 %v19051_v28  ;;  %v19250_v28 = vand.u32 4294901760, %v2196_v10  ;;  %v2205_v31 = vsub.f32 %v2203_v26, %v19252_v29 }
  0x95   : > { %16951 = vmatprep.subr.mxu1 %v19070_v30  ;;  %16933 = vmatprep.subr.mxu0 %v19116_v5 }
  0x96   : > { %16925 = vmatmul.mubr.f32.gmra.mxu1 %v18990_v21  ;;  %16934 = vmatpush3.msra.mxu0 %v19116_v5  ;;  %v2206_v36 = vand.u32 4294901760, %v2205_v31  ;;  %v2220_v5 = vand.u32 4294901760, %v2219_v14 }
  0x97   : > { %16905 = vmatmul.mubr.f32.gmra.mxu0 %v18970_v2  ;;  %16952 = vmatpush3.msra.mxu1 %v19070_v30  ;;  %v2198_v30 = vsub.f32 %v2196_v10, %v19250_v28 }
  0x98   : > { %16953 = vmatprep.subr.mxu1 %v19081_v3  ;;  %16935 = vmatprep.mubr.f32.mxu0 %v18896_v32 }
  0x99   : > { %16954 = vmatpush3.msra.mxu1 %v19081_v3  ;;  %16955 = vmatprep.mubr.f32.mxu1 %v18896_v32  ;;  %v2212_v3 = vsub.f32 %v19243_v11, %v19255_v12  ;;  %v2199_v33 = vand.u32 4294901760, %v2198_v30 }
  0x9a   : > { %16956 = vmatmul.mubr.f32.vlgmr.msra.gmra.mxu1 %v18899_v34  ;;  %16967 = vmatprep.subr.mxu0 %v19229_v0 }
  0x9b   : > { %16936 = vmatmul.mubr.f32.vlgmr.msra.gmra.mxu0 %v18899_v34  ;;  %16958 = vmatprep.mubr.f32.mxu1 %v18901_v35  ;;  %v2213_v37 = vand.u32 4294901760, %v2212_v3 }
  0x9c   : > { %16938 = vmatprep.mubr.f32.mxu0 %v18901_v35  ;;  %16968 = vmatpush3.msra.mxu0 %v19229_v0 }
  0x9d   : > { %16969 = vmatprep.subr.mxu0 %v19231_v17  ;;  %16987 = vmatprep.subr.mxu1 %v2199_v33 }
  0x9e   : > { %16959 = vmatmul.mubr.f32.gmra.mxu1 %v18908_v40  ;;  %16970 = vmatpush3.msra.mxu0 %v19231_v17 }
  0x9f   : > { %16939 = vmatmul.mubr.f32.gmra.mxu0 %v18908_v40  ;;  %16961 = vmatprep.mubr.f32.mxu1 %v18918_v45 }
  0xa0   : > { %16941 = vmatprep.mubr.f32.mxu0 %v18918_v45  ;;  %16971 = vmatprep.subr.mxu0 %v19233_v20 }
  0xa1   : > { %16972 = vmatpush3.msra.mxu0 %v19233_v20  ;;  %16988 = vmatpush3.msra.mxu1 %v2199_v33 }
  0xa2   : > { %16962 = vmatmul.mubr.f32.gmra.mxu1 %v18921_v46  ;;  %16973 = vmatprep.subr.mxu0 %v19238_v8 }
  0xa3   : > { %16942 = vmatmul.mubr.f32.gmra.mxu0 %v18921_v46  ;;  %16964 = vmatprep.mubr.f32.mxu1 %v18948_v57 }
  0xa4   : > { %16944 = vmatprep.mubr.f32.mxu0 %v18948_v57  ;;  %16974 = vmatpush3.msra.mxu0 %v19238_v8 }
  0xa5   : > { %16989 = vmatprep.subr.mxu1 %v2206_v36  ;;  %17007 = vmatprep.subr.mxu0 %v2196_v10 }
  0xa6   : > { %16965 = vmatmul.mubr.f32.gmra.mxu1 %v18950_v58 }
  0xa7   : > { %16945 = vmatmul.mubr.f32.gmra.mxu0 %v18950_v58  ;;  %16995 = vmatprep.mubr.f32.mxu1 %v18896_v32 }
  0xa8   : > { %16975 = vmatprep.mubr.f32.mxu0 %v18962_v63  ;;  %16990 = vmatpush3.msra.mxu1 %v2206_v36 }
  0xa9   : > { %16991 = vmatprep.subr.mxu1 %v2213_v37 }
  0xaa   : > { %16992 = vmatpush3.msra.mxu1 %v2213_v37 }
  0xab   : > { %16976 = vmatmul.mubr.f32.vlgmr.msra.gmra.mxu0 %v18972_v6  ;;  %16993 = vmatprep.subr.mxu1 %v2220_v5 }
  0xac   : > { %16978 = vmatprep.mubr.f32.mxu0 %v18974_v16  ;;  %17008 = vmatpush3.msra.mxu0 %v2196_v10 }
  0xad   : > { %17009 = vmatprep.subr.mxu0 %v2203_v26  ;;  %16994 = vmatpush3.msra.mxu1 %v2220_v5 }
  0xae   : > { %17010 = vmatpush3.msra.mxu0 %v2203_v26  ;;  %16996 = vmatmul.mubr.f32.vlgmr.msra.gmra.mxu1 %v18899_v34 }
  0xaf   : > { %16979 = vmatmul.mubr.f32.gmra.mxu0 %v18985_v19  ;;  %17027 = vmatprep.subr.mxu1 %v19229_v0 }
  0xb0   : > { %16981 = vmatprep.mubr.f32.mxu0 %v18993_v22  ;;  %16998 = vmatprep.mubr.f32.mxu1 %v18901_v35 }
  0xb1   : > { %17028 = vmatpush3.msra.mxu1 %v19229_v0  ;;  %17011 = vmatprep.subr.mxu0 %v19243_v11 }
  0xb2   : > { %17029 = vmatprep.subr.mxu1 %v19231_v17  ;;  %16999 = vmatmul.mubr.f32.gmra.mxu1 %v18908_v40 }
  0xb3   : > { %16982 = vmatmul.mubr.f32.gmra.mxu0 %v19004_v24  ;;  %17030 = vmatpush3.msra.mxu1 %v19231_v17 }
  0xb4   : > { %16984 = vmatprep.mubr.f32.mxu0 %v19010_v25  ;;  %17031 = vmatprep.subr.mxu1 %v19233_v20 }
  0xb5   : > { %17001 = vmatprep.mubr.f32.mxu1 %v18918_v45  ;;  %17032 = vmatpush3.msra.mxu1 %v19233_v20 }
  0xb6   : > { %17033 = vmatprep.subr.mxu1 %v19238_v8  ;;  %17002 = vmatmul.mubr.f32.gmra.mxu1 %v18921_v46 }
  0xb7   : > { %16985 = vmatmul.mubr.f32.gmra.mxu0 %v19018_v9  ;;  %17034 = vmatpush3.msra.mxu1 %v19238_v8 }
  0xb8   : > { %17012 = vmatpush3.msra.mxu0 %v19243_v11  ;;  %17004 = vmatprep.mubr.f32.mxu1 %v18948_v57 }
  0xb9   : > { %17013 = vmatprep.subr.mxu0 %v19247_v27  ;;  %17015 = vmatprep.mubr.f32.mxu0 %v18905_v39 }
  0xba   : > { %17014 = vmatpush3.msra.mxu0 %v19247_v27  ;;  %17067 = vmatprep.subr.mxu1 %v19229_v0 }
  0xbb   : > { %17016 = vmatmul.mubr.f32.vlgmr.msra.gmra.mxu0 %v18913_v43  ;;  %17005 = vmatmul.mubr.f32.gmra.mxu1 %v18950_v58 }
  0xbc   : > { %17018 = vmatprep.mubr.f32.mxu0 %v18916_v44  ;;  %17035 = vmatprep.mubr.f32.mxu1 %v18924_v47 }
  0xbd   : > { %17047 = vmatprep.subr.mxu0 %v19250_v28 }
  0xbe   : > { %17048 = vmatpush3.msra.mxu0 %v19250_v28 }
  0xbf   : > { %17019 = vmatmul.mubr.f32.gmra.mxu0 %v18927_v48  ;;  %17049 = vmatprep.subr.mxu0 %v19252_v29 }
  0xc0   : > { %17036 = vmatmul.mubr.f32.vlgmr.msra.gmra.mxu1 %v18932_v51  ;;  %17021 = vmatprep.mubr.f32.mxu0 %v18938_v53 }
  0xc1   : > { %17038 = vmatprep.mubr.f32.mxu1 %v18935_v52  ;;  %17068 = vmatpush3.msra.mxu1 %v19229_v0 }
  0xc2   : > { %17069 = vmatprep.subr.mxu1 %v19231_v17  ;;  %17050 = vmatpush3.msra.mxu0 %v19252_v29 }
  0xc3   : > { %17070 = vmatpush3.msra.mxu1 %v19231_v17  ;;  %17022 = vmatmul.mubr.f32.gmra.mxu0 %v18941_v54 }
  0xc4   : > { %17039 = vmatmul.mubr.f32.gmra.mxu1 %v18946_v56  ;;  %17071 = vmatprep.subr.mxu1 %v19233_v20 }
  0xc5   : > { %17041 = vmatprep.mubr.f32.mxu1 %v18957_v61  ;;  %17072 = vmatpush3.msra.mxu1 %v19233_v20 }
  0xc6   : > { %17073 = vmatprep.subr.mxu1 %v19238_v8  ;;  %17024 = vmatprep.mubr.f32.mxu0 %v18967_v1 }
  0xc7   : > { %17074 = vmatpush3.msra.mxu1 %v19238_v8  ;;  %17025 = vmatmul.mubr.f32.gmra.mxu0 %v18970_v2 }
  0xc8   : > { %17042 = vmatmul.mubr.f32.gmra.mxu1 %v18960_v62  ;;  %17051 = vmatprep.subr.mxu0 %v19255_v12 }
  0xc9   : > { %17044 = vmatprep.mubr.f32.mxu1 %v18981_v18  ;;  %17052 = vmatpush3.msra.mxu0 %v19255_v12 }
  0xca   : > { %17053 = vmatprep.subr.mxu0 %v19259_v13  ;;  %17055 = vmatprep.mubr.f32.mxu0 %v18896_v32 }
  0xcb   : > { %17054 = vmatpush3.msra.mxu0 %v19259_v13 }
  0xcc   : > { %17045 = vmatmul.mubr.f32.gmra.mxu1 %v18990_v21  ;;  %17056 = vmatmul.mubr.f32.vlgmr.msra.gmra.mxu0 %v18899_v34 }
  0xcd   : > { %17075 = vmatprep.mubr.f32.mxu1 %v18896_v32  ;;  %17058 = vmatprep.mubr.f32.mxu0 %v18901_v35 }
  0xd0   : > { %17076 = vmatmul.mubr.f32.vlgmr.msra.gmra.mxu1 %v18899_v34  ;;  %17059 = vmatmul.mubr.f32.gmra.mxu0 %v18908_v40 }
  0xd1   : > { %17078 = vmatprep.mubr.f32.mxu1 %v18901_v35  ;;  %17061 = vmatprep.mubr.f32.mxu0 %v18918_v45 }
  0xd4   : > { %17079 = vmatmul.mubr.f32.gmra.mxu1 %v18908_v40  ;;  %17062 = vmatmul.mubr.f32.gmra.mxu0 %v18921_v46 }
  0xd5   : > { %17081 = vmatprep.mubr.f32.mxu1 %v18918_v45  ;;  %17064 = vmatprep.mubr.f32.mxu0 %v18948_v57 }
  0xd8   : > { %17082 = vmatmul.mubr.f32.gmra.mxu1 %v18921_v46  ;;  %17065 = vmatmul.mubr.f32.gmra.mxu0 %v18950_v58 }
  0xd9   : > { %17084 = vmatprep.mubr.f32.mxu1 %v18948_v57 }
  0xdc   : > { %17085 = vmatmul.mubr.f32.gmra.mxu1 %v18950_v58 }
 0x10a   : > { %v19272_v4 = vpop.f32.mrf.mxu1 }
 0x10b   : > { %v19275_v38 = vpop.f32.mrf.mxu0 }
 0x10c   : > { %v19278_v15 = vpop.f32.mrf.mxu1  ;;  %v520_v27 = vadd.f32 %v19275_v38, %v19286_v42 }
 0x10d   : > { %v19280_v7 = vpop.f32.mrf.mxu0 }
 0x10e   : > { %v16760_v41 = vpop.f32.mrf.mxu1  ;;  %v510_v44 = vadd.f32 %v19286_v42, %v19280_v7  ;;  %v677_v28 = vadd.f32 %v19272_v4, %v520_v27 }
 0x10f   : > { %v16740_v49 = vpop.f32.mrf.mxu0 }
 0x110   : > { %v540_v50 = vadd.f32 %v16740_v49, %v19286_v42  ;;  %v19290_v55 = vpop.f32.mrf.mxu1 }
 0x111   : > { %v19292_v59 = vpop.f32.mrf.mxu0 }
 0x112   : > { %v689_v60 = vadd.f32 %v16760_v41, %v540_v50  ;;  %v16763_v23 = vpop.f32.mrf.mxu1  ;;  %v530_v16 = vadd.f32 %v19286_v42, %v19292_v59 }
 0x113   : > { %v16743_v10 = vpop.f32.mrf.mxu0 }
 0x114   : > { %v560_v30 = vadd.f32 %v16743_v10, %v19286_v42  ;;  %v19299_v31 = vpop.f32.mrf.mxu1 }
 0x115   : > { %v19303_v26 = vpop.f32.mrf.mxu0 }
 0x116   : > { %v701_v3 = vadd.f32 %v16763_v23, %v560_v30  ;;  %v16766_v33 = vpop.f32.mrf.mxu1 }
 0x117   : > { %v16746_v36 = vpop.f32.mrf.mxu0 }
 0x118   : > { %v580_v14 = vadd.f32 %v16746_v36, %v19286_v42  ;;  %v19312_v37 = vpop.f32.mrf.mxu1 }
 0x119   : > { %v19316_v5 = vpop.f32.mrf.mxu0 }
 0x11a   : > { %v713_v41 = vadd.f32 %v16766_v33, %v580_v14  ;;  %v16797_v49 = vpop.f32.mrf.mxu1 }
 0x11b   : > { %v16777_v50 = vpop.f32.mrf.mxu0 }
 0x11c   : > { %v918_v23 = vpop.f32.mrf.mxu1 }
 0x11d   : > { %v792_v10 = vpop.f32.mrf.mxu0 }
 0x11e   : > { %v16800_v30 = vpop.f32.mrf.mxu1 }
 0x11f   : > { %v16780_v11 = vpop.f32.mrf.mxu0 }
 0x120   : > { %v814_v33 = vadd.f32 %v16780_v11, %v689_v60  ;;  %v19334_v36 = vpop.f32.mrf.mxu1 }
 0x121   : > { %v19337_v14 = vpop.f32.mrf.mxu0 }
 0x122   : > { %v19343_v43 = vadd.f32 %v16800_v30, %v814_v33  ;;  %v16803_v47 = vpop.f32.mrf.mxu1  ;;  %v671_v30 = vadd.f32 %v19278_v15, %v510_v44  ;;  %v800_v33 = vadd.f32 %v16777_v50, %v677_v28 }
 0x123   : > { %v16783_v38 = vpop.f32.mrf.mxu0 }
 0x124   : > { %v828_v60 = vadd.f32 %v16783_v38, %v701_v3  ;;  %v19350_v11 = vpop.f32.mrf.mxu1  ;;  %v793_v29 = vadd.f32 %v792_v10, %v671_v30 }
 0x125   : > { %v19354_v7 = vpop.f32.mrf.mxu0 }
 0x126   : > { %v19359_v53 = vadd.f32 %v16803_v47, %v828_v60  ;;  %v16806_v0 = vpop.f32.mrf.mxu1  ;;  %v927_v47 = vadd.f32 %v16797_v49, %v800_v33 }
 0x127   : > { %v16786_v4 = vpop.f32.mrf.mxu0 }
 0x128   : > { %v842_v3 = vadd.f32 %v16786_v4, %v713_v41  ;;  %v19365_v17 = vpop.f32.mrf.mxu1  ;;  %v919_v41 = vadd.f32 %v918_v23, %v793_v29 }
 0x129   : > { %22512 = vst [vmem:[#allocation43_spill] sm:$0xff] %v19365_v17  ;;  %v19369_v44 = vpop.f32.mrf.mxu0 }
 0x12a   : > { %v19373_v15 = vadd.f32 %v16806_v0, %v842_v3  ;;  %v16837_v50 = vpop.f32.mrf.mxu1 }
 0x12b   : > { %v16817_v20 = vpop.f32.mrf.mxu0 }
 0x12c   : > { %22513 = vst [vmem:[#allocation44_spill] sm:$0xff] %v19373_v15  ;;  %v1064_v10 = vadd.f32 %v16817_v20, %v927_v47  ;;  %v1174_v27 = vpop.f32.mrf.mxu1 }
 0x12d   : > { %v1057_v8 = vpop.f32.mrf.mxu0 }
 0x12e   : > { %v1058_v49 = vadd.f32 %v1057_v8, %v919_v41  ;;  %v19382_v38 = vpop.f32.mrf.mxu1  ;;  %v19390_v12 = vadd.f32 %v16837_v50, %v1064_v10 }
 0x12f   : > { %v19386_v28 = vpop.f32.mrf.mxu0 }
 0x130   : > { %22514 = vst [vmem:[#allocation45_spill] sm:$0xff] %v19390_v12  ;;  %v19392_v23 = vadd.f32 %v1174_v27, %v1058_v49  ;;  %v19394_v60 = vpop.f32.mrf.mxu1  ;;  %v2808_v3 = vmul.f32 %v19390_v12, %v19390_v12 }
 0x131   : > { %v19396_v13 = vpop.f32.mrf.mxu0 }
 0x132   : > { %22515 = vst [vmem:[#allocation46_spill] sm:$0xff] %v19392_v23  ;;  %v19398_v30 = vpop.f32.mrf.mxu1  ;;  %v2807_v33 = vmul.f32 %v19392_v23, %v19392_v23  ;;  %v2819_v10 = vsel %vm2815_vm1, %v2808_v3, 0.0 }
 0x133   : > { %v19404_v0 = vpop.f32.mrf.mxu0 }
 0x134   : > { %v19408_v4 = vpop.f32.mrf.mxu1  ;;  %v2816_v29 = vsel %vm2815_vm1, %v2807_v33, 0.0 }
 0x135   : > { %22516 = vst [vmem:[#allocation47_spill] sm:$0xff] %v19408_v4  ;;  %v19413_v47 = vpop.f32.mrf.mxu0  ;;  %2817 = vadd.xlane.f32.xlu1 %v2816_v29 }
 0x136   : > { %v19415_v50 = vpop.f32.mrf.mxu1 }
 0x137   : > { %22517 = vst [vmem:[#allocation48_spill] sm:$0xff] %v19415_v50  ;;  %v19419_v20 = vpop.f32.mrf.mxu0  ;;  %v683_v50 = vadd.f32 %v19290_v55, %v530_v16 }
 0x138   : > { %22518 = vst [vmem:[#allocation49_spill] sm:$0xff] %v19419_v20  ;;  %v19423_v41 = vpop.f32.mrf.mxu1 }
 0x139   : > { %22519 = vst [vmem:[#allocation50_spill] sm:$0xff] %v19423_v41  ;;  %v19426_v27 = vpop.f32.mrf.mxu0  ;;  %2820 = vadd.xlane.f32.xlu1 %v2819_v10  ;;  %v807_v59 = vadd.f32 %v19337_v14, %v683_v50 }
 0x13a   : > { %22520 = vst [vmem:[#allocation51_spill] sm:$0xff] %v19426_v27  ;;  %v16877_v8 = vpop.f32.mrf.mxu1 }
 0x13b   : > { %v16857_v49 = vpop.f32.mrf.mxu0 }
 0x13c   : > { %v1460_v33 = vpop.f32.mrf.mxu1  ;;  %v1467_v19 = vadd.f32 %v16877_v8, %v16857_v49 }
 0x13d   : > { %v1299_v29 = vpop.f32.mrf.mxu0 }
 0x13e   : > { %v16880_v21 = vpop.f32.mrf.mxu1  ;;  %v1461_v6 = vadd.f32 %v1460_v33, %v1299_v29 }
 0x13f   : > { %v16860_v2 = vpop.f32.mrf.mxu0 }
 0x140   : > { %v1472_v18 = vpop.f32.mrf.mxu1  ;;  %v1479_v12 = vadd.f32 %v16880_v21, %v16860_v2  ;;  %v550_v2 = vadd.f32 %v19286_v42, %v19303_v26 }
 0x141   : > { %v1319_v1 = vpop.f32.mrf.mxu0 }
 0x142   : > { %v16883_v3 = vpop.f32.mrf.mxu1  ;;  %v1473_v27 = vadd.f32 %v1472_v18, %v1319_v1 }
 0x143   : > { %v16863_v62 = vpop.f32.mrf.mxu0 }
 0x144   : > { %v1484_v54 = vpop.f32.mrf.mxu1 }
 0x145   : > { %v1339_v10 = vpop.f32.mrf.mxu0 }
 0x146   : > { %v19432_v61 = vpop.f32.mrf.mxu1 }
 0x147   : > { %v19434_v56 = vpop.f32.mrf.mxu0 }
 0x148   : > { %v1496_v48 = vpop.f32.mrf.mxu1 }
 0x149   : > { %v1359_v52 = vpop.f32.mrf.mxu0 }
 0x14a   : > { %v16917_v51 = vpop.f32.mrf.mxu1 }
 0x14b   : > { %v16897_v39 = vpop.f32.mrf.mxu0 }
 0x14c   : > { %v1708_v9 = vpop.f32.mrf.mxu1  ;;  %v1590_v34 = vadd.f32 %v16897_v39, %v1467_v19 }
 0x14d   : > { %v1582_v25 = vpop.f32.mrf.mxu0 }
 0x14e   : > { %v16920_v57 = vpop.f32.mrf.mxu1  ;;  %v1583_v23 = vadd.f32 %v1582_v25, %v1461_v6  ;;  %v1717_v8 = vadd.f32 %v16917_v51, %v1590_v34  ;;  %v1491_v6 = vadd.f32 %v16883_v3, %v16863_v62  ;;  %v1485_v25 = vadd.f32 %v1484_v54, %v1339_v10 }
 0x14f   : > { %v16900_v24 = vpop.f32.mrf.mxu0  ;;  %v935_v51 = vadd.f32 %v19334_v36, %v807_v59  ;;  %v1503_v10 = vadd.f32 %v19432_v61, %v19434_v56 }
 0x150   : > { %v1724_v58 = vpop.f32.mrf.mxu1  ;;  %v1604_v49 = vadd.f32 %v16900_v24, %v1479_v12  ;;  %v1709_v39 = vadd.f32 %v1708_v9, %v1583_v23 }
 0x151   : > { %v1596_v46 = vpop.f32.mrf.mxu0 }
 0x152   : > { %v16923_v22 = vpop.f32.mrf.mxu1  ;;  %v1597_v17 = vadd.f32 %v1596_v46, %v1473_v27  ;;  %v1733_v4 = vadd.f32 %v16920_v57, %v1604_v49  ;;  %v1076_v46 = vadd.f32 %v19386_v28, %v19343_v43  ;;  %v695_v57 = vadd.f32 %v19299_v31, %v550_v2 }
 0x153   : > { %v16903_v45 = vpop.f32.mrf.mxu0  ;;  %v570_v31 = vadd.f32 %v19286_v42, %v19316_v5 }
 0x154   : > { %v1740_v40 = vpop.f32.mrf.mxu1  ;;  %v1725_v18 = vadd.f32 %v1724_v58, %v1597_v17  ;;  %v1618_v24 = vadd.f32 %v16903_v45, %v1491_v6  ;;  %v821_v58 = vadd.f32 %v19354_v7, %v695_v57  ;;  %v1497_v17 = vadd.f32 %v1496_v48, %v1359_v52 }
 0x155   : > { %v1610_v35 = vpop.f32.mrf.mxu0 }
 0x156   : > { %v19438_v32 = vpop.f32.mrf.mxu1  ;;  %v1611_v55 = vadd.f32 %v1610_v35, %v1485_v25  ;;  %v1749_v28 = vadd.f32 %v16923_v22, %v1618_v24  ;;  %v951_v5 = vadd.f32 %v19350_v11, %v821_v58  ;;  %v22524_v24 = vld [vmem:[#allocation49_spill] sm:$0xff] }
 0x157   : > { %v19440_v63 = vpop.f32.mrf.mxu0 }
 0x158   : > { %v19442_v41 = vpop.f32.mrf.mxu1  ;;  %v1741_v50 = vadd.f32 %v1740_v40, %v1611_v55  ;;  %v1632_v56 = vadd.f32 %v19440_v63, %v1503_v10 }
 0x159   : > { %v1624_v20 = vpop.f32.mrf.mxu0 }
 0x15a   : > { %v16957_v15 = vpop.f32.mrf.mxu1  ;;  %v1625_v7 = vadd.f32 %v1624_v20, %v1497_v17  ;;  %v22527_v17 = vld [vmem:[#allocation50_spill] sm:$0xff] }
 0x15b   : > { %v16937_v33 = vpop.f32.mrf.mxu0 }
 0x15c   : > { %v1854_v19 = vadd.f32 %v16937_v33, %v1717_v8  ;;  %v1964_v29 = vpop.f32.mrf.mxu1  ;;  %v707_v33 = vadd.f32 %v19312_v37, %v570_v31  ;;  %v1765_v37 = vadd.f32 %v19438_v32, %v1632_v56  ;;  %v22523_v32 = vld [vmem:[#allocation44_spill] sm:$0xff] }
 0x15d   : > { %v1847_v21 = vpop.f32.mrf.mxu0 }
 0x15e   : > { %v19448_v16 = vadd.f32 %v16957_v15, %v1854_v19  ;;  %v1848_v1 = vadd.f32 %v1847_v21, %v1709_v39  ;;  %v16960_v34 = vpop.f32.mrf.mxu1  ;;  %v1070_v15 = vadd.f32 %v19396_v13, %v935_v51  ;;  %v19468_v13 = vadd.f32 %v19382_v38, %v1076_v46  ;;  %v22522_v46 = vld [vmem:[#allocation43_spill] sm:$0xff] }
 0x15f   : > { %v16940_v9 = vpop.f32.mrf.mxu0  ;;  %v1088_v38 = vadd.f32 %v19404_v0, %v19359_v53  ;;  %v1082_v39 = vadd.f32 %v19413_v47, %v951_v5  ;;  %v1757_v53 = vadd.f32 %v19442_v41, %v1625_v7  ;;  %v835_v2 = vadd.f32 %v19369_v44, %v707_v33 }
 0x160   : > { %v19453_v14 = vadd.f32 %v1964_v29, %v1848_v1  ;;  %v1866_v26 = vadd.f32 %v16940_v9, %v1733_v4  ;;  %v1976_v62 = vpop.f32.mrf.mxu1  ;;  %v2921_v54 = vmul.f32 %v19448_v16, %v19448_v16  ;;  %v19473_v3 = vadd.f32 %v19394_v60, %v1070_v15  ;;  %v22521_v1 = vld [vmem:[#allocation47_spill] sm:$0xff] }
 0x161   : > { %v1859_v12 = vpop.f32.mrf.mxu0  ;;  %v2810_v59 = vmul.f32 %v19468_v13, %v19468_v13  ;;  %v19501_v6 = vadd.f32 %v19398_v30, %v1088_v38  ;;  %v1100_v9 = vadd.f32 %v22524_v24, %v22523_v32 }
 0x162   : > { %v1860_v36 = vadd.f32 %v1859_v12, %v1725_v18  ;;  %v19459_v23 = vadd.f32 %v16960_v34, %v1866_v26  ;;  %v2931_v43 = vsel %vm2815_vm1, %v2921_v54, 0.0  ;;  %v16963_v45 = vpop.f32.mrf.mxu1  ;;  %v2920_v35 = vmul.f32 %v19453_v14, %v19453_v14  ;;  %v22525_v54 = vld [vmem:[#allocation51_spill] sm:$0xff] }
 0x163   : > { %2932 = vadd.xlane.f32.xlu0 %v2931_v43  ;;  %v16943_v4 = vpop.f32.mrf.mxu0  ;;  %v2809_v29 = vmul.f32 %v19473_v3, %v19473_v3  ;;  %v2825_v21 = vsel %vm2815_vm1, %v2810_v59, 0.0  ;;  %v19508_v34 = vadd.f32 %v22521_v1, %v1082_v39  ;;  %v967_v18 = vadd.f32 %v22522_v46, %v835_v2  ;;  %v22526_v43 = vld [vmem:[#allocation48_spill] sm:$0xff] }
 0x164   : > { %v19470_v27 = vadd.f32 %v1976_v62, %v1860_v36  ;;  %v1878_v48 = vadd.f32 %v16943_v4, %v1749_v28  ;;  %v1988_v22 = vpop.f32.mrf.mxu1  ;;  %v2928_v49 = vsel %vm2815_vm1, %v2920_v35, 0.0  ;;  %v2923_v40 = vmul.f32 %v19459_v23, %v19459_v23 }
 0x165   : > { %v1871_v52 = vpop.f32.mrf.mxu0  ;;  %v2822_v44 = vsel %vm2815_vm1, %v2809_v29, 0.0  ;;  %v2812_v62 = vmul.f32 %v19501_v6, %v19501_v6  ;;  %v1094_v57 = vadd.f32 %v22525_v54, %v967_v18  ;;  %v2811_v36 = vmul.f32 %v19508_v34, %v19508_v34  ;;  %v22529_v18 = vld [vmem:[#allocation45_spill] sm:$0xff] }
 0x166   : > { %v1872_v8 = vadd.f32 %v1871_v52, %v1741_v50  ;;  %v2922_v42 = vmul.f32 %v19470_v27, %v19470_v27  ;;  %v16966_v11 = vpop.f32.mrf.mxu1  ;;  %v19494_v0 = vadd.f32 %v16963_v45, %v1878_v48  ;;  %v2937_v63 = vsel %vm2815_vm1, %v2923_v40, 0.0 }
 0x167   : > { %v16946_v60 = vpop.f32.mrf.mxu0  ;;  %2929 = vadd.xlane.f32.xlu0 %v2928_v49  ;;  %v19528_v45 = vadd.f32 %v22526_v43, %v1100_v9  ;;  %v2831_v35 = vsel %vm2815_vm1, %v2812_v62, 0.0  ;;  %v19534_v28 = vadd.f32 %v22527_v17, %v1094_v57  ;;  %v2828_v4 = vsel %vm2815_vm1, %v2811_v36, 0.0 }
 0x168   : > { %v19486_v61 = vadd.f32 %v1988_v22, %v1872_v8  ;;  %v2934_v20 = vsel %vm2815_vm1, %v2922_v42, 0.0  ;;  %v2000_v25 = vpop.f32.mrf.mxu1  ;;  %v1890_v51 = vadd.f32 %v16946_v60, %v1765_v37  ;;  %v2925_v30 = vmul.f32 %v19494_v0, %v19494_v0 }
 0x169   : > { %v1883_v19 = vpop.f32.mrf.mxu0  ;;  %2935 = vadd.xlane.f32.xlu1 %v2934_v20  ;;  %v2814_v10 = vmul.f32 %v19528_v45, %v19528_v45  ;;  %v2813_v48 = vmul.f32 %v19534_v28, %v19534_v28 }
 0x16a   : > { %v1884_v47 = vadd.f32 %v1883_v19, %v1757_v53  ;;  %v2924_v41 = vmul.f32 %v19486_v61, %v19486_v61  ;;  %v19522_v15 = vadd.f32 %v16966_v11, %v1890_v51  ;;  %v2943_v12 = vsel %vm2815_vm1, %v2925_v30, 0.0 }
 0x16b   : > { %2938 = vadd.xlane.f32.xlu0 %v2937_v63  ;;  %v2837_v52 = vsel %vm2815_vm1, %v2814_v10, 0.0  ;;  %v2834_v22 = vsel %vm2815_vm1, %v2813_v48, 0.0  ;;  %v22528_v63 = vld [vmem:[#allocation46_spill] sm:$0xff] }
 0x16c   : > { %v19516_v55 = vadd.f32 %v2000_v25, %v1884_v47  ;;  %v2940_v26 = vsel %vm2815_vm1, %v2924_v41, 0.0  ;;  %v2927_v31 = vmul.f32 %v19522_v15, %v19522_v15 }
 0x16d   : > { %2826 = vadd.xlane.f32.xlu1 %v2825_v21 }
 0x16e   : > { %v2926_v58 = vmul.f32 %v19516_v55, %v19516_v55  ;;  %v2949_v7 = vsel %vm2815_vm1, %v2927_v31, 0.0  ;;  %v19578_v17 = vpop.f32.mrf.mxu1 }
 0x16f   : > { %2823 = vadd.xlane.f32.xlu0 %v2822_v44 }
 0x170   : > { %v2946_v50 = vsel %vm2815_vm1, %v2926_v58, 0.0  ;;  %v19576_v58 = vpop.f32.mrf.mxu0  ;;  %v19582_v48 = vpop.f32.mrf.mxu1 }
 0x171   : > { %2941 = vadd.xlane.f32.xlu1 %v2940_v26 }
 0x173   : > { %2944 = vadd.xlane.f32.xlu0 %v2943_v12 }
 0x175   : > { %2832 = vadd.xlane.f32.xlu1 %v2831_v35 }
 0x177   : > { %2829 = vadd.xlane.f32.xlu0 %v2828_v4 }
 0x179   : > { %2947 = vadd.xlane.f32.xlu1 %v2946_v50 }
 0x17b   : > { %2950 = vadd.xlane.f32.xlu0 %v2949_v7  ;;  %v19580_v7 = vpop.f32.mrf.mxu0 }
 0x17d   : > { %2838 = vadd.xlane.f32.xlu1 %v2837_v52 }
 0x17f   : > { %2835 = vadd.xlane.f32.xlu0 %v2834_v22 }
 0x1be   : > { %v2818_v8 = vpop.xlane.xlu1 %2817 }
 0x1bf   : > { %18375 = vrsqrt.f32 %v2818_v8  ;;  %vm2842_vm2 = vcmp.eq.f32.partialorder %v2818_v8, inf  ;;  %v2845_v5 = vand.u32 2147483648, %v2818_v8  ;;  %vm2844_vm3 = vcmp.eq.f32.partialorder %v2818_v8, 0.0 }
 0x1c2   : > { %v2821_v49 = vpop.xlane.xlu1 %2820 }
 0x1c3   : > { %18377 = vrsqrt.f32 %v2821_v49  ;;  %vm2849_vm4 = vcmp.eq.f32.partialorder %v2821_v49, inf  ;;  %v2852_v39 = vand.u32 2147483648, %v2821_v49  ;;  %vm2851_vm5 = vcmp.eq.f32.partialorder %v2821_v49, 0.0 }
 0x1cc   : > { %v18376_v42 = vpop.eup %18375 }
 0x1cd   : > { %v2841_v40 = vmul.f32 %v18376_v42, %v2818_v8 }
 0x1cf   : > { %v2843_v38 = vsel %vm2842_vm2, %v2818_v8, %v2841_v40 }
 0x1d0   : > { %v2846_v60 = vsel %vm2844_vm3, %v2845_v5, %v2843_v38  ;;  %v18378_v20 = vpop.eup %18377  ;;  %v16980_v38 = vpop.f32.mrf.mxu0 }
 0x1d1   : > { %v2896_v56 = vmax.f32 %v2846_v60, 1e-12  ;;  %v2848_v59 = vmul.f32 %v18378_v20, %v2821_v49  ;;  %v19591_v60 = vpop.f32.mrf.mxu1 }
 0x1d3   : > { %18379 = vrcp.f32 %v2896_v56  ;;  %v2850_v33 = vsel %vm2849_vm4, %v2821_v49, %v2848_v59 }
 0x1d4   : > { %v2853_v19 = vsel %vm2851_vm5, %v2852_v39, %v2850_v33 }
 0x1d5   : > { %v2897_v53 = vmax.f32 %v2853_v19, 1e-12 }
 0x1d7   : > { %18381 = vrcp.f32 %v2897_v53  ;;  %v19598_v53 = vpop.f32.mrf.mxu1 }
 0x1d8   : > { %22531 = vst [vmem:[#allocation43_spill] sm:$0xff] %v19598_v53 }
 0x1e0   : > { %v18380_v11 = vpop.eup %18379 }
 0x1e1   : > { %v2905_v29 = vmul.f32 %v18380_v11, %v22528_v63  ;;  %v19596_v11 = vpop.f32.mrf.mxu0 }
 0x1e2   : > { %22530 = vst [vmem:[#allocation47_spill] sm:$0xff] %v19596_v11 }
 0x1e3   : > { %v3033_v2 = vsel %vm2815_vm1, %v2905_v29, 0 }
 0x1e4   : > { %v19549_v37 = vand.u32 4294901760, %v3033_v2  ;;  %v18382_v44 = vpop.eup %18381 }
 0x1e5   : > { %v2907_v32 = vmul.f32 %v18382_v44, %v22529_v18 }
 0x1e6   : > { %17098 = vmatprep.mubr.f32.mxu1 %v19549_v37  ;;  %v19553_v47 = vsub.f32 %v3033_v2, %v19549_v37 }
 0x1e7   : > { %v3036_v26 = vsel %vm2815_vm1, %v2907_v32, 0 }
 0x1e8   : > { %v22464_v21 = vand.u32 4294901760, %v19553_v47  ;;  %v19574_v43 = vand.u32 4294901760, %v3036_v26 }
 0x1ea   : > { %v3114_v41 = vsub.f32 %v19553_v47, %v22464_v21  ;;  %v19589_v42 = vsub.f32 %v3036_v26, %v19574_v43 }
 0x1ec   : > { %v2933_v25 = vpop.xlane.xlu0 %2932  ;;  %v3115_v1 = vand.u32 4294901760, %v3114_v41 }
 0x1ed   : > { %18383 = vrsqrt.f32 %v2933_v25  ;;  %vm2961_vm6 = vcmp.eq.f32.partialorder %v2933_v25, inf  ;;  %v2964_v12 = vand.u32 2147483648, %v2933_v25  ;;  %vm2963_vm7 = vcmp.eq.f32.partialorder %v2933_v25, 0.0 }
 0x1ee   : > { %17091 = vmatprep.mubr.f32.mxu0 %v3115_v1  ;;  %v16983_v1 = vpop.f32.mrf.mxu0 }
 0x1f0   : > { %v2930_v51 = vpop.xlane.xlu0 %2929 }
 0x1f1   : > { %18385 = vrsqrt.f32 %v2930_v51  ;;  %vm2954_vm8 = vcmp.eq.f32.partialorder %v2930_v51, inf  ;;  %vm2956_vm9 = vcmp.eq.f32.partialorder %v2930_v51, 0.0  ;;  %v2957_v22 = vand.u32 2147483648, %v2930_v51 }
 0x1f2   : > { %v2936_v30 = vpop.xlane.xlu1 %2935 }
 0x1f3   : > { %18387 = vrsqrt.f32 %v2936_v30  ;;  %vm2968_vm10 = vcmp.eq.f32.partialorder %v2936_v30, inf  ;;  %vm2970_vm11 = vcmp.eq.f32.partialorder %v2936_v30, 0.0  ;;  %v2971_v59 = vand.u32 2147483648, %v2936_v30 }
 0x1f4   : > { %v19559_v46 = vpop.xlane.xlu0 %2938 }
 0x1f5   : > { %18389 = vrsqrt.f32 %v19559_v46  ;;  %vm2975_vm12 = vcmp.eq.f32.partialorder %v19559_v46, inf  ;;  %v2978_v2 = vand.u32 2147483648, %v19559_v46  ;;  %vm2977_vm13 = vcmp.eq.f32.partialorder %v19559_v46, 0.0 }
 0x1f6   : > { %v19563_v24 = vpop.xlane.xlu1 %2826 }
 0x1f7   : > { %18391 = vrsqrt.f32 %v19563_v24  ;;  %vm2863_vm14 = vcmp.eq.f32.partialorder %v19563_v24, inf  ;;  %vm2865_vm15 = vcmp.eq.f32.partialorder %v19563_v24, 0.0  ;;  %v2866_v18 = vand.u32 2147483648, %v19563_v24 }
 0x1f8   : > { %v19566_v9 = vpop.xlane.xlu0 %2823 }
 0x1f9   : > { %18393 = vrsqrt.f32 %v19566_v9  ;;  %vm2856_vm2 = vcmp.eq.f32.partialorder %v19566_v9, inf  ;;  %vm2858_vm3 = vcmp.eq.f32.partialorder %v19566_v9, 0.0 }
 0x1fa   : > { %v18384_v62 = vpop.eup %18383  ;;  %v19570_v54 = vpop.xlane.xlu1 %2941 }
 0x1fb   : > { %v2960_v57 = vmul.f32 %v18384_v62, %v2933_v25  ;;  %vm2982_vm5 = vcmp.eq.f32.partialorder %v19570_v54, inf }
 0x1fc   : > { %v19572_v36 = vpop.xlane.xlu0 %2944 }
 0x1fd   : > { %v2962_v35 = vsel %vm2961_vm6, %v2933_v25, %v2960_v57  ;;  %vm2984_vm6 = vcmp.eq.f32.partialorder %v19570_v54, 0.0 }
 0x1fe   : > { %v18386_v4 = vpop.eup %18385  ;;  %v2965_v31 = vsel %vm2963_vm7, %v2964_v12, %v2962_v35  ;;  %v19584_v8 = vpop.xlane.xlu1 %2832  ;;  %vm2989_vm7 = vcmp.eq.f32.partialorder %v19572_v36, inf }
 0x1ff   : > { %v3009_v50 = vmax.f32 %v2965_v31, 1e-12  ;;  %v2953_v10 = vmul.f32 %v18386_v4, %v2930_v51  ;;  %v2859_v4 = vand.u32 2147483648, %v19566_v9 }
 0x200   : > { %v18388_v52 = vpop.eup %18387  ;;  %v19586_v49 = vpop.xlane.xlu0 %2829 }
 0x201   : > { %18395 = vrcp.f32 %v3009_v50  ;;  %v2955_v40 = vsel %vm2954_vm8, %v2930_v51, %v2953_v10  ;;  %v2967_v5 = vmul.f32 %v18388_v52, %v2936_v30  ;;  %v19606_v51 = vpop.f32.mrf.mxu1  ;;  %vm2870_vm4 = vcmp.eq.f32.partialorder %v19586_v49, inf }
 0x202   : > { %v18390_v56 = vpop.eup %18389  ;;  %v2958_v20 = vsel %vm2956_vm9, %v2957_v22, %v2955_v40  ;;  %18397 = vrsqrt.f32 %v19586_v49  ;;  %v22463_v40 = vand.u32 4294901760, %v19589_v42  ;;  %vm2991_vm8 = vcmp.eq.f32.partialorder %v19572_v36, 0.0 }
 0x203   : > { %v3008_v33 = vmax.f32 %v2958_v20, 1e-12  ;;  %v2969_v39 = vsel %vm2968_vm10, %v2936_v30, %v2967_v5  ;;  %v2974_v19 = vmul.f32 %v18390_v56, %v19559_v46  ;;  %18399 = vrsqrt.f32 %v19572_v36  ;;  %v19615_v12 = vpop.f32.mrf.mxu1 }
 0x204   : > { %v18392_v63 = vpop.eup %18391  ;;  %v2972_v29 = vsel %vm2970_vm11, %v2971_v59, %v2969_v39  ;;  %18401 = vrsqrt.f32 %v19584_v8  ;;  %22533 = vst [vmem:[#allocation49_spill] sm:$0xff] %v19615_v12  ;;  %v19640_v39 = vpop.xlane.xlu0 %2950  ;;  %vm2872_vm9 = vcmp.eq.f32.partialorder %v19586_v49, 0.0  ;;  %vm2877_vm10 = vcmp.eq.f32.partialorder %v19584_v8, inf }
 0x205   : > { %18403 = vrcp.f32 %v3008_v33  ;;  %v2976_v41 = vsel %vm2975_vm12, %v19559_v46, %v2974_v19  ;;  %v2862_v25 = vmul.f32 %v18392_v63, %v19563_v24  ;;  %v3010_v32 = vmax.f32 %v2972_v29, 1e-12  ;;  %v19613_v46 = vpop.f32.mrf.mxu0 }
 0x206   : > { %v18394_v44 = vpop.eup %18393  ;;  %v2979_v30 = vsel %vm2977_vm13, %v2978_v2, %v2976_v41  ;;  %22532 = vst [vmem:[#allocation44_spill] sm:$0xff] %v19613_v46  ;;  %18405 = vrsqrt.f32 %v19570_v54  ;;  %v19647_v2 = vsub.f32 %v19589_v42, %v22463_v40  ;;  %vm2879_vm11 = vcmp.eq.f32.partialorder %v19584_v8, 0.0 }
 0x207   : > { %v3011_v26 = vmax.f32 %v2979_v30, 1e-12  ;;  %v2864_v62 = vsel %vm2863_vm14, %v19563_v24, %v2862_v25  ;;  %v2855_v57 = vmul.f32 %v18394_v44, %v19566_v9  ;;  %v19622_v10 = vpop.f32.mrf.mxu0  ;;  %v19624_v24 = vpop.f32.mrf.mxu1  ;;  %vm3003_vm14 = vcmp.eq.f32.partialorder %v19640_v39, inf }
 0x208   : > { %v2867_v35 = vsel %vm2865_vm15, %v2866_v18, %v2864_v62 }
 0x209   : > { %v2899_v31 = vmax.f32 %v2867_v35, 1e-12  ;;  %v2857_v50 = vsel %vm2856_vm2, %v19566_v9, %v2855_v57  ;;  %18407 = vrcp.f32 %v3011_v26  ;;  %v19627_v5 = vpop.f32.mrf.mxu0  ;;  %v19629_v56 = vpop.f32.mrf.mxu1  ;;  %v19634_v9 = vld [vmem:[%s22390_s5] ss:$0 sm:$0xff]  ;;  %vm3005_vm2 = vcmp.eq.f32.partialorder %v19640_v39, 0.0 }
 0x20a   : > { %v2860_v52 = vsel %vm2858_vm3, %v2859_v4, %v2857_v50  ;;  %18409 = vrcp.f32 %v3010_v32  ;;  %22534 = vst [vmem:[#allocation51_spill] sm:$0xff] %v19627_v5  ;;  %22535 = vst [vmem:[#allocation48_spill] sm:$0xff] %v19629_v56  ;;  %v2127_v19 = vadd.f32 %v16980_v38, %v19634_v9  ;;  %v2147_v38 = vadd.f32 %v16983_v1, %v19634_v9  ;;  %v19663_v35 = vpop.xlane.xlu1 %2947 }
 0x20b   : > { %v2898_v22 = vmax.f32 %v2860_v52, 1e-12  ;;  %18411 = vrcp.f32 %v2899_v31  ;;  %v19636_v20 = vpop.f32.mrf.mxu0  ;;  %v19638_v59 = vpop.f32.mrf.mxu1  ;;  %v3125_v1 = vand.u32 4294901760, %v19647_v2  ;;  %v2873_v2 = vand.u32 2147483648, %v19586_v49 }
 0x20c   : > { %22536 = vst [vmem:[#allocation50_spill] sm:$0xff] %v19638_v59  ;;  %v19655_v18 = vadd.f32 %v19591_v60, %v2127_v19  ;;  %v19678_v19 = vpop.xlane.xlu0 %2835  ;;  %v2992_v5 = vand.u32 2147483648, %v19572_v36  ;;  %vm2996_vm13 = vcmp.eq.f32.partialorder %v19663_v35, inf }
 0x20d   : > { %18413 = vrcp.f32 %v2898_v22  ;;  %v19649_v41 = vpop.f32.mrf.mxu0  ;;  %v19651_v25 = vpop.f32.mrf.mxu1  ;;  %vm2884_vm12 = vcmp.eq.f32.partialorder %v19678_v19, inf  ;;  %vm2886_vm15 = vcmp.eq.f32.partialorder %v19678_v19, 0.0 }
 0x20e   : > { %v18396_v33 = vpop.eup %18395  ;;  %22537 = vst [vmem:[#allocation46_spill] sm:$0xff] %v19651_v25  ;;  %18415 = vrsqrt.f32 %v19678_v19 }
 0x20f   : > { %v18398_v63 = vpop.eup %18397  ;;  %v3019_v29 = vmul.f32 %v18396_v33, %v19448_v16  ;;  %v19659_v26 = vpop.f32.mrf.mxu0  ;;  %18417 = vrsqrt.f32 %v19640_v39 }
 0x210   : > { %v18400_v44 = vpop.eup %18399  ;;  %v2869_v30 = vmul.f32 %v18398_v63, %v19586_v49  ;;  %v19661_v62 = vpop.f32.mrf.mxu1  ;;  %18419 = vrsqrt.f32 %v19663_v35 }
 0x211   : > { %v18402_v32 = vpop.eup %18401  ;;  %v3042_v16 = vsel %vm2815_vm1, %v3019_v29, 0  ;;  %v2988_v31 = vmul.f32 %v18400_v44, %v19572_v36  ;;  %v19671_v50 = vpop.f32.mrf.mxu0 }
 0x212   : > { %v18404_v57 = vpop.eup %18403  ;;  %v19665_v4 = vand.u32 4294901760, %v3042_v16  ;;  %22538 = vst [vmem:[#allocation45_spill] sm:$0xff] %v19671_v50  ;;  %v19673_v52 = vpop.f32.mrf.mxu1  ;;  %v2871_v33 = vsel %vm2870_vm4, %v19586_v49, %v2869_v30  ;;  %vm2998_vm4 = vcmp.eq.f32.partialorder %v19663_v35, 0.0 }
 0x213   : > { %v3017_v60 = vmul.f32 %v18404_v57, %v19453_v14  ;;  %22539 = vst [vmem:[#allocation52_spill] sm:$0xff] %v19673_v52  ;;  %v18406_v29 = vpop.eup %18405  ;;  %v2876_v14 = vmul.f32 %v18402_v32, %v19584_v8  ;;  %v19687_v57 = vadd.f32 %v19606_v51, %v2147_v38  ;;  %v19689_v40 = vpop.f32.mrf.mxu0  ;;  %v2874_v21 = vsel %vm2872_vm9, %v2873_v2, %v2871_v33 }
 0x214   : > { %17087 = vmatprep.subr.mxu0 %v19665_v4  ;;  %v3161_v63 = vsub.f32 %v3042_v16, %v19665_v4  ;;  %v19691_v30 = vpop.f32.mrf.mxu1  ;;  %v2981_v56 = vmul.f32 %v18406_v29, %v19570_v54  ;;  %v2880_v2 = vand.u32 2147483648, %v19584_v8 }
 0x215   : > { %17088 = vmatpush3.xpose.msra.mxu0 %v19665_v4  ;;  %v3039_v44 = vsel %vm2815_vm1, %v3017_v60, 0  ;;  %v2990_v60 = vsel %vm2989_vm7, %v19572_v36, %v2988_v31  ;;  %v19703_v38 = vpop.f32.mrf.mxu0  ;;  %v2878_v33 = vsel %vm2877_vm10, %v19584_v8, %v2876_v14 }
 0x216   : > { %v19697_v32 = vand.u32 4294901760, %v3039_v44  ;;  %v18408_v16 = vpop.eup %18407  ;;  %v19701_v51 = vand.u32 4294901760, %v3161_v63  ;;  %22540 = vst [vmem:[#allocation53_spill] sm:$0xff] %v19703_v38  ;;  %v19710_v12 = vpop.f32.mrf.mxu1  ;;  %v2983_v25 = vsel %vm2982_vm5, %v19570_v54, %v2981_v56  ;;  %v2881_v59 = vsel %vm2879_vm11, %v2880_v2, %v2878_v33 }
 0x217   : > { %v18410_v22 = vpop.eup %18409  ;;  %22541 = vst [vmem:[#allocation54_spill] sm:$0xff] %v19710_v12  ;;  %v19715_v38 = vpop.xlane.xlu1 %2838  ;;  %v2900_v12 = vmax.f32 %v2874_v21, 1e-12  ;;  %v3023_v14 = vmul.f32 %v18408_v16, %v19459_v23 }
 0x218   : > { %17089 = vmatprep.subr.mxu0 %v19697_v32  ;;  %v3168_v49 = vsub.f32 %v3039_v44, %v19697_v32  ;;  %v18412_v31 = vpop.eup %18411  ;;  %v3163_v29 = vsub.f32 %v3161_v63, %v19701_v51  ;;  %v19719_v46 = vpop.f32.mrf.mxu0  ;;  %v2993_v44 = vsel %vm2991_vm8, %v2992_v5, %v2990_v60  ;;  %18421 = vrsqrt.f32 %v19715_v38 }
 0x219   : > { %17090 = vmatpush3.xpose.msra.mxu0 %v19697_v32  ;;  %v19734_v36 = vpop.f32.mrf.mxu1  ;;  %v3013_v23 = vmax.f32 %v2993_v44, 1e-12  ;;  %v3021_v5 = vmul.f32 %v18410_v22, %v19470_v27  ;;  %18423 = vrcp.f32 %v2900_v12  ;;  %v22543_v60 = vand.u32 2147483648, %v19570_v54 }
 0x21a   : > { %v18414_v52 = vpop.eup %18413  ;;  %17101 = vmatprep.subr.mxu0 %v3161_v63  ;;  %v19723_v50 = vand.u32 4294901760, %v3168_v49  ;;  %v3164_v53 = vand.u32 4294901760, %v3163_v29  ;;  %v2167_v22 = vadd.f32 %v19622_v10, %v19634_v9  ;;  %vm2891_vm3 = vcmp.eq.f32.partialorder %v19715_v38, inf }
 0x21b   : > { %v2909_v11 = vmul.f32 %v18414_v52, %v19473_v3  ;;  %v2911_v3 = vmul.f32 %v18412_v31, %v19468_v13  ;;  %v19739_v52 = vpop.f32.mrf.mxu0  ;;  %v19750_v27 = vpop.f32.mrf.mxu1  ;;  %18425 = vrcp.f32 %v3013_v23  ;;  %vm2893_vm5 = vcmp.eq.f32.partialorder %v19715_v38, 0.0 }
 0x21c   : > { %17092 = vmatmul.mubr.f32.vlgmr.msra.gmra.mxu0 %v3125_v1  ;;  %v3170_v21 = vsub.f32 %v3168_v49, %v19723_v50  ;;  %17094 = vmatprep.subr.mxu1 %v3164_v53  ;;  %22542 = vst [vmem:[#allocation55_spill] sm:$0xff] %v19739_v52  ;;  %v3556_v1 = vsel %vm2815_vm1, %v3023_v14, 0  ;;  %22544 = vst [vmem:[#allocation56_spill] sm:$0xff] %v19750_v27  ;;  %v2999_v52 = vand.u32 2147483648, %v19663_v35 }
 0x21d   : > { %17102 = vmatpush3.xpose.msra.mxu0 %v3161_v63  ;;  %v3547_v8 = vsel %vm2815_vm1, %v2909_v11, 0  ;;  %17095 = vmatpush3.xpose.msra.mxu1 %v3164_v53  ;;  %v2986_v11 = vsel %vm2984_vm6, %v22543_v60, %v2983_v25  ;;  %v2901_v63 = vmax.f32 %v2881_v59, 1e-12  ;;  %v3550_v13 = vsel %vm2815_vm1, %v2911_v3, 0  ;;  %v19759_v31 = vpop.f32.mrf.mxu0  ;;  %v19767_v33 = vpop.f32.mrf.mxu1 }
 0x21e   : > { %17105 = vmatprep.mubr.f32.mxu0 %v19553_v47  ;;  %v3171_v56 = vand.u32 4294901760, %v3170_v21  ;;  %v19743_v16 = vand.u32 4294901760, %v3547_v8  ;;  %17103 = vmatprep.subr.mxu0 %v3168_v49  ;;  %v19752_v53 = vand.u32 4294901760, %v3556_v1  ;;  %v3012_v54 = vmax.f32 %v2986_v11, 1e-12 }
 0x21f   : > { %v3553_v59 = vsel %vm2815_vm1, %v3021_v5, 0  ;;  %v19763_v25 = vand.u32 4294901760, %v3550_v13  ;;  %18427 = vrcp.f32 %v2901_v63  ;;  %v19777_v44 = vpop.f32.mrf.mxu0  ;;  %v22545_v21 = vand.u32 4294901760, %v19553_v47 }
 0x220   : > { %17096 = vmatprep.subr.mxu1 %v3171_v56  ;;  %v19755_v12 = vsub.f32 %v3547_v8, %v19743_v16  ;;  %v19772_v2 = vand.u32 4294901760, %v3553_v59  ;;  %v19775_v29 = vsub.f32 %v3556_v1, %v19752_v53  ;;  %18429 = vrcp.f32 %v3012_v54 }
 0x221   : > { %17104 = vmatpush3.xpose.msra.mxu0 %v3168_v49  ;;  %17097 = vmatpush3.xpose.msra.mxu1 %v3171_v56  ;;  %v18416_v49 = vpop.eup %18415  ;;  %v19783_v23 = vsub.f32 %v3550_v13, %v19763_v25  ;;  %v19788_v8 = vpop.f32.mrf.mxu0  ;;  %v19792_v3 = vadd.f32 %v19624_v24, %v2167_v22 }
 0x222   : > { %17115 = vmatprep.subr.mxu0 %v19701_v51  ;;  %17108 = vmatprep.subr.mxu1 %v19665_v4  ;;  %v22465_v10 = vand.u32 4294901760, %v19755_v12  ;;  %v18418_v14 = vpop.eup %18417  ;;  %v19794_v56 = vpop.f32.mrf.mxu1  ;;  %v19802_v11 = vand.u32 4294901760, %v19775_v29  ;;  %v19805_v63 = vsub.f32 %v3553_v59, %v19772_v2 }
 0x223   : > { %v18420_v5 = vpop.eup %18419  ;;  %v3002_v1 = vmul.f32 %v18418_v14, %v19640_v39  ;;  %v19817_v54 = vpop.f32.mrf.mxu0  ;;  %v2887_v14 = vand.u32 2147483648, %v19678_v19 }
 0x224   : > { %17106 = vmatmul.mubr.f32.vlgmr.msra.gmra.mxu0 %v19589_v42  ;;  %17099 = vmatmul.mubr.f32.vlgmr.msra.gmra.mxu1 %v19574_v43  ;;  %v3628_v60 = vsub.f32 %v19755_v12, %v22465_v10  ;;  %v19811_v13 = vpop.f32.mrf.mxu1  ;;  %22546 = vst [vmem:[#allocation57_spill] sm:$0xff] %v19817_v54  ;;  %v2995_v59 = vmul.f32 %v18420_v5, %v19663_v35  ;;  %v22547_v10 = vand.u32 4294901760, %v19589_v42  ;;  %v19831_v5 = vand.u32 4294901760, %v19805_v63 }
 0x225   : > { %17116 = vmatpush3.xpose.msra.mxu0 %v19701_v51  ;;  %17109 = vmatpush3.xpose.msra.mxu1 %v19665_v4  ;;  %v2883_v51 = vmul.f32 %v18416_v49, %v19678_v19  ;;  %v18422_v47 = vpop.eup %18421  ;;  %v3677_v24 = vsub.f32 %v19775_v29, %v19802_v11  ;;  %v2415_v54 = vadd.f32 %v19689_v40, %v19687_v57 }
 0x226   : > { %17112 = vmatprep.mubr.f32.mxu1 %v22545_v21  ;;  %17119 = vmatprep.mubr.f32.mxu0 %v19549_v37  ;;  %v2890_v49 = vmul.f32 %v18422_v47, %v19715_v38  ;;  %v3004_v21 = vsel %vm3003_vm14, %v19640_v39, %v3002_v1  ;;  %v3006_v47 = vand.u32 2147483648, %v19640_v39  ;;  %v19840_v1 = vpop.f32.mrf.mxu1  ;;  %v2401_v39 = vadd.f32 %v19659_v26, %v19655_v18 }
 0x227   : > { %17110 = vmatprep.subr.mxu1 %v19697_v32  ;;  %17117 = vmatprep.subr.mxu0 %v19723_v50  ;;  %v2885_v22 = vsel %vm2884_vm12, %v19678_v19, %v2883_v51  ;;  %v3629_v51 = vand.u32 4294901760, %v3628_v60  ;;  %v22548_v19 = vand.u32 4294901760, %v19783_v23  ;;  %22549 = vst [vmem:[#allocation58_spill] sm:$0xff] %v19840_v1  ;;  %v3684_v1 = vsub.f32 %v19805_v63, %v19831_v5 }
 0x228   : > { %v2888_v27 = vsel %vm2886_vm15, %v2887_v14, %v2885_v22  ;;  %v2894_v22 = vand.u32 2147483648, %v19715_v38  ;;  %v2892_v14 = vsel %vm2891_vm3, %v19715_v38, %v2890_v49  ;;  %v2530_v18 = vadd.f32 %v19661_v62, %v2401_v39  ;;  %v17083_v26 = vpop.f32.mrf.mxu1 }
 0x229   : > { %17118 = vmatpush3.xpose.msra.mxu0 %v19723_v50  ;;  %17111 = vmatpush3.xpose.msra.mxu1 %v19697_v32  ;;  %v18424_v50 = vpop.eup %18423  ;;  %v3638_v42 = vsub.f32 %v19783_v23, %v22548_v19  ;;  %v2902_v19 = vmax.f32 %v2888_v27, 1e-12  ;;  %v2546_v57 = vadd.f32 %v19691_v30, %v2415_v54 }
 0x22a   : > { %17129 = vmatprep.subr.mxu0 %v19752_v53  ;;  %17122 = vmatprep.subr.mxu1 %v19665_v4  ;;  %v18426_v60 = vpop.eup %18425 }
 0x22b   : > { %v3027_v49 = vmul.f32 %v18426_v60, %v19494_v0  ;;  %v2429_v0 = vadd.f32 %v19719_v46, %v19792_v3  ;;  %18431 = vrcp.f32 %v2902_v19  ;;  %v19881_v3 = vpop.f32.mrf.mxu1 }
 0x22c   : > { %17120 = vmatmul.mubr.f32.vlgmr.msra.gmra.mxu0 %v19574_v43  ;;  %17113 = vmatmul.mubr.f32.vlgmr.msra.gmra.mxu1 %v22547_v10  ;;  %v2913_v10 = vmul.f32 %v18424_v50, %v19508_v34  ;;  %v2997_v34 = vsel %vm2996_vm13, %v19663_v35, %v2995_v59  ;;  %v3007_v50 = vsel %vm3005_vm2, %v3006_v47, %v3004_v21  ;;  %v3639_v59 = vand.u32 4294901760, %v3638_v42 }
 0x22d   : > { %17130 = vmatpush3.xpose.msra.mxu0 %v19752_v53  ;;  %17123 = vmatpush3.xpose.msra.mxu1 %v19665_v4  ;;  %v18428_v4 = vpop.eup %18427  ;;  %v2895_v47 = vsel %vm2893_vm5, %v2894_v22, %v2892_v14  ;;  %v3015_v62 = vmax.f32 %v3007_v50, 1e-12  ;;  %v3685_v35 = vand.u32 4294901760, %v3684_v1  ;;  %v4070_v30 = vsel %vm2815_vm1, %v3027_v49, 0 }
 0x22e   : > { %17126 = vmatprep.mubr.f32.mxu1 %v19549_v37  ;;  %17133 = vmatprep.mubr.f32.mxu0 %v3629_v51  ;;  %v17063_v37 = vpop.f32.mrf.mxu0  ;;  %v3678_v51 = vand.u32 4294901760, %v3677_v24  ;;  %v4061_v21 = vsel %vm2815_vm1, %v2913_v10, 0  ;;  %v18430_v27 = vpop.eup %18429  ;;  %v2915_v40 = vmul.f32 %v18428_v4, %v19501_v6  ;;  %v3000_v24 = vsel %vm2998_vm4, %v2999_v52, %v2997_v34 }
 0x22f   : > { %17124 = vmatprep.subr.mxu1 %v19697_v32  ;;  %17131 = vmatprep.subr.mxu0 %v19772_v2  ;;  %v19874_v38 = vand.u32 4294901760, %v4061_v21  ;;  %v2663_v6 = vadd.f32 %v19788_v8, %v2530_v18  ;;  %v3025_v52 = vmul.f32 %v18430_v27, %v19486_v61  ;;  %v2562_v46 = vadd.f32 %v19734_v36, %v2429_v0 }
 0x230   : > { %v2675_v42 = vadd.f32 %v17063_v37, %v2546_v57  ;;  %v3014_v1 = vmax.f32 %v3000_v24, 1e-12  ;;  %v19890_v61 = vand.u32 4294901760, %v4070_v30  ;;  %18433 = vrcp.f32 %v3015_v62  ;;  %v17086_v37 = vpop.f32.mrf.mxu1 }
 0x231   : > { %17132 = vmatpush3.xpose.msra.mxu0 %v19772_v2  ;;  %17125 = vmatpush3.xpose.msra.mxu1 %v19697_v32  ;;  %v19868_v32 = vpop.f32.mrf.mxu0  ;;  %v19886_v8 = vadd.f32 %v19811_v13, %v2663_v6  ;;  %v19893_v36 = vsub.f32 %v4061_v21, %v19874_v38  ;;  %v4067_v13 = vsel %vm2815_vm1, %v3025_v52, 0  ;;  %v22550_v14 = vand.u32 4294901760, %v19755_v12 }
 0x232   : > { %17143 = vmatprep.subr.mxu0 %v19775_v29  ;;  %17136 = vmatprep.subr.mxu1 %v3678_v51  ;;  %v19899_v22 = vadd.f32 %v17083_v26, %v2675_v42  ;;  %v19908_v34 = vand.u32 4294901760, %v4067_v13  ;;  %v4189_v50 = vsub.f32 %v4070_v30, %v19890_v61 }
 0x233   : > { %v17066_v54 = vpop.f32.mrf.mxu0  ;;  %v4141_v4 = vand.u32 4294901760, %v19893_v36 }
 0x234   : > { %17134 = vmatmul.mubr.f32.vlgmr.msra.gmra.mxu0 %v3639_v59  ;;  %17127 = vmatmul.mubr.f32.vlgmr.msra.gmra.mxu1 %v19574_v43  ;;  %v2903_v43 = vmax.f32 %v2895_v47, 1e-12  ;;  %v2687_v10 = vadd.f32 %v17066_v54, %v2562_v46  ;;  %v4190_v19 = vand.u32 4294901760, %v4189_v50  ;;  %v2097_v46 = vadd.f32 %v19634_v9, %v19580_v7 }
 0x235   : > { %17144 = vmatpush3.xpose.msra.mxu0 %v19775_v29  ;;  %17137 = vmatpush3.xpose.msra.mxu1 %v3678_v51  ;;  %v4064_v29 = vsel %vm2815_vm1, %v2915_v40, 0  ;;  %v4196_v51 = vsub.f32 %v4067_v13, %v19908_v34 }
 0x236   : > { %17140 = vmatprep.mubr.f32.mxu1 %v19743_v16  ;;  %17147 = vmatprep.mubr.f32.mxu0 %v19755_v12  ;;  %v19897_v60 = vand.u32 4294901760, %v4064_v29  ;;  %18435 = vrcp.f32 %v2903_v43  ;;  %v4191_v21 = vsub.f32 %v4189_v50, %v4190_v19 }
 0x237   : > { %17138 = vmatprep.subr.mxu1 %v3685_v35  ;;  %17145 = vmatprep.subr.mxu0 %v19805_v63  ;;  %18437 = vrcp.f32 %v3014_v1  ;;  %v4197_v18 = vand.u32 4294901760, %v4196_v51 }
 0x238   : > { %v19915_v39 = vsub.f32 %v4064_v29, %v19897_v60  ;;  %v18432_v59 = vpop.eup %18431  ;;  %v4192_v57 = vand.u32 4294901760, %v4191_v21 }
 0x239   : > { %17146 = vmatpush3.xpose.msra.mxu0 %v19805_v63  ;;  %17139 = vmatpush3.xpose.msra.mxu1 %v3685_v35  ;;  %v19902_v63 = vadd.f32 %v17086_v37, %v2687_v10  ;;  %v2917_v27 = vmul.f32 %v18432_v59, %v19534_v28  ;;  %v4198_v24 = vsub.f32 %v4196_v51, %v4197_v18 }
 0x23a   : > { %17157 = vmatprep.subr.mxu0 %v19802_v11  ;;  %17150 = vmatprep.subr.mxu1 %v19752_v53  ;;  %v4151_v12 = vand.u32 4294901760, %v19915_v39 }
 0x23b   : > { %v4575_v47 = vsel %vm2815_vm1, %v2917_v27, 0  ;;  %v4199_v62 = vand.u32 4294901760, %v4198_v24  ;;  %v20055_v27 = vpop.f32.mrf.mxu0 }
 0x23c   : > { %17148 = vmatmul.mubr.f32.vlgmr.msra.gmra.mxu0 %v19783_v23  ;;  %17141 = vmatmul.mubr.f32.vlgmr.msra.gmra.mxu1 %v19763_v25  ;;  %v4152_v26 = vsub.f32 %v19915_v39, %v4151_v12  ;;  %v19947_v35 = vand.u32 4294901760, %v4575_v47 }
 0x23d   : > { %17158 = vmatpush3.xpose.msra.mxu0 %v19802_v11  ;;  %17151 = vmatpush3.xpose.msra.mxu1 %v19752_v53  ;;  %v4142_v11 = vsub.f32 %v19893_v36, %v4141_v4  ;;  %v18434_v40 = vpop.eup %18433 }
 0x23e   : > { %17154 = vmatprep.mubr.f32.mxu1 %v22550_v14  ;;  %17161 = vmatprep.mubr.f32.mxu0 %v19743_v16  ;;  %v19959_v30 = vsub.f32 %v4575_v47, %v19947_v35 }
 0x23f   : > { %17152 = vmatprep.subr.mxu1 %v19772_v2  ;;  %17159 = vmatprep.subr.mxu0 %v19831_v5  ;;  %v4143_v49 = vand.u32 4294901760, %v4142_v11 }
 0x240   : > { %v4655_v43 = vand.u32 4294901760, %v19959_v30 }
 0x241   : > { %17160 = vmatpush3.xpose.msra.mxu0 %v19831_v5  ;;  %17153 = vmatpush3.xpose.msra.mxu1 %v19772_v2  ;;  %v22551_v5 = vand.u32 4294901760, %v19783_v23 }
 0x242   : > { %17171 = vmatprep.subr.mxu0 %v19890_v61  ;;  %17164 = vmatprep.subr.mxu1 %v19752_v53  ;;  %v4656_v42 = vsub.f32 %v19959_v30, %v4655_v43 }
 0x243   : > { %v18436_v23 = vpop.eup %18435 }
 0x244   : > { %17162 = vmatmul.mubr.f32.vlgmr.msra.gmra.mxu0 %v19763_v25  ;;  %17155 = vmatmul.mubr.f32.vlgmr.msra.gmra.mxu1 %v22551_v5  ;;  %v18438_v28 = vpop.eup %18437  ;;  %v2919_v0 = vmul.f32 %v18436_v23, %v19528_v45  ;;  %v2107_v45 = vadd.f32 %v19576_v58, %v19634_v9  ;;  %v4657_v37 = vand.u32 4294901760, %v4656_v42 }
 0x245   : > { %17172 = vmatpush3.xpose.msra.mxu0 %v19890_v61  ;;  %17165 = vmatpush3.xpose.msra.mxu1 %v19752_v53  ;;  %v3031_v53 = vmul.f32 %v18434_v40, %v19522_v15  ;;  %v3029_v15 = vmul.f32 %v18438_v28, %v19516_v55  ;;  %v20057_v40 = vpop.f32.mrf.mxu1 }
 0x246   : > { %17168 = vmatprep.mubr.f32.mxu1 %v19743_v16  ;;  %17175 = vmatprep.mubr.f32.mxu0 %v4143_v49  ;;  %v4153_v16 = vand.u32 4294901760, %v4152_v26  ;;  %v4578_v6 = vsel %vm2815_vm1, %v2919_v0, 0  ;;  %v2264_v58 = vadd.f32 %v19578_v17, %v2107_v45  ;;  %v2258_v17 = vadd.f32 %v19582_v48, %v2097_v46 }
 0x247   : > { %17166 = vmatprep.subr.mxu1 %v19772_v2  ;;  %17173 = vmatprep.subr.mxu0 %v19908_v34  ;;  %v4581_v52 = vsel %vm2815_vm1, %v3029_v15, 0  ;;  %v19962_v55 = vand.u32 4294901760, %v4578_v6  ;;  %v20059_v46 = vstv %s5088_s27  ;;  %s18613_s27 = sshll.u32 %s18683_s29, 4  ;;  %s18614_s27 = int_to_ptr.vmem [resolvable:$false] %s18613_s27 }
 0x248   : > { %v19971_v29 = vand.u32 4294901760, %v4581_v52  ;;  %v2387_v9 = vadd.f32 %v19636_v20, %v2264_v58  ;;  %v2380_v48 = vadd.f32 %v19649_v41, %v2258_v17  ;;  %v22552_v20 = vld [vmem:[#allocation50_spill] sm:$0xff]  ;;  %s18615_s12 = scalar_lea.vmem %s18614_s27, 2048  ;;  %p18616_p11 = scmp.lt.s32.totalorder %s22337_s11, %s18614_s27 }
 0x249   : > { %17174 = vmatpush3.xpose.msra.mxu0 %v19908_v34  ;;  %17167 = vmatpush3.xpose.msra.mxu1 %v19772_v2  ;;  %v4584_v2 = vsel %vm2815_vm1, %v3031_v53, 0  ;;  %v19978_v7 = vsub.f32 %v4578_v6, %v19962_v55  ;;  %v22553_v41 = vld [vmem:[#allocation46_spill] sm:$0xff]  ;;  %p18617_p0 = scmp.lt.s32.totalorder %s18615_s12, %s18609_s26 }
 0x24a   : > { %17185 = vmatprep.subr.mxu0 %v4189_v50  ;;  %17178 = vmatprep.subr.mxu1 %v4192_v57  ;;  %v4710_v1 = vsub.f32 %v4581_v52, %v19971_v29  ;;  %v2514_v13 = vadd.f32 %v22552_v20, %v2387_v9  ;;  %v2506_v11 = vadd.f32 %v22553_v41, %v2380_v48  ;;  %v5098_v9 = vld [vmem:[%s22393_s8] sm:$0xff] }
 0x24b   : > { %p18618_p1 = por %p18617_p0, %p18616_p11 }
 0x24c   : > { %17176 = vmatmul.mubr.f32.vlgmr.msra.gmra.mxu0 %v4153_v16  ;;  %17169 = vmatmul.mubr.f32.vlgmr.msra.gmra.mxu1 %v19763_v25  ;;  %v19956_v25 = vand.u32 4294901760, %v4584_v2 }
 0x24d   : > { %17186 = vmatpush3.xpose.msra.mxu0 %v4189_v50  ;;  %17179 = vmatpush3.xpose.msra.mxu1 %v4192_v57  ;;  %v4711_v50 = vand.u32 4294901760, %v4710_v1  ;;  %p18619_p3 = pnand %p18618_p1, %p18612_p8 }
 0x24e   : > { %17182 = vmatprep.mubr.f32.mxu1 %v19874_v38  ;;  %17189 = vmatprep.mubr.f32.mxu0 %v19893_v36  ;;  %v4703_v54 = vsub.f32 %v4584_v2, %v19956_v25  ;;  %v4665_v36 = vand.u32 4294901760, %v19978_v7 }
 0x24f   : > { %17180 = vmatprep.subr.mxu1 %v4199_v62  ;;  %17187 = vmatprep.subr.mxu0 %v4196_v51 }
 0x250   : > { %v4704_v10 = vand.u32 4294901760, %v4703_v54  ;;  %v4666_v14 = vsub.f32 %v19978_v7, %v4665_v36 }
 0x251   : > { %17188 = vmatpush3.xpose.msra.mxu0 %v4196_v51  ;;  %17181 = vmatpush3.xpose.msra.mxu1 %v4199_v62  ;;  %v4712_v51 = vsub.f32 %v4710_v1, %v4711_v50 }
 0x252   : > { %17199 = vmatprep.subr.mxu0 %v4190_v19  ;;  %17192 = vmatprep.subr.mxu1 %v19890_v61 }
 0x254   : > { %17190 = vmatmul.mubr.f32.vlgmr.msra.gmra.mxu0 %v19915_v39  ;;  %17183 = vmatmul.mubr.f32.vlgmr.msra.gmra.mxu1 %v19897_v60 }
 0x255   : > { %17200 = vmatpush3.xpose.msra.mxu0 %v4190_v19  ;;  %17193 = vmatpush3.xpose.msra.mxu1 %v19890_v61  ;;  %v2651_v19 = vadd.f32 %v19759_v31, %v2514_v13  ;;  %v4713_v31 = vand.u32 4294901760, %v4712_v51 }
 0x256   : > { %17196 = vmatprep.mubr.f32.mxu1 %v4141_v4  ;;  %17203 = vmatprep.mubr.f32.mxu0 %v19874_v38  ;;  %v4705_v4 = vsub.f32 %v4703_v54, %v4704_v10 }
 0x257   : > { %17194 = vmatprep.subr.mxu1 %v19908_v34  ;;  %17201 = vmatprep.subr.mxu0 %v4197_v18 }
 0x258   : > { %v4706_v39 = vand.u32 4294901760, %v4705_v4 }
 0x259   : > { %17202 = vmatpush3.xpose.msra.mxu0 %v4197_v18  ;;  %17195 = vmatpush3.xpose.msra.mxu1 %v19908_v34 }
 0x25a   : > { %17213 = vmatprep.subr.mxu0 %v19956_v25  ;;  %17206 = vmatprep.subr.mxu1 %v19890_v61 }
 0x25c   : > { %17204 = vmatmul.mubr.f32.vlgmr.msra.gmra.mxu0 %v19897_v60  ;;  %17197 = vmatmul.mubr.f32.vlgmr.msra.gmra.mxu1 %v4151_v12  ;;  %v2768_v12 = vadd.f32 %v19767_v33, %v2651_v19 }
 0x25d   : > { %17214 = vmatpush3.xpose.msra.mxu0 %v19956_v25  ;;  %17207 = vmatpush3.xpose.msra.mxu1 %v19890_v61  ;;  %v4667_v61 = vand.u32 4294901760, %v4666_v14 }
 0x25e   : > { %17210 = vmatprep.mubr.f32.mxu1 %v19874_v38  ;;  %17217 = vmatprep.mubr.f32.mxu0 %v4657_v37  ;;  %v2645_v38 = vadd.f32 %v19777_v44, %v2506_v11  ;;  %v20012_v59 = vand.u32 4294901760, %v2768_v12 }
 0x25f   : > { %17208 = vmatprep.subr.mxu1 %v19908_v34  ;;  %17215 = vmatprep.subr.mxu0 %v19971_v29 }
 0x260   : > { %v20017_v33 = vsub.f32 %v2768_v12, %v20012_v59 }
 0x261   : > { %17216 = vmatpush3.xpose.msra.mxu0 %v19971_v29  ;;  %17209 = vmatpush3.xpose.msra.mxu1 %v19908_v34  ;;  %v2762_v34 = vadd.f32 %v19794_v56, %v2645_v38 }
 0x262   : > { %17227 = vmatprep.subr.mxu0 %v4703_v54  ;;  %17220 = vmatprep.subr.mxu1 %v4706_v39 }
 0x263   : > { %v20019_v44 = vand.u32 4294901760, %v2762_v34 }
 0x264   : > { %17218 = vmatmul.mubr.f32.vlgmr.msra.gmra.mxu0 %v4667_v61  ;;  %17211 = vmatmul.mubr.f32.vlgmr.msra.gmra.mxu1 %v19897_v60  ;;  %v20032_v60 = vand.u32 4294901760, %v20017_v33 }
 0x265   : > { %17228 = vmatpush3.xpose.msra.mxu0 %v4703_v54  ;;  %17221 = vmatpush3.xpose.msra.mxu1 %v4706_v39  ;;  %v20029_v56 = vsub.f32 %v2762_v34, %v20019_v44  ;;  %v5099_v54 = vld [vmem:[%s22393_s8 + $0x8] sm:$0xff] }
 0x266   : > { %17224 = vmatprep.mubr.f32.mxu1 %v19947_v35  ;;  %17231 = vmatprep.mubr.f32.mxu0 %v19959_v30  ;;  %v5327_v5 = vsub.f32 %v20017_v33, %v20032_v60 }
 0x267   : > { %17222 = vmatprep.subr.mxu1 %v4713_v31  ;;  %17229 = vmatprep.subr.mxu0 %v4710_v1  ;;  %v20040_v49 = vand.u32 4294901760, %v20029_v56 }
 0x268   : > { %v5328_v21 = vand.u32 4294901760, %v5327_v5 }
 0x269   : > { %17230 = vmatpush3.xpose.msra.mxu0 %v4710_v1  ;;  %17223 = vmatpush3.xpose.msra.mxu1 %v4713_v31  ;;  %v5334_v18 = vsub.f32 %v20029_v56, %v20040_v49 }
 0x26a   : > { %17241 = vmatprep.subr.mxu0 %v4704_v10  ;;  %17234 = vmatprep.subr.mxu1 %v19956_v25 }
 0x26b   : > { %v5335_v26 = vand.u32 4294901760, %v5334_v18 }
 0x26c   : > { %17232 = vmatmul.mubr.f32.vlgmr.msra.gmra.mxu0 %v19978_v7  ;;  %17225 = vmatmul.mubr.f32.vlgmr.msra.gmra.mxu1 %v19962_v55 }
 0x26d   : > { %17242 = vmatpush3.xpose.msra.mxu0 %v4704_v10  ;;  %17235 = vmatpush3.xpose.msra.mxu1 %v19956_v25 }
 0x26e   : > { %17238 = vmatprep.mubr.f32.mxu1 %v4655_v43  ;;  %17245 = vmatprep.mubr.f32.mxu0 %v19947_v35 }
 0x26f   : > { %17236 = vmatprep.subr.mxu1 %v19971_v29  ;;  %17243 = vmatprep.subr.mxu0 %v4711_v50 }
 0x271   : > { %17244 = vmatpush3.xpose.msra.mxu0 %v4711_v50  ;;  %17237 = vmatpush3.xpose.msra.mxu1 %v19971_v29 }
 0x272   : > { %17255 = vmatprep.subr.mxu0 %v20012_v59  ;;  %17248 = vmatprep.subr.mxu1 %v19956_v25 }
 0x274   : > { %17246 = vmatmul.mubr.f32.vlgmr.msra.gmra.mxu0 %v19962_v55  ;;  %17239 = vmatmul.mubr.f32.vlgmr.msra.gmra.mxu1 %v4665_v36 }
 0x275   : > { %17256 = vmatpush3.msra.mxu0 %v20012_v59  ;;  %17249 = vmatpush3.xpose.msra.mxu1 %v19956_v25 }
 0x276   : > { %17252 = vmatprep.mubr.f32.mxu1 %v19947_v35  ;;  %17250 = vmatprep.subr.mxu1 %v19971_v29 }
 0x277   : > { %17257 = vmatprep.subr.mxu0 %v20019_v44 }
 0x278   : > { %17258 = vmatpush3.msra.mxu0 %v20019_v44 }
 0x279   : > { %17269 = vmatprep.subr.mxu0 %v20017_v33  ;;  %17251 = vmatpush3.xpose.msra.mxu1 %v19971_v29 }
 0x27a   : > { %17262 = vmatprep.subr.mxu1 %v5328_v21 }
 0x27c   : > { %17253 = vmatmul.mubr.f32.vlgmr.msra.gmra.mxu1 %v19962_v55 }
 0x27d   : > { %17263 = vmatpush3.msra.mxu1 %v5328_v21 }
 0x27e   : > { %17264 = vmatprep.subr.mxu1 %v5335_v26 }
 0x27f   : > { %17265 = vmatpush3.msra.mxu1 %v5335_v26 }
 0x280   : > { %17276 = vmatprep.subr.mxu1 %v20012_v59 }
 0x2dc   : > { %v17093_v23 = vpop.f32.mrf.mxu0 }
 0x2de   : > { %v3117_v24 = vpop.f32.mrf.mxu0 }
 0x2e4   : > { %v17100_v57 = vpop.f32.mrf.mxu1  ;;  %v17107_v47 = vpop.f32.mrf.mxu0 }
 0x2e5   : > { %v3215_v53 = vadd.f32 %v17100_v57, %v17093_v23  ;;  %v5101_v57 = vld [vmem:[%s22393_s8 + $0x18] sm:$0xff] }
 0x2e6   : > { %v3208_v16 = vpop.f32.mrf.mxu1  ;;  %v3290_v35 = vpop.f32.mrf.mxu0 }
 0x2e7   : > { %v3209_v28 = vadd.f32 %v3208_v16, %v3117_v24  ;;  %v3298_v62 = vadd.f32 %v17107_v47, %v3215_v53  ;;  %v5100_v53 = vld [vmem:[%s22393_s8 + $0x10] sm:$0xff] }
 0x2e9   : > { %v3291_v15 = vadd.f32 %v3290_v35, %v3209_v28 }
 0x2ec   : > { %v17114_v0 = vpop.f32.mrf.mxu1  ;;  %v17121_v45 = vpop.f32.mrf.mxu0 }
 0x2ed   : > { %v3381_v6 = vadd.f32 %v17114_v0, %v3298_v62 }
 0x2ee   : > { %v3372_v2 = vpop.f32.mrf.mxu1  ;;  %v3457_v52 = vpop.f32.mrf.mxu0 }
 0x2ef   : > { %v3373_v25 = vadd.f32 %v3372_v2, %v3291_v15  ;;  %v3464_v30 = vadd.f32 %v17121_v45, %v3381_v6 }
 0x2f1   : > { %v3458_v58 = vadd.f32 %v3457_v52, %v3373_v25 }
 0x2f4   : > { %v17128_v55 = vpop.f32.mrf.mxu1  ;;  %v17135_v48 = vpop.f32.mrf.mxu0 }
 0x2f5   : > { %v3543_v43 = vadd.f32 %v17128_v55, %v3464_v30 }
 0x2f6   : > { %v3536_v29 = vpop.f32.mrf.mxu1  ;;  %v3631_v37 = vpop.f32.mrf.mxu0 }
 0x2f7   : > { %v5091_v7 = vmul.f32 %v20059_v46, %v3543_v43  ;;  %v3537_v17 = vadd.f32 %v3536_v29, %v3458_v58 }
 0x2f9   : > { %v5090_v42 = vmul.f32 %v20059_v46, %v3537_v17  ;;  %v20069_v10 = vadd.f32 %v5099_v54, %v5091_v7 }
 0x2fb   : > { %v5117_v1 = vsel %vm2815_vm1, %v20069_v10, -inf  ;;  %v20073_v36 = vadd.f32 %v5098_v9, %v5090_v42 }
 0x2fc   : > { %5118 = vmax.xlane.f32.xlu1 %v5117_v1  ;;  %v17142_v20 = vpop.f32.mrf.mxu1  ;;  %v17149_v14 = vpop.f32.mrf.mxu0 }
 0x2fd   : > { %v5114_v13 = vsel %vm2815_vm1, %v20073_v36, -inf  ;;  %v3729_v50 = vadd.f32 %v17142_v20, %v17135_v48 }
 0x2fe   : > { %5115 = vmax.xlane.f32.xlu0 %v5114_v13  ;;  %v3722_v4 = vpop.f32.mrf.mxu1  ;;  %v3804_v39 = vpop.f32.mrf.mxu0 }
 0x2ff   : > { %v3723_v41 = vadd.f32 %v3722_v4, %v3631_v37  ;;  %v3812_v19 = vadd.f32 %v17149_v14, %v3729_v50  ;;  %v5103_v4 = vld [vmem:[%s22393_s8 + $0x28] sm:$0xff] }
 0x301   : > { %v3805_v61 = vadd.f32 %v3804_v39, %v3723_v41  ;;  %v5102_v41 = vld [vmem:[%s22393_s8 + $0x20] sm:$0xff] }
 0x304   : > { %v17156_v11 = vpop.f32.mrf.mxu1  ;;  %v17163_v12 = vpop.f32.mrf.mxu0 }
 0x305   : > { %v3895_v38 = vadd.f32 %v17156_v11, %v3812_v19 }
 0x306   : > { %v3886_v51 = vpop.f32.mrf.mxu1  ;;  %v3971_v5 = vpop.f32.mrf.mxu0 }
 0x307   : > { %v3887_v31 = vadd.f32 %v3886_v51, %v3805_v61  ;;  %v3978_v34 = vadd.f32 %v17163_v12, %v3895_v38 }
 0x309   : > { %v3972_v18 = vadd.f32 %v3971_v5, %v3887_v31 }
 0x30c   : > { %v17170_v21 = vpop.f32.mrf.mxu1  ;;  %v17177_v35 = vpop.f32.mrf.mxu0 }
 0x30d   : > { %v4057_v26 = vadd.f32 %v17170_v21, %v3978_v34 }
 0x30e   : > { %v4050_v23 = vpop.f32.mrf.mxu1  ;;  %v4145_v6 = vpop.f32.mrf.mxu0 }
 0x30f   : > { %v5093_v24 = vmul.f32 %v20059_v46, %v4057_v26  ;;  %v4051_v16 = vadd.f32 %v4050_v23, %v3972_v18 }
 0x311   : > { %v5092_v47 = vmul.f32 %v20059_v46, %v4051_v16  ;;  %v20085_v28 = vadd.f32 %v5101_v57, %v5093_v24 }
 0x313   : > { %v5123_v0 = vsel %vm2815_vm1, %v20085_v28, -inf  ;;  %v20089_v62 = vadd.f32 %v5100_v53, %v5092_v47 }
 0x314   : > { %5124 = vmax.xlane.f32.xlu1 %v5123_v0  ;;  %v17184_v2 = vpop.f32.mrf.mxu1  ;;  %v17191_v30 = vpop.f32.mrf.mxu0 }
 0x315   : > { %v5120_v15 = vsel %vm2815_vm1, %v20089_v62, -inf  ;;  %v4243_v25 = vadd.f32 %v17184_v2, %v17177_v35 }
 0x316   : > { %5121 = vmax.xlane.f32.xlu0 %v5120_v15  ;;  %v4236_v45 = vpop.f32.mrf.mxu1  ;;  %v4318_v43 = vpop.f32.mrf.mxu0 }
 0x317   : > { %v4237_v52 = vadd.f32 %v4236_v45, %v4145_v6  ;;  %v4326_v58 = vadd.f32 %v17191_v30, %v4243_v25  ;;  %v5105_v30 = vld [vmem:[%s22393_s8 + $0x38] sm:$0xff] }
 0x319   : > { %v4319_v54 = vadd.f32 %v4318_v43, %v4237_v52 }
 0x31c   : > { %v17198_v55 = vpop.f32.mrf.mxu1  ;;  %v17205_v17 = vpop.f32.mrf.mxu0 }
 0x31d   : > { %v4409_v7 = vadd.f32 %v17198_v55, %v4326_v58  ;;  %v5104_v58 = vld [vmem:[%s22393_s8 + $0x30] sm:$0xff] }
 0x31e   : > { %v4400_v29 = vpop.f32.mrf.mxu1  ;;  %v4485_v1 = vpop.f32.mrf.mxu0 }
 0x31f   : > { %v4401_v9 = vadd.f32 %v4400_v29, %v4319_v54  ;;  %v4492_v42 = vadd.f32 %v17205_v17, %v4409_v7 }
 0x321   : > { %v4486_v20 = vadd.f32 %v4485_v1, %v4401_v9 }
 0x324   : > { %v17212_v48 = vpop.f32.mrf.mxu1  ;;  %v17219_v61 = vpop.f32.mrf.mxu0 }
 0x325   : > { %v4571_v13 = vadd.f32 %v17212_v48, %v4492_v42 }
 0x326   : > { %v4564_v37 = vpop.f32.mrf.mxu1  ;;  %v4659_v31 = vpop.f32.mrf.mxu0 }
 0x327   : > { %v5095_v50 = vmul.f32 %v20059_v46, %v4571_v13  ;;  %v4565_v14 = vadd.f32 %v4564_v37, %v4486_v20 }
 0x329   : > { %v5094_v11 = vmul.f32 %v20059_v46, %v4565_v14  ;;  %v20101_v19 = vadd.f32 %v5103_v4, %v5095_v50 }
 0x32b   : > { %v5129_v39 = vsel %vm2815_vm1, %v20101_v19, -inf  ;;  %v20105_v51 = vadd.f32 %v5102_v41, %v5094_v11 }
 0x32c   : > { %5130 = vmax.xlane.f32.xlu1 %v5129_v39  ;;  %v17226_v38 = vpop.f32.mrf.mxu1  ;;  %v17233_v21 = vpop.f32.mrf.mxu0 }
 0x32d   : > { %v5126_v12 = vsel %vm2815_vm1, %v20105_v51, -inf  ;;  %v4757_v5 = vadd.f32 %v17226_v38, %v17219_v61 }
 0x32e   : > { %5127 = vmax.xlane.f32.xlu0 %v5126_v12  ;;  %v4750_v34 = vpop.f32.mrf.mxu1  ;;  %v4832_v57 = vpop.f32.mrf.mxu0 }
 0x32f   : > { %v4751_v18 = vadd.f32 %v4750_v34, %v4659_v31  ;;  %v4840_v23 = vadd.f32 %v17233_v21, %v4757_v5 }
 0x331   : > { %v4833_v16 = vadd.f32 %v4832_v57, %v4751_v18 }
 0x334   : > { %v17240_v26 = vpop.f32.mrf.mxu1  ;;  %v17247_v47 = vpop.f32.mrf.mxu0 }
 0x335   : > { %v4923_v53 = vadd.f32 %v17240_v26, %v4840_v23 }
 0x336   : > { %v4914_v24 = vpop.f32.mrf.mxu1  ;;  %v4999_v2 = vpop.f32.mrf.mxu0 }
 0x337   : > { %v4915_v0 = vadd.f32 %v4914_v24, %v4833_v16  ;;  %v5006_v35 = vadd.f32 %v17247_v47, %v4923_v53 }
 0x339   : > { %v5000_v6 = vadd.f32 %v4999_v2, %v4915_v0 }
 0x33c   : > { %v17254_v15 = vpop.f32.mrf.mxu1 }
 0x33d   : > { %v5085_v45 = vadd.f32 %v17254_v15, %v5006_v35 }
 0x33e   : > { %v5078_v25 = vpop.f32.mrf.mxu1 }
 0x33f   : > { %v5097_v52 = vmul.f32 %v20059_v46, %v5085_v45  ;;  %v5079_v55 = vadd.f32 %v5078_v25, %v5000_v6  ;;  %v20157_v45 = vld [vmem:[%s22390_s5] ss:$0 sm:$0xff] }
 0x340   : > { %v22554_v25 = vld [vmem:[#allocation47_spill] sm:$0xff] }
 0x341   : > { %v5096_v43 = vmul.f32 %v20059_v46, %v5079_v55  ;;  %v5113_v29 = vadd.f32 %v5105_v30, %v5097_v52  ;;  %v2117_v30 = vadd.f32 %v20157_v45, %v22554_v25  ;;  %v22555_v52 = vld [vmem:[#allocation43_spill] sm:$0xff] }
 0x343   : > { %v5135_v54 = vsel %vm2815_vm1, %v5113_v29, -inf  ;;  %v5112_v7 = vadd.f32 %v5104_v58, %v5096_v43  ;;  %v2270_v55 = vadd.f32 %v22555_v52, %v2117_v30  ;;  %v22556_v58 = vld [vmem:[#allocation45_spill] sm:$0xff] }
 0x344   : > { %5136 = vmax.xlane.f32.xlu1 %v5135_v54 }
 0x345   : > { %v5132_v17 = vsel %vm2815_vm1, %v5112_v7, -inf  ;;  %v2394_v43 = vadd.f32 %v22556_v58, %v2270_v55 }
 0x346   : > { %5133 = vmax.xlane.f32.xlu0 %v5132_v17 }
 0x385   : > { %v5119_v9 = vpop.xlane.xlu1 %5118 }
 0x386   : > { %v5139_v42 = vsub.f32 %v20069_v10, %v5119_v9  ;;  %v22558_v9 = vld [vmem:[#allocation57_spill] sm:$0xff] }
 0x387   : > { %v5116_v1 = vpop.xlane.xlu0 %5115 }
 0x388   : > { %v5148_v48 = vmul.f32 1.442695, %v5139_v42  ;;  %v5138_v20 = vsub.f32 %v20073_v36, %v5116_v1  ;;  %v22559_v1 = vld [vmem:[#allocation58_spill] sm:$0xff] }
 0x38a   : > { %18439 = vpow2.f32 %v5148_v48  ;;  %v5146_v13 = vmul.f32 1.442695, %v5138_v20  ;;  %v20167_v20 = vand.u32 4294901760, %v19886_v8 }
 0x38c   : > { %18441 = vpow2.f32 %v5146_v13 }
 0x397   : > { %v18440_v37 = vpop.eup %18439 }
 0x398   : > { %v5165_v46 = vsel %vm2815_vm1, %v18440_v37, 0.0 }
 0x399   : > { %v20122_v4 = vpop.eup %18441  ;;  %5166 = vadd.xlane.f32.xlu1 %v5165_v46 }
 0x39a   : > { %v5162_v50 = vsel %vm2815_vm1, %v20122_v4, 0.0 }
 0x39b   : > { %5163 = vadd.xlane.f32.xlu0 %v5162_v50 }
 0x39d   : > { %v5125_v14 = vpop.xlane.xlu1 %5124 }
 0x39e   : > { %v5141_v10 = vsub.f32 %v20085_v28, %v5125_v14  ;;  %v22560_v14 = vld [vmem:[#allocation44_spill] sm:$0xff] }
 0x39f   : > { %v5122_v41 = vpop.xlane.xlu0 %5121 }
 0x3a0   : > { %v5152_v11 = vmul.f32 1.442695, %v5141_v10  ;;  %v5140_v36 = vsub.f32 %v20089_v62, %v5122_v41  ;;  %v2137_v10 = vadd.f32 %v20157_v45, %v22560_v14 }
 0x3a2   : > { %18443 = vpow2.f32 %v5152_v11  ;;  %v5150_v39 = vmul.f32 1.442695, %v5140_v36  ;;  %v20175_v11 = vsub.f32 %v19886_v8, %v20167_v20 }
 0x3a4   : > { %18445 = vpow2.f32 %v5150_v39 }
 0x3af   : > { %v20128_v61 = vpop.eup %18443 }
 0x3b0   : > { %v5171_v38 = vsel %vm2815_vm1, %v20128_v61, 0.0 }
 0x3b1   : > { %v20132_v12 = vpop.eup %18445  ;;  %5172 = vadd.xlane.f32.xlu1 %v5171_v38 }
 0x3b2   : > { %v5168_v31 = vsel %vm2815_vm1, %v20132_v12, 0.0 }
 0x3b3   : > { %5169 = vadd.xlane.f32.xlu0 %v5168_v31 }
 0x3b5   : > { %v5131_v28 = vpop.xlane.xlu1 %5130 }
 0x3b6   : > { %v5143_v34 = vsub.f32 %v20101_v19, %v5131_v28  ;;  %v22561_v28 = vld [vmem:[#allocation49_spill] sm:$0xff] }
 0x3b7   : > { %v5128_v5 = vpop.xlane.xlu0 %5127 }
 0x3b8   : > { %v5156_v62 = vmul.f32 1.442695, %v5143_v34  ;;  %v5142_v21 = vsub.f32 %v20105_v51, %v5128_v5 }
 0x3ba   : > { %18447 = vpow2.f32 %v5156_v62  ;;  %v5154_v18 = vmul.f32 1.442695, %v5142_v21  ;;  %v20188_v21 = vand.u32 4294901760, %v20175_v11 }
 0x3bc   : > { %18449 = vpow2.f32 %v5154_v18  ;;  %v22562_v18 = vld [vmem:[#allocation53_spill] sm:$0xff] }
 0x3c7   : > { %v20138_v26 = vpop.eup %18447 }
 0x3c8   : > { %v5177_v23 = vsel %vm2815_vm1, %v20138_v26, 0.0 }
 0x3c9   : > { %v20142_v57 = vpop.eup %18449  ;;  %5178 = vadd.xlane.f32.xlu1 %v5177_v23 }
 0x3ca   : > { %v5174_v24 = vsel %vm2815_vm1, %v20142_v57, 0.0 }
 0x3cb   : > { %5175 = vadd.xlane.f32.xlu0 %v5174_v24 }
 0x3cd   : > { %v5137_v19 = vpop.xlane.xlu1 %5136 }
 0x3ce   : > { %v5145_v16 = vsub.f32 %v5113_v29, %v5137_v19 }
 0x3cf   : > { %v5134_v53 = vpop.xlane.xlu0 %5133 }
 0x3d0   : > { %v5160_v47 = vmul.f32 1.442695, %v5145_v16  ;;  %v5144_v51 = vsub.f32 %v5112_v7, %v5134_v53  ;;  %v22557_v7 = vld [vmem:[#allocation52_spill] sm:$0xff]  ;;  %v5835_v53 = vsub.f32 %v20175_v11, %v20188_v21 }
 0x3d1   : > { %v2522_v17 = vadd.f32 %v22557_v7, %v2394_v43 }
 0x3d2   : > { %18451 = vpow2.f32 %v5160_v47  ;;  %v5158_v0 = vmul.f32 1.442695, %v5144_v51  ;;  %v5836_v52 = vand.u32 4294901760, %v5835_v53 }
 0x3d3   : > { %v2657_v42 = vadd.f32 %v22558_v9, %v2522_v17 }
 0x3d4   : > { %18453 = vpow2.f32 %v5158_v0 }
 0x3d5   : > { %v2774_v48 = vadd.f32 %v22559_v1, %v2657_v42 }
 0x3d7   : > { %v20171_v41 = vand.u32 4294901760, %v2774_v48 }
 0x3d9   : > { %v20184_v34 = vsub.f32 %v2774_v48, %v20171_v41 }
 0x3db   : > { %v20194_v16 = vand.u32 4294901760, %v20184_v34 }
 0x3dd   : > { %v5842_v30 = vsub.f32 %v20184_v34, %v20194_v16 }
 0x3df   : > { %v20146_v35 = vpop.eup %18451 }
 0x3e0   : > { %v5183_v2 = vsel %vm2815_vm1, %v20146_v35, 0.0 }
 0x3e1   : > { %v20150_v15 = vpop.eup %18453  ;;  %5184 = vadd.xlane.f32.xlu1 %v5183_v2  ;;  %v22563_v2 = vld [vmem:[#allocation54_spill] sm:$0xff] }
 0x3e2   : > { %v5180_v6 = vsel %vm2815_vm1, %v20150_v15, 0.0 }
 0x3e3   : > { %5181 = vadd.xlane.f32.xlu0 %v5180_v6 }
 0x422   : > { %v5167_v29 = vpop.xlane.xlu1 %5166 }
 0x423   : > { %18455 = vrcp.f32 %v5167_v29  ;;  %v22564_v29 = vld [vmem:[#allocation51_spill] sm:$0xff] }
 0x424   : > { %v5164_v54 = vpop.xlane.xlu0 %5163 }
 0x425   : > { %18457 = vrcp.f32 %v5164_v54 }
 0x430   : > { %v18456_v13 = vpop.eup %18455 }
 0x431   : > { %v5189_v46 = vmul.f32 %v18456_v13, %v18440_v37  ;;  %v2282_v37 = vadd.f32 %v22561_v28, %v2137_v10 }
 0x432   : > { %v18458_v50 = vpop.eup %18457 }
 0x433   : > { %v5187_v36 = vmul.f32 %v18458_v50, %v20122_v4  ;;  %v5206_v39 = vsel %vm2815_vm1, %v5189_v46, 0  ;;  %v2408_v23 = vadd.f32 %v22562_v18, %v2282_v37  ;;  %v22566_v46 = vld [vmem:[#allocation55_spill] sm:$0xff]  ;;  %v22567_v37 = vld [vmem:[#allocation56_spill] sm:$0xff] }
 0x434   : > { %v20179_v38 = vand.u32 4294901760, %v5206_v39 }
 0x435   : > { %v5203_v31 = vsel %vm2815_vm1, %v5187_v36, 0  ;;  %v2538_v6 = vadd.f32 %v22563_v2, %v2408_v23 }
 0x436   : > { %v5275_v5 = vand.u32 4294901760, %v5203_v31  ;;  %v5286_v62 = vsub.f32 %v5206_v39, %v20179_v38 }
 0x437   : > { %v2669_v58 = vadd.f32 %v19868_v32, %v2538_v6  ;;  %v20216_v32 = vand.u32 4294901760, %v19899_v22 }
 0x438   : > { %17266 = vmatprep.mubr.f32.mxu1 %v5275_v5  ;;  %v5276_v8 = vsub.f32 %v5203_v31, %v5275_v5  ;;  %v5287_v4 = vand.u32 4294901760, %v5286_v62 }
 0x439   : > { %17267 = vmatmul.mubr.f32.vlgmr.msra.gmra.mxu1 %v20179_v38  ;;  %v20228_v7 = vsub.f32 %v19899_v22, %v20216_v32 }
 0x43a   : > { %17277 = vmatpush3.msra.mxu1 %v20012_v59  ;;  %v5173_v24 = vpop.xlane.xlu1 %5172  ;;  %v5277_v19 = vand.u32 4294901760, %v5276_v8  ;;  %v5288_v47 = vsub.f32 %v5286_v62, %v5287_v4 }
 0x43b   : > { %17278 = vmatprep.subr.mxu1 %v20019_v44  ;;  %18459 = vrcp.f32 %v5173_v24  ;;  %v20247_v1 = vand.u32 4294901760, %v20228_v7 }
 0x43c   : > { %17279 = vmatpush3.msra.mxu1 %v20019_v44  ;;  %v5170_v51 = vpop.xlane.xlu0 %5169  ;;  %17280 = vmatprep.mubr.f32.mxu1 %v5277_v19  ;;  %v5278_v0 = vsub.f32 %v5276_v8, %v5277_v19  ;;  %v5289_v55 = vand.u32 4294901760, %v5288_v47 }
 0x43d   : > { %18461 = vrcp.f32 %v5170_v51  ;;  %17290 = vmatprep.subr.mxu1 %v20012_v59  ;;  %17281 = vmatmul.mubr.f32.vlgmr.msra.gmra.mxu1 %v5287_v4  ;;  %v6343_v39 = vsub.f32 %v20228_v7, %v20247_v1 }
 0x43e   : > { %17291 = vmatpush3.msra.mxu1 %v20012_v59  ;;  %17294 = vmatprep.mubr.f32.mxu1 %v5275_v5  ;;  %v5279_v25 = vand.u32 4294901760, %v5278_v0  ;;  %v5843_v59 = vand.u32 4294901760, %v5842_v30 }
 0x43f   : > { %17292 = vmatprep.subr.mxu1 %v20019_v44  ;;  %v6344_v4 = vand.u32 4294901760, %v6343_v39 }
 0x440   : > { %17293 = vmatpush3.msra.mxu1 %v20019_v44  ;;  %17259 = vmatprep.mubr.f32.mxu0 %v5279_v25  ;;  %v2786_v44 = vadd.f32 %v19881_v3, %v2669_v58  ;;  %v2157_v3 = vadd.f32 %v20157_v45, %v22564_v29  ;;  %v22565_v45 = vld [vmem:[#allocation48_spill] sm:$0xff] }
 0x441   : > { %17304 = vmatprep.subr.mxu1 %v5836_v52  ;;  %17260 = vmatmul.mubr.f32.vlgmr.msra.gmra.mxu0 %v5289_v55 }
 0x442   : > { %17270 = vmatpush3.msra.mxu0 %v20017_v33  ;;  %17295 = vmatmul.mubr.f32.vlgmr.msra.gmra.mxu1 %v20179_v38  ;;  %v20223_v54 = vand.u32 4294901760, %v2786_v44  ;;  %v2294_v9 = vadd.f32 %v22565_v45, %v2157_v3 }
 0x443   : > { %17305 = vmatpush3.msra.mxu1 %v5836_v52  ;;  %17271 = vmatprep.subr.mxu0 %v20029_v56 }
 0x444   : > { %17273 = vmatprep.mubr.f32.mxu0 %v5276_v8  ;;  %17306 = vmatprep.subr.mxu1 %v5843_v59  ;;  %v20241_v22 = vsub.f32 %v2786_v44, %v20223_v54  ;;  %v2422_v50 = vadd.f32 %v22566_v46, %v2294_v9 }
 0x445   : > { %17272 = vmatpush3.msra.mxu0 %v20029_v56  ;;  %17307 = vmatpush3.msra.mxu1 %v5843_v59 }
 0x446   : > { %17283 = vmatprep.subr.mxu0 %v20032_v60  ;;  %17318 = vmatprep.subr.mxu1 %v20167_v20  ;;  %v20253_v36 = vand.u32 4294901760, %v20241_v22 }
 0x447   : > { %17274 = vmatmul.mubr.f32.vlgmr.msra.gmra.mxu0 %v5286_v62 }
 0x448   : > { %v18460_v33 = vpop.eup %18459  ;;  %17284 = vmatpush3.msra.mxu0 %v20032_v60  ;;  %17287 = vmatprep.mubr.f32.mxu0 %v5275_v5  ;;  %v2554_v5 = vadd.f32 %v22567_v37, %v2422_v50  ;;  %v6350_v8 = vsub.f32 %v20241_v22, %v20253_v36 }
 0x449   : > { %17285 = vmatprep.subr.mxu0 %v20040_v49  ;;  %v5193_v43 = vmul.f32 %v18460_v33, %v20128_v61 }
 0x44a   : > { %v18462_v56 = vpop.eup %18461  ;;  %17286 = vmatpush3.msra.mxu0 %v20040_v49  ;;  %v2681_v23 = vadd.f32 %v20055_v27, %v2554_v5  ;;  %v20275_v27 = vand.u32 4294901760, %v19902_v63 }
 0x44b   : > { %17297 = vmatprep.subr.mxu0 %v20167_v20  ;;  %17288 = vmatmul.mubr.f32.vlgmr.msra.gmra.mxu0 %v20179_v38  ;;  %v5191_v60 = vmul.f32 %v18462_v56, %v20132_v12  ;;  %v5714_v61 = vsel %vm2815_vm1, %v5193_v43, 0 }
 0x44c   : > { %17298 = vmatpush3.msra.mxu0 %v20167_v20  ;;  %v20235_v17 = vand.u32 4294901760, %v5714_v61 }
 0x44d   : > { %17299 = vmatprep.subr.mxu0 %v20171_v41  ;;  %v5711_v49 = vsel %vm2815_vm1, %v5191_v60, 0 }
 0x44e   : > { %17300 = vmatpush3.msra.mxu0 %v20171_v41  ;;  %v5783_v42 = vand.u32 4294901760, %v5711_v49  ;;  %v5794_v12 = vsub.f32 %v5714_v61, %v20235_v17 }
 0x44f   : > { %17311 = vmatprep.subr.mxu0 %v20175_v11 }
 0x450   : > { %17308 = vmatprep.mubr.f32.mxu1 %v5783_v42  ;;  %v5784_v48 = vsub.f32 %v5711_v49, %v5783_v42  ;;  %v5795_v13 = vand.u32 4294901760, %v5794_v12 }
 0x451   : > { %17309 = vmatmul.mubr.f32.vlgmr.msra.gmra.mxu1 %v20235_v17 }
 0x452   : > { %17319 = vmatpush3.msra.mxu1 %v20167_v20  ;;  %v5179_v14 = vpop.xlane.xlu1 %5178  ;;  %v5785_v10 = vand.u32 4294901760, %v5784_v48  ;;  %v5796_v38 = vsub.f32 %v5794_v12, %v5795_v13 }
 0x453   : > { %17320 = vmatprep.subr.mxu1 %v20171_v41  ;;  %18463 = vrcp.f32 %v5179_v14 }
 0x454   : > { %17321 = vmatpush3.msra.mxu1 %v20171_v41  ;;  %v5176_v31 = vpop.xlane.xlu0 %5175  ;;  %17322 = vmatprep.mubr.f32.mxu1 %v5785_v10  ;;  %v5786_v28 = vsub.f32 %v5784_v48, %v5785_v10  ;;  %v5797_v18 = vand.u32 4294901760, %v5796_v38 }
 0x455   : > { %18465 = vrcp.f32 %v5176_v31  ;;  %17332 = vmatprep.subr.mxu1 %v20167_v20  ;;  %17323 = vmatmul.mubr.f32.vlgmr.msra.gmra.mxu1 %v5795_v13 }
 0x456   : > { %17333 = vmatpush3.msra.mxu1 %v20167_v20  ;;  %17336 = vmatprep.mubr.f32.mxu1 %v5783_v42  ;;  %v5787_v62 = vand.u32 4294901760, %v5786_v28  ;;  %v6351_v20 = vand.u32 4294901760, %v6350_v8 }
 0x457   : > { %17334 = vmatprep.subr.mxu1 %v20171_v41 }
 0x458   : > { %17335 = vmatpush3.msra.mxu1 %v20171_v41  ;;  %17301 = vmatprep.mubr.f32.mxu0 %v5787_v62  ;;  %v2798_v41 = vadd.f32 %v20057_v40, %v2681_v23  ;;  %v20285_v40 = vsub.f32 %v19902_v63, %v20275_v27 }
 0x459   : > { %17346 = vmatprep.subr.mxu1 %v6344_v4  ;;  %17302 = vmatmul.mubr.f32.vlgmr.msra.gmra.mxu0 %v5797_v18 }
 0x45a   : > { %17312 = vmatpush3.msra.mxu0 %v20175_v11  ;;  %17337 = vmatmul.mubr.f32.vlgmr.msra.gmra.mxu1 %v20235_v17  ;;  %v20280_v19 = vand.u32 4294901760, %v2798_v41 }
 0x45b   : > { %17347 = vmatpush3.msra.mxu1 %v6344_v4  ;;  %17313 = vmatprep.subr.mxu0 %v20184_v34 }
 0x45c   : > { %17315 = vmatprep.mubr.f32.mxu0 %v5784_v48  ;;  %17348 = vmatprep.subr.mxu1 %v6351_v20 }
 0x45d   : > { %17314 = vmatpush3.msra.mxu0 %v20184_v34  ;;  %17349 = vmatpush3.msra.mxu1 %v6351_v20 }
 0x45e   : > { %17325 = vmatprep.subr.mxu0 %v20188_v21  ;;  %17360 = vmatprep.subr.mxu1 %v20216_v32 }
 0x45f   : > { %17316 = vmatmul.mubr.f32.vlgmr.msra.gmra.mxu0 %v5794_v12 }
 0x460   : > { %v18464_v11 = vpop.eup %18463  ;;  %17326 = vmatpush3.msra.mxu0 %v20188_v21  ;;  %17329 = vmatprep.mubr.f32.mxu0 %v5783_v42 }
 0x461   : > { %17327 = vmatprep.subr.mxu0 %v20194_v16  ;;  %v5197_v24 = vmul.f32 %v18464_v11, %v20138_v26 }
 0x462   : > { %v18466_v34 = vpop.eup %18465  ;;  %17328 = vmatpush3.msra.mxu0 %v20194_v16  ;;  %v20295_v16 = vsub.f32 %v2798_v41, %v20280_v19 }
 0x463   : > { %17339 = vmatprep.subr.mxu0 %v20216_v32  ;;  %17330 = vmatmul.mubr.f32.vlgmr.msra.gmra.mxu0 %v20235_v17  ;;  %v5195_v21 = vmul.f32 %v18466_v34, %v20142_v57  ;;  %v6222_v53 = vsel %vm2815_vm1, %v5197_v24, 0  ;;  %v20300_v57 = vand.u32 4294901760, %v20285_v40 }
 0x464   : > { %17340 = vmatpush3.msra.mxu0 %v20216_v32  ;;  %v6301_v26 = vand.u32 4294901760, %v6222_v53  ;;  %v20304_v30 = vand.u32 4294901760, %v20295_v16 }
 0x465   : > { %17341 = vmatprep.subr.mxu0 %v20223_v54  ;;  %v6219_v47 = vsel %vm2815_vm1, %v5195_v21, 0  ;;  %v6851_v52 = vsub.f32 %v20285_v40, %v20300_v57  ;;  %v22570_v21 = vld [vmem:[#allocation12_spill] sm:$0xff] }
 0x466   : > { %17342 = vmatpush3.msra.mxu0 %v20223_v54  ;;  %v6291_v63 = vand.u32 4294901760, %v6219_v47  ;;  %v6302_v51 = vsub.f32 %v6222_v53, %v6301_v26  ;;  %v6858_v33 = vsub.f32 %v20295_v16, %v20304_v30  ;;  %v22571_v53 = vld [vmem:[#allocation34_spill] sm:$0xff] }
 0x467   : > { %17353 = vmatprep.subr.mxu0 %v20228_v7  ;;  %v6852_v43 = vand.u32 4294901760, %v6851_v52  ;;  %v15768_v52 = vld [vmem:[%s22387_s2 + $0x38] sm:$0xff] }
 0x468   : > { %17350 = vmatprep.mubr.f32.mxu1 %v6291_v63  ;;  %v6292_v0 = vsub.f32 %v6219_v47, %v6291_v63  ;;  %v6303_v2 = vand.u32 4294901760, %v6302_v51  ;;  %v6859_v29 = vand.u32 4294901760, %v6858_v33  ;;  %v22573_v47 = vld [vmem:[#allocation35_spill] sm:$0xff]  ;;  %v15767_v33 = vld [vmem:[%s22387_s2 + $0x30] sm:$0xff] }
 0x469   : > { %17351 = vmatmul.mubr.f32.vlgmr.msra.gmra.mxu1 %v6301_v26 }
 0x46a   : > { %17361 = vmatpush3.msra.mxu1 %v20216_v32  ;;  %v5185_v6 = vpop.xlane.xlu1 %5184  ;;  %v6293_v25 = vand.u32 4294901760, %v6292_v0  ;;  %v6304_v55 = vsub.f32 %v6302_v51, %v6303_v2 }
 0x46b   : > { %17362 = vmatprep.subr.mxu1 %v20223_v54  ;;  %18467 = vrcp.f32 %v5185_v6  ;;  %v22580_v6 = vld [vmem:[#allocation27_spill] sm:$0xff] }
 0x46c   : > { %17363 = vmatpush3.msra.mxu1 %v20223_v54  ;;  %v5182_v58 = vpop.xlane.xlu0 %5181  ;;  %17364 = vmatprep.mubr.f32.mxu1 %v6293_v25  ;;  %v6294_v59 = vsub.f32 %v6292_v0, %v6293_v25  ;;  %v6305_v56 = vand.u32 4294901760, %v6304_v55  ;;  %v22581_v25 = vld [vmem:[#allocation41_spill] sm:$0xff]  ;;  %v22583_v55 = vld [vmem:[#allocation42_spill] sm:$0xff] }
 0x46d   : > { %18469 = vrcp.f32 %v5182_v58  ;;  %17374 = vmatprep.subr.mxu1 %v20216_v32  ;;  %17365 = vmatmul.mubr.f32.vlgmr.msra.gmra.mxu1 %v6303_v2  ;;  %v22579_v2 = vld [vmem:[#allocation40_spill] sm:$0xff]  ;;  %v22584_v58 = vld [vmem:[#allocation14_spill] sm:$0xff] }
 0x46e   : > { %17375 = vmatpush3.msra.mxu1 %v20216_v32  ;;  %17378 = vmatprep.mubr.f32.mxu1 %v6291_v63  ;;  %v6295_v44 = vand.u32 4294901760, %v6294_v59  ;;  %v15762_v32 = vld [vmem:[%s22386_s1 + $0x38] sm:$0xff]  ;;  %v20443_v59 = vand.u32 4294901760, %v15768_v52 }
 0x46f   : > { %17376 = vmatprep.subr.mxu1 %v20223_v54  ;;  %v20324_v3 = vand.u32 4294901760, %v15762_v32 }
 0x470   : > { %17377 = vmatpush3.msra.mxu1 %v20223_v54  ;;  %17343 = vmatprep.mubr.f32.mxu0 %v6295_v44  ;;  %v22585_v44 = vld [vmem:[#allocation20_spill] sm:$0xff] }
 0x471   : > { %17388 = vmatprep.subr.mxu1 %v6852_v43  ;;  %17344 = vmatmul.mubr.f32.vlgmr.msra.gmra.mxu0 %v6305_v56  ;;  %v20337_v45 = vsub.f32 %v15762_v32, %v20324_v3  ;;  %v22587_v56 = vld [vmem:[#allocation22_spill] sm:$0xff]  ;;  %v22589_v32 = vld [vmem:[#allocation23_spill] sm:$0xff] }
 0x472   : > { %17354 = vmatpush3.msra.mxu0 %v20228_v7  ;;  %17379 = vmatmul.mubr.f32.vlgmr.msra.gmra.mxu1 %v6301_v26  ;;  %v15761_v7 = vld [vmem:[%s22386_s1 + $0x30] sm:$0xff] }
 0x473   : > { %17389 = vmatpush3.msra.mxu1 %v6852_v43  ;;  %17355 = vmatprep.subr.mxu0 %v20241_v22  ;;  %v20339_v9 = vand.u32 4294901760, %v15761_v7  ;;  %v20355_v13 = vand.u32 4294901760, %v20337_v45  ;;  %v22586_v43 = vld [vmem:[#allocation16_spill] sm:$0xff] }
 0x474   : > { %17357 = vmatprep.mubr.f32.mxu0 %v6292_v0  ;;  %17390 = vmatprep.subr.mxu1 %v6859_v29  ;;  %v22578_v0 = vld [vmem:[#allocation19_spill] sm:$0xff] }
 0x475   : > { %17356 = vmatpush3.msra.mxu0 %v20241_v22  ;;  %17391 = vmatpush3.msra.mxu1 %v6859_v29  ;;  %v20358_v46 = vsub.f32 %v15761_v7, %v20339_v9  ;;  %v7426_v31 = vsub.f32 %v20337_v45, %v20355_v13  ;;  %v22588_v29 = vld [vmem:[#allocation17_spill] sm:$0xff]  ;;  %v20459_v7 = vand.u32 4294901760, %v15767_v33 }
 0x476   : > { %17367 = vmatprep.subr.mxu0 %v20247_v1  ;;  %17402 = vmatprep.subr.mxu1 %v20275_v27 }
 0x477   : > { %17358 = vmatmul.mubr.f32.vlgmr.msra.gmra.mxu0 %v6302_v51  ;;  %v20370_v28 = vand.u32 4294901760, %v20358_v46  ;;  %v7427_v18 = vand.u32 4294901760, %v7426_v31  ;;  %v22576_v51 = vld [vmem:[#allocation18_spill] sm:$0xff] }
 0x478   : > { %v18468_v54 = vpop.eup %18467  ;;  %17368 = vmatpush3.msra.mxu0 %v20247_v1  ;;  %17371 = vmatprep.mubr.f32.mxu0 %v6291_v63  ;;  %v22575_v63 = vld [vmem:[#allocation37_spill] sm:$0xff] }
 0x479   : > { %v5201_v60 = vmul.f32 %v18468_v54, %v20146_v35  ;;  %17369 = vmatprep.subr.mxu0 %v20253_v36  ;;  %v15760_v35 = vld [vmem:[%s22386_s1 + $0x28] sm:$0xff]  ;;  %v7433_v23 = vsub.f32 %v20358_v46, %v20370_v28  ;;  %v20457_v54 = vsub.f32 %v15768_v52, %v20443_v59 }
 0x47a   : > { %v18470_v61 = vpop.eup %18469  ;;  %17370 = vmatpush3.msra.mxu0 %v20253_v36  ;;  %v20351_v48 = vand.u32 4294901760, %v15760_v35 }
 0x47b   : > { %17381 = vmatprep.subr.mxu0 %v20275_v27  ;;  %17372 = vmatmul.mubr.f32.vlgmr.msra.gmra.mxu0 %v6301_v26  ;;  %v5199_v17 = vmul.f32 %v18470_v61, %v20150_v15  ;;  %v6730_v49 = vsel %vm2815_vm1, %v5201_v60, 0  ;;  %v15759_v15 = vld [vmem:[%s22386_s1 + $0x20] sm:$0xff]  ;;  %v22572_v26 = vld [vmem:[#allocation13_spill] sm:$0xff]  ;;  %v15766_v60 = vld [vmem:[%s22387_s2 + $0x28] sm:$0xff] }
 0x47c   : > { %17382 = vmatpush3.msra.mxu0 %v20275_v27  ;;  %v6809_v22 = vand.u32 4294901760, %v6730_v49  ;;  %v20360_v10 = vand.u32 4294901760, %v15759_v15  ;;  %v20364_v39 = vsub.f32 %v15760_v35, %v20351_v48  ;;  %v22590_v61 = vld [vmem:[#allocation21_spill] sm:$0xff]  ;;  %v20476_v35 = vsub.f32 %v15767_v33, %v20459_v7 }
 0x47d   : > { %17383 = vmatprep.subr.mxu0 %v20280_v19  ;;  %v6727_v42 = vsel %vm2815_vm1, %v5199_v17, 0  ;;  %v22591_v17 = vld [vmem:[#allocation26_spill] sm:$0xff] }
 0x47e   : > { %17384 = vmatpush3.msra.mxu0 %v20280_v19  ;;  %v6799_v12 = vand.u32 4294901760, %v6727_v42  ;;  %v6810_v1 = vsub.f32 %v6730_v49, %v6809_v22  ;;  %v20374_v5 = vsub.f32 %v15759_v15, %v20360_v10  ;;  %v20379_v8 = vand.u32 4294901760, %v20364_v39  ;;  %v22592_v49 = vld [vmem:[#allocation24_spill] sm:$0xff]  ;;  %v22594_v15 = vld [vmem:[#allocation25_spill] sm:$0xff] }
 0x47f   : > { %17395 = vmatprep.subr.mxu0 %v20285_v40 }
 0x480   : > { %17392 = vmatprep.mubr.f32.mxu1 %v6799_v12  ;;  %v6800_v50 = vsub.f32 %v6727_v42, %v6799_v12  ;;  %v6811_v14 = vand.u32 4294901760, %v6810_v1  ;;  %v20386_v20 = vand.u32 4294901760, %v20374_v5  ;;  %v7440_v41 = vsub.f32 %v20364_v39, %v20379_v8  ;;  %v15765_v42 = vld [vmem:[%s22387_s2 + $0x20] sm:$0xff] }
 0x481   : > { %17393 = vmatmul.mubr.f32.vlgmr.msra.gmra.mxu1 %v6809_v22 }
 0x482   : > { %17403 = vmatpush3.msra.mxu1 %v20275_v27  ;;  %v6801_v36 = vand.u32 4294901760, %v6800_v50  ;;  %v6812_v38 = vsub.f32 %v6810_v1, %v6811_v14  ;;  %v7447_v11 = vsub.f32 %v20374_v5, %v20386_v20  ;;  %v7441_v24 = vand.u32 4294901760, %v7440_v41 }
 0x483   : > { %17404 = vmatprep.subr.mxu1 %v20280_v19 }
 0x484   : > { %17405 = vmatpush3.msra.mxu1 %v20280_v19  ;;  %17406 = vmatprep.mubr.f32.mxu1 %v6801_v36  ;;  %v6802_v37 = vsub.f32 %v6800_v50, %v6801_v36  ;;  %v6813_v4 = vand.u32 4294901760, %v6812_v38  ;;  %v7448_v34 = vand.u32 4294901760, %v7447_v11  ;;  %v22598_v36 = vld [vmem:[#allocation33_spill] sm:$0xff] }
 0x485   : > { %17416 = vmatprep.subr.mxu1 %v20275_v27  ;;  %17407 = vmatmul.mubr.f32.vlgmr.msra.gmra.mxu1 %v6811_v14 }
 0x486   : > { %17417 = vmatpush3.msra.mxu1 %v20275_v27  ;;  %17420 = vmatprep.mubr.f32.mxu1 %v6799_v12  ;;  %v6803_v62 = vand.u32 4294901760, %v6802_v37  ;;  %v7434_v27 = vand.u32 4294901760, %v7433_v23 }
 0x487   : > { %17418 = vmatprep.subr.mxu1 %v20280_v19 }
 0x488   : > { %17419 = vmatpush3.msra.mxu1 %v20280_v19  ;;  %17385 = vmatprep.mubr.f32.mxu0 %v6803_v62  ;;  %v22568_v19 = vld [vmem:[#allocation31_spill] sm:$0xff] }
 0x489   : > { %17386 = vmatmul.mubr.f32.vlgmr.msra.gmra.mxu0 %v6813_v4  ;;  %17421 = vmatmul.mubr.f32.vlgmr.msra.gmra.mxu1 %v6809_v22 }
 0x48a   : > { %17396 = vmatpush3.msra.mxu0 %v20285_v40  ;;  %17399 = vmatprep.mubr.f32.mxu0 %v6800_v50  ;;  %v22569_v40 = vld [vmem:[#allocation11_spill] sm:$0xff] }
 0x48b   : > { %17397 = vmatprep.subr.mxu0 %v20295_v16  ;;  %17443 = vmatprep.subr.mxu1 %v7427_v18 }
 0x48c   : > { %17398 = vmatpush3.msra.mxu0 %v20295_v16  ;;  %17444 = vmatpush3.msra.mxu1 %v7427_v18  ;;  %v22574_v16 = vld [vmem:[#allocation15_spill] sm:$0xff] }
 0x48d   : > { %17409 = vmatprep.subr.mxu0 %v20300_v57  ;;  %17400 = vmatmul.mubr.f32.vlgmr.msra.gmra.mxu0 %v6810_v1  ;;  %v22596_v1 = vld [vmem:[#allocation32_spill] sm:$0xff] }
 0x48e   : > { %17410 = vmatpush3.msra.mxu0 %v20300_v57  ;;  %17413 = vmatprep.mubr.f32.mxu0 %v6799_v12  ;;  %v22577_v57 = vld [vmem:[#allocation39_spill] sm:$0xff]  ;;  %v22595_v12 = vld [vmem:[#allocation30_spill] sm:$0xff] }
 0x48f   : > { %17411 = vmatprep.subr.mxu0 %v20304_v30  ;;  %17445 = vmatprep.subr.mxu1 %v7434_v27 }
 0x490   : > { %17412 = vmatpush3.msra.mxu0 %v20304_v30  ;;  %17446 = vmatpush3.msra.mxu1 %v7434_v27  ;;  %v22582_v30 = vld [vmem:[#allocation28_spill] sm:$0xff] }
 0x491   : > { %17423 = vmatprep.subr.mxu0 %v20324_v3  ;;  %17414 = vmatmul.mubr.f32.vlgmr.msra.gmra.mxu0 %v6809_v22  ;;  %v20478_v22 = vand.u32 4294901760, %v15766_v60 }
 0x492   : > { %17424 = vmatpush3.msra.mxu0 %v20324_v3  ;;  %17447 = vmatprep.subr.mxu1 %v7441_v24 }
 0x493   : > { %17425 = vmatprep.subr.mxu0 %v20339_v9  ;;  %17448 = vmatpush3.msra.mxu1 %v7441_v24  ;;  %v20499_v14 = vsub.f32 %v15766_v60, %v20478_v22 }
 0x494   : > { %17426 = vmatpush3.msra.mxu0 %v20339_v9  ;;  %17449 = vmatprep.subr.mxu1 %v7448_v34 }
 0x495   : > { %17427 = vmatprep.subr.mxu0 %v20351_v48  ;;  %17431 = vmatprep.mubr.f32.mxu0 %v22568_v19 }
 0x496   : > { %17428 = vmatpush3.msra.mxu0 %v20351_v48  ;;  %17450 = vmatpush3.msra.mxu1 %v7448_v34 }
 0x497   : > { %17429 = vmatprep.subr.mxu0 %v20360_v10  ;;  %17451 = vmatprep.mubr.f32.mxu1 %v22569_v40 }
 0x498   : > { %17430 = vmatpush3.msra.mxu0 %v20360_v10  ;;  %17452 = vmatmul.mubr.f32.vlgmr.msra.gmra.mxu1 %v22570_v21 }
 0x499   : > { %17432 = vmatmul.mubr.f32.vlgmr.msra.gmra.mxu0 %v22571_v53  ;;  %17454 = vmatprep.mubr.f32.mxu1 %v22572_v26 }
 0x49a   : > { %17434 = vmatprep.mubr.f32.mxu0 %v22573_v47  ;;  %17463 = vmatprep.subr.mxu0 %v20337_v45 }
 0x49b   : > { %17464 = vmatpush3.msra.mxu0 %v20337_v45  ;;  %17483 = vmatprep.subr.mxu1 %v20324_v3  ;;  %v22593_v45 = vld [vmem:[#allocation29_spill] sm:$0xff] }
 0x49c   : > { %17455 = vmatmul.mubr.f32.gmra.mxu1 %v22574_v16  ;;  %17465 = vmatprep.subr.mxu0 %v20358_v46 }
 0x49d   : > { %17435 = vmatmul.mubr.f32.gmra.mxu0 %v22575_v63  ;;  %17457 = vmatprep.mubr.f32.mxu1 %v22576_v51 }
 0x49e   : > { %17437 = vmatprep.mubr.f32.mxu0 %v22577_v57  ;;  %17484 = vmatpush3.msra.mxu1 %v20324_v3 }
 0x49f   : > { %17485 = vmatprep.subr.mxu1 %v20339_v9  ;;  %17466 = vmatpush3.msra.mxu0 %v20358_v46  ;;  %v20489_v46 = vand.u32 4294901760, %v15765_v42 }
 0x4a0   : > { %17458 = vmatmul.mubr.f32.gmra.mxu1 %v22578_v0  ;;  %17467 = vmatprep.subr.mxu0 %v20364_v39 }
 0x4a1   : > { %17438 = vmatmul.mubr.f32.gmra.mxu0 %v22579_v2  ;;  %17460 = vmatprep.mubr.f32.mxu1 %v22580_v6  ;;  %v20508_v38 = vsub.f32 %v15765_v42, %v20489_v46 }
 0x4a2   : > { %17440 = vmatprep.mubr.f32.mxu0 %v22581_v25  ;;  %17486 = vmatpush3.msra.mxu1 %v20339_v9 }
 0x4a3   : > { %17487 = vmatprep.subr.mxu1 %v20351_v48  ;;  %17468 = vmatpush3.msra.mxu0 %v20364_v39  ;;  %v22599_v39 = vld [vmem:[#allocation38_spill] sm:$0xff] }
 0x4a4   : > { %17461 = vmatmul.mubr.f32.gmra.mxu1 %v22582_v30  ;;  %17469 = vmatprep.subr.mxu0 %v20374_v5 }
 0x4a5   : > { %17441 = vmatmul.mubr.f32.gmra.mxu0 %v22583_v55  ;;  %17488 = vmatpush3.msra.mxu1 %v20351_v48 }
 0x4a6   : > { %17489 = vmatprep.subr.mxu1 %v20360_v10  ;;  %17470 = vmatpush3.msra.mxu0 %v20374_v5 }
 0x4a7   : > { %17471 = vmatprep.mubr.f32.mxu0 %v22584_v58  ;;  %17490 = vmatpush3.msra.mxu1 %v20360_v10 }
 0x4a8   : > { %17491 = vmatprep.mubr.f32.mxu1 %v22585_v44  ;;  %17503 = vmatprep.subr.mxu0 %v20355_v13 }
 0x4a9   : > { %17472 = vmatmul.mubr.f32.vlgmr.msra.gmra.mxu0 %v22586_v43  ;;  %17492 = vmatmul.mubr.f32.vlgmr.msra.gmra.mxu1 %v22587_v56 }
 0x4aa   : > { %17474 = vmatprep.mubr.f32.mxu0 %v22588_v29  ;;  %17494 = vmatprep.mubr.f32.mxu1 %v22589_v32 }
 0x4ab   : > { %17504 = vmatpush3.msra.mxu0 %v20355_v13  ;;  %17523 = vmatprep.subr.mxu1 %v20324_v3  ;;  %v22597_v13 = vld [vmem:[#allocation36_spill] sm:$0xff] }
 0x4ac   : > { %17524 = vmatpush3.msra.mxu1 %v20324_v3  ;;  %17505 = vmatprep.subr.mxu0 %v20370_v28  ;;  %v20473_v3 = vand.u32 4294901760, %v20457_v54 }
 0x4ad   : > { %17475 = vmatmul.mubr.f32.gmra.mxu0 %v22590_v61  ;;  %17495 = vmatmul.mubr.f32.gmra.mxu1 %v22591_v17 }
 0x4ae   : > { %17477 = vmatprep.mubr.f32.mxu0 %v22592_v49  ;;  %17497 = vmatprep.mubr.f32.mxu1 %v22593_v45  ;;  %v8217_v50 = vsub.f32 %v20457_v54, %v20473_v3 }
 0x4af   : > { %17525 = vmatprep.subr.mxu1 %v20339_v9  ;;  %17506 = vmatpush3.msra.mxu0 %v20370_v28  ;;  %v20515_v28 = vand.u32 4294901760, %v20499_v14 }
 0x4b0   : > { %17526 = vmatpush3.msra.mxu1 %v20339_v9  ;;  %17507 = vmatprep.subr.mxu0 %v20379_v8  ;;  %v20496_v9 = vand.u32 4294901760, %v20476_v35  ;;  %v8218_v31 = vand.u32 4294901760, %v8217_v50 }
 0x4b1   : > { %17478 = vmatmul.mubr.f32.gmra.mxu0 %v22594_v15  ;;  %17498 = vmatmul.mubr.f32.gmra.mxu1 %v22595_v12  ;;  %v8231_v5 = vsub.f32 %v20499_v14, %v20515_v28 }
 0x4b2   : > { %17480 = vmatprep.mubr.f32.mxu0 %v22596_v1  ;;  %17500 = vmatprep.mubr.f32.mxu1 %v22597_v13 }
 0x4b3   : > { %17527 = vmatprep.subr.mxu1 %v20351_v48  ;;  %17508 = vmatpush3.msra.mxu0 %v20379_v8  ;;  %v8232_v8 = vand.u32 4294901760, %v8231_v5 }
 0x4b4   : > { %17528 = vmatpush3.msra.mxu1 %v20351_v48  ;;  %17509 = vmatprep.subr.mxu0 %v20386_v20  ;;  %v8224_v48 = vsub.f32 %v20476_v35, %v20496_v9 }
 0x4b5   : > { %17481 = vmatmul.mubr.f32.gmra.mxu0 %v22598_v36  ;;  %17501 = vmatmul.mubr.f32.gmra.mxu1 %v22599_v39 }
 0x4b6   : > { %17529 = vmatprep.subr.mxu1 %v20360_v10  ;;  %17510 = vmatpush3.msra.mxu0 %v20386_v20  ;;  %v8225_v37 = vand.u32 4294901760, %v8224_v48 }
 0x4b7   : > { %17511 = vmatprep.mubr.f32.mxu0 %v22569_v40  ;;  %17530 = vmatpush3.msra.mxu1 %v20360_v10  ;;  %v20524_v10 = vand.u32 4294901760, %v20508_v38 }
 0x4b8   : > { %17531 = vmatprep.mubr.f32.mxu1 %v22569_v40  ;;  %17543 = vmatprep.subr.mxu0 %v20443_v59 }
 0x4b9   : > { %17512 = vmatmul.mubr.f32.vlgmr.msra.gmra.mxu0 %v22570_v21  ;;  %17532 = vmatmul.mubr.f32.vlgmr.msra.gmra.mxu1 %v22570_v21  ;;  %v8238_v62 = vsub.f32 %v20508_v38, %v20524_v10 }
 0x4ba   : > { %17514 = vmatprep.mubr.f32.mxu0 %v22572_v26  ;;  %17534 = vmatprep.mubr.f32.mxu1 %v22572_v26 }
 0x4bb   : > { %17544 = vmatpush3.msra.mxu0 %v20443_v59  ;;  %17563 = vmatprep.subr.mxu1 %v8218_v31  ;;  %v8239_v4 = vand.u32 4294901760, %v8238_v62 }
 0x4bc   : > { %17564 = vmatpush3.msra.mxu1 %v8218_v31  ;;  %17545 = vmatprep.subr.mxu0 %v20459_v7 }
 0x4bd   : > { %17515 = vmatmul.mubr.f32.gmra.mxu0 %v22574_v16  ;;  %17535 = vmatmul.mubr.f32.gmra.mxu1 %v22574_v16 }
 0x4be   : > { %17517 = vmatprep.mubr.f32.mxu0 %v22576_v51  ;;  %17537 = vmatprep.mubr.f32.mxu1 %v22576_v51 }
 0x4bf   : > { %17565 = vmatprep.subr.mxu1 %v8225_v37  ;;  %17546 = vmatpush3.msra.mxu0 %v20459_v7 }
 0x4c0   : > { %17566 = vmatpush3.msra.mxu1 %v8225_v37  ;;  %17547 = vmatprep.subr.mxu0 %v20478_v22 }
 0x4c1   : > { %17518 = vmatmul.mubr.f32.gmra.mxu0 %v22578_v0  ;;  %17538 = vmatmul.mubr.f32.gmra.mxu1 %v22578_v0 }
 0x4c2   : > { %17520 = vmatprep.mubr.f32.mxu0 %v22580_v6  ;;  %17540 = vmatprep.mubr.f32.mxu1 %v22580_v6 }
 0x4c3   : > { %17567 = vmatprep.subr.mxu1 %v8232_v8  ;;  %17548 = vmatpush3.msra.mxu0 %v20478_v22 }
 0x4c4   : > { %17568 = vmatpush3.msra.mxu1 %v8232_v8  ;;  %17549 = vmatprep.subr.mxu0 %v20489_v46 }
 0x4c5   : > { %17521 = vmatmul.mubr.f32.gmra.mxu0 %v22582_v30  ;;  %17541 = vmatmul.mubr.f32.gmra.mxu1 %v22582_v30 }
 0x4c6   : > { %17569 = vmatprep.subr.mxu1 %v8239_v4  ;;  %17550 = vmatpush3.msra.mxu0 %v20489_v46 }
 0x4c7   : > { %17551 = vmatprep.mubr.f32.mxu0 %v22568_v19  ;;  %17570 = vmatpush3.msra.mxu1 %v8239_v4 }
 0x4c8   : > { %17571 = vmatprep.mubr.f32.mxu1 %v22569_v40  ;;  %17583 = vmatprep.subr.mxu0 %v20457_v54 }
 0x4c9   : > { %17552 = vmatmul.mubr.f32.vlgmr.msra.gmra.mxu0 %v22571_v53  ;;  %17572 = vmatmul.mubr.f32.vlgmr.msra.gmra.mxu1 %v22570_v21 }
 0x4ca   : > { %17554 = vmatprep.mubr.f32.mxu0 %v22573_v47  ;;  %17574 = vmatprep.mubr.f32.mxu1 %v22572_v26 }
 0x4cb   : > { %17584 = vmatpush3.msra.mxu0 %v20457_v54  ;;  %17603 = vmatprep.subr.mxu1 %v20443_v59 }
 0x4cc   : > { %17604 = vmatpush3.msra.mxu1 %v20443_v59  ;;  %17585 = vmatprep.subr.mxu0 %v20476_v35 }
 0x4cd   : > { %17555 = vmatmul.mubr.f32.gmra.mxu0 %v22575_v63  ;;  %17575 = vmatmul.mubr.f32.gmra.mxu1 %v22574_v16 }
 0x4ce   : > { %17557 = vmatprep.mubr.f32.mxu0 %v22577_v57  ;;  %17577 = vmatprep.mubr.f32.mxu1 %v22576_v51 }
 0x4cf   : > { %17605 = vmatprep.subr.mxu1 %v20459_v7  ;;  %17586 = vmatpush3.msra.mxu0 %v20476_v35 }
 0x4d0   : > { %17606 = vmatpush3.msra.mxu1 %v20459_v7  ;;  %17587 = vmatprep.subr.mxu0 %v20499_v14 }
 0x4d1   : > { %17558 = vmatmul.mubr.f32.gmra.mxu0 %v22579_v2  ;;  %17578 = vmatmul.mubr.f32.gmra.mxu1 %v22578_v0 }
 0x4d2   : > { %17560 = vmatprep.mubr.f32.mxu0 %v22581_v25  ;;  %17580 = vmatprep.mubr.f32.mxu1 %v22580_v6 }
 0x4d3   : > { %17607 = vmatprep.subr.mxu1 %v20478_v22  ;;  %17588 = vmatpush3.msra.mxu0 %v20499_v14 }
 0x4d4   : > { %17608 = vmatpush3.msra.mxu1 %v20478_v22  ;;  %17589 = vmatprep.subr.mxu0 %v20508_v38 }
 0x4d5   : > { %17561 = vmatmul.mubr.f32.gmra.mxu0 %v22583_v55  ;;  %17581 = vmatmul.mubr.f32.gmra.mxu1 %v22582_v30 }
 0x4d6   : > { %17609 = vmatprep.subr.mxu1 %v20489_v46  ;;  %17590 = vmatpush3.msra.mxu0 %v20508_v38 }
 0x4d7   : > { %17591 = vmatprep.mubr.f32.mxu0 %v22584_v58  ;;  %17610 = vmatpush3.msra.mxu1 %v20489_v46 }
 0x4d8   : > { %17611 = vmatprep.mubr.f32.mxu1 %v22585_v44  ;;  %17623 = vmatprep.subr.mxu0 %v20473_v3 }
 0x4d9   : > { %17592 = vmatmul.mubr.f32.vlgmr.msra.gmra.mxu0 %v22586_v43  ;;  %17612 = vmatmul.mubr.f32.vlgmr.msra.gmra.mxu1 %v22587_v56 }
 0x4da   : > { %17594 = vmatprep.mubr.f32.mxu0 %v22588_v29  ;;  %17614 = vmatprep.mubr.f32.mxu1 %v22589_v32 }
 0x4db   : > { %17624 = vmatpush3.msra.mxu0 %v20473_v3  ;;  %17643 = vmatprep.subr.mxu1 %v20443_v59 }
 0x4dc   : > { %17644 = vmatpush3.msra.mxu1 %v20443_v59  ;;  %17625 = vmatprep.subr.mxu0 %v20496_v9 }
 0x4dd   : > { %17595 = vmatmul.mubr.f32.gmra.mxu0 %v22590_v61  ;;  %17615 = vmatmul.mubr.f32.gmra.mxu1 %v22591_v17 }
 0x4de   : > { %17597 = vmatprep.mubr.f32.mxu0 %v22592_v49  ;;  %17617 = vmatprep.mubr.f32.mxu1 %v22593_v45 }
 0x4df   : > { %17645 = vmatprep.subr.mxu1 %v20459_v7  ;;  %17626 = vmatpush3.msra.mxu0 %v20496_v9 }
 0x4e0   : > { %17646 = vmatpush3.msra.mxu1 %v20459_v7  ;;  %17627 = vmatprep.subr.mxu0 %v20515_v28 }
 0x4e1   : > { %17598 = vmatmul.mubr.f32.gmra.mxu0 %v22594_v15  ;;  %17618 = vmatmul.mubr.f32.gmra.mxu1 %v22595_v12 }
 0x4e2   : > { %17600 = vmatprep.mubr.f32.mxu0 %v22596_v1  ;;  %17620 = vmatprep.mubr.f32.mxu1 %v22597_v13 }
 0x4e3   : > { %17647 = vmatprep.subr.mxu1 %v20478_v22  ;;  %17628 = vmatpush3.msra.mxu0 %v20515_v28 }
 0x4e4   : > { %17648 = vmatpush3.msra.mxu1 %v20478_v22  ;;  %17629 = vmatprep.subr.mxu0 %v20524_v10 }
 0x4e5   : > { %17601 = vmatmul.mubr.f32.gmra.mxu0 %v22598_v36  ;;  %17621 = vmatmul.mubr.f32.gmra.mxu1 %v22599_v39 }
 0x4e6   : > { %17649 = vmatprep.subr.mxu1 %v20489_v46  ;;  %17630 = vmatpush3.msra.mxu0 %v20524_v10 }
 0x4e7   : > { %17631 = vmatprep.mubr.f32.mxu0 %v22569_v40  ;;  %17650 = vmatpush3.msra.mxu1 %v20489_v46 }
 0x4e8   : > { %17651 = vmatprep.mubr.f32.mxu1 %v22569_v40 }
 0x4e9   : > { %17632 = vmatmul.mubr.f32.vlgmr.msra.gmra.mxu0 %v22570_v21  ;;  %17652 = vmatmul.mubr.f32.vlgmr.msra.gmra.mxu1 %v22570_v21 }
 0x4ea   : > { %17634 = vmatprep.mubr.f32.mxu0 %v22572_v26  ;;  %17654 = vmatprep.mubr.f32.mxu1 %v22572_v26 }
 0x4ed   : > { %17635 = vmatmul.mubr.f32.gmra.mxu0 %v22574_v16  ;;  %17655 = vmatmul.mubr.f32.gmra.mxu1 %v22574_v16 }
 0x4ee   : > { %17637 = vmatprep.mubr.f32.mxu0 %v22576_v51  ;;  %17657 = vmatprep.mubr.f32.mxu1 %v22576_v51 }
 0x4f1   : > { %17638 = vmatmul.mubr.f32.gmra.mxu0 %v22578_v0  ;;  %17658 = vmatmul.mubr.f32.gmra.mxu1 %v22578_v0 }
 0x4f2   : > { %17640 = vmatprep.mubr.f32.mxu0 %v22580_v6  ;;  %17660 = vmatprep.mubr.f32.mxu1 %v22580_v6 }
 0x4f5   : > { %17641 = vmatmul.mubr.f32.gmra.mxu0 %v22582_v30  ;;  %17661 = vmatmul.mubr.f32.gmra.mxu1 %v22582_v30 }
 0x4f6   : > { %17671 = vmatprep.mubr.f32.mxu0 %v22568_v19  ;;  %17691 = vmatprep.mubr.f32.mxu1 %v22569_v40 }
 0x4f9   : > { %v17268_v18 = vpop.f32.mrf.mxu1 }
 0x4fb   : > { %v20629_v23 = vpop.f32.mrf.mxu1 }
 0x4fc   : > { %22600 = vst [vmem:[#allocation50_spill] sm:$0xff] %v20629_v23 }
 0x4fd   : > { %v17282_v11 = vpop.f32.mrf.mxu1 }
 0x4ff   : > { %v20633_v52 = vpop.f32.mrf.mxu1 }
 0x500   : > { %22602 = vst [vmem:[#allocation47_spill] sm:$0xff] %v20633_v52 }
 0x501   : > { %v17261_v20 = vpop.f32.mrf.mxu0 }
 0x502   : > { %v5379_v41 = vadd.f32 %v17268_v18, %v17261_v20  ;;  %v17296_v19 = vpop.f32.mrf.mxu1 }
 0x503   : > { %v20631_v27 = vpop.f32.mrf.mxu0 }
 0x504   : > { %22601 = vst [vmem:[#allocation46_spill] sm:$0xff] %v20631_v27  ;;  %v20639_v3 = vpop.f32.mrf.mxu1 }
 0x505   : > { %22605 = vst [vmem:[#allocation52_spill] sm:$0xff] %v20639_v3 }
 0x507   : > { %v17275_v24 = vpop.f32.mrf.mxu0 }
 0x508   : > { %v5462_v34 = vadd.f32 %v17275_v24, %v5379_v41 }
 0x509   : > { %v20635_v59 = vpop.f32.mrf.mxu0 }
 0x50a   : > { %22603 = vst [vmem:[#allocation43_spill] sm:$0xff] %v20635_v59  ;;  %v5545_v33 = vadd.f32 %v17282_v11, %v5462_v34 }
 0x50b   : > { %v17289_v54 = vpop.f32.mrf.mxu0 }
 0x50c   : > { %v5628_v7 = vadd.f32 %v17289_v54, %v5545_v33 }
 0x50d   : > { %v20641_v22 = vpop.f32.mrf.mxu0 }
 0x50e   : > { %v20637_v60 = vadd.f32 %v17296_v19, %v5628_v7  ;;  %22606 = vst [vmem:[#allocation57_spill] sm:$0xff] %v20641_v22 }
 0x510   : > { %22604 = vst [vmem:[#allocation45_spill] sm:$0xff] %v20637_v60 }
 0x511   : > { %v17310_v35 = vpop.f32.mrf.mxu1 }
 0x513   : > { %v20643_v42 = vpop.f32.mrf.mxu1 }
 0x514   : > { %22607 = vst [vmem:[#allocation58_spill] sm:$0xff] %v20643_v42 }
 0x515   : > { %v17324_v14 = vpop.f32.mrf.mxu1 }
 0x517   : > { %v20647_v48 = vpop.f32.mrf.mxu1 }
 0x518   : > { %22609 = vst [vmem:[#allocation49_spill] sm:$0xff] %v20647_v48 }
 0x519   : > { %v17303_v46 = vpop.f32.mrf.mxu0 }
 0x51a   : > { %v5887_v50 = vadd.f32 %v17310_v35, %v17303_v46  ;;  %v17338_v62 = vpop.f32.mrf.mxu1 }
 0x51b   : > { %v20645_v9 = vpop.f32.mrf.mxu0 }
 0x51c   : > { %22608 = vst [vmem:[#allocation44_spill] sm:$0xff] %v20645_v9  ;;  %v20653_v4 = vpop.f32.mrf.mxu1 }
 0x51d   : > { %22612 = vst [vmem:[#allocation51_spill] sm:$0xff] %v20653_v4 }
 0x51f   : > { %v17317_v38 = vpop.f32.mrf.mxu0 }
 0x520   : > { %v5970_v31 = vadd.f32 %v17317_v38, %v5887_v50 }
 0x521   : > { %v20649_v28 = vpop.f32.mrf.mxu0 }
 0x522   : > { %22610 = vst [vmem:[#allocation53_spill] sm:$0xff] %v20649_v28  ;;  %v6053_v10 = vadd.f32 %v17324_v14, %v5970_v31 }
 0x523   : > { %v17331_v37 = vpop.f32.mrf.mxu0 }
 0x524   : > { %v6136_v5 = vadd.f32 %v17331_v37, %v6053_v10 }
 0x525   : > { %v20655_v20 = vpop.f32.mrf.mxu0 }
 0x526   : > { %v20651_v8 = vadd.f32 %v17338_v62, %v6136_v5  ;;  %22613 = vst [vmem:[#allocation48_spill] sm:$0xff] %v20655_v20 }
 0x528   : > { %22611 = vst [vmem:[#allocation54_spill] sm:$0xff] %v20651_v8 }
 0x529   : > { %v17352_v18 = vpop.f32.mrf.mxu1 }
 0x52b   : > { %v20657_v41 = vpop.f32.mrf.mxu1 }
 0x52c   : > { %22614 = vst [vmem:[#allocation55_spill] sm:$0xff] %v20657_v41 }
 0x52d   : > { %v17366_v33 = vpop.f32.mrf.mxu1 }
 0x52f   : > { %v20661_v7 = vpop.f32.mrf.mxu1 }
 0x530   : > { %22616 = vst [vmem:[#allocation31_spill] sm:$0xff] %v20661_v7 }
 0x531   : > { %v17345_v11 = vpop.f32.mrf.mxu0 }
 0x532   : > { %v6395_v24 = vadd.f32 %v17352_v18, %v17345_v11  ;;  %v17380_v14 = vpop.f32.mrf.mxu1 }
 0x533   : > { %v20659_v34 = vpop.f32.mrf.mxu0 }
 0x534   : > { %22615 = vst [vmem:[#allocation56_spill] sm:$0xff] %v20659_v34  ;;  %v20667_v10 = vpop.f32.mrf.mxu1 }
 0x535   : > { %22619 = vst [vmem:[#allocation34_spill] sm:$0xff] %v20667_v10 }
 0x537   : > { %v17359_v54 = vpop.f32.mrf.mxu0 }
 0x538   : > { %v6478_v19 = vadd.f32 %v17359_v54, %v6395_v24 }
 0x539   : > { %v20663_v35 = vpop.f32.mrf.mxu0 }
 0x53a   : > { %22617 = vst [vmem:[#allocation11_spill] sm:$0xff] %v20663_v35  ;;  %v6561_v46 = vadd.f32 %v17366_v33, %v6478_v19 }
 0x53b   : > { %v17373_v50 = vpop.f32.mrf.mxu0 }
 0x53c   : > { %v6644_v38 = vadd.f32 %v17373_v50, %v6561_v46  ;;  %v15772_v46 = vld [vmem:[%s22388_s3 + $0x38] sm:$0xff]  ;;  %v15771_v50 = vld [vmem:[%s22388_s3 + $0x30] sm:$0xff] }
 0x53d   : > { %v20671_v62 = vpop.f32.mrf.mxu0 }
 0x53e   : > { %v20665_v31 = vadd.f32 %v17380_v14, %v6644_v38  ;;  %22621 = vst [vmem:[#allocation35_spill] sm:$0xff] %v20671_v62  ;;  %v15770_v14 = vld [vmem:[%s22388_s3 + $0x28] sm:$0xff] }
 0x540   : > { %22618 = vst [vmem:[#allocation12_spill] sm:$0xff] %v20665_v31  ;;  %v20695_v31 = vand.u32 4294901760, %v15770_v14 }
 0x541   : > { %v17394_v37 = vpop.f32.mrf.mxu1 }
 0x543   : > { %v20669_v5 = vpop.f32.mrf.mxu1 }
 0x544   : > { %22620 = vst [vmem:[#allocation13_spill] sm:$0xff] %v20669_v5 }
 0x545   : > { %v17408_v11 = vpop.f32.mrf.mxu1 }
 0x547   : > { %v20675_v54 = vpop.f32.mrf.mxu1 }
 0x548   : > { %22623 = vst [vmem:[#allocation37_spill] sm:$0xff] %v20675_v54 }
 0x549   : > { %v17387_v18 = vpop.f32.mrf.mxu0  ;;  %v17422_v54 = vpop.f32.mrf.mxu1 }
 0x54a   : > { %v6903_v8 = vadd.f32 %v17394_v37, %v17387_v18  ;;  %v20688_v37 = vand.u32 4294901760, %v15772_v46  ;;  %v20690_v18 = vand.u32 4294901760, %v15771_v50 }
 0x54b   : > { %v20673_v60 = vpop.f32.mrf.mxu0 }
 0x54c   : > { %22622 = vst [vmem:[#allocation15_spill] sm:$0xff] %v20673_v60  ;;  %17663 = vmatprep.subr.mxu0 %v20688_v37  ;;  %v9014_v4 = vsub.f32 %v15772_v46, %v20688_v37 }
 0x54d   : > { %v17401_v24 = vpop.f32.mrf.mxu0  ;;  %17664 = vmatpush3.msra.mxu0 %v20688_v37 }
 0x54e   : > { %v6986_v33 = vadd.f32 %v17401_v24, %v6903_v8  ;;  %v15769_v8 = vld [vmem:[%s22388_s3 + $0x20] sm:$0xff]  ;;  %17665 = vmatprep.subr.mxu0 %v20690_v18  ;;  %v20712_v20 = vand.u32 4294901760, %v9014_v4 }
 0x54f   : > { %v20677_v19 = vpop.f32.mrf.mxu0  ;;  %v20697_v10 = vand.u32 4294901760, %v15769_v8  ;;  %17666 = vmatpush3.msra.mxu0 %v20690_v18 }
 0x550   : > { %22624 = vst [vmem:[#allocation18_spill] sm:$0xff] %v20677_v19  ;;  %v7069_v38 = vadd.f32 %v17408_v11, %v6986_v33  ;;  %v9021_v11 = vsub.f32 %v15771_v50, %v20690_v18  ;;  %v20704_v33 = vsub.f32 %v15770_v14, %v20695_v31  ;;  %v20723_v14 = vpop.f32.mrf.mxu1  ;;  %17667 = vmatprep.subr.mxu0 %v20695_v31 }
 0x551   : > { %v17415_v24 = vpop.f32.mrf.mxu0  ;;  %v20707_v19 = vsub.f32 %v15769_v8, %v20697_v10  ;;  %22626 = vst [vmem:[#allocation19_spill] sm:$0xff] %v20723_v14  ;;  %v9016_v8 = vsub.f32 %v9014_v4, %v20712_v20  ;;  %17668 = vmatpush3.msra.mxu0 %v20695_v31 }
 0x552   : > { %v7152_v62 = vadd.f32 %v17415_v24, %v7069_v38  ;;  %v20714_v38 = vand.u32 4294901760, %v9021_v11  ;;  %v20718_v46 = vand.u32 4294901760, %v20704_v33  ;;  %v20733_v24 = vld [vmem:[%s22389_s4 + $0x1] ss:$0 sm:$0xff]  ;;  %17669 = vmatprep.subr.mxu0 %v20697_v10 }
 0x553   : > { %v20721_v50 = vand.u32 4294901760, %v20707_v19  ;;  %v9017_v14 = vand.u32 4294901760, %v9016_v8  ;;  %17670 = vmatpush3.msra.mxu0 %v20697_v10 }
 0x554   : > { %v20709_v7 = vadd.f32 %v17422_v54, %v7152_v62  ;;  %v9023_v62 = vsub.f32 %v9021_v11, %v20714_v38  ;;  %v20728_v54 = vpop.f32.mrf.mxu0  ;;  %17672 = vmatmul.mubr.f32.vlgmr.msra.gmra.mxu0 %v22571_v53  ;;  %17703 = vmatprep.subr.mxu0 %v9014_v4 }
 0x555   : > { %22627 = vst [vmem:[#allocation40_spill] sm:$0xff] %v20728_v54  ;;  %v9037_v60 = vsub.f32 %v20707_v19, %v20721_v50  ;;  %17683 = vmatprep.subr.mxu1 %v9017_v14  ;;  %17674 = vmatprep.mubr.f32.mxu0 %v22573_v47 }
 0x556   : > { %22625 = vst [vmem:[#allocation39_spill] sm:$0xff] %v20709_v7  ;;  %v9030_v7 = vsub.f32 %v20704_v33, %v20718_v46  ;;  %v9024_v5 = vand.u32 4294901760, %v9023_v62  ;;  %17684 = vmatpush3.msra.mxu1 %v9017_v14  ;;  %17704 = vmatpush3.msra.mxu0 %v9014_v4 }
 0x557   : > { %v9038_v34 = vand.u32 4294901760, %v9037_v60  ;;  %17705 = vmatprep.subr.mxu0 %v9021_v11 }
 0x558   : > { %v17453_v3 = vpop.f32.mrf.mxu1  ;;  %v9031_v22 = vand.u32 4294901760, %v9030_v7  ;;  %17685 = vmatprep.subr.mxu1 %v9024_v5  ;;  %17675 = vmatmul.mubr.f32.gmra.mxu0 %v22575_v63 }
 0x559   : > { %v17433_v35 = vpop.f32.mrf.mxu0  ;;  %17686 = vmatpush3.msra.mxu1 %v9024_v5  ;;  %17677 = vmatprep.mubr.f32.mxu0 %v22577_v57 }
 0x55a   : > { %v7335_v54 = vadd.f32 %v17433_v35, %v20733_v24  ;;  %v20743_v48 = vpop.f32.mrf.mxu1  ;;  %17687 = vmatprep.subr.mxu1 %v9031_v22  ;;  %17706 = vmatpush3.msra.mxu0 %v9021_v11 }
 0x55b   : > { %v20746_v41 = vpop.f32.mrf.mxu0  ;;  %17688 = vmatpush3.msra.mxu1 %v9031_v22  ;;  %17707 = vmatprep.subr.mxu0 %v20704_v33 }
 0x55c   : > { %v7492_v8 = vadd.f32 %v17453_v3, %v7335_v54  ;;  %v17456_v62 = vpop.f32.mrf.mxu1  ;;  %17689 = vmatprep.subr.mxu1 %v9038_v34  ;;  %17678 = vmatmul.mubr.f32.gmra.mxu0 %v22579_v2 }
 0x55d   : > { %v17436_v28 = vpop.f32.mrf.mxu0  ;;  %17690 = vmatpush3.msra.mxu1 %v9038_v34  ;;  %17680 = vmatprep.mubr.f32.mxu0 %v22581_v25 }
 0x55e   : > { %v7355_v35 = vadd.f32 %v17436_v28, %v20733_v24  ;;  %v20750_v52 = vpop.f32.mrf.mxu1  ;;  %17692 = vmatmul.mubr.f32.vlgmr.msra.gmra.mxu1 %v22570_v21  ;;  %17723 = vmatprep.subr.mxu1 %v20688_v37 }
 0x55f   : > { %v20753_v53 = vpop.f32.mrf.mxu0  ;;  %17694 = vmatprep.mubr.f32.mxu1 %v22572_v26  ;;  %17724 = vmatpush3.msra.mxu1 %v20688_v37 }
 0x560   : > { %v7504_v47 = vadd.f32 %v17456_v62, %v7355_v35  ;;  %v17459_v3 = vpop.f32.mrf.mxu1  ;;  %17725 = vmatprep.subr.mxu1 %v20690_v18  ;;  %17681 = vmatmul.mubr.f32.gmra.mxu0 %v22583_v55 }
 0x561   : > { %v17439_v60 = vpop.f32.mrf.mxu0  ;;  %17708 = vmatpush3.msra.mxu0 %v20704_v33  ;;  %17726 = vmatpush3.msra.mxu1 %v20690_v18 }
 0x562   : > { %v7375_v4 = vadd.f32 %v17439_v60, %v20733_v24  ;;  %v20757_v28 = vpop.f32.mrf.mxu1  ;;  %17695 = vmatmul.mubr.f32.gmra.mxu1 %v22574_v16  ;;  %17709 = vmatprep.subr.mxu0 %v20707_v19 }
 0x563   : > { %v20761_v63 = vpop.f32.mrf.mxu0  ;;  %17697 = vmatprep.mubr.f32.mxu1 %v22576_v51  ;;  %17727 = vmatprep.subr.mxu1 %v20695_v31 }
 0x564   : > { %v7516_v57 = vadd.f32 %v17459_v3, %v7375_v4  ;;  %v17462_v22 = vpop.f32.mrf.mxu1  ;;  %17710 = vmatpush3.msra.mxu0 %v20707_v19  ;;  %17711 = vmatprep.mubr.f32.mxu0 %v22584_v58 }
 0x565   : > { %v17442_v34 = vpop.f32.mrf.mxu0  ;;  %17728 = vmatpush3.msra.mxu1 %v20695_v31  ;;  %17712 = vmatmul.mubr.f32.vlgmr.msra.gmra.mxu0 %v22586_v43 }
 0x566   : > { %v7395_v7 = vadd.f32 %v17442_v34, %v20733_v24  ;;  %v20770_v2 = vpop.f32.mrf.mxu1  ;;  %17698 = vmatmul.mubr.f32.gmra.mxu1 %v22578_v0  ;;  %17729 = vmatprep.subr.mxu1 %v20697_v10 }
 0x567   : > { %v20774_v5 = vpop.f32.mrf.mxu0  ;;  %17700 = vmatprep.mubr.f32.mxu1 %v22580_v6  ;;  %17730 = vmatpush3.msra.mxu1 %v20697_v10 }
 0x568   : > { %v7528_v25 = vadd.f32 %v17462_v22, %v7395_v7  ;;  %17714 = vmatprep.mubr.f32.mxu0 %v22588_v29  ;;  %17743 = vmatprep.subr.mxu0 %v20712_v20 }
 0x569   : > { %v17473_v11 = vpop.f32.mrf.mxu0  ;;  %v17493_v14 = vpop.f32.mrf.mxu1  ;;  %17744 = vmatpush3.msra.mxu0 %v20712_v20  ;;  %17763 = vmatprep.subr.mxu1 %v20688_v37 }
 0x56a   : > { %v7615_v54 = vadd.f32 %v17473_v11, %v7492_v8  ;;  %17701 = vmatmul.mubr.f32.gmra.mxu1 %v22582_v30  ;;  %17715 = vmatmul.mubr.f32.gmra.mxu0 %v22590_v61 }
 0x56b   : > { %v20784_v55 = vpop.f32.mrf.mxu0  ;;  %v20786_v62 = vpop.f32.mrf.mxu1  ;;  %17731 = vmatprep.mubr.f32.mxu1 %v22585_v44  ;;  %17745 = vmatprep.subr.mxu0 %v20714_v38 }
 0x56c   : > { %v20790_v33 = vadd.f32 %v17493_v14, %v7615_v54  ;;  %17717 = vmatprep.mubr.f32.mxu0 %v22592_v49  ;;  %17746 = vmatpush3.msra.mxu0 %v20714_v38 }
 0x56d   : > { %v17476_v19 = vpop.f32.mrf.mxu0  ;;  %v17496_v8 = vpop.f32.mrf.mxu1  ;;  %17747 = vmatprep.subr.mxu0 %v20718_v46 }
 0x56e   : > { %v7629_v58 = vadd.f32 %v17476_v19, %v7504_v47  ;;  %17732 = vmatmul.mubr.f32.vlgmr.msra.gmra.mxu1 %v22587_v56  ;;  %17718 = vmatmul.mubr.f32.gmra.mxu0 %v22594_v15 }
 0x56f   : > { %v20798_v35 = vpop.f32.mrf.mxu0  ;;  %v20800_v3 = vpop.f32.mrf.mxu1  ;;  %17734 = vmatprep.mubr.f32.mxu1 %v22589_v32  ;;  %17764 = vmatpush3.msra.mxu1 %v20688_v37 }
 0x570   : > { %v20804_v43 = vadd.f32 %v17496_v8, %v7629_v58  ;;  %17720 = vmatprep.mubr.f32.mxu0 %v22596_v1  ;;  %17765 = vmatprep.subr.mxu1 %v20690_v18 }
 0x571   : > { %v17479_v29 = vpop.f32.mrf.mxu0  ;;  %v17499_v47 = vpop.f32.mrf.mxu1  ;;  %17748 = vmatpush3.msra.mxu0 %v20718_v46  ;;  %17766 = vmatpush3.msra.mxu1 %v20690_v18 }
 0x572   : > { %v7643_v60 = vadd.f32 %v17479_v29, %v7516_v57  ;;  %17735 = vmatmul.mubr.f32.gmra.mxu1 %v22591_v17  ;;  %17721 = vmatmul.mubr.f32.gmra.mxu0 %v22598_v36 }
 0x573   : > { %v20812_v44 = vpop.f32.mrf.mxu0  ;;  %v20814_v20 = vpop.f32.mrf.mxu1  ;;  %17737 = vmatprep.mubr.f32.mxu1 %v22593_v45  ;;  %17749 = vmatprep.subr.mxu0 %v20721_v50 }
 0x574   : > { %v20818_v61 = vadd.f32 %v17499_v47, %v7643_v60  ;;  %17767 = vmatprep.subr.mxu1 %v20695_v31  ;;  %17750 = vmatpush3.msra.mxu0 %v20721_v50 }
 0x575   : > { %v17482_v49 = vpop.f32.mrf.mxu0  ;;  %v17502_v4 = vpop.f32.mrf.mxu1  ;;  %17751 = vmatprep.mubr.f32.mxu0 %v22569_v40  ;;  %17768 = vmatpush3.msra.mxu1 %v20695_v31 }
 0x576   : > { %22628 = vst [vmem:[#allocation27_spill] sm:$0xff] %v20818_v61  ;;  %v7657_v56 = vadd.f32 %v17482_v49, %v7528_v25  ;;  %17738 = vmatmul.mubr.f32.gmra.mxu1 %v22595_v12  ;;  %17752 = vmatmul.mubr.f32.vlgmr.msra.gmra.mxu0 %v22570_v21 }
 0x577   : > { %v20826_v32 = vpop.f32.mrf.mxu0  ;;  %v20828_v37 = vpop.f32.mrf.mxu1  ;;  %17740 = vmatprep.mubr.f32.mxu1 %v22597_v13  ;;  %17769 = vmatprep.subr.mxu1 %v20697_v10 }
 0x578   : > { %22629 = vst [vmem:[#allocation41_spill] sm:$0xff] %v20826_v32  ;;  %22630 = vst [vmem:[#allocation28_spill] sm:$0xff] %v20828_v37  ;;  %v7790_v15 = vadd.f32 %v17502_v4, %v7657_v56  ;;  %17770 = vmatpush3.msra.mxu1 %v20697_v10  ;;  %17754 = vmatprep.mubr.f32.mxu0 %v22572_v26  ;;  %v7325_v56 = vadd.f32 %v20733_v24, %v20746_v41 }
 0x579   : > { %v20834_v1 = vpop.f32.mrf.mxu0  ;;  %v20836_v38 = vpop.f32.mrf.mxu1 }
 0x57a   : > { %17741 = vmatmul.mubr.f32.gmra.mxu1 %v22599_v39  ;;  %17755 = vmatmul.mubr.f32.gmra.mxu0 %v22574_v16 }
 0x57b   : > { %v20842_v17 = vpop.f32.mrf.mxu0  ;;  %v20844_v45 = vpop.f32.mrf.mxu1  ;;  %17771 = vmatprep.mubr.f32.mxu1 %v22569_v40  ;;  %17757 = vmatprep.mubr.f32.mxu0 %v22576_v51 }
 0x57d   : > { %v20850_v36 = vpop.f32.mrf.mxu0  ;;  %v20852_v18 = vpop.f32.mrf.mxu1 }
 0x57e   : > { %17772 = vmatmul.mubr.f32.vlgmr.msra.gmra.mxu1 %v22570_v21  ;;  %17758 = vmatmul.mubr.f32.gmra.mxu0 %v22578_v0 }
 0x57f   : > { %v20857_v12 = vpop.f32.mrf.mxu0  ;;  %v20859_v46 = vpop.f32.mrf.mxu1  ;;  %17774 = vmatprep.mubr.f32.mxu1 %v22572_v26  ;;  %17760 = vmatprep.mubr.f32.mxu0 %v22580_v6 }
 0x581   : > { %v20863_v13 = vpop.f32.mrf.mxu0  ;;  %v20865_v31 = vpop.f32.mrf.mxu1 }
 0x582   : > { %22631 = vst [vmem:[#allocation42_spill] sm:$0xff] %v20863_v13  ;;  %22632 = vst [vmem:[#allocation14_spill] sm:$0xff] %v20865_v31  ;;  %17775 = vmatmul.mubr.f32.gmra.mxu1 %v22574_v16  ;;  %17761 = vmatmul.mubr.f32.gmra.mxu0 %v22582_v30 }
 0x583   : > { %v20869_v10 = vpop.f32.mrf.mxu0  ;;  %v20871_v50 = vpop.f32.mrf.mxu1  ;;  %17777 = vmatprep.mubr.f32.mxu1 %v22576_v51 }
 0x584   : > { %22633 = vst [vmem:[#allocation20_spill] sm:$0xff] %v20871_v50 }
 0x585   : > { %v17522_v39 = vpop.f32.mrf.mxu0  ;;  %v17542_v40 = vpop.f32.mrf.mxu1 }
 0x586   : > { %v7915_v57 = vadd.f32 %v17522_v39, %v7790_v15  ;;  %17778 = vmatmul.mubr.f32.gmra.mxu1 %v22578_v0 }
 0x587   : > { %v20877_v22 = vpop.f32.mrf.mxu0  ;;  %v20879_v34 = vpop.f32.mrf.mxu1  ;;  %17780 = vmatprep.mubr.f32.mxu1 %v22580_v6 }
 0x588   : > { %22634 = vst [vmem:[#allocation16_spill] sm:$0xff] %v20877_v22  ;;  %22635 = vst [vmem:[#allocation22_spill] sm:$0xff] %v20879_v34  ;;  %v20882_v21 = vadd.f32 %v17542_v40, %v7915_v57  ;;  %v7486_v57 = vadd.f32 %v20743_v48, %v7325_v56  ;;  %v7345_v34 = vadd.f32 %v20733_v24, %v20753_v53 }
 0x589   : > { %v17553_v26 = vpop.f32.mrf.mxu0  ;;  %v17573_v7 = vpop.f32.mrf.mxu1 }
 0x58a   : > { %22636 = vst [vmem:[#allocation17_spill] sm:$0xff] %v20882_v21  ;;  %17781 = vmatmul.mubr.f32.gmra.mxu1 %v22582_v30  ;;  %v7608_v59 = vadd.f32 %v20784_v55, %v7486_v57  ;;  %v8283_v21 = vadd.f32 %v17573_v7, %v17553_v26  ;;  %v7498_v55 = vadd.f32 %v20750_v52, %v7345_v34 }
 0x58b   : > { %v8115_v25 = vpop.f32.mrf.mxu0  ;;  %v8276_v11 = vpop.f32.mrf.mxu1  ;;  %v7365_v52 = vadd.f32 %v20733_v24, %v20761_v63 }
 0x58c   : > { %v8277_v41 = vadd.f32 %v8276_v11, %v8115_v25  ;;  %v7734_v50 = vadd.f32 %v20786_v62, %v7608_v59  ;;  %v7879_v59 = vadd.f32 %v20834_v1, %v20790_v33 }
 0x58d   : > { %v17556_v14 = vpop.f32.mrf.mxu0  ;;  %v17576_v16 = vpop.f32.mrf.mxu1 }
 0x58e   : > { %v8295_v56 = vadd.f32 %v17576_v16, %v17556_v14  ;;  %v7873_v26 = vadd.f32 %v20842_v17, %v7734_v50 }
 0x58f   : > { %v8135_v54 = vpop.f32.mrf.mxu0  ;;  %v8288_v19 = vpop.f32.mrf.mxu1 }
 0x590   : > { %v8289_v7 = vadd.f32 %v8288_v19, %v8135_v54  ;;  %v20921_v17 = vadd.f32 %v20844_v45, %v7873_v26 }
 0x591   : > { %v17559_v8 = vpop.f32.mrf.mxu0  ;;  %v17579_v51 = vpop.f32.mrf.mxu1 }
 0x593   : > { %v8155_v58 = vpop.f32.mrf.mxu0  ;;  %v8300_v29 = vpop.f32.mrf.mxu1 }
 0x595   : > { %v20888_v47 = vpop.f32.mrf.mxu0  ;;  %v20890_v60 = vpop.f32.mrf.mxu1 }
 0x597   : > { %v20892_v49 = vpop.f32.mrf.mxu0  ;;  %v20894_v0 = vpop.f32.mrf.mxu1 }
 0x599   : > { %v17593_v4 = vpop.f32.mrf.mxu0  ;;  %v17613_v6 = vpop.f32.mrf.mxu1 }
 0x59a   : > { %v8406_v37 = vadd.f32 %v17593_v4, %v8283_v21  ;;  %v7622_v21 = vadd.f32 %v20798_v35, %v7498_v55 }
 0x59b   : > { %v8398_v30 = vpop.f32.mrf.mxu0  ;;  %v8524_v15 = vpop.f32.mrf.mxu1 }
 0x59c   : > { %v8399_v61 = vadd.f32 %v8398_v30, %v8277_v41  ;;  %v8533_v32 = vadd.f32 %v17613_v6, %v8406_v37  ;;  %v8307_v37 = vadd.f32 %v17579_v51, %v17559_v8  ;;  %v7750_v33 = vadd.f32 %v20800_v3, %v7622_v21 }
 0x59d   : > { %v17596_v39 = vpop.f32.mrf.mxu0  ;;  %v17616_v40 = vpop.f32.mrf.mxu1  ;;  %v7510_v51 = vadd.f32 %v20757_v28, %v7365_v52  ;;  %v7891_v28 = vadd.f32 %v20850_v36, %v20804_v43  ;;  %v8319_v36 = vadd.f32 %v20890_v60, %v20888_v47 }
 0x59e   : > { %v8420_v25 = vadd.f32 %v17596_v39, %v8295_v56  ;;  %v8525_v16 = vadd.f32 %v8524_v15, %v8399_v61  ;;  %v8301_v61 = vadd.f32 %v8300_v29, %v8155_v58  ;;  %v7885_v15 = vadd.f32 %v20857_v12, %v7750_v33  ;;  %v22640_v33 = vld [vmem:[#allocation20_spill] sm:$0xff] }
 0x59f   : > { %v8412_v42 = vpop.f32.mrf.mxu0  ;;  %v8540_v9 = vpop.f32.mrf.mxu1  ;;  %v7636_v41 = vadd.f32 %v20812_v44, %v7510_v51 }
 0x5a0   : > { %v8413_v62 = vadd.f32 %v8412_v42, %v8289_v7  ;;  %v8549_v54 = vadd.f32 %v17616_v40, %v8420_v25  ;;  %v20927_v42 = vadd.f32 %v20836_v38, %v7879_v59  ;;  %v9625_v38 = vmul.f32 %v20921_v17, %v20921_v17 }
 0x5a1   : > { %v17599_v23 = vpop.f32.mrf.mxu0  ;;  %v17619_v27 = vpop.f32.mrf.mxu1  ;;  %v7385_v7 = vadd.f32 %v20733_v24, %v20774_v5  ;;  %v20953_v25 = vadd.f32 %v20859_v46, %v7885_v15  ;;  %v20963_v24 = vadd.f32 %v20852_v18, %v7891_v28  ;;  %v8313_v46 = vadd.f32 %v20894_v0, %v20892_v49  ;;  %v22637_v49 = vld [vmem:[#allocation41_spill] sm:$0xff]  ;;  %v22642_v15 = vld [vmem:[#allocation14_spill] sm:$0xff] }
 0x5a2   : > { %v8434_v63 = vadd.f32 %v17599_v23, %v8307_v37  ;;  %v9633_v43 = vsel %vm2815_vm1, %v9625_v38, 0.0  ;;  %v22639_v37 = vld [vmem:[#allocation42_spill] sm:$0xff] }
 0x5a3   : > { %v8426_v22 = vpop.f32.mrf.mxu0  ;;  %v20902_v31 = vpop.f32.mrf.mxu1  ;;  %v7522_v60 = vadd.f32 %v20770_v2, %v7385_v7 }
 0x5a4   : > { %v8427_v39 = vadd.f32 %v8426_v22, %v8301_v61  ;;  %v9626_v22 = vmul.f32 %v20927_v42, %v20927_v42  ;;  %v8565_v56 = vadd.f32 %v17619_v27, %v8434_v63 }
 0x5a5   : > { %v20905_v13 = vpop.f32.mrf.mxu0  ;;  %v20907_v48 = vpop.f32.mrf.mxu1  ;;  %v7650_v0 = vadd.f32 %v22637_v49, %v7522_v60 }
 0x5a6   : > { %v8557_v27 = vadd.f32 %v20902_v31, %v8427_v39  ;;  %v9636_v5 = vsel %vm2815_vm1, %v9626_v22, 0.0 }
 0x5a7   : > { %v20911_v57 = vpop.f32.mrf.mxu0  ;;  %v20913_v53 = vpop.f32.mrf.mxu1 }
 0x5a8   : > { %v8441_v18 = vadd.f32 %v20911_v57, %v8313_v46  ;;  %v9628_v57 = vmul.f32 %v20963_v24, %v20963_v24 }
 0x5a9   : > { %v17633_v11 = vpop.f32.mrf.mxu0  ;;  %v17653_v14 = vpop.f32.mrf.mxu1 }
 0x5aa   : > { %v8670_v4 = vadd.f32 %v17633_v11, %v8533_v32  ;;  %v8541_v32 = vadd.f32 %v8540_v9, %v8413_v62  ;;  %v7766_v11 = vadd.f32 %v20814_v20, %v7636_v41 }
 0x5ab   : > { %v8663_v50 = vpop.f32.mrf.mxu0  ;;  %v8780_v34 = vpop.f32.mrf.mxu1 }
 0x5ac   : > { %v20923_v19 = vadd.f32 %v17653_v14, %v8670_v4  ;;  %v8664_v35 = vadd.f32 %v8663_v50, %v8525_v16  ;;  %v8448_v14 = vadd.f32 %v20905_v13, %v8319_v36  ;;  %v7897_v16 = vadd.f32 %v20869_v10, %v7766_v11  ;;  %v22648_v11 = vld [vmem:[#allocation17_spill] sm:$0xff] }
 0x5ad   : > { %v17636_v1 = vpop.f32.mrf.mxu0  ;;  %v17656_v6 = vpop.f32.mrf.mxu1  ;;  %v9627_v13 = vmul.f32 %v20953_v25, %v20953_v25 }
 0x5ae   : > { %v20929_v30 = vadd.f32 %v8780_v34, %v8664_v35  ;;  %v8682_v45 = vadd.f32 %v17636_v1, %v8549_v54  ;;  %v9738_v8 = vmul.f32 %v20923_v19, %v20923_v19  ;;  %v22638_v34 = vld [vmem:[#allocation27_spill] sm:$0xff]  ;;  %v8581_v2 = vadd.f32 %v20907_v48, %v8448_v14 }
 0x5af   : > { %v8675_v3 = vpop.f32.mrf.mxu0  ;;  %v8792_v40 = vpop.f32.mrf.mxu1  ;;  %v7903_v54 = vadd.f32 %v22639_v37, %v22638_v34  ;;  %v20989_v61 = vadd.f32 %v22640_v33, %v7897_v16 }
 0x5b0   : > { %v8676_v9 = vadd.f32 %v8675_v3, %v8541_v32  ;;  %v20937_v58 = vadd.f32 %v17656_v6, %v8682_v45  ;;  %v9748_v23 = vsel %vm2815_vm1, %v9738_v8, 0.0  ;;  %v9737_v29 = vmul.f32 %v20929_v30, %v20929_v30  ;;  %v22641_v8 = vld [vmem:[#allocation28_spill] sm:$0xff] }
 0x5b1   : > { %9749 = vadd.xlane.f32.xlu0 %v9748_v23  ;;  %v17639_v12 = vpop.f32.mrf.mxu0  ;;  %v17659_v21 = vpop.f32.mrf.mxu1  ;;  %v8573_v6 = vadd.f32 %v20913_v53, %v8441_v18  ;;  %v9639_v45 = vsel %vm2815_vm1, %v9627_v13, 0.0  ;;  %v7782_v51 = vadd.f32 %v22641_v8, %v7650_v0  ;;  %v20997_v39 = vadd.f32 %v22642_v15, %v7903_v54  ;;  %v22643_v53 = vld [vmem:[#allocation16_spill] sm:$0xff] }
 0x5b2   : > { %v20947_v55 = vadd.f32 %v8792_v40, %v8676_v9  ;;  %v9745_v26 = vsel %vm2815_vm1, %v9737_v29, 0.0  ;;  %v8694_v59 = vadd.f32 %v17639_v12, %v8565_v56  ;;  %v9740_v62 = vmul.f32 %v20937_v58, %v20937_v58 }
 0x5b3   : > { %v8687_v44 = vpop.f32.mrf.mxu0  ;;  %9746 = vadd.xlane.f32.xlu1 %v9745_v26  ;;  %v8804_v4 = vpop.f32.mrf.mxu1  ;;  %v9642_v40 = vsel %vm2815_vm1, %v9628_v57, 0.0  ;;  %v7909_v23 = vadd.f32 %v22643_v53, %v7782_v51  ;;  %v9629_v28 = vmul.f32 %v20989_v61, %v20989_v61  ;;  %v9630_v56 = vmul.f32 %v20997_v39, %v20997_v39  ;;  %v22646_v26 = vld [vmem:[#allocation22_spill] sm:$0xff] }
 0x5b4   : > { %v8688_v47 = vadd.f32 %v8687_v44, %v8557_v27  ;;  %v9739_v31 = vmul.f32 %v20947_v55, %v20947_v55  ;;  %v20974_v52 = vadd.f32 %v17659_v21, %v8694_v59  ;;  %v9754_v50 = vsel %vm2815_vm1, %v9740_v62, 0.0 }
 0x5b5   : > { %9634 = vadd.xlane.f32.xlu0 %v9633_v43  ;;  %v17642_v20 = vpop.f32.mrf.mxu0  ;;  %v17662_v1 = vpop.f32.mrf.mxu1  ;;  %v21014_v7 = vadd.f32 %v22646_v26, %v7909_v23  ;;  %v9645_v44 = vsel %vm2815_vm1, %v9629_v28, 0.0  ;;  %v9648_v43 = vsel %vm2815_vm1, %v9630_v56, 0.0 }
 0x5b6   : > { %v20983_v10 = vadd.f32 %v8804_v4, %v8688_v47  ;;  %v9751_v35 = vsel %vm2815_vm1, %v9739_v31, 0.0  ;;  %v8706_v63 = vadd.f32 %v17642_v20, %v8581_v2  ;;  %v9742_v48 = vmul.f32 %v20974_v52, %v20974_v52 }
 0x5b7   : > { %9637 = vadd.xlane.f32.xlu1 %v9636_v5  ;;  %v8699_v32 = vpop.f32.mrf.mxu0  ;;  %v8816_v9 = vpop.f32.mrf.mxu1  ;;  %22647 = vst [vmem:[#allocation26_spill] sm:$0xff] %v21014_v7  ;;  %v9631_v59 = vmul.f32 %v21014_v7, %v21014_v7  ;;  %v9632_v5 = vmul.f32 %v22648_v11, %v22648_v11 }
 0x5b8   : > { %v8700_v3 = vadd.f32 %v8699_v32, %v8573_v6  ;;  %v9741_v38 = vmul.f32 %v20983_v10, %v20983_v10  ;;  %v21003_v29 = vadd.f32 %v17662_v1, %v8706_v63  ;;  %v9760_v41 = vsel %vm2815_vm1, %v9742_v48, 0.0 }
 0x5b9   : > { %9755 = vadd.xlane.f32.xlu0 %v9754_v50  ;;  %v9651_v46 = vsel %vm2815_vm1, %v9631_v59, 0.0  ;;  %v9654_v14 = vsel %vm2815_vm1, %v9632_v5, 0.0 }
 0x5ba   : > { %22644 = vst [vmem:[#allocation23_spill] sm:$0xff] %v21003_v29  ;;  %v21008_v12 = vadd.f32 %v8816_v9, %v8700_v3  ;;  %v9757_v22 = vsel %vm2815_vm1, %v9741_v38, 0.0  ;;  %v9744_v21 = vmul.f32 %v21003_v29, %v21003_v29 }
 0x5bb   : > { %9752 = vadd.xlane.f32.xlu1 %v9751_v35 }
 0x5bc   : > { %22645 = vst [vmem:[#allocation21_spill] sm:$0xff] %v21008_v12  ;;  %v9743_v36 = vmul.f32 %v21008_v12, %v21008_v12  ;;  %v9766_v27 = vsel %vm2815_vm1, %v9744_v21, 0.0 }
 0x5bd   : > { %9640 = vadd.xlane.f32.xlu0 %v9639_v45 }
 0x5be   : > { %v9763_v62 = vsel %vm2815_vm1, %v9743_v36, 0.0 }
 0x5bf   : > { %9643 = vadd.xlane.f32.xlu1 %v9642_v40 }
 0x5c1   : > { %9761 = vadd.xlane.f32.xlu0 %v9760_v41 }
 0x5c3   : > { %9758 = vadd.xlane.f32.xlu1 %v9757_v22 }
 0x5c5   : > { %9646 = vadd.xlane.f32.xlu0 %v9645_v44 }
 0x5c7   : > { %9649 = vadd.xlane.f32.xlu1 %v9648_v43 }
 0x5c9   : > { %9767 = vadd.xlane.f32.xlu0 %v9766_v27 }
 0x5cb   : > { %9764 = vadd.xlane.f32.xlu1 %v9763_v62 }
 0x5cd   : > { %9652 = vadd.xlane.f32.xlu0 %v9651_v46 }
 0x5cf   : > { %9655 = vadd.xlane.f32.xlu1 %v9654_v14 }
 0x614   : > { %v21044_v63 = vpop.f32.mrf.mxu0 }
 0x615   : > { %22649 = vst [vmem:[#allocation24_spill] sm:$0xff] %v21044_v63 }
 0x616   : > { %v21050_v9 = vpop.f32.mrf.mxu0 }
 0x617   : > { %22651 = vst [vmem:[#allocation25_spill] sm:$0xff] %v21050_v9 }
 0x618   : > { %v21061_v21 = vpop.f32.mrf.mxu0 }
 0x61a   : > { %v21073_v14 = vpop.f32.mrf.mxu0 }
 0x61e   : > { %v21046_v45 = vpop.f32.mrf.mxu1 }
 0x61f   : > { %22650 = vst [vmem:[#allocation29_spill] sm:$0xff] %v21046_v45 }
 0x620   : > { %v21052_v53 = vpop.f32.mrf.mxu1 }
 0x621   : > { %22652 = vst [vmem:[#allocation30_spill] sm:$0xff] %v21052_v53 }
 0x622   : > { %v21063_v43 = vpop.f32.mrf.mxu1 }
 0x63a   : > { %v9750_v47 = vpop.xlane.xlu0 %9749 }
 0x63b   : > { %18471 = vrsqrt.f32 %v9750_v47  ;;  %vm9778_vm6 = vcmp.eq.f32.partialorder %v9750_v47, inf  ;;  %v9781_v34 = vand.u32 2147483648, %v9750_v47  ;;  %vm9780_vm7 = vcmp.eq.f32.partialorder %v9750_v47, 0.0 }
 0x63c   : > { %v9747_v31 = vpop.xlane.xlu1 %9746 }
 0x63d   : > { %18473 = vrsqrt.f32 %v9747_v31  ;;  %vm9771_vm8 = vcmp.eq.f32.partialorder %v9747_v31, inf  ;;  %vm9773_vm9 = vcmp.eq.f32.partialorder %v9747_v31, 0.0  ;;  %v9774_v33 = vand.u32 2147483648, %v9747_v31 }
 0x63e   : > { %v9635_v60 = vpop.xlane.xlu0 %9634 }
 0x63f   : > { %18475 = vrsqrt.f32 %v9635_v60  ;;  %vm9659_vm10 = vcmp.eq.f32.partialorder %v9635_v60, inf  ;;  %vm9661_vm11 = vcmp.eq.f32.partialorder %v9635_v60, 0.0  ;;  %v9662_v51 = vand.u32 2147483648, %v9635_v60 }
 0x640   : > { %v9638_v16 = vpop.xlane.xlu1 %9637 }
 0x641   : > { %18477 = vrsqrt.f32 %v9638_v16  ;;  %vm9666_vm12 = vcmp.eq.f32.partialorder %v9638_v16, inf  ;;  %vm9668_vm13 = vcmp.eq.f32.partialorder %v9638_v16, 0.0  ;;  %v9669_v28 = vand.u32 2147483648, %v9638_v16 }
 0x642   : > { %v21030_v20 = vpop.xlane.xlu0 %9755 }
 0x643   : > { %18479 = vrsqrt.f32 %v21030_v20  ;;  %vm9792_vm14 = vcmp.eq.f32.partialorder %v21030_v20, inf  ;;  %vm9794_vm15 = vcmp.eq.f32.partialorder %v21030_v20, 0.0  ;;  %v9795_v59 = vand.u32 2147483648, %v21030_v20 }
 0x644   : > { %v21033_v4 = vpop.xlane.xlu1 %9752 }
 0x645   : > { %18481 = vrsqrt.f32 %v21033_v4  ;;  %vm9785_vm2 = vcmp.eq.f32.partialorder %v21033_v4, inf  ;;  %vm9787_vm3 = vcmp.eq.f32.partialorder %v21033_v4, 0.0 }
 0x646   : > { %v21036_v18 = vpop.xlane.xlu0 %9640 }
 0x647   : > { %18483 = vrsqrt.f32 %v21036_v18  ;;  %vm9673_vm4 = vcmp.eq.f32.partialorder %v21036_v18, inf  ;;  %vm9675_vm5 = vcmp.eq.f32.partialorder %v21036_v18, 0.0 }
 0x648   : > { %v18472_v50 = vpop.eup %18471  ;;  %v21039_v13 = vpop.xlane.xlu1 %9643 }
 0x649   : > { %v9777_v49 = vmul.f32 %v18472_v50, %v9750_v47  ;;  %18485 = vrsqrt.f32 %v21039_v13 }
 0x64a   : > { %v18474_v0 = vpop.eup %18473  ;;  %v21042_v37 = vpop.xlane.xlu0 %9761 }
 0x64b   : > { %v9779_v54 = vsel %vm9778_vm6, %v9750_v47, %v9777_v49  ;;  %v9770_v2 = vmul.f32 %v18474_v0, %v9747_v31  ;;  %v21075_v47 = vpop.f32.mrf.mxu1  ;;  %v21081_v49 = vpop.f32.mrf.mxu0  ;;  %vm9680_vm6 = vcmp.eq.f32.partialorder %v21039_v13, inf }
 0x64c   : > { %v18476_v35 = vpop.eup %18475  ;;  %v9782_v57 = vsel %vm9780_vm7, %v9781_v34, %v9779_v54  ;;  %v21057_v22 = vpop.xlane.xlu1 %9758  ;;  %v9788_v34 = vand.u32 2147483648, %v21033_v4  ;;  %v9676_v54 = vand.u32 2147483648, %v21036_v18  ;;  %vm9682_vm7 = vcmp.eq.f32.partialorder %v21039_v13, 0.0 }
 0x64d   : > { %v9826_v32 = vmax.f32 %v9782_v57, 1e-12  ;;  %v9772_v1 = vsel %vm9771_vm8, %v9747_v31, %v9770_v2  ;;  %v9658_v6 = vmul.f32 %v18476_v35, %v9635_v60  ;;  %vm9806_vm8 = vcmp.eq.f32.partialorder %v21042_v37, inf }
 0x64e   : > { %v18478_v48 = vpop.eup %18477  ;;  %v9775_v8 = vsel %vm9773_vm9, %v9774_v33, %v9772_v1  ;;  %v21048_v15 = vpop.xlane.xlu0 %9646  ;;  %vm9808_vm9 = vcmp.eq.f32.partialorder %v21042_v37, 0.0 }
 0x64f   : > { %18487 = vrcp.f32 %v9826_v32  ;;  %v9825_v3 = vmax.f32 %v9775_v8, 1e-12  ;;  %v9660_v40 = vsel %vm9659_vm10, %v9635_v60, %v9658_v6  ;;  %v9665_v38 = vmul.f32 %v18478_v48, %v9638_v16  ;;  %v21094_v32 = vpop.f32.mrf.mxu0 }
 0x650   : > { %v18480_v23 = vpop.eup %18479  ;;  %v9663_v41 = vsel %vm9661_vm11, %v9662_v51, %v9660_v40  ;;  %18489 = vrsqrt.f32 %v21042_v37  ;;  %v21089_v2 = vpop.xlane.xlu1 %9649  ;;  %v9683_v8 = vand.u32 2147483648, %v21039_v13  ;;  %vm9799_vm10 = vcmp.eq.f32.partialorder %v21057_v22, inf }
 0x651   : > { %18491 = vrcp.f32 %v9825_v3  ;;  %v9713_v56 = vmax.f32 %v9663_v41, 1e-12  ;;  %v9667_v26 = vsel %vm9666_vm12, %v9638_v16, %v9665_v38  ;;  %v9791_v44 = vmul.f32 %v18480_v23, %v21030_v20 }
 0x652   : > { %v18482_v36 = vpop.eup %18481  ;;  %v9670_v27 = vsel %vm9668_vm13, %v9669_v28, %v9667_v26  ;;  %18493 = vrsqrt.f32 %v21048_v15  ;;  %v21113_v26 = vpop.xlane.xlu0 %9767  ;;  %vm9687_vm11 = vcmp.eq.f32.partialorder %v21048_v15, inf  ;;  %vm9801_vm12 = vcmp.eq.f32.partialorder %v21057_v22, 0.0 }
 0x653   : > { %18495 = vrcp.f32 %v9713_v56  ;;  %v9714_v62 = vmax.f32 %v9670_v27, 1e-12  ;;  %v9793_v5 = vsel %vm9792_vm14, %v21030_v20, %v9791_v44  ;;  %v9784_v46 = vmul.f32 %v18482_v36, %v21033_v4  ;;  %v21083_v20 = vpop.f32.mrf.mxu1 }
 0x654   : > { %v18484_v31 = vpop.eup %18483  ;;  %v9796_v60 = vsel %vm9794_vm15, %v9795_v59, %v9793_v5  ;;  %vm9689_vm13 = vcmp.eq.f32.partialorder %v21048_v15, 0.0  ;;  %vm9694_vm14 = vcmp.eq.f32.partialorder %v21089_v2, inf  ;;  %vm9696_vm15 = vcmp.eq.f32.partialorder %v21089_v2, 0.0 }
 0x655   : > { %18497 = vrcp.f32 %v9714_v62  ;;  %v9786_v16 = vsel %vm9785_vm2, %v21033_v4, %v9784_v46  ;;  %v9672_v50 = vmul.f32 %v18484_v31, %v21036_v18  ;;  %v9828_v35 = vmax.f32 %v9796_v60, 1e-12  ;;  %v21096_v1 = vpop.f32.mrf.mxu1 }
 0x656   : > { %v18486_v0 = vpop.eup %18485  ;;  %18499 = vrsqrt.f32 %v21057_v22  ;;  %v9789_v6 = vsel %vm9787_vm3, %v9788_v34, %v9786_v16  ;;  %vm9820_vm3 = vcmp.eq.f32.partialorder %v21113_v26, inf }
 0x657   : > { %v9674_v57 = vsel %vm9673_vm4, %v21036_v18, %v9672_v50  ;;  %v9679_v33 = vmul.f32 %v18486_v0, %v21039_v13  ;;  %18501 = vrsqrt.f32 %v21089_v2  ;;  %v21105_v18 = vpop.f32.mrf.mxu0  ;;  %v21107_v40 = vpop.f32.mrf.mxu1  ;;  %v9827_v4 = vmax.f32 %v9789_v6, 1e-12 }
 0x658   : > { %v9677_v48 = vsel %vm9675_vm5, %v9676_v54, %v9674_v57  ;;  %18503 = vrcp.f32 %v9828_v35  ;;  %v21138_v6 = vpop.xlane.xlu1 %9764 }
 0x659   : > { %v9715_v51 = vmax.f32 %v9677_v48, 1e-12  ;;  %v9681_v3 = vsel %vm9680_vm6, %v21039_v13, %v9679_v33  ;;  %v21109_v23 = vpop.f32.mrf.mxu0  ;;  %v21111_v41 = vpop.f32.mrf.mxu1  ;;  %vm9813_vm4 = vcmp.eq.f32.partialorder %v21138_v6, inf  ;;  %vm9822_vm6 = vcmp.eq.f32.partialorder %v21113_v26, 0.0 }
 0x65a   : > { %v9684_v38 = vsel %vm9682_vm7, %v9683_v8, %v9681_v3  ;;  %v21140_v48 = vpop.xlane.xlu0 %9652  ;;  %vm9815_vm7 = vcmp.eq.f32.partialorder %v21138_v6, 0.0 }
 0x65b   : > { %v9716_v56 = vmax.f32 %v9684_v38, 1e-12  ;;  %18505 = vrcp.f32 %v9715_v51  ;;  %v21115_v13 = vpop.f32.mrf.mxu0  ;;  %v21117_v36 = vpop.f32.mrf.mxu1  ;;  %v9802_v38 = vand.u32 2147483648, %v21057_v22  ;;  %vm9701_vm2 = vcmp.eq.f32.partialorder %v21140_v48, inf }
 0x65c   : > { %v18488_v28 = vpop.eup %18487  ;;  %22653 = vst [vmem:[#allocation32_spill] sm:$0xff] %v21115_v13  ;;  %22654 = vst [vmem:[#allocation36_spill] sm:$0xff] %v21117_v36  ;;  %18507 = vrcp.f32 %v9827_v4  ;;  %vm9703_vm5 = vcmp.eq.f32.partialorder %v21140_v48, 0.0 }
 0x65d   : > { %v18490_v44 = vpop.eup %18489  ;;  %v9836_v62 = vmul.f32 %v18488_v28, %v20923_v19  ;;  %v21121_v46 = vpop.f32.mrf.mxu0  ;;  %18509 = vrcp.f32 %v9716_v56  ;;  %v9809_v19 = vand.u32 2147483648, %v21042_v37 }
 0x65e   : > { %v18492_v27 = vpop.eup %18491  ;;  %22655 = vst [vmem:[#allocation33_spill] sm:$0xff] %v21121_v46  ;;  %v21123_v31 = vpop.f32.mrf.mxu1  ;;  %v9805_v54 = vmul.f32 %v18490_v44, %v21042_v37  ;;  %18511 = vrsqrt.f32 %v21113_v26 }
 0x65f   : > { %v18494_v59 = vpop.eup %18493  ;;  %v9834_v5 = vmul.f32 %v18492_v27, %v20929_v30  ;;  %22656 = vst [vmem:[#allocation38_spill] sm:$0xff] %v21123_v31  ;;  %v9859_v16 = vsel %vm2815_vm1, %v9836_v62, 0  ;;  %v21128_v0 = vpop.f32.mrf.mxu0  ;;  %18513 = vrsqrt.f32 %v21140_v48 }
 0x660   : > { %v18496_v60 = vpop.eup %18495  ;;  %v21133_v30 = vand.u32 4294901760, %v9859_v16  ;;  %v21135_v35 = vpop.f32.mrf.mxu1  ;;  %v9686_v33 = vmul.f32 %v18494_v59, %v21048_v15  ;;  %v9807_v27 = vsel %vm9806_vm8, %v21042_v37, %v9805_v54  ;;  %18515 = vrsqrt.f32 %v21138_v6 }
 0x661   : > { %v9856_v50 = vsel %vm2815_vm1, %v9834_v5, 0  ;;  %v9722_v51 = vmul.f32 %v18496_v60, %v20921_v17  ;;  %v21153_v28 = vpop.f32.mrf.mxu0  ;;  %v21194_v31 = vpop.xlane.xlu1 %9655 }
 0x662   : > { %v18498_v34 = vpop.eup %18497  ;;  %v21142_v8 = vand.u32 4294901760, %v9856_v50  ;;  %17783 = vmatprep.subr.mxu0 %v21133_v30  ;;  %v21151_v4 = vsub.f32 %v9859_v16, %v21133_v30  ;;  %v21171_v5 = vpop.f32.mrf.mxu1  ;;  %v9688_v60 = vsel %vm9687_vm11, %v21048_v15, %v9686_v33  ;;  %18517 = vrsqrt.f32 %v21194_v31 }
 0x663   : > { %v18500_v57 = vpop.eup %18499  ;;  %v9724_v3 = vmul.f32 %v18498_v34, %v20927_v42  ;;  %17784 = vmatpush3.xpose.msra.mxu0 %v21133_v30  ;;  %v9850_v17 = vsel %vm2815_vm1, %v9722_v51, 0  ;;  %22657 = vst [vmem:[#allocation41_spill] sm:$0xff] %v21171_v5  ;;  %v21191_v33 = vpop.f32.mrf.mxu0  ;;  %vm9708_vm8 = vcmp.eq.f32.partialorder %v21194_v31, inf }
 0x664   : > { %v21160_v42 = vsub.f32 %v9856_v50, %v21142_v8  ;;  %v18502_v44 = vpop.eup %18501  ;;  %v9798_v59 = vmul.f32 %v18500_v57, %v21057_v22  ;;  %17785 = vmatprep.subr.mxu0 %v21142_v8  ;;  %v21169_v62 = vand.u32 4294901760, %v9850_v17  ;;  %v21177_v16 = vand.u32 4294901760, %v21151_v4  ;;  %v21211_v9 = vpop.f32.mrf.mxu1 }
 0x665   : > { %v9853_v56 = vsel %vm2815_vm1, %v9724_v3, 0  ;;  %v18504_v54 = vpop.eup %18503  ;;  %v9690_v57 = vand.u32 2147483648, %v21048_v15  ;;  %v9693_v3 = vmul.f32 %v18502_v44, %v21089_v2  ;;  %22658 = vst [vmem:[#allocation27_spill] sm:$0xff] %v21211_v9 }
 0x666   : > { %v21180_v50 = vand.u32 4294901760, %v21160_v42  ;;  %v21182_v34 = vand.u32 4294901760, %v9853_v56  ;;  %17794 = vmatprep.mubr.f32.mxu1 %v21169_v62  ;;  %v21189_v51 = vsub.f32 %v9850_v17, %v21169_v62  ;;  %v9980_v36 = vsub.f32 %v21151_v4, %v21177_v16  ;;  %v21229_v9 = vpop.f32.mrf.mxu1 }
 0x667   : > { %17786 = vmatpush3.xpose.msra.mxu0 %v21142_v8  ;;  %v9810_v17 = vsel %vm9808_vm9, %v9809_v19, %v9807_v27  ;;  %v9800_v44 = vsel %vm9799_vm10, %v21057_v22, %v9798_v59  ;;  %v9691_v53 = vsel %vm9689_vm13, %v9690_v57, %v9688_v60  ;;  %v9840_v12 = vmul.f32 %v18504_v54, %v20937_v58  ;;  %v21219_v19 = vpop.f32.mrf.mxu0 }
 0x668   : > { %v9987_v15 = vsub.f32 %v21160_v42, %v21180_v50  ;;  %v21202_v46 = vsub.f32 %v9853_v56, %v21182_v34  ;;  %v18506_v13 = vpop.eup %18505  ;;  %17797 = vmatprep.subr.mxu0 %v21151_v4  ;;  %v9930_v45 = vand.u32 4294901760, %v21189_v51  ;;  %v9981_v11 = vand.u32 4294901760, %v9980_v36 }
 0x669   : > { %v18508_v29 = vpop.eup %18507  ;;  %v9830_v59 = vmax.f32 %v9810_v17, 1e-12  ;;  %v9695_v36 = vsel %vm9694_vm14, %v21089_v2, %v9693_v3  ;;  %v9726_v60 = vmul.f32 %v18506_v13, %v20953_v25  ;;  %v9803_v54 = vsel %vm9801_vm12, %v9802_v38, %v9800_v44  ;;  %v21237_v22 = vpop.f32.mrf.mxu0 }
 0x66a   : > { %v9988_v63 = vand.u32 4294901760, %v9987_v15  ;;  %v22470_v56 = vand.u32 4294901760, %v21202_v46  ;;  %v9931_v37 = vsub.f32 %v21189_v51, %v9930_v45  ;;  %v18510_v27 = vpop.eup %18509  ;;  %17790 = vmatprep.subr.mxu1 %v9981_v11  ;;  %v9717_v57 = vmax.f32 %v9691_v53, 1e-12 }
 0x66b   : > { %v9697_v15 = vand.u32 2147483648, %v21089_v2  ;;  %17791 = vmatpush3.xpose.msra.mxu1 %v9981_v11  ;;  %v10373_v3 = vsel %vm2815_vm1, %v9840_v12, 0  ;;  %v10364_v5 = vsel %vm2815_vm1, %v9726_v60, 0  ;;  %v9728_v53 = vmul.f32 %v18510_v27, %v20963_v24  ;;  %v18512_v38 = vpop.eup %18511  ;;  %v21248_v24 = vld [vmem:[%s22390_s5 + $0x1] ss:$0 sm:$0xff]  ;;  %v21260_v44 = vpop.f32.mrf.mxu0 }
 0x66c   : > { %v9941_v58 = vsub.f32 %v21202_v46, %v22470_v56  ;;  %v9932_v7 = vand.u32 4294901760, %v9931_v37  ;;  %17792 = vmatprep.subr.mxu1 %v9988_v63  ;;  %v9838_v56 = vmul.f32 %v18508_v29, %v20947_v55  ;;  %18519 = vrcp.f32 %v9830_v59  ;;  %v21250_v29 = vpop.f32.mrf.mxu1 }
 0x66d   : > { %v9698_v25 = vsel %vm9696_vm15, %v9697_v15, %v9695_v36  ;;  %v9829_v11 = vmax.f32 %v9803_v54, 1e-12  ;;  %v21239_v13 = vand.u32 4294901760, %v10364_v5  ;;  %18521 = vrcp.f32 %v9717_v57  ;;  %v21282_v60 = vpop.f32.mrf.mxu0 }
 0x66e   : > { %v9942_v17 = vand.u32 4294901760, %v9941_v58  ;;  %17787 = vmatprep.mubr.f32.mxu0 %v9932_v7  ;;  %v21242_v12 = vand.u32 4294901760, %v10373_v3  ;;  %v10370_v55 = vsel %vm2815_vm1, %v9838_v56, 0  ;;  %v18514_v7 = vpop.eup %18513  ;;  %v9718_v2 = vmax.f32 %v9698_v25, 1e-12 }
 0x66f   : > { %17793 = vmatpush3.xpose.msra.mxu1 %v9988_v63  ;;  %v21256_v63 = vadd.f32 %v21061_v21, %v21248_v24  ;;  %v18516_v56 = vpop.eup %18515  ;;  %18523 = vrcp.f32 %v9829_v11  ;;  %v21264_v37 = vsub.f32 %v10364_v5, %v21239_v13  ;;  %v21266_v27 = vand.u32 4294901760, %v10370_v55 }
 0x670   : > { %17788 = vmatmul.mubr.f32.vlgmr.msra.gmra.mxu0 %v9942_v17  ;;  %17804 = vmatprep.subr.mxu1 %v21133_v30  ;;  %v9700_v59 = vmul.f32 %v18514_v7, %v21140_v48  ;;  %v21271_v21 = vsub.f32 %v10373_v3, %v21242_v12  ;;  %18525 = vrcp.f32 %v9718_v2  ;;  %v9819_v5 = vmul.f32 %v18512_v38, %v21113_v26  ;;  %v21310_v38 = vpop.f32.mrf.mxu0 }
 0x671   : > { %17798 = vmatpush3.xpose.msra.mxu0 %v21151_v4  ;;  %17801 = vmatprep.mubr.f32.mxu0 %v21189_v51  ;;  %v10367_v4 = vsel %vm2815_vm1, %v9728_v53, 0  ;;  %v21273_v51 = vpop.f32.mrf.mxu1  ;;  %v9812_v58 = vmul.f32 %v18516_v56, %v21138_v6  ;;  %v22471_v54 = vand.u32 4294901760, %v21264_v37  ;;  %v21287_v57 = vsub.f32 %v10370_v55, %v21266_v27 }
 0x672   : > { %17799 = vmatprep.subr.mxu0 %v21160_v42  ;;  %17795 = vmatmul.mubr.f32.vlgmr.msra.gmra.mxu1 %v21182_v34  ;;  %v21277_v36 = vand.u32 4294901760, %v10367_v4  ;;  %v21293_v15 = vand.u32 4294901760, %v21271_v21  ;;  %v9704_v3 = vand.u32 2147483648, %v21140_v48  ;;  %v9821_v53 = vsel %vm9820_vm3, %v21113_v26, %v9819_v5 }
 0x673   : > { %17805 = vmatpush3.xpose.msra.mxu1 %v21133_v30  ;;  %17808 = vmatprep.mubr.f32.mxu1 %v9930_v45  ;;  %v18518_v45 = vpop.eup %18517  ;;  %v21295_v17 = vpop.f32.mrf.mxu1  ;;  %v9814_v11 = vsel %vm9813_vm4, %v21138_v6, %v9812_v58  ;;  %v22659_v7 = vand.u32 4294901760, %v21202_v46  ;;  %v10445_v2 = vsub.f32 %v21264_v37, %v22471_v54  ;;  %v9823_v56 = vand.u32 2147483648, %v21113_v26 }
 0x674   : > { %17806 = vmatprep.subr.mxu1 %v21142_v8  ;;  %v21303_v25 = vsub.f32 %v10367_v4, %v21277_v36  ;;  %v21319_v4 = vand.u32 4294901760, %v21287_v57  ;;  %v21330_v58 = vpop.f32.mrf.mxu0  ;;  %vm9710_vm9 = vcmp.eq.f32.partialorder %v21194_v31, 0.0 }
 0x675   : > { %17800 = vmatpush3.xpose.msra.mxu0 %v21160_v42  ;;  %v9702_v42 = vsel %vm9701_vm2, %v21140_v48, %v9700_v59  ;;  %v9816_v59 = vand.u32 2147483648, %v21138_v6  ;;  %v21328_v5 = vpop.f32.mrf.mxu1  ;;  %v8935_v6 = vadd.f32 %v21248_v24, %v21073_v14  ;;  %v10446_v54 = vand.u32 4294901760, %v10445_v2 }
 0x676   : > { %17811 = vmatprep.subr.mxu0 %v21177_v16  ;;  %v9705_v55 = vsel %vm9703_vm5, %v9704_v3, %v9702_v42  ;;  %v10454_v26 = vand.u32 4294901760, %v21303_v25  ;;  %v9474_v2 = vpop.f32.mrf.mxu0 }
 0x677   : > { %17807 = vmatpush3.xpose.msra.mxu1 %v21142_v8  ;;  %v9719_v42 = vmax.f32 %v9705_v55, 1e-12  ;;  %v21345_v3 = vpop.f32.mrf.mxu1 }
 0x678   : > { %17802 = vmatmul.mubr.f32.vlgmr.msra.gmra.mxu0 %v21202_v46  ;;  %17818 = vmatprep.subr.mxu1 %v21133_v30  ;;  %v10494_v46 = vsub.f32 %v21271_v21, %v21293_v15 }
 0x679   : > { %17812 = vmatpush3.xpose.msra.mxu0 %v21177_v16  ;;  %17815 = vmatprep.mubr.f32.mxu0 %v21169_v62  ;;  %v9707_v16 = vmul.f32 %v18518_v45, %v21194_v31  ;;  %v18520_v48 = vpop.eup %18519  ;;  %18527 = vrcp.f32 %v9719_v42 }
 0x67a   : > { %17813 = vmatprep.subr.mxu0 %v21180_v50  ;;  %17809 = vmatmul.mubr.f32.vlgmr.msra.gmra.mxu1 %v22659_v7  ;;  %v18522_v45 = vpop.eup %18521  ;;  %v9844_v55 = vmul.f32 %v18520_v48, %v20974_v52  ;;  %v8955_v52 = vadd.f32 %v21248_v24, %v21094_v32  ;;  %v8975_v48 = vadd.f32 %v21248_v24, %v21109_v23 }
 0x67b   : > { %17819 = vmatpush3.xpose.msra.mxu1 %v21133_v30  ;;  %17822 = vmatprep.mubr.f32.mxu1 %v21169_v62  ;;  %v21338_v30 = vsel %vm9822_vm6, %v9823_v56, %v9821_v53  ;;  %v21340_v62 = vsel %vm9815_vm7, %v9816_v59, %v9814_v11  ;;  %v9709_v7 = vsel %vm9708_vm8, %v21194_v31, %v9707_v16  ;;  %v10495_v11 = vand.u32 4294901760, %v10494_v46  ;;  %v9591_v46 = vpop.f32.mrf.mxu1 }
 0x67c   : > { %17820 = vmatprep.subr.mxu1 %v21142_v8  ;;  %v9094_v53 = vadd.f32 %v21063_v43, %v21256_v63  ;;  %v18524_v56 = vpop.eup %18523  ;;  %v9730_v14 = vmul.f32 %v18522_v45, %v20989_v61  ;;  %v8965_v16 = vadd.f32 %v21081_v49, %v21248_v24  ;;  %v9711_v59 = vand.u32 2147483648, %v21194_v31 }
 0x67d   : > { %17814 = vmatpush3.xpose.msra.mxu0 %v21180_v50  ;;  %v10501_v50 = vsub.f32 %v21287_v57, %v21319_v4  ;;  %v10455_v43 = vsub.f32 %v21303_v25, %v10454_v26  ;;  %v18526_v63 = vpop.eup %18525  ;;  %v9832_v61 = vmax.f32 %v21338_v30, 1e-12  ;;  %v9842_v45 = vmul.f32 %v18524_v56, %v20983_v10 }
 0x67e   : > { %17825 = vmatprep.subr.mxu0 %v21242_v12  ;;  %v9106_v49 = vadd.f32 %v21083_v20, %v8965_v16  ;;  %v9100_v30 = vadd.f32 %v21096_v1, %v8955_v52  ;;  %v9712_v20 = vsel %vm9710_vm9, %v9711_v59, %v9709_v7  ;;  %v9732_v10 = vmul.f32 %v18526_v63, %v20997_v39 }
 0x67f   : > { %17821 = vmatpush3.xpose.msra.mxu1 %v21142_v8  ;;  %v9088_v8 = vadd.f32 %v21075_v47, %v8935_v6  ;;  %v9831_v47 = vmax.f32 %v21340_v62, 1e-12  ;;  %v10502_v32 = vand.u32 4294901760, %v10501_v50  ;;  %v17759_v6 = vpop.f32.mrf.mxu0  ;;  %v9112_v1 = vadd.f32 %v21111_v41, %v8975_v48  ;;  %v17779_v50 = vpop.f32.mrf.mxu1 }
 0x680   : > { %17816 = vmatmul.mubr.f32.vlgmr.msra.gmra.mxu0 %v21182_v34  ;;  %17832 = vmatprep.subr.mxu1 %v10495_v11  ;;  %v9219_v31 = vadd.f32 %v21128_v0, %v9094_v53  ;;  %v10456_v62 = vand.u32 4294901760, %v10455_v43  ;;  %v9233_v7 = vadd.f32 %v21191_v33, %v9106_v49  ;;  %v22660_v53 = vld [vmem:[#allocation41_spill] sm:$0xff]  ;;  %18529 = vrcp.f32 %v9832_v61 }
 0x681   : > { %17826 = vmatpush3.xpose.msra.mxu0 %v21242_v12  ;;  %17829 = vmatprep.mubr.f32.mxu0 %v10446_v54  ;;  %v8985_v54 = vadd.f32 %v21105_v18, %v21248_v24  ;;  %v10878_v18 = vsel %vm2815_vm1, %v9730_v14, 0  ;;  %v9212_v42 = vadd.f32 %v21153_v28, %v9088_v8  ;;  %v22661_v28 = vld [vmem:[#allocation27_spill] sm:$0xff]  ;;  %v9720_v16 = vmax.f32 %v9712_v20, 1e-12  ;;  %v9603_v52 = vpop.f32.mrf.mxu1 }
 0x682   : > { %17827 = vmatprep.subr.mxu0 %v21266_v27  ;;  %17823 = vmatmul.mubr.f32.vlgmr.msra.gmra.mxu1 %v21182_v34  ;;  %v10887_v34 = vsel %vm2815_vm1, %v9844_v55, 0  ;;  %v21391_v56 = vand.u32 4294901760, %v10878_v18  ;;  %v9348_v39 = vadd.f32 %v21135_v35, %v9219_v31  ;;  %v9364_v14 = vadd.f32 %v22661_v28, %v9233_v7 }
 0x683   : > { %17833 = vmatpush3.xpose.msra.mxu1 %v10495_v11  ;;  %17836 = vmatprep.mubr.f32.mxu1 %v21239_v13  ;;  %v9118_v23 = vadd.f32 %v21107_v40, %v8985_v54  ;;  %v9226_v40 = vadd.f32 %v21219_v19, %v9100_v30  ;;  %v10884_v11 = vsel %vm2815_vm1, %v9842_v45, 0  ;;  %v21396_v0 = vand.u32 4294901760, %v10887_v34  ;;  %v9486_v19 = vpop.f32.mrf.mxu0 }
 0x684   : > { %17834 = vmatprep.subr.mxu1 %v10502_v32  ;;  %v9340_v55 = vadd.f32 %v22660_v53, %v9212_v42  ;;  %v9240_v35 = vadd.f32 %v21260_v44, %v9112_v1  ;;  %v21407_v59 = vand.u32 4294901760, %v10884_v11  ;;  %v10881_v43 = vsel %vm2815_vm1, %v9732_v10, 0 }
 0x685   : > { %17828 = vmatpush3.xpose.msra.mxu0 %v21266_v27  ;;  %v9247_v41 = vadd.f32 %v21237_v22, %v9118_v23  ;;  %v9356_v33 = vadd.f32 %v21229_v9, %v9226_v40  ;;  %v9481_v9 = vadd.f32 %v21330_v58, %v9348_v39  ;;  %18531 = vrcp.f32 %v9831_v47  ;;  %v17762_v54 = vpop.f32.mrf.mxu0  ;;  %v22665_v40 = vld [vmem:[#allocation21_spill] sm:$0xff]  ;;  %v22666_v39 = vld [vmem:[#allocation24_spill] sm:$0xff] }
 0x686   : > { %17839 = vmatprep.subr.mxu0 %v21271_v21  ;;  %v9475_v8 = vadd.f32 %v9474_v2, %v9340_v55  ;;  %v21416_v44 = vadd.f32 %v21273_v51, %v9240_v35  ;;  %v22662_v61 = vand.u32 4294901760, %v21264_v37  ;;  %v21422_v58 = vsub.f32 %v10887_v34, %v21396_v0  ;;  %v18528_v30 = vpop.eup %18527  ;;  %v22667_v55 = vld [vmem:[#allocation17_spill] sm:$0xff] }
 0x687   : > { %17835 = vmatpush3.xpose.msra.mxu1 %v10502_v32  ;;  %v9380_v22 = vadd.f32 %v21250_v29, %v9247_v41  ;;  %v9493_v29 = vadd.f32 %v17759_v6, %v9364_v14  ;;  %v9487_v63 = vadd.f32 %v9486_v19, %v9356_v33  ;;  %v21425_v2 = vadd.f32 %v21345_v3, %v9481_v9  ;;  %v17782_v32 = vpop.f32.mrf.mxu1  ;;  %v22668_v19 = vld [vmem:[#allocation25_spill] sm:$0xff] }
 0x688   : > { %17830 = vmatmul.mubr.f32.vlgmr.msra.gmra.mxu0 %v10456_v62  ;;  %17846 = vmatprep.subr.mxu1 %v21242_v12  ;;  %v21427_v49 = vadd.f32 %v9591_v46, %v9475_v8  ;;  %18533 = vrcp.f32 %v9720_v16  ;;  %v21440_v46 = vsub.f32 %v10884_v11, %v21407_v59  ;;  %v8925_v41 = vadd.f32 %v22666_v39, %v21248_v24  ;;  %v22669_v35 = vld [vmem:[#allocation29_spill] sm:$0xff] }
 0x689   : > { %17840 = vmatpush3.xpose.msra.mxu0 %v21271_v21  ;;  %17843 = vmatprep.mubr.f32.mxu0 %v21264_v37  ;;  %v21413_v21 = vsub.f32 %v10878_v18, %v21391_v56  ;;  %v21431_v51 = vadd.f32 %v17779_v50, %v9493_v29  ;;  %v9505_v48 = vadd.f32 %v17762_v54, %v9380_v22  ;;  %v21436_v37 = vand.u32 4294901760, %v10881_v43 }
 0x68a   : > { %17841 = vmatprep.subr.mxu0 %v21287_v57  ;;  %17837 = vmatmul.mubr.f32.vlgmr.msra.gmra.mxu1 %v21277_v36  ;;  %v21433_v47 = vadd.f32 %v9603_v52, %v9487_v63  ;;  %v21462_v23 = vand.u32 4294901760, %v21440_v46  ;;  %v8915_v16 = vadd.f32 %v21248_v24, %v22668_v19  ;;  %v9082_v22 = vadd.f32 %v22669_v35, %v8925_v41  ;;  %v22670_v52 = vld [vmem:[#allocation30_spill] sm:$0xff]  ;;  %v22671_v63 = vld [vmem:[#allocation32_spill] sm:$0xff] }
 0x68b   : > { %17847 = vmatpush3.xpose.msra.mxu1 %v21242_v12  ;;  %17850 = vmatprep.mubr.f32.mxu1 %v22662_v61  ;;  %v10958_v3 = vand.u32 4294901760, %v21413_v21  ;;  %v21442_v45 = vadd.f32 %v17782_v32, %v9505_v48  ;;  %v21454_v20 = vsub.f32 %v10881_v43, %v21436_v37  ;;  %v22672_v32 = vld [vmem:[#allocation33_spill] sm:$0xff] }
 0x68c   : > { %17848 = vmatprep.subr.mxu1 %v21266_v27  ;;  %v11015_v34 = vsub.f32 %v21440_v46, %v21462_v23  ;;  %v9076_v29 = vadd.f32 %v22670_v52, %v8915_v16  ;;  %v9205_v61 = vadd.f32 %v22671_v63, %v9082_v22  ;;  %v21598_v63 = vstv %s15775_s30  ;;  %s15790_s30 = sshll.u32 %s18762_s17, 10  ;;  %s22345_s17 = scalar_lea.sflag [#allocation4], %s380_s28 }
 0x68d   : > { %17842 = vmatpush3.xpose.msra.mxu0 %v21287_v57  ;;  %v21447_v57 = vand.u32 4294901760, %v21422_v58  ;;  %v10959_v18 = vsub.f32 %v21413_v21, %v10958_v3  ;;  %s22335_s21 = scalar_lea.hbm %s22395_s10, %s15790_s30 }
 0x68e   : > { %17853 = vmatprep.subr.mxu0 %v21293_v15  ;;  %v11016_v42 = vand.u32 4294901760, %v11015_v34 }
 0x68f   : > { %17849 = vmatpush3.xpose.msra.mxu1 %v21266_v27  ;;  %v10960_v6 = vand.u32 4294901760, %v10959_v18 }
 0x690   : > { %17844 = vmatmul.mubr.f32.vlgmr.msra.gmra.mxu0 %v21303_v25  ;;  %17860 = vmatprep.subr.mxu1 %v21242_v12  ;;  %v18530_v25 = vpop.eup %18529 }
 0x691   : > { %17854 = vmatpush3.xpose.msra.mxu0 %v21293_v15  ;;  %17857 = vmatprep.mubr.f32.mxu0 %v21239_v13  ;;  %v11008_v15 = vsub.f32 %v21422_v58, %v21447_v57 }
 0x692   : > { %17855 = vmatprep.subr.mxu0 %v21319_v4  ;;  %17851 = vmatmul.mubr.f32.vlgmr.msra.gmra.mxu1 %v10454_v26  ;;  %v10968_v26 = vand.u32 4294901760, %v21454_v20  ;;  %v18532_v1 = vpop.eup %18531 }
 0x693   : > { %17861 = vmatpush3.xpose.msra.mxu1 %v21242_v12  ;;  %17864 = vmatprep.mubr.f32.mxu1 %v21239_v13  ;;  %v11009_v13 = vand.u32 4294901760, %v11008_v15  ;;  %v22663_v12 = vld [vmem:[#allocation26_spill] sm:$0xff]  ;;  %v9846_v50 = vmul.f32 %v18532_v1, %v22665_v40  ;;  %v21594_v40 = vpop.f32.mrf.mxu0 }
 0x694   : > { %17862 = vmatprep.subr.mxu1 %v21266_v27  ;;  %v9734_v10 = vmul.f32 %v18528_v30, %v22663_v12  ;;  %v10969_v62 = vsub.f32 %v21454_v20, %v10968_v26 }
 0x695   : > { %17856 = vmatpush3.xpose.msra.mxu0 %v21319_v4  ;;  %v22664_v4 = vld [vmem:[#allocation23_spill] sm:$0xff]  ;;  %v11398_v33 = vsel %vm2815_vm1, %v9846_v50, 0  ;;  %v21596_v50 = vpop.f32.mrf.mxu1 }
 0x696   : > { %17867 = vmatprep.subr.mxu0 %v21396_v0  ;;  %v9848_v31 = vmul.f32 %v18530_v25, %v22664_v4  ;;  %v11392_v7 = vsel %vm2815_vm1, %v9734_v10, 0  ;;  %v21509_v9 = vand.u32 4294901760, %v11398_v33 }
 0x697   : > { %17863 = vmatpush3.xpose.msra.mxu1 %v21266_v27  ;;  %v18534_v27 = vpop.eup %18533  ;;  %v21492_v53 = vand.u32 4294901760, %v11392_v7 }
 0x698   : > { %17858 = vmatmul.mubr.f32.vlgmr.msra.gmra.mxu0 %v21277_v36  ;;  %17874 = vmatprep.subr.mxu1 %v11009_v13  ;;  %v11401_v11 = vsel %vm2815_vm1, %v9848_v31, 0  ;;  %v9736_v28 = vmul.f32 %v18534_v27, %v22667_v55  ;;  %v11527_v48 = vsub.f32 %v11398_v33, %v21509_v9 }
 0x699   : > { %17868 = vmatpush3.xpose.msra.mxu0 %v21396_v0  ;;  %17871 = vmatprep.mubr.f32.mxu0 %v10960_v6  ;;  %v21495_v14 = vand.u32 4294901760, %v11401_v11  ;;  %v21507_v43 = vsub.f32 %v11392_v7, %v21492_v53  ;;  %v22674_v6 = vld [vmem:[#allocation38_spill] sm:$0xff] }
 0x69a   : > { %17869 = vmatprep.subr.mxu0 %v21407_v59  ;;  %17865 = vmatmul.mubr.f32.vlgmr.msra.gmra.mxu1 %v21277_v36  ;;  %v10970_v36 = vand.u32 4294901760, %v10969_v62  ;;  %v11395_v8 = vsel %vm2815_vm1, %v9736_v28, 0  ;;  %v11528_v25 = vand.u32 4294901760, %v11527_v48 }
 0x69b   : > { %17875 = vmatpush3.xpose.msra.mxu1 %v11009_v13  ;;  %17878 = vmatprep.mubr.f32.mxu1 %v21391_v56  ;;  %v11520_v24 = vsub.f32 %v11401_v11, %v21495_v14  ;;  %v11472_v54 = vand.u32 4294901760, %v21507_v43 }
 0x69c   : > { %17876 = vmatprep.subr.mxu1 %v11016_v42  ;;  %v11529_v12 = vsub.f32 %v11527_v48, %v11528_v25 }
 0x69d   : > { %17870 = vmatpush3.xpose.msra.mxu0 %v21407_v59  ;;  %v11473_v15 = vsub.f32 %v21507_v43, %v11472_v54 }
 0x69e   : > { %17881 = vmatprep.subr.mxu0 %v21422_v58  ;;  %v11530_v10 = vand.u32 4294901760, %v11529_v12 }
 0x69f   : > { %17877 = vmatpush3.xpose.msra.mxu1 %v11016_v42 }
 0x6a0   : > { %17872 = vmatmul.mubr.f32.vlgmr.msra.gmra.mxu0 %v10970_v36  ;;  %17888 = vmatprep.subr.mxu1 %v21396_v0 }
 0x6a1   : > { %17882 = vmatpush3.xpose.msra.mxu0 %v21422_v58  ;;  %17885 = vmatprep.mubr.f32.mxu0 %v21413_v21  ;;  %v21521_v58 = vand.u32 4294901760, %v11395_v8  ;;  %v11521_v21 = vand.u32 4294901760, %v11520_v24 }
 0x6a2   : > { %17883 = vmatprep.subr.mxu0 %v21440_v46  ;;  %17879 = vmatmul.mubr.f32.vlgmr.msra.gmra.mxu1 %v21436_v37 }
 0x6a3   : > { %17889 = vmatpush3.xpose.msra.mxu1 %v21396_v0  ;;  %17892 = vmatprep.mubr.f32.mxu1 %v10958_v3  ;;  %v9198_v3 = vadd.f32 %v22672_v32, %v9076_v29  ;;  %v11481_v18 = vsub.f32 %v11395_v8, %v21521_v58  ;;  %v15776_v32 = vld [vmem:[%s22393_s8 + $0x40] sm:$0xff] }
 0x6a4   : > { %17890 = vmatprep.subr.mxu1 %v21407_v59 }
 0x6a5   : > { %17884 = vmatpush3.xpose.msra.mxu0 %v21440_v46  ;;  %v22673_v46 = vld [vmem:[#allocation36_spill] sm:$0xff]  ;;  %v9324_v34 = vadd.f32 %v22674_v6, %v9198_v3 }
 0x6a6   : > { %17895 = vmatprep.subr.mxu0 %v21447_v57  ;;  %v9332_v30 = vadd.f32 %v22673_v46, %v9205_v61 }
 0x6a7   : > { %17891 = vmatpush3.xpose.msra.mxu1 %v21407_v59 }
 0x6a8   : > { %17886 = vmatmul.mubr.f32.vlgmr.msra.gmra.mxu0 %v21454_v20  ;;  %17902 = vmatprep.subr.mxu1 %v21396_v0  ;;  %v9469_v13 = vadd.f32 %v21282_v60, %v9332_v30  ;;  %v11482_v20 = vand.u32 4294901760, %v11481_v18 }
 0x6a9   : > { %17896 = vmatpush3.xpose.msra.mxu0 %v21447_v57  ;;  %17899 = vmatprep.mubr.f32.mxu0 %v21391_v56  ;;  %v11522_v57 = vsub.f32 %v11520_v24, %v11521_v21 }
 0x6aa   : > { %17897 = vmatprep.subr.mxu0 %v21462_v23  ;;  %17893 = vmatmul.mubr.f32.vlgmr.msra.gmra.mxu1 %v10968_v26  ;;  %v11474_v26 = vand.u32 4294901760, %v11473_v15  ;;  %v11483_v60 = vsub.f32 %v11481_v18, %v11482_v20 }
 0x6ab   : > { %17903 = vmatpush3.xpose.msra.mxu1 %v21396_v0  ;;  %17906 = vmatprep.mubr.f32.mxu1 %v21391_v56  ;;  %v11523_v0 = vand.u32 4294901760, %v11522_v57  ;;  %v9463_v56 = vadd.f32 %v21310_v38, %v9324_v34 }
 0x6ac   : > { %17904 = vmatprep.subr.mxu1 %v21407_v59  ;;  %v11484_v38 = vand.u32 4294901760, %v11483_v60 }
 0x6ad   : > { %17898 = vmatpush3.xpose.msra.mxu0 %v21462_v23  ;;  %v9586_v23 = vadd.f32 %v21295_v17, %v9469_v13  ;;  %v9580_v1 = vadd.f32 %v21328_v5, %v9463_v56 }
 0x6ae   : > { %17909 = vmatprep.subr.mxu0 %v21495_v14 }
 0x6af   : > { %17905 = vmatpush3.xpose.msra.mxu1 %v21407_v59  ;;  %v21553_v59 = vand.u32 4294901760, %v9586_v23 }
 0x6b0   : > { %17900 = vmatmul.mubr.f32.vlgmr.msra.gmra.mxu0 %v21436_v37  ;;  %17916 = vmatprep.subr.mxu1 %v11523_v0 }
 0x6b1   : > { %17910 = vmatpush3.xpose.msra.mxu0 %v21495_v14  ;;  %17913 = vmatprep.mubr.f32.mxu0 %v11474_v26  ;;  %v21558_v17 = vsub.f32 %v9586_v23, %v21553_v59 }
 0x6b2   : > { %17911 = vmatprep.subr.mxu0 %v21509_v9  ;;  %17907 = vmatmul.mubr.f32.vlgmr.msra.gmra.mxu1 %v21436_v37  ;;  %v21560_v37 = vand.u32 4294901760, %v9580_v1 }
 0x6b3   : > { %17917 = vmatpush3.xpose.msra.mxu1 %v11523_v0  ;;  %17920 = vmatprep.mubr.f32.mxu1 %v21492_v53  ;;  %v21570_v4 = vand.u32 4294901760, %v21558_v17 }
 0x6b4   : > { %17918 = vmatprep.subr.mxu1 %v11530_v10  ;;  %v21567_v5 = vsub.f32 %v9580_v1, %v21560_v37 }
 0x6b5   : > { %17912 = vmatpush3.xpose.msra.mxu0 %v21509_v9  ;;  %v12145_v31 = vsub.f32 %v21558_v17, %v21570_v4 }
 0x6b6   : > { %17923 = vmatprep.subr.mxu0 %v11520_v24  ;;  %v21577_v62 = vand.u32 4294901760, %v21567_v5 }
 0x6b7   : > { %17919 = vmatpush3.xpose.msra.mxu1 %v11530_v10  ;;  %v12146_v42 = vand.u32 4294901760, %v12145_v31 }
 0x6b8   : > { %17914 = vmatmul.mubr.f32.vlgmr.msra.gmra.mxu0 %v11484_v38  ;;  %17930 = vmatprep.subr.mxu1 %v21495_v14  ;;  %v12152_v27 = vsub.f32 %v21567_v5, %v21577_v62 }
 0x6b9   : > { %17924 = vmatpush3.xpose.msra.mxu0 %v11520_v24  ;;  %17927 = vmatprep.mubr.f32.mxu0 %v21507_v43 }
 0x6ba   : > { %17925 = vmatprep.subr.mxu0 %v11527_v48  ;;  %17921 = vmatmul.mubr.f32.vlgmr.msra.gmra.mxu1 %v21521_v58  ;;  %v12153_v7 = vand.u32 4294901760, %v12152_v27 }
 0x6bb   : > { %17931 = vmatpush3.xpose.msra.mxu1 %v21495_v14  ;;  %17934 = vmatprep.mubr.f32.mxu1 %v11472_v54  ;;  %v15777_v54 = vld [vmem:[%s22393_s8 + $0x48] sm:$0xff] }
 0x6bc   : > { %17932 = vmatprep.subr.mxu1 %v21509_v9 }
 0x6bd   : > { %17926 = vmatpush3.xpose.msra.mxu0 %v11527_v48 }
 0x6be   : > { %17937 = vmatprep.subr.mxu0 %v11521_v21 }
 0x6bf   : > { %17933 = vmatpush3.xpose.msra.mxu1 %v21509_v9 }
 0x6c0   : > { %17928 = vmatmul.mubr.f32.vlgmr.msra.gmra.mxu0 %v11481_v18  ;;  %17944 = vmatprep.subr.mxu1 %v21495_v14 }
 0x6c1   : > { %17938 = vmatpush3.xpose.msra.mxu0 %v11521_v21  ;;  %17941 = vmatprep.mubr.f32.mxu0 %v21492_v53 }
 0x6c2   : > { %17939 = vmatprep.subr.mxu0 %v11528_v25  ;;  %17935 = vmatmul.mubr.f32.vlgmr.msra.gmra.mxu1 %v11482_v20 }
 0x6c3   : > { %17945 = vmatpush3.xpose.msra.mxu1 %v21495_v14  ;;  %17948 = vmatprep.mubr.f32.mxu1 %v21492_v53 }
 0x6c4   : > { %17946 = vmatprep.subr.mxu1 %v21509_v9 }
 0x6c5   : > { %17940 = vmatpush3.xpose.msra.mxu0 %v11528_v25 }
 0x6c6   : > { %17951 = vmatprep.subr.mxu0 %v21553_v59 }
 0x6c7   : > { %17947 = vmatpush3.xpose.msra.mxu1 %v21509_v9 }
 0x6c8   : > { %17942 = vmatmul.mubr.f32.vlgmr.msra.gmra.mxu0 %v21521_v58  ;;  %17958 = vmatprep.subr.mxu1 %v12146_v42 }
 0x6c9   : > { %17952 = vmatpush3.msra.mxu0 %v21553_v59 }
 0x6ca   : > { %17953 = vmatprep.subr.mxu0 %v21560_v37  ;;  %17949 = vmatmul.mubr.f32.vlgmr.msra.gmra.mxu1 %v21521_v58 }
 0x6cb   : > { %17954 = vmatpush3.msra.mxu0 %v21560_v37  ;;  %17959 = vmatpush3.msra.mxu1 %v12146_v42 }
 0x6cc   : > { %17965 = vmatprep.subr.mxu0 %v21558_v17  ;;  %17960 = vmatprep.subr.mxu1 %v12153_v7 }
 0x6cd   : > { %17961 = vmatpush3.msra.mxu1 %v12153_v7 }
 0x6ce   : > { %17972 = vmatprep.subr.mxu1 %v21553_v59 }
 0x730   : > { %v17789_v11 = vpop.f32.mrf.mxu0 }
 0x732   : > { %v17796_v39 = vpop.f32.mrf.mxu1  ;;  %v9934_v41 = vpop.f32.mrf.mxu0 }
 0x733   : > { %v10032_v55 = vadd.f32 %v17796_v39, %v17789_v11 }
 0x734   : > { %v10025_v36 = vpop.f32.mrf.mxu1 }
 0x735   : > { %v10026_v14 = vadd.f32 %v10025_v36, %v9934_v41  ;;  %v15779_v41 = vld [vmem:[%s22393_s8 + $0x58] sm:$0xff] }
 0x738   : > { %v17803_v53 = vpop.f32.mrf.mxu0 }
 0x739   : > { %v10115_v33 = vadd.f32 %v17803_v53, %v10032_v55  ;;  %v15778_v55 = vld [vmem:[%s22393_s8 + $0x50] sm:$0xff] }
 0x73a   : > { %v10107_v28 = vpop.f32.mrf.mxu0  ;;  %v17810_v19 = vpop.f32.mrf.mxu1 }
 0x73b   : > { %v10108_v16 = vadd.f32 %v10107_v28, %v10026_v14  ;;  %v10198_v22 = vadd.f32 %v17810_v19, %v10115_v33 }
 0x73c   : > { %v10189_v35 = vpop.f32.mrf.mxu1 }
 0x73d   : > { %v10190_v9 = vadd.f32 %v10189_v35, %v10108_v16 }
 0x740   : > { %v17817_v43 = vpop.f32.mrf.mxu0 }
 0x741   : > { %v10281_v8 = vadd.f32 %v17817_v43, %v10198_v22 }
 0x742   : > { %v10274_v24 = vpop.f32.mrf.mxu0  ;;  %v17824_v29 = vpop.f32.mrf.mxu1 }
 0x743   : > { %v10275_v52 = vadd.f32 %v10274_v24, %v10190_v9  ;;  %v10360_v61 = vadd.f32 %v17824_v29, %v10281_v8 }
 0x744   : > { %v10353_v58 = vpop.f32.mrf.mxu1 }
 0x745   : > { %v11908_v48 = vmul.f32 %v21598_v63, %v10360_v61  ;;  %v10354_v21 = vadd.f32 %v10353_v58, %v10275_v52 }
 0x747   : > { %v11907_v3 = vmul.f32 %v21598_v63, %v10354_v21  ;;  %v21608_v46 = vadd.f32 %v15777_v54, %v11908_v48 }
 0x748   : > { %v17831_v30 = vpop.f32.mrf.mxu0 }
 0x749   : > { %v11935_v18 = vsel %vm2815_vm1, %v21608_v46, -inf  ;;  %v21612_v15 = vadd.f32 %v15776_v32, %v11907_v3 }
 0x74a   : > { %11936 = vmax.xlane.f32.xlu1 %v11935_v18  ;;  %v17838_v25 = vpop.f32.mrf.mxu1  ;;  %v10448_v6 = vpop.f32.mrf.mxu0 }
 0x74b   : > { %v11932_v57 = vsel %vm2815_vm1, %v21612_v15, -inf  ;;  %v10546_v20 = vadd.f32 %v17838_v25, %v17831_v30 }
 0x74c   : > { %11933 = vmax.xlane.f32.xlu0 %v11932_v57  ;;  %v10539_v34 = vpop.f32.mrf.mxu1 }
 0x74d   : > { %v10540_v12 = vadd.f32 %v10539_v34, %v10448_v6 }
 0x750   : > { %v17845_v13 = vpop.f32.mrf.mxu0 }
 0x751   : > { %v10629_v0 = vadd.f32 %v17845_v13, %v10546_v20  ;;  %v15781_v13 = vld [vmem:[%s22393_s8 + $0x68] sm:$0xff] }
 0x752   : > { %v10621_v26 = vpop.f32.mrf.mxu0  ;;  %v17852_v56 = vpop.f32.mrf.mxu1 }
 0x753   : > { %v10622_v23 = vadd.f32 %v10621_v26, %v10540_v12  ;;  %v10712_v10 = vadd.f32 %v17852_v56, %v10629_v0  ;;  %v15780_v12 = vld [vmem:[%s22393_s8 + $0x60] sm:$0xff] }
 0x754   : > { %v10703_v60 = vpop.f32.mrf.mxu1 }
 0x755   : > { %v10704_v38 = vadd.f32 %v10703_v60, %v10622_v23 }
 0x758   : > { %v17859_v1 = vpop.f32.mrf.mxu0 }
 0x759   : > { %v10795_v31 = vadd.f32 %v17859_v1, %v10712_v10 }
 0x75a   : > { %v10788_v42 = vpop.f32.mrf.mxu0  ;;  %v17866_v7 = vpop.f32.mrf.mxu1 }
 0x75b   : > { %v10789_v27 = vadd.f32 %v10788_v42, %v10704_v38  ;;  %v10874_v11 = vadd.f32 %v17866_v7, %v10795_v31 }
 0x75c   : > { %v10867_v39 = vpop.f32.mrf.mxu1 }
 0x75d   : > { %v11910_v36 = vmul.f32 %v21598_v63, %v10874_v11  ;;  %v10868_v53 = vadd.f32 %v10867_v39, %v10789_v27 }
 0x75f   : > { %v11909_v28 = vmul.f32 %v21598_v63, %v10868_v53  ;;  %v21624_v14 = vadd.f32 %v15779_v41, %v11910_v36 }
 0x760   : > { %v17873_v33 = vpop.f32.mrf.mxu0 }
 0x761   : > { %v11941_v19 = vsel %vm2815_vm1, %v21624_v14, -inf  ;;  %v21628_v16 = vadd.f32 %v15778_v55, %v11909_v28 }
 0x762   : > { %11942 = vmax.xlane.f32.xlu1 %v11941_v19  ;;  %v17880_v35 = vpop.f32.mrf.mxu1  ;;  %v10962_v43 = vpop.f32.mrf.mxu0 }
 0x763   : > { %v11938_v22 = vsel %vm2815_vm1, %v21628_v16, -inf  ;;  %v11060_v24 = vadd.f32 %v17880_v35, %v17873_v33 }
 0x764   : > { %11939 = vmax.xlane.f32.xlu0 %v11938_v22  ;;  %v11053_v9 = vpop.f32.mrf.mxu1 }
 0x765   : > { %v11054_v29 = vadd.f32 %v11053_v9, %v10962_v43 }
 0x768   : > { %v17887_v8 = vpop.f32.mrf.mxu0 }
 0x769   : > { %v11143_v61 = vadd.f32 %v17887_v8, %v11060_v24 }
 0x76a   : > { %v11135_v52 = vpop.f32.mrf.mxu0  ;;  %v17894_v58 = vpop.f32.mrf.mxu1 }
 0x76b   : > { %v11136_v54 = vadd.f32 %v11135_v52, %v11054_v29  ;;  %v11226_v21 = vadd.f32 %v17894_v58, %v11143_v61  ;;  %v15783_v52 = vld [vmem:[%s22393_s8 + $0x78] sm:$0xff]  ;;  %v15782_v58 = vld [vmem:[%s22393_s8 + $0x70] sm:$0xff] }
 0x76c   : > { %v11217_v48 = vpop.f32.mrf.mxu1 }
 0x76d   : > { %v11218_v3 = vadd.f32 %v11217_v48, %v11136_v54 }
 0x770   : > { %v17901_v32 = vpop.f32.mrf.mxu0 }
 0x771   : > { %v11309_v30 = vadd.f32 %v17901_v32, %v11226_v21 }
 0x772   : > { %v11302_v18 = vpop.f32.mrf.mxu0  ;;  %v17908_v57 = vpop.f32.mrf.mxu1 }
 0x773   : > { %v11303_v25 = vadd.f32 %v11302_v18, %v11218_v3  ;;  %v11388_v6 = vadd.f32 %v17908_v57, %v11309_v30 }
 0x774   : > { %v11381_v34 = vpop.f32.mrf.mxu1 }
 0x775   : > { %v11912_v20 = vmul.f32 %v21598_v63, %v11388_v6  ;;  %v11382_v26 = vadd.f32 %v11381_v34, %v11303_v25 }
 0x777   : > { %v11911_v0 = vmul.f32 %v21598_v63, %v11382_v26  ;;  %v21640_v56 = vadd.f32 %v15781_v13, %v11912_v20 }
 0x778   : > { %v17915_v23 = vpop.f32.mrf.mxu0 }
 0x779   : > { %v11947_v60 = vsel %vm2815_vm1, %v21640_v56, -inf  ;;  %v21644_v10 = vadd.f32 %v15780_v12, %v11911_v0 }
 0x77a   : > { %11948 = vmax.xlane.f32.xlu1 %v11947_v60  ;;  %v17922_v1 = vpop.f32.mrf.mxu1  ;;  %v11476_v31 = vpop.f32.mrf.mxu0 }
 0x77b   : > { %v11944_v38 = vsel %vm2815_vm1, %v21644_v10, -inf  ;;  %v11574_v7 = vadd.f32 %v17922_v1, %v17915_v23 }
 0x77c   : > { %11945 = vmax.xlane.f32.xlu0 %v11944_v38  ;;  %v11567_v42 = vpop.f32.mrf.mxu1 }
 0x77d   : > { %v11568_v39 = vadd.f32 %v11567_v42, %v11476_v31 }
 0x780   : > { %v17929_v27 = vpop.f32.mrf.mxu0 }
 0x781   : > { %v11657_v41 = vadd.f32 %v17929_v27, %v11574_v7 }
 0x782   : > { %v11649_v11 = vpop.f32.mrf.mxu0  ;;  %v17936_v36 = vpop.f32.mrf.mxu1 }
 0x783   : > { %v11650_v53 = vadd.f32 %v11649_v11, %v11568_v39  ;;  %v11740_v28 = vadd.f32 %v17936_v36, %v11657_v41 }
 0x784   : > { %v11731_v55 = vpop.f32.mrf.mxu1 }
 0x785   : > { %v11732_v19 = vadd.f32 %v11731_v55, %v11650_v53 }
 0x788   : > { %v17943_v33 = vpop.f32.mrf.mxu0 }
 0x789   : > { %v11823_v35 = vadd.f32 %v17943_v33, %v11740_v28 }
 0x78a   : > { %v11816_v22 = vpop.f32.mrf.mxu0  ;;  %v17950_v9 = vpop.f32.mrf.mxu1 }
 0x78b   : > { %v11817_v43 = vadd.f32 %v11816_v22, %v11732_v19  ;;  %v11902_v8 = vadd.f32 %v17950_v9, %v11823_v35 }
 0x78c   : > { %v11895_v24 = vpop.f32.mrf.mxu1 }
 0x78d   : > { %v11914_v29 = vmul.f32 %v21598_v63, %v11902_v8  ;;  %v11896_v61 = vadd.f32 %v11895_v24, %v11817_v43 }
 0x78f   : > { %v11913_v54 = vmul.f32 %v21598_v63, %v11896_v61  ;;  %v11931_v48 = vadd.f32 %v15783_v52, %v11914_v29  ;;  %v21691_v29 = vand.u32 4294901760, %v21425_v2 }
 0x791   : > { %v11953_v21 = vsel %vm2815_vm1, %v11931_v48, -inf  ;;  %v11930_v32 = vadd.f32 %v15782_v58, %v11913_v54 }
 0x792   : > { %11954 = vmax.xlane.f32.xlu1 %v11953_v21  ;;  %v21698_v21 = vsub.f32 %v21425_v2, %v21691_v29 }
 0x793   : > { %v11950_v3 = vsel %vm2815_vm1, %v11930_v32, -inf }
 0x794   : > { %11951 = vmax.xlane.f32.xlu0 %v11950_v3 }
 0x7d3   : > { %v11937_v30 = vpop.xlane.xlu1 %11936 }
 0x7d4   : > { %v11957_v18 = vsub.f32 %v21608_v46, %v11937_v30 }
 0x7d5   : > { %v11934_v25 = vpop.xlane.xlu0 %11933 }
 0x7d6   : > { %v11966_v57 = vmul.f32 1.442695, %v11957_v18  ;;  %v11956_v6 = vsub.f32 %v21612_v15, %v11934_v25 }
 0x7d8   : > { %18535 = vpow2.f32 %v11966_v57  ;;  %v11964_v34 = vmul.f32 1.442695, %v11956_v6 }
 0x7da   : > { %18537 = vpow2.f32 %v11964_v34  ;;  %v21707_v34 = vand.u32 4294901760, %v21698_v21 }
 0x7e5   : > { %v18536_v13 = vpop.eup %18535 }
 0x7e6   : > { %v11983_v63 = vsel %vm2815_vm1, %v18536_v13, 0.0 }
 0x7e7   : > { %v18538_v20 = vpop.eup %18537  ;;  %11984 = vadd.xlane.f32.xlu1 %v11983_v63 }
 0x7e8   : > { %v11980_v26 = vsel %vm2815_vm1, %v18538_v20, 0.0 }
 0x7e9   : > { %11981 = vadd.xlane.f32.xlu0 %v11980_v26 }
 0x7eb   : > { %v11943_v12 = vpop.xlane.xlu1 %11942 }
 0x7ec   : > { %v11959_v0 = vsub.f32 %v21624_v14, %v11943_v12 }
 0x7ed   : > { %v11940_v23 = vpop.xlane.xlu0 %11939 }
 0x7ee   : > { %v11970_v46 = vmul.f32 1.442695, %v11959_v0  ;;  %v11958_v60 = vsub.f32 %v21628_v16, %v11940_v23 }
 0x7f0   : > { %18539 = vpow2.f32 %v11970_v46  ;;  %v11968_v15 = vmul.f32 1.442695, %v11958_v60 }
 0x7f2   : > { %18541 = vpow2.f32 %v11968_v15 }
 0x7fd   : > { %v21664_v1 = vpop.eup %18539 }
 0x7fe   : > { %v11989_v38 = vsel %vm2815_vm1, %v21664_v1, 0.0 }
 0x7ff   : > { %v21668_v31 = vpop.eup %18541  ;;  %11990 = vadd.xlane.f32.xlu1 %v11989_v38 }
 0x800   : > { %v11986_v42 = vsel %vm2815_vm1, %v21668_v31, 0.0 }
 0x801   : > { %11987 = vadd.xlane.f32.xlu0 %v11986_v42 }
 0x803   : > { %v11949_v14 = vpop.xlane.xlu1 %11948 }
 0x804   : > { %v11961_v27 = vsub.f32 %v21640_v56, %v11949_v14 }
 0x805   : > { %v11946_v7 = vpop.xlane.xlu0 %11945 }
 0x806   : > { %v11974_v16 = vmul.f32 1.442695, %v11961_v27  ;;  %v11960_v11 = vsub.f32 %v21644_v10, %v11946_v7 }
 0x808   : > { %18543 = vpow2.f32 %v11974_v16  ;;  %v11972_v39 = vmul.f32 1.442695, %v11960_v11 }
 0x80a   : > { %18545 = vpow2.f32 %v11972_v39 }
 0x815   : > { %v21674_v41 = vpop.eup %18543 }
 0x816   : > { %v11995_v36 = vsel %vm2815_vm1, %v21674_v41, 0.0 }
 0x817   : > { %v21678_v53 = vpop.eup %18545  ;;  %11996 = vadd.xlane.f32.xlu1 %v11995_v36 }
 0x818   : > { %v11992_v55 = vsel %vm2815_vm1, %v21678_v53, 0.0 }
 0x819   : > { %11993 = vadd.xlane.f32.xlu0 %v11992_v55 }
 0x81b   : > { %v11955_v56 = vpop.xlane.xlu1 %11954 }
 0x81c   : > { %v11963_v28 = vsub.f32 %v11931_v48, %v11955_v56  ;;  %v21694_v48 = vand.u32 4294901760, %v21427_v49 }
 0x81d   : > { %v11952_v33 = vpop.xlane.xlu0 %11951 }
 0x81e   : > { %v11978_v19 = vmul.f32 1.442695, %v11963_v28  ;;  %v11962_v10 = vsub.f32 %v11930_v32, %v11952_v33  ;;  %v21704_v25 = vsub.f32 %v21427_v49, %v21694_v48  ;;  %v12653_v49 = vsub.f32 %v21698_v21, %v21707_v34 }
 0x820   : > { %18547 = vpow2.f32 %v11978_v19  ;;  %v11976_v35 = vmul.f32 1.442695, %v11962_v10  ;;  %v21711_v26 = vand.u32 4294901760, %v21704_v25  ;;  %v12654_v15 = vand.u32 4294901760, %v12653_v49 }
 0x822   : > { %18549 = vpow2.f32 %v11976_v35  ;;  %v12660_v60 = vsub.f32 %v21704_v25, %v21711_v26 }
 0x824   : > { %v12661_v42 = vand.u32 4294901760, %v12660_v60 }
 0x82d   : > { %v21682_v22 = vpop.eup %18547 }
 0x82e   : > { %v12001_v43 = vsel %vm2815_vm1, %v21682_v22, 0.0 }
 0x82f   : > { %v21686_v9 = vpop.eup %18549  ;;  %12002 = vadd.xlane.f32.xlu1 %v12001_v43 }
 0x830   : > { %v11998_v8 = vsel %vm2815_vm1, %v21686_v9, 0.0 }
 0x831   : > { %11999 = vadd.xlane.f32.xlu0 %v11998_v8 }
 0x870   : > { %v11985_v24 = vpop.xlane.xlu1 %11984 }
 0x871   : > { %18551 = vrcp.f32 %v11985_v24 }
 0x872   : > { %v11982_v52 = vpop.xlane.xlu0 %11981 }
 0x873   : > { %18553 = vrcp.f32 %v11982_v52  ;;  %v9499_v52 = vadd.f32 %v21594_v40, %v21416_v44  ;;  %v21785_v44 = vand.u32 4294901760, %v21442_v45 }
 0x87e   : > { %v18552_v61 = vpop.eup %18551 }
 0x87f   : > { %v12007_v58 = vmul.f32 %v18552_v61, %v18536_v13  ;;  %v9616_v61 = vadd.f32 %v21596_v50, %v9499_v52  ;;  %v21795_v50 = vsub.f32 %v21442_v45, %v21785_v44 }
 0x880   : > { %v18554_v54 = vpop.eup %18553 }
 0x881   : > { %v12005_v32 = vmul.f32 %v18554_v54, %v18538_v20  ;;  %v12024_v3 = vsel %vm2815_vm1, %v12007_v58, 0 }
 0x882   : > { %v12103_v30 = vand.u32 4294901760, %v12024_v3 }
 0x883   : > { %v12021_v18 = vsel %vm2815_vm1, %v12005_v32, 0 }
 0x884   : > { %v12093_v57 = vand.u32 4294901760, %v12021_v18  ;;  %v12104_v6 = vsub.f32 %v12024_v3, %v12103_v30 }
 0x886   : > { %17962 = vmatprep.mubr.f32.mxu1 %v12093_v57  ;;  %v12094_v13 = vsub.f32 %v12021_v18, %v12093_v57  ;;  %v12105_v63 = vand.u32 4294901760, %v12104_v6 }
 0x887   : > { %17963 = vmatmul.mubr.f32.vlgmr.msra.gmra.mxu1 %v12103_v30 }
 0x888   : > { %17973 = vmatpush3.msra.mxu1 %v21553_v59  ;;  %v11991_v2 = vpop.xlane.xlu1 %11990  ;;  %v12095_v20 = vand.u32 4294901760, %v12094_v13  ;;  %v12106_v12 = vsub.f32 %v12104_v6, %v12105_v63 }
 0x889   : > { %18555 = vrcp.f32 %v11991_v2  ;;  %17974 = vmatprep.subr.mxu1 %v21560_v37 }
 0x88a   : > { %17975 = vmatpush3.msra.mxu1 %v21560_v37  ;;  %17976 = vmatprep.mubr.f32.mxu1 %v12095_v20  ;;  %v11988_v0 = vpop.xlane.xlu0 %11987  ;;  %v12096_v23 = vsub.f32 %v12094_v13, %v12095_v20  ;;  %v12107_v38 = vand.u32 4294901760, %v12106_v12 }
 0x88b   : > { %17986 = vmatprep.subr.mxu1 %v21553_v59  ;;  %18557 = vrcp.f32 %v11988_v0  ;;  %17977 = vmatmul.mubr.f32.vlgmr.msra.gmra.mxu1 %v12105_v63 }
 0x88c   : > { %17987 = vmatpush3.msra.mxu1 %v21553_v59  ;;  %17990 = vmatprep.mubr.f32.mxu1 %v12093_v57  ;;  %v12097_v46 = vand.u32 4294901760, %v12096_v23  ;;  %v21729_v59 = vand.u32 4294901760, %v21431_v51 }
 0x88d   : > { %17988 = vmatprep.subr.mxu1 %v21560_v37 }
 0x88e   : > { %17989 = vmatpush3.msra.mxu1 %v21560_v37  ;;  %17955 = vmatprep.mubr.f32.mxu0 %v12097_v46  ;;  %v21740_v27 = vsub.f32 %v21431_v51, %v21729_v59 }
 0x88f   : > { %18000 = vmatprep.subr.mxu1 %v12654_v15  ;;  %17956 = vmatmul.mubr.f32.vlgmr.msra.gmra.mxu0 %v12107_v38 }
 0x890   : > { %17966 = vmatpush3.msra.mxu0 %v21558_v17  ;;  %17991 = vmatmul.mubr.f32.vlgmr.msra.gmra.mxu1 %v12103_v30 }
 0x891   : > { %18001 = vmatpush3.msra.mxu1 %v12654_v15  ;;  %17967 = vmatprep.subr.mxu0 %v21567_v5 }
 0x892   : > { %17969 = vmatprep.mubr.f32.mxu0 %v12094_v13  ;;  %18002 = vmatprep.subr.mxu1 %v12661_v42 }
 0x893   : > { %17968 = vmatpush3.msra.mxu0 %v21567_v5  ;;  %18003 = vmatpush3.msra.mxu1 %v12661_v42  ;;  %v21735_v5 = vand.u32 4294901760, %v21433_v47 }
 0x894   : > { %17979 = vmatprep.subr.mxu0 %v21570_v4  ;;  %18014 = vmatprep.subr.mxu1 %v21691_v29 }
 0x895   : > { %17970 = vmatmul.mubr.f32.vlgmr.msra.gmra.mxu0 %v12104_v6 }
 0x896   : > { %v18556_v37 = vpop.eup %18555  ;;  %17980 = vmatpush3.msra.mxu0 %v21570_v4  ;;  %17983 = vmatprep.mubr.f32.mxu0 %v12093_v57 }
 0x897   : > { %v12011_v17 = vmul.f32 %v18556_v37, %v21664_v1  ;;  %17981 = vmatprep.subr.mxu0 %v21577_v62 }
 0x898   : > { %v18558_v14 = vpop.eup %18557  ;;  %17982 = vmatpush3.msra.mxu0 %v21577_v62  ;;  %v21752_v62 = vsub.f32 %v21433_v47, %v21735_v5 }
 0x899   : > { %17993 = vmatprep.subr.mxu0 %v21691_v29  ;;  %17984 = vmatmul.mubr.f32.vlgmr.msra.gmra.mxu0 %v12103_v30  ;;  %v12009_v4 = vmul.f32 %v18558_v14, %v21668_v31  ;;  %v12532_v7 = vsel %vm2815_vm1, %v12011_v17, 0  ;;  %v21758_v31 = vand.u32 4294901760, %v21740_v27 }
 0x89a   : > { %17994 = vmatpush3.msra.mxu0 %v21691_v29  ;;  %v21746_v1 = vand.u32 4294901760, %v12532_v7  ;;  %v21763_v56 = vand.u32 4294901760, %v21752_v62 }
 0x89b   : > { %17995 = vmatprep.subr.mxu0 %v21694_v48  ;;  %v12529_v16 = vsel %vm2815_vm1, %v12009_v4, 0  ;;  %v13161_v28 = vsub.f32 %v21740_v27, %v21758_v31 }
 0x89c   : > { %17996 = vmatpush3.msra.mxu0 %v21694_v48  ;;  %v12601_v51 = vand.u32 4294901760, %v12529_v16  ;;  %v12612_v11 = vsub.f32 %v12532_v7, %v21746_v1  ;;  %v13168_v43 = vsub.f32 %v21752_v62, %v21763_v56 }
 0x89d   : > { %18007 = vmatprep.subr.mxu0 %v21698_v21  ;;  %v13162_v8 = vand.u32 4294901760, %v13161_v28 }
 0x89e   : > { %18004 = vmatprep.mubr.f32.mxu1 %v12601_v51  ;;  %v12602_v39 = vsub.f32 %v12529_v16, %v12601_v51  ;;  %v12613_v36 = vand.u32 4294901760, %v12612_v11 }
 0x89f   : > { %18005 = vmatmul.mubr.f32.vlgmr.msra.gmra.mxu1 %v21746_v1 }
 0x8a0   : > { %18015 = vmatpush3.msra.mxu1 %v21691_v29  ;;  %v11997_v55 = vpop.xlane.xlu1 %11996  ;;  %v12603_v47 = vand.u32 4294901760, %v12602_v39  ;;  %v12614_v33 = vsub.f32 %v12612_v11, %v12613_v36 }
 0x8a1   : > { %18559 = vrcp.f32 %v11997_v55  ;;  %18016 = vmatprep.subr.mxu1 %v21694_v48 }
 0x8a2   : > { %18017 = vmatpush3.msra.mxu1 %v21694_v48  ;;  %18018 = vmatprep.mubr.f32.mxu1 %v12603_v47  ;;  %v11994_v19 = vpop.xlane.xlu0 %11993  ;;  %v12604_v10 = vsub.f32 %v12602_v39, %v12603_v47  ;;  %v12615_v24 = vand.u32 4294901760, %v12614_v33 }
 0x8a3   : > { %18028 = vmatprep.subr.mxu1 %v21691_v29  ;;  %18561 = vrcp.f32 %v11994_v19  ;;  %18019 = vmatmul.mubr.f32.vlgmr.msra.gmra.mxu1 %v12613_v36 }
 0x8a4   : > { %18029 = vmatpush3.msra.mxu1 %v21691_v29  ;;  %18032 = vmatprep.mubr.f32.mxu1 %v12601_v51  ;;  %v12605_v35 = vand.u32 4294901760, %v12604_v10  ;;  %v13169_v29 = vand.u32 4294901760, %v13168_v43 }
 0x8a5   : > { %18030 = vmatprep.subr.mxu1 %v21694_v48 }
 0x8a6   : > { %18031 = vmatpush3.msra.mxu1 %v21694_v48  ;;  %17997 = vmatprep.mubr.f32.mxu0 %v12605_v35  ;;  %v21790_v48 = vand.u32 4294901760, %v9616_v61 }
 0x8a7   : > { %18042 = vmatprep.subr.mxu1 %v13162_v8  ;;  %17998 = vmatmul.mubr.f32.vlgmr.msra.gmra.mxu0 %v12615_v24 }
 0x8a8   : > { %18008 = vmatpush3.msra.mxu0 %v21698_v21  ;;  %18033 = vmatmul.mubr.f32.vlgmr.msra.gmra.mxu1 %v21746_v1  ;;  %v21805_v30 = vsub.f32 %v9616_v61, %v21790_v48 }
 0x8a9   : > { %18043 = vmatpush3.msra.mxu1 %v13162_v8  ;;  %18009 = vmatprep.subr.mxu0 %v21704_v25 }
 0x8aa   : > { %18011 = vmatprep.mubr.f32.mxu0 %v12602_v39  ;;  %18044 = vmatprep.subr.mxu1 %v13169_v29  ;;  %v21814_v13 = vand.u32 4294901760, %v21805_v30 }
 0x8ab   : > { %18010 = vmatpush3.msra.mxu0 %v21704_v25  ;;  %18045 = vmatpush3.msra.mxu1 %v13169_v29 }
 0x8ac   : > { %18021 = vmatprep.subr.mxu0 %v21707_v34  ;;  %18056 = vmatprep.subr.mxu1 %v21729_v59  ;;  %v13676_v12 = vsub.f32 %v21805_v30, %v21814_v13 }
 0x8ad   : > { %18012 = vmatmul.mubr.f32.vlgmr.msra.gmra.mxu0 %v12612_v11  ;;  %v14053_v11 = vld [vmem:[#allocation2 + $0x10] sm:$0xff] }
 0x8ae   : > { %v18560_v40 = vpop.eup %18559  ;;  %18022 = vmatpush3.msra.mxu0 %v21707_v34  ;;  %18025 = vmatprep.mubr.f32.mxu0 %v12601_v51  ;;  %v13677_v46 = vand.u32 4294901760, %v13676_v12  ;;  %v21859_v39 = vand.u32 4294901760, %v14053_v11 }
 0x8af   : > { %v12015_v58 = vmul.f32 %v18560_v40, %v21674_v41  ;;  %18023 = vmatprep.subr.mxu0 %v21711_v26 }
 0x8b0   : > { %v18562_v54 = vpop.eup %18561  ;;  %18024 = vmatpush3.msra.mxu0 %v21711_v26  ;;  %v21867_v55 = vsub.f32 %v14053_v11, %v21859_v39 }
 0x8b1   : > { %18035 = vmatprep.subr.mxu0 %v21729_v59  ;;  %18026 = vmatmul.mubr.f32.vlgmr.msra.gmra.mxu0 %v21746_v1  ;;  %v12013_v21 = vmul.f32 %v18562_v54, %v21678_v53  ;;  %v13040_v32 = vsel %vm2815_vm1, %v12015_v58, 0  ;;  %v21810_v53 = vand.u32 4294901760, %v21795_v50 }
 0x8b2   : > { %18036 = vmatpush3.msra.mxu0 %v21729_v59  ;;  %v13119_v41 = vand.u32 4294901760, %v13040_v32 }
 0x8b3   : > { %18037 = vmatprep.subr.mxu0 %v21735_v5  ;;  %v13037_v3 = vsel %vm2815_vm1, %v12013_v21, 0  ;;  %v13669_v63 = vsub.f32 %v21795_v50, %v21810_v53 }
 0x8b4   : > { %18038 = vmatpush3.msra.mxu0 %v21735_v5  ;;  %v13109_v45 = vand.u32 4294901760, %v13037_v3  ;;  %v13120_v18 = vsub.f32 %v13040_v32, %v13119_v41 }
 0x8b5   : > { %18049 = vmatprep.subr.mxu0 %v21740_v27  ;;  %v13670_v0 = vand.u32 4294901760, %v13669_v63 }
 0x8b6   : > { %18046 = vmatprep.mubr.f32.mxu1 %v13109_v45  ;;  %v13110_v25 = vsub.f32 %v13037_v3, %v13109_v45  ;;  %v13121_v57 = vand.u32 4294901760, %v13120_v18 }
 0x8b7   : > { %18047 = vmatmul.mubr.f32.vlgmr.msra.gmra.mxu1 %v13119_v41 }
 0x8b8   : > { %18057 = vmatpush3.msra.mxu1 %v21729_v59  ;;  %v12003_v6 = vpop.xlane.xlu1 %12002  ;;  %v13111_v34 = vand.u32 4294901760, %v13110_v25  ;;  %v13122_v2 = vsub.f32 %v13120_v18, %v13121_v57 }
 0x8b9   : > { %18563 = vrcp.f32 %v12003_v6  ;;  %18058 = vmatprep.subr.mxu1 %v21735_v5 }
 0x8ba   : > { %18059 = vmatpush3.msra.mxu1 %v21735_v5  ;;  %18060 = vmatprep.mubr.f32.mxu1 %v13111_v34  ;;  %v12000_v20 = vpop.xlane.xlu0 %11999  ;;  %v13112_v26 = vsub.f32 %v13110_v25, %v13111_v34  ;;  %v13123_v23 = vand.u32 4294901760, %v13122_v2 }
 0x8bb   : > { %18070 = vmatprep.subr.mxu1 %v21729_v59  ;;  %18565 = vrcp.f32 %v12000_v20  ;;  %18061 = vmatmul.mubr.f32.vlgmr.msra.gmra.mxu1 %v13121_v57 }
 0x8bc   : > { %18071 = vmatpush3.msra.mxu1 %v21729_v59  ;;  %18074 = vmatprep.mubr.f32.mxu1 %v13109_v45  ;;  %v13113_v49 = vand.u32 4294901760, %v13112_v26 }
 0x8bd   : > { %18072 = vmatprep.subr.mxu1 %v21735_v5 }
 0x8be   : > { %18073 = vmatpush3.msra.mxu1 %v21735_v5  ;;  %18039 = vmatprep.mubr.f32.mxu0 %v13113_v49 }
 0x8bf   : > { %18084 = vmatprep.subr.mxu1 %v13670_v0  ;;  %18040 = vmatmul.mubr.f32.vlgmr.msra.gmra.mxu0 %v13123_v23 }
 0x8c0   : > { %18050 = vmatpush3.msra.mxu0 %v21740_v27  ;;  %18075 = vmatmul.mubr.f32.vlgmr.msra.gmra.mxu1 %v13119_v41 }
 0x8c1   : > { %18085 = vmatpush3.msra.mxu1 %v13670_v0  ;;  %18051 = vmatprep.subr.mxu0 %v21752_v62 }
 0x8c2   : > { %18053 = vmatprep.mubr.f32.mxu0 %v13110_v25  ;;  %18086 = vmatprep.subr.mxu1 %v13677_v46 }
 0x8c3   : > { %18052 = vmatpush3.msra.mxu0 %v21752_v62  ;;  %18087 = vmatpush3.msra.mxu1 %v13677_v46  ;;  %v14054_v62 = vld [vmem:[#allocation2 + $0x18] sm:$0xff] }
 0x8c4   : > { %18063 = vmatprep.subr.mxu0 %v21758_v31  ;;  %18098 = vmatprep.subr.mxu1 %v21785_v44  ;;  %v21852_v51 = vand.u32 4294901760, %v14054_v62 }
 0x8c5   : > { %18054 = vmatmul.mubr.f32.vlgmr.msra.gmra.mxu0 %v13120_v18 }
 0x8c6   : > { %v18564_v60 = vpop.eup %18563  ;;  %18064 = vmatpush3.msra.mxu0 %v21758_v31  ;;  %18067 = vmatprep.mubr.f32.mxu0 %v13109_v45  ;;  %v21857_v31 = vsub.f32 %v14054_v62, %v21852_v51 }
 0x8c7   : > { %v12019_v15 = vmul.f32 %v18564_v60, %v21682_v22  ;;  %18065 = vmatprep.subr.mxu0 %v21763_v56 }
 0x8c8   : > { %v18566_v38 = vpop.eup %18565  ;;  %18066 = vmatpush3.msra.mxu0 %v21763_v56  ;;  %v21864_v36 = vand.u32 4294901760, %v21857_v31  ;;  %v21873_v56 = vand.u32 4294901760, %v21867_v55 }
 0x8c9   : > { %18077 = vmatprep.subr.mxu0 %v21785_v44  ;;  %18068 = vmatmul.mubr.f32.vlgmr.msra.gmra.mxu0 %v13119_v41  ;;  %v12017_v42 = vmul.f32 %v18566_v38, %v21686_v9  ;;  %v13548_v59 = vsel %vm2815_vm1, %v12019_v15, 0 }
 0x8ca   : > { %18078 = vmatpush3.msra.mxu0 %v21785_v44  ;;  %v13627_v37 = vand.u32 4294901760, %v13548_v59  ;;  %v14258_v47 = vsub.f32 %v21857_v31, %v21864_v36  ;;  %v14265_v33 = vsub.f32 %v21867_v55, %v21873_v56 }
 0x8cb   : > { %18079 = vmatprep.subr.mxu0 %v21790_v48  ;;  %v13545_v17 = vsel %vm2815_vm1, %v12017_v42, 0 }
 0x8cc   : > { %18080 = vmatpush3.msra.mxu0 %v21790_v48  ;;  %v13617_v22 = vand.u32 4294901760, %v13545_v17  ;;  %v13628_v14 = vsub.f32 %v13548_v59, %v13627_v37  ;;  %v14259_v28 = vand.u32 4294901760, %v14258_v47  ;;  %v14266_v19 = vand.u32 4294901760, %v14265_v33 }
 0x8cd   : > { %18091 = vmatprep.subr.mxu0 %v21795_v50 }
 0x8ce   : > { %18088 = vmatprep.mubr.f32.mxu1 %v13617_v22  ;;  %v13618_v5 = vsub.f32 %v13545_v17, %v13617_v22  ;;  %v13629_v27 = vand.u32 4294901760, %v13628_v14 }
 0x8cf   : > { %18089 = vmatmul.mubr.f32.vlgmr.msra.gmra.mxu1 %v13627_v37 }
 0x8d0   : > { %18099 = vmatpush3.msra.mxu1 %v21785_v44  ;;  %v13619_v9 = vand.u32 4294901760, %v13618_v5  ;;  %v13630_v4 = vsub.f32 %v13628_v14, %v13629_v27 }
 0x8d1   : > { %18100 = vmatprep.subr.mxu1 %v21790_v48 }
 0x8d2   : > { %18101 = vmatpush3.msra.mxu1 %v21790_v48  ;;  %18102 = vmatprep.mubr.f32.mxu1 %v13619_v9  ;;  %v13620_v7 = vsub.f32 %v13618_v5, %v13619_v9  ;;  %v13631_v16 = vand.u32 4294901760, %v13630_v4 }
 0x8d3   : > { %18112 = vmatprep.subr.mxu1 %v21785_v44  ;;  %18103 = vmatmul.mubr.f32.vlgmr.msra.gmra.mxu1 %v13629_v27 }
 0x8d4   : > { %18113 = vmatpush3.msra.mxu1 %v21785_v44  ;;  %18116 = vmatprep.mubr.f32.mxu1 %v13617_v22  ;;  %v13621_v1 = vand.u32 4294901760, %v13620_v7 }
 0x8d5   : > { %18114 = vmatprep.subr.mxu1 %v21790_v48 }
 0x8d6   : > { %18115 = vmatpush3.msra.mxu1 %v21790_v48  ;;  %18081 = vmatprep.mubr.f32.mxu0 %v13621_v1 }
 0x8d7   : > { %18082 = vmatmul.mubr.f32.vlgmr.msra.gmra.mxu0 %v13631_v16  ;;  %18117 = vmatmul.mubr.f32.vlgmr.msra.gmra.mxu1 %v13627_v37 }
 0x8d8   : > { %18092 = vmatpush3.msra.mxu0 %v21795_v50  ;;  %18095 = vmatprep.mubr.f32.mxu0 %v13618_v5 }
 0x8d9   : > { %18093 = vmatprep.subr.mxu0 %v21805_v30  ;;  %18135 = vmatprep.subr.mxu1 %v14259_v28 }
 0x8da   : > { %18094 = vmatpush3.msra.mxu0 %v21805_v30  ;;  %18136 = vmatpush3.msra.mxu1 %v14259_v28 }
 0x8db   : > { %18105 = vmatprep.subr.mxu0 %v21810_v53  ;;  %18096 = vmatmul.mubr.f32.vlgmr.msra.gmra.mxu0 %v13628_v14 }
 0x8dc   : > { %18106 = vmatpush3.msra.mxu0 %v21810_v53  ;;  %18109 = vmatprep.mubr.f32.mxu0 %v13617_v22 }
 0x8dd   : > { %18107 = vmatprep.subr.mxu0 %v21814_v13  ;;  %18137 = vmatprep.subr.mxu1 %v14266_v19 }
 0x8de   : > { %18108 = vmatpush3.msra.mxu0 %v21814_v13  ;;  %18138 = vmatpush3.msra.mxu1 %v14266_v19 }
 0x8df   : > { %18110 = vmatmul.mubr.f32.vlgmr.msra.gmra.mxu0 %v13627_v37  ;;  %18119 = vmatprep.subr.mxu0 %v21852_v51 }
 0x8e0   : > { %18120 = vmatpush3.msra.mxu0 %v21852_v51  ;;  %18167 = vmatprep.subr.mxu1 %v21852_v51 }
 0x8e1   : > { %18121 = vmatprep.subr.mxu0 %v21859_v39 }
 0x8e2   : > { %18122 = vmatpush3.msra.mxu0 %v21859_v39 }
 0x8e3   : > { %18151 = vmatprep.subr.mxu0 %v21857_v31 }
 0x947   : > { %v17964_v10 = vpop.f32.mrf.mxu1 }
 0x949   : > { %v12190_v35 = vpop.f32.mrf.mxu1 }
 0x94b   : > { %v17978_v8 = vpop.f32.mrf.mxu1 }
 0x94d   : > { %v12354_v29 = vpop.f32.mrf.mxu1 }
 0x94f   : > { %v17957_v43 = vpop.f32.mrf.mxu0 }
 0x950   : > { %v12197_v52 = vadd.f32 %v17964_v10, %v17957_v43  ;;  %v17992_v50 = vpop.f32.mrf.mxu1 }
 0x951   : > { %v12099_v24 = vpop.f32.mrf.mxu0 }
 0x952   : > { %v12191_v44 = vadd.f32 %v12190_v35, %v12099_v24  ;;  %v12518_v18 = vpop.f32.mrf.mxu1 }
 0x955   : > { %v17971_v61 = vpop.f32.mrf.mxu0 }
 0x956   : > { %v12280_v40 = vadd.f32 %v17971_v61, %v12197_v52 }
 0x957   : > { %v12272_v58 = vpop.f32.mrf.mxu0 }
 0x958   : > { %v12273_v54 = vadd.f32 %v12272_v58, %v12191_v44  ;;  %v12363_v48 = vadd.f32 %v17978_v8, %v12280_v40 }
 0x959   : > { %v17985_v21 = vpop.f32.mrf.mxu0 }
 0x95a   : > { %v12446_v32 = vadd.f32 %v17985_v21, %v12363_v48  ;;  %v12355_v41 = vadd.f32 %v12354_v29, %v12273_v54 }
 0x95b   : > { %v12439_v3 = vpop.f32.mrf.mxu0 }
 0x95c   : > { %v12525_v30 = vadd.f32 %v17992_v50, %v12446_v32  ;;  %v12440_v45 = vadd.f32 %v12439_v3, %v12355_v41 }
 0x95e   : > { %v14059_v53 = vsel %vm2815_vm1, %v12525_v30, 0  ;;  %v12519_v25 = vadd.f32 %v12518_v18, %v12440_v45 }
 0x95f   : > { %v21884_v57 = vand.u32 4294901760, %v14059_v53  ;;  %v18006_v63 = vpop.f32.mrf.mxu1 }
 0x960   : > { %v14056_v6 = vsel %vm2815_vm1, %v12519_v25, 0 }
 0x961   : > { %v21888_v34 = vsub.f32 %v14059_v53, %v21884_v57  ;;  %v21890_v13 = vand.u32 4294901760, %v14056_v6  ;;  %v12698_v26 = vpop.f32.mrf.mxu1 }
 0x963   : > { %v14158_v2 = vand.u32 4294901760, %v21888_v34  ;;  %v21894_v20 = vsub.f32 %v14056_v6, %v21890_v13  ;;  %18139 = vmatprep.mubr.f32.mxu1 %v21890_v13  ;;  %v18020_v46 = vpop.f32.mrf.mxu1 }
 0x964   : > { %18140 = vmatmul.mubr.f32.vlgmr.msra.gmra.mxu1 %v21884_v57 }
 0x965   : > { %v14148_v49 = vand.u32 4294901760, %v21894_v20  ;;  %18168 = vmatpush3.msra.mxu1 %v21852_v51  ;;  %v14159_v12 = vsub.f32 %v21888_v34, %v14158_v2  ;;  %v12862_v59 = vpop.f32.mrf.mxu1 }
 0x966   : > { %18169 = vmatprep.subr.mxu1 %v21859_v39 }
 0x967   : > { %v17999_v0 = vpop.f32.mrf.mxu0  ;;  %v14149_v23 = vsub.f32 %v21894_v20, %v14148_v49  ;;  %18170 = vmatpush3.msra.mxu1 %v21859_v39  ;;  %v14160_v38 = vand.u32 4294901760, %v14159_v12 }
 0x968   : > { %18199 = vmatprep.subr.mxu1 %v21852_v51  ;;  %v12705_v42 = vadd.f32 %v18006_v63, %v17999_v0  ;;  %v18034_v9 = vpop.f32.mrf.mxu1 }
 0x969   : > { %v12607_v60 = vpop.f32.mrf.mxu0  ;;  %v14150_v15 = vand.u32 4294901760, %v14149_v23 }
 0x96a   : > { %v12699_v17 = vadd.f32 %v12698_v26, %v12607_v60  ;;  %v13026_v47 = vpop.f32.mrf.mxu1 }
 0x96b   : > { %18123 = vmatprep.mubr.f32.mxu0 %v14150_v15 }
 0x96c   : > { %18124 = vmatmul.mubr.f32.vlgmr.msra.gmra.mxu0 %v14160_v38 }
 0x96d   : > { %v18013_v37 = vpop.f32.mrf.mxu0  ;;  %18152 = vmatpush3.msra.mxu0 %v21857_v31 }
 0x96e   : > { %v12788_v22 = vadd.f32 %v18013_v37, %v12705_v42  ;;  %18153 = vmatprep.subr.mxu0 %v21867_v55 }
 0x96f   : > { %v12780_v14 = vpop.f32.mrf.mxu0  ;;  %18154 = vmatpush3.msra.mxu0 %v21867_v55 }
 0x970   : > { %v12781_v5 = vadd.f32 %v12780_v14, %v12699_v17  ;;  %v12871_v27 = vadd.f32 %v18020_v46, %v12788_v22  ;;  %18183 = vmatprep.subr.mxu0 %v21864_v36 }
 0x971   : > { %v18027_v4 = vpop.f32.mrf.mxu0 }
 0x972   : > { %v12954_v7 = vadd.f32 %v18027_v4, %v12871_v27  ;;  %v12863_v1 = vadd.f32 %v12862_v59, %v12781_v5 }
 0x973   : > { %v12947_v16 = vpop.f32.mrf.mxu0 }
 0x974   : > { %v13033_v62 = vadd.f32 %v18034_v9, %v12954_v7  ;;  %v12948_v11 = vadd.f32 %v12947_v16, %v12863_v1 }
 0x976   : > { %v14065_v31 = vsel %vm2815_vm1, %v13033_v62, 0  ;;  %v13027_v28 = vadd.f32 %v13026_v47, %v12948_v11 }
 0x977   : > { %v21914_v33 = vand.u32 4294901760, %v14065_v31  ;;  %v18048_v35 = vpop.f32.mrf.mxu1 }
 0x978   : > { %v14062_v19 = vsel %vm2815_vm1, %v13027_v28, 0 }
 0x979   : > { %v21918_v55 = vsub.f32 %v14065_v31, %v21914_v33  ;;  %v21920_v10 = vand.u32 4294901760, %v14062_v19  ;;  %v13206_v24 = vpop.f32.mrf.mxu1 }
 0x97b   : > { %v21923_v43 = vsub.f32 %v14062_v19, %v21920_v10  ;;  %18142 = vmatprep.mubr.f32.mxu1 %v21920_v10  ;;  %v14178_v8 = vand.u32 4294901760, %v21918_v55  ;;  %v18062_v40 = vpop.f32.mrf.mxu1 }
 0x97c   : > { %18143 = vmatmul.mubr.f32.gmra.mxu1 %v21914_v33 }
 0x97d   : > { %v14168_v52 = vand.u32 4294901760, %v21923_v43  ;;  %v14179_v29 = vsub.f32 %v21918_v55, %v14178_v8  ;;  %v13370_v21 = vpop.f32.mrf.mxu1 }
 0x97f   : > { %v18041_v61 = vpop.f32.mrf.mxu0  ;;  %v14169_v44 = vsub.f32 %v21923_v43, %v14168_v52  ;;  %v14180_v48 = vand.u32 4294901760, %v14179_v29 }
 0x980   : > { %v13213_v50 = vadd.f32 %v18048_v35, %v18041_v61  ;;  %v18076_v53 = vpop.f32.mrf.mxu1 }
 0x981   : > { %v13115_v58 = vpop.f32.mrf.mxu0  ;;  %v14170_v54 = vand.u32 4294901760, %v14169_v44 }
 0x982   : > { %v13207_v41 = vadd.f32 %v13206_v24, %v13115_v58  ;;  %v13534_v23 = vpop.f32.mrf.mxu1  ;;  %v7235_v24 = vld [vmem:[#allocation2 + $0x8] sm:$0xff] }
 0x983   : > { %18126 = vmatprep.mubr.f32.mxu0 %v14170_v54 }
 0x984   : > { %18127 = vmatmul.mubr.f32.gmra.mxu0 %v14180_v48  ;;  %v21957_v48 = vand.u32 4294901760, %v7235_v24 }
 0x985   : > { %v18055_v32 = vpop.f32.mrf.mxu0 }
 0x986   : > { %v13296_v3 = vadd.f32 %v18055_v32, %v13213_v50 }
 0x987   : > { %v13288_v30 = vpop.f32.mrf.mxu0 }
 0x988   : > { %v13289_v45 = vadd.f32 %v13288_v30, %v13207_v41  ;;  %v13379_v18 = vadd.f32 %v18062_v40, %v13296_v3 }
 0x989   : > { %v18069_v25 = vpop.f32.mrf.mxu0 }
 0x98a   : > { %v13462_v6 = vadd.f32 %v18069_v25, %v13379_v18  ;;  %v13371_v63 = vadd.f32 %v13370_v21, %v13289_v45  ;;  %v21961_v45 = vsub.f32 %v7235_v24, %v21957_v48 }
 0x98b   : > { %v13455_v26 = vpop.f32.mrf.mxu0 }
 0x98c   : > { %v13541_v12 = vadd.f32 %v18076_v53, %v13462_v6  ;;  %v13456_v0 = vadd.f32 %v13455_v26, %v13371_v63  ;;  %v21972_v63 = vand.u32 4294901760, %v21961_v45 }
 0x98e   : > { %v14071_v46 = vsel %vm2815_vm1, %v13541_v12, 0  ;;  %v13535_v60 = vadd.f32 %v13534_v23, %v13456_v0  ;;  %v7234_v0 = vld [vmem:[#allocation2] sm:$0xff]  ;;  %v22675_v23 = vld [vmem:[#allocation46_spill] sm:$0xff] }
 0x98f   : > { %v21936_v15 = vand.u32 4294901760, %v14071_v46  ;;  %v18090_v38 = vpop.f32.mrf.mxu1 }
 0x990   : > { %v14068_v42 = vsel %vm2815_vm1, %v13535_v60, 0 }
 0x991   : > { %v21940_v59 = vsub.f32 %v14071_v46, %v21936_v15  ;;  %v21942_v37 = vand.u32 4294901760, %v14068_v42  ;;  %v13714_v22 = vpop.f32.mrf.mxu1  ;;  %v22676_v46 = vld [vmem:[#allocation50_spill] sm:$0xff] }
 0x992   : > { %v5373_v60 = vadd.f32 %v22676_v46, %v22675_v23  ;;  %v22694_v46 = vld [vmem:[#allocation35_spill] sm:$0xff] }
 0x993   : > { %v21945_v17 = vsub.f32 %v14068_v42, %v21942_v37  ;;  %18145 = vmatprep.mubr.f32.mxu1 %v21942_v37  ;;  %v14198_v14 = vand.u32 4294901760, %v21940_v59  ;;  %v18104_v9 = vpop.f32.mrf.mxu1 }
 0x994   : > { %18146 = vmatmul.mubr.f32.gmra.mxu1 %v21936_v15 }
 0x995   : > { %v14188_v5 = vand.u32 4294901760, %v21945_v17  ;;  %v14199_v27 = vsub.f32 %v21940_v59, %v14198_v14  ;;  %v13878_v47 = vpop.f32.mrf.mxu1 }
 0x997   : > { %v18083_v4 = vpop.f32.mrf.mxu0  ;;  %v14189_v7 = vsub.f32 %v21945_v17, %v14188_v5  ;;  %v14200_v11 = vand.u32 4294901760, %v14199_v27  ;;  %v18118_v44 = vpop.f32.mrf.mxu1  ;;  %v22677_v27 = vld [vmem:[#allocation43_spill] sm:$0xff] }
 0x998   : > { %v13721_v62 = vadd.f32 %v18090_v38, %v18083_v4 }
 0x999   : > { %v13623_v1 = vpop.f32.mrf.mxu0  ;;  %v14190_v16 = vand.u32 4294901760, %v14189_v7  ;;  %v14042_v41 = vpop.f32.mrf.mxu1  ;;  %v21986_v7 = vand.u32 4294901760, %v7234_v0 }
 0x99a   : > { %v13715_v28 = vadd.f32 %v13714_v22, %v13623_v1  ;;  %v15042_v22 = vsub.f32 %v21961_v45, %v21972_v63 }
 0x99b   : > { %18129 = vmatprep.mubr.f32.mxu0 %v14190_v16  ;;  %v18097_v31 = vpop.f32.mrf.mxu0  ;;  %v22679_v16 = vld [vmem:[#allocation58_spill] sm:$0xff] }
 0x99c   : > { %18130 = vmatmul.mubr.f32.gmra.mxu0 %v14200_v11  ;;  %v13804_v19 = vadd.f32 %v18097_v31, %v13721_v62  ;;  %v22680_v31 = vld [vmem:[#allocation47_spill] sm:$0xff] }
 0x99d   : > { %v13796_v35 = vpop.f32.mrf.mxu0 }
 0x99e   : > { %v13797_v29 = vadd.f32 %v13796_v35, %v13715_v28  ;;  %v13887_v61 = vadd.f32 %v18104_v9, %v13804_v19  ;;  %v5455_v9 = vadd.f32 %v22677_v27, %v5373_v60  ;;  %v22681_v19 = vld [vmem:[#allocation53_spill] sm:$0xff]  ;;  %v22683_v35 = vld [vmem:[#allocation55_spill] sm:$0xff] }
 0x99f   : > { %v18111_v40 = vpop.f32.mrf.mxu0 }
 0x9a0   : > { %v13970_v58 = vadd.f32 %v18111_v40, %v13887_v61  ;;  %v13879_v54 = vadd.f32 %v13878_v47, %v13797_v29  ;;  %v15043_v47 = vand.u32 4294901760, %v15042_v22  ;;  %v5537_v28 = vadd.f32 %v22680_v31, %v5455_v9  ;;  %v22684_v29 = vld [vmem:[#allocation57_spill] sm:$0xff]  ;;  %v22697_v22 = vld [vmem:[#allocation34_spill] sm:$0xff]  ;;  %v22698_v9 = vld [vmem:[#allocation40_spill] sm:$0xff] }
 0x9a1   : > { %v13963_v50 = vpop.f32.mrf.mxu0 }
 0x9a2   : > { %v14049_v21 = vadd.f32 %v18118_v44, %v13970_v58  ;;  %v13964_v32 = vadd.f32 %v13963_v50, %v13879_v54  ;;  %v22685_v44 = vld [vmem:[#allocation49_spill] sm:$0xff]  ;;  %v22686_v58 = vld [vmem:[#allocation11_spill] sm:$0xff]  ;;  %v22689_v50 = vld [vmem:[#allocation52_spill] sm:$0xff] }
 0x9a4   : > { %v14077_v3 = vsel %vm2815_vm1, %v14049_v21, 0  ;;  %v14043_v30 = vadd.f32 %v14042_v41, %v13964_v32  ;;  %v22690_v41 = vld [vmem:[#allocation48_spill] sm:$0xff] }
 0x9a5   : > { %v21963_v18 = vand.u32 4294901760, %v14077_v3 }
 0x9a6   : > { %v14074_v53 = vsel %vm2815_vm1, %v14043_v30, 0 }
 0x9a7   : > { %v21967_v25 = vsub.f32 %v14077_v3, %v21963_v18  ;;  %v21969_v6 = vand.u32 4294901760, %v14074_v53  ;;  %v22691_v3 = vld [vmem:[#allocation31_spill] sm:$0xff] }
 0x9a9   : > { %v14207_v26 = vsub.f32 %v14074_v53, %v21969_v6  ;;  %18148 = vmatprep.mubr.f32.mxu1 %v21969_v6  ;;  %v14218_v12 = vand.u32 4294901760, %v21967_v25 }
 0x9aa   : > { %18149 = vmatmul.mubr.f32.gmra.mxu1 %v21963_v18 }
 0x9ab   : > { %18171 = vmatprep.mubr.f32.mxu1 %v14148_v49  ;;  %v14208_v38 = vand.u32 4294901760, %v14207_v26  ;;  %v14219_v42 = vsub.f32 %v21967_v25, %v14218_v12  ;;  %v22678_v49 = vld [vmem:[#allocation44_spill] sm:$0xff] }
 0x9ac   : > { %v5881_v62 = vadd.f32 %v22679_v16, %v22678_v49 }
 0x9ad   : > { %v14209_v4 = vsub.f32 %v14207_v26, %v14208_v38  ;;  %v14220_v11 = vand.u32 4294901760, %v14219_v42 }
 0x9ae   : > { %18172 = vmatmul.mubr.f32.vlgmr.msra.gmra.mxu1 %v14158_v2  ;;  %v21999_v2 = vsub.f32 %v7234_v0, %v21986_v7  ;;  %v22693_v0 = vld [vmem:[#allocation51_spill] sm:$0xff] }
 0x9af   : > { %18174 = vmatprep.mubr.f32.mxu1 %v14168_v52  ;;  %v14210_v1 = vand.u32 4294901760, %v14209_v4  ;;  %18200 = vmatpush3.msra.mxu1 %v21852_v51  ;;  %v5963_v52 = vadd.f32 %v22681_v19, %v5881_v62  ;;  %v22682_v51 = vld [vmem:[#allocation56_spill] sm:$0xff]  ;;  %v22700_v62 = vld [vmem:[#allocation19_spill] sm:$0xff] }
 0x9b0   : > { %18201 = vmatprep.subr.mxu1 %v21859_v39  ;;  %v6389_v24 = vadd.f32 %v22683_v35, %v22682_v51  ;;  %v22011_v61 = vand.u32 4294901760, %v21999_v2  ;;  %v22701_v19 = vld [vmem:[#allocation12_spill] sm:$0xff] }
 0x9b1   : > { %18132 = vmatprep.mubr.f32.mxu0 %v14210_v1  ;;  %18202 = vmatpush3.msra.mxu1 %v21859_v39  ;;  %v5622_v39 = vadd.f32 %v22684_v29, %v5537_v28  ;;  %v6045_v40 = vadd.f32 %v22685_v44, %v5963_v52  ;;  %v22699_v1 = vld [vmem:[#allocation54_spill] sm:$0xff] }
 0x9b2   : > { %18133 = vmatmul.mubr.f32.gmra.mxu0 %v14220_v11  ;;  %18175 = vmatmul.mubr.f32.gmra.mxu1 %v14178_v8  ;;  %v6471_v54 = vadd.f32 %v22686_v58, %v6389_v24  ;;  %v22688_v8 = vld [vmem:[#allocation13_spill] sm:$0xff]  ;;  %v15049_v32 = vsub.f32 %v21999_v2, %v22011_v61  ;;  %v14849_v49 = vsel %vm2815_vm1, %v22699_v1, 0 }
 0x9b3   : > { %18155 = vmatprep.mubr.f32.mxu0 %v21894_v20  ;;  %18177 = vmatprep.mubr.f32.mxu1 %v14188_v5  ;;  %v22687_v20 = vld [vmem:[#allocation15_spill] sm:$0xff]  ;;  %v5701_v21 = vadd.f32 %v22689_v50, %v5622_v39 }
 0x9b4   : > { %18231 = vmatprep.subr.mxu1 %v15043_v47  ;;  %v6897_v5 = vadd.f32 %v22688_v8, %v22687_v20  ;;  %v6553_v30 = vadd.f32 %v22691_v3, %v6471_v54 }
 0x9b6   : > { %18156 = vmatmul.mubr.f32.vlgmr.msra.gmra.mxu0 %v21888_v34  ;;  %18178 = vmatmul.mubr.f32.gmra.mxu1 %v14198_v14  ;;  %v6130_v34 = vadd.f32 %v22690_v41, %v6045_v40  ;;  %v22692_v14 = vld [vmem:[#allocation18_spill] sm:$0xff]  ;;  %v6638_v60 = vadd.f32 %v22694_v46, %v6553_v30 }
 0x9b7   : > { %18158 = vmatprep.mubr.f32.mxu0 %v21923_v43  ;;  %18180 = vmatprep.mubr.f32.mxu1 %v14208_v38  ;;  %v6979_v53 = vadd.f32 %v22692_v14, %v6897_v5  ;;  %v15050_v43 = vand.u32 4294901760, %v15049_v32  ;;  %v22695_v38 = vld [vmem:[#allocation37_spill] sm:$0xff] }
 0x9b8   : > { %18184 = vmatpush3.msra.mxu0 %v21864_v36  ;;  %v14840_v36 = vsel %vm2815_vm1, %v5701_v21, 0  ;;  %v6209_v23 = vadd.f32 %v22693_v0, %v6130_v34  ;;  %v6717_v27 = vadd.f32 %v22697_v22, %v6638_v60 }
 0x9b9   : > { %18185 = vmatprep.subr.mxu0 %v21873_v56  ;;  %v7061_v42 = vadd.f32 %v22695_v38, %v6979_v53 }
 0x9ba   : > { %18159 = vmatmul.mubr.f32.gmra.mxu0 %v21918_v55  ;;  %18181 = vmatmul.mubr.f32.gmra.mxu1 %v14218_v12  ;;  %v22041_v55 = vand.u32 4294901760, %v14840_v36  ;;  %v14846_v12 = vsel %vm2815_vm1, %v6209_v23, 0 }
 0x9bb   : > { %18161 = vmatprep.mubr.f32.mxu0 %v21945_v17  ;;  %18203 = vmatprep.mubr.f32.mxu1 %v21890_v13  ;;  %v7146_v4 = vadd.f32 %v22698_v9, %v7061_v42  ;;  %v22059_v16 = vand.u32 4294901760, %v14846_v12 }
 0x9bc   : > { %18186 = vmatpush3.msra.mxu0 %v21873_v56  ;;  %v22696_v56 = vld [vmem:[#allocation45_spill] sm:$0xff] }
 0x9bd   : > { %18215 = vmatprep.subr.mxu0 %v21957_v48  ;;  %v14843_v17 = vsel %vm2815_vm1, %v22696_v56, 0  ;;  %v7225_v11 = vadd.f32 %v22700_v62, %v7146_v4  ;;  %v22076_v28 = vsub.f32 %v14846_v12, %v22059_v16 }
 0x9be   : > { %18162 = vmatmul.mubr.f32.gmra.mxu0 %v21940_v59  ;;  %18204 = vmatmul.mubr.f32.vlgmr.msra.gmra.mxu1 %v21884_v57  ;;  %v22052_v59 = vand.u32 4294901760, %v14843_v17 }
 0x9bf   : > { %18164 = vmatprep.mubr.f32.mxu0 %v14207_v26  ;;  %18206 = vmatprep.mubr.f32.mxu1 %v21920_v10  ;;  %v22055_v26 = vsub.f32 %v14840_v36, %v22041_v55  ;;  %v14952_v40 = vand.u32 4294901760, %v22076_v28 }
 0x9c0   : > { %18232 = vmatpush3.msra.mxu1 %v15043_v47  ;;  %v22071_v47 = vand.u32 4294901760, %v14849_v49 }
 0x9c1   : > { %18233 = vmatprep.subr.mxu1 %v15050_v43  ;;  %v14932_v31 = vand.u32 4294901760, %v22055_v26  ;;  %v14953_v50 = vsub.f32 %v22076_v28, %v14952_v40 }
 0x9c2   : > { %18165 = vmatmul.mubr.f32.gmra.mxu0 %v21967_v25  ;;  %18207 = vmatmul.mubr.f32.gmra.mxu1 %v21914_v33  ;;  %v14852_v25 = vsel %vm2815_vm1, %v6717_v27, 0  ;;  %v22090_v35 = vsub.f32 %v14849_v49, %v22071_v47 }
 0x9c3   : > { %18187 = vmatprep.mubr.f32.mxu0 %v21890_v13  ;;  %18209 = vmatprep.mubr.f32.mxu1 %v21942_v37  ;;  %v22069_v13 = vsub.f32 %v14843_v17, %v22052_v59  ;;  %v22080_v52 = vand.u32 4294901760, %v14852_v25  ;;  %v14933_v29 = vsub.f32 %v22055_v26, %v14932_v31  ;;  %v14954_v3 = vand.u32 4294901760, %v14953_v50 }
 0x9c4   : > { %18234 = vmatpush3.msra.mxu1 %v15050_v43  ;;  %v14962_v8 = vand.u32 4294901760, %v22090_v35 }
 0x9c5   : > { %18263 = vmatprep.subr.mxu1 %v21957_v48  ;;  %v14942_v51 = vand.u32 4294901760, %v22069_v13  ;;  %v22097_v39 = vsub.f32 %v14852_v25, %v22080_v52 }
 0x9c6   : > { %18188 = vmatmul.mubr.f32.vlgmr.msra.gmra.mxu0 %v21884_v57  ;;  %18210 = vmatmul.mubr.f32.gmra.mxu1 %v21936_v15  ;;  %v14855_v57 = vsel %vm2815_vm1, %v22701_v19, 0  ;;  %v14963_v41 = vsub.f32 %v22090_v35, %v14962_v8 }
 0x9c7   : > { %18190 = vmatprep.mubr.f32.mxu0 %v21920_v10  ;;  %18212 = vmatprep.mubr.f32.mxu1 %v21969_v6  ;;  %v14858_v10 = vsel %vm2815_vm1, %v7225_v11, 0  ;;  %v22092_v24 = vand.u32 4294901760, %v14855_v57  ;;  %v14943_v58 = vsub.f32 %v22069_v13, %v14942_v51 }
 0x9c8   : > { %18216 = vmatpush3.msra.mxu0 %v21957_v48 }
 0x9c9   : > { %18217 = vmatprep.subr.mxu0 %v21986_v7  ;;  %v22111_v54 = vsub.f32 %v14855_v57, %v22092_v24  ;;  %v14944_v21 = vand.u32 4294901760, %v14943_v58 }
 0x9ca   : > { %18191 = vmatmul.mubr.f32.gmra.mxu0 %v21914_v33  ;;  %18213 = vmatmul.mubr.f32.gmra.mxu1 %v21963_v18  ;;  %v22702_v33 = vld [vmem:[#allocation39_spill] sm:$0xff] }
 0x9cb   : > { %18193 = vmatprep.mubr.f32.mxu0 %v21942_v37  ;;  %18235 = vmatprep.mubr.f32.mxu1 %v22041_v55  ;;  %v14861_v44 = vsel %vm2815_vm1, %v22702_v33, 0  ;;  %v22101_v37 = vand.u32 4294901760, %v14858_v10  ;;  %v14982_v34 = vand.u32 4294901760, %v22111_v54 }
 0x9cc   : > { %18218 = vmatpush3.msra.mxu0 %v21986_v7  ;;  %v22113_v20 = vand.u32 4294901760, %v14861_v44 }
 0x9cd   : > { %18247 = vmatprep.subr.mxu0 %v21961_v45  ;;  %v14991_v5 = vsub.f32 %v14858_v10, %v22101_v37  ;;  %v14983_v53 = vsub.f32 %v22111_v54, %v14982_v34 }
 0x9ce   : > { %18194 = vmatmul.mubr.f32.gmra.mxu0 %v21936_v15  ;;  %18236 = vmatmul.mubr.f32.vlgmr.msra.gmra.mxu1 %v22052_v59  ;;  %v14934_v15 = vand.u32 4294901760, %v14933_v29  ;;  %v15001_v32 = vsub.f32 %v14861_v44, %v22113_v20 }
 0x9cf   : > { %18196 = vmatprep.mubr.f32.mxu0 %v21969_v6  ;;  %18238 = vmatprep.mubr.f32.mxu1 %v22059_v16  ;;  %v14972_v6 = vand.u32 4294901760, %v22097_v39  ;;  %v14992_v14 = vand.u32 4294901760, %v14991_v5  ;;  %v14984_v23 = vand.u32 4294901760, %v14983_v53 }
 0x9d0   : > { %18264 = vmatpush3.msra.mxu1 %v21957_v48  ;;  %v15002_v36 = vand.u32 4294901760, %v15001_v32 }
 0x9d1   : > { %18265 = vmatprep.subr.mxu1 %v21986_v7  ;;  %v14973_v30 = vsub.f32 %v22097_v39, %v14972_v6  ;;  %v14993_v0 = vsub.f32 %v14991_v5, %v14992_v14 }
 0x9d2   : > { %18197 = vmatmul.mubr.f32.gmra.mxu0 %v21963_v18  ;;  %18239 = vmatmul.mubr.f32.gmra.mxu1 %v22071_v47  ;;  %v14964_v18 = vand.u32 4294901760, %v14963_v41  ;;  %v15003_v46 = vsub.f32 %v15001_v32, %v15002_v36 }
 0x9d3   : > { %18219 = vmatprep.mubr.f32.mxu0 %v14934_v15  ;;  %18241 = vmatprep.mubr.f32.mxu1 %v22080_v52  ;;  %v14974_v43 = vand.u32 4294901760, %v14973_v30  ;;  %v14994_v60 = vand.u32 4294901760, %v14993_v0 }
 0x9d4   : > { %18266 = vmatpush3.msra.mxu1 %v21986_v7 }
 0x9d5   : > { %18295 = vmatprep.subr.mxu1 %v21957_v48 }
 0x9d6   : > { %18220 = vmatmul.mubr.f32.vlgmr.msra.gmra.mxu0 %v14944_v21  ;;  %18242 = vmatmul.mubr.f32.gmra.mxu1 %v22092_v24 }
 0x9d7   : > { %18222 = vmatprep.mubr.f32.mxu0 %v14954_v3  ;;  %18244 = vmatprep.mubr.f32.mxu1 %v22101_v37 }
 0x9d8   : > { %18248 = vmatpush3.msra.mxu0 %v21961_v45  ;;  %v15004_v45 = vand.u32 4294901760, %v15003_v46 }
 0x9d9   : > { %18249 = vmatprep.subr.mxu0 %v21999_v2 }
 0x9da   : > { %18223 = vmatmul.mubr.f32.gmra.mxu0 %v14964_v18  ;;  %18245 = vmatmul.mubr.f32.gmra.mxu1 %v22113_v20 }
 0x9db   : > { %18225 = vmatprep.mubr.f32.mxu0 %v14974_v43  ;;  %18267 = vmatprep.mubr.f32.mxu1 %v14932_v31 }
 0x9dc   : > { %18250 = vmatpush3.msra.mxu0 %v21999_v2 }
 0x9dd   : > { %18279 = vmatprep.subr.mxu0 %v21972_v63 }
 0x9de   : > { %18226 = vmatmul.mubr.f32.gmra.mxu0 %v14984_v23  ;;  %18268 = vmatmul.mubr.f32.vlgmr.msra.gmra.mxu1 %v14942_v51 }
 0x9df   : > { %18228 = vmatprep.mubr.f32.mxu0 %v14994_v60  ;;  %18270 = vmatprep.mubr.f32.mxu1 %v14952_v40 }
 0x9e0   : > { %18296 = vmatpush3.msra.mxu1 %v21957_v48 }
 0x9e1   : > { %18297 = vmatprep.subr.mxu1 %v21986_v7 }
 0x9e2   : > { %18229 = vmatmul.mubr.f32.gmra.mxu0 %v15004_v45  ;;  %18271 = vmatmul.mubr.f32.gmra.mxu1 %v14962_v8 }
 0x9e3   : > { %18251 = vmatprep.mubr.f32.mxu0 %v22055_v26  ;;  %18273 = vmatprep.mubr.f32.mxu1 %v14972_v6 }
 0x9e4   : > { %18298 = vmatpush3.msra.mxu1 %v21986_v7 }
 0x9e6   : > { %18252 = vmatmul.mubr.f32.vlgmr.msra.gmra.mxu0 %v22069_v13  ;;  %18274 = vmatmul.mubr.f32.gmra.mxu1 %v14982_v34 }
 0x9e7   : > { %18254 = vmatprep.mubr.f32.mxu0 %v22076_v28  ;;  %18276 = vmatprep.mubr.f32.mxu1 %v14992_v14 }
 0x9e8   : > { %18280 = vmatpush3.msra.mxu0 %v21972_v63 }
 0x9e9   : > { %18281 = vmatprep.subr.mxu0 %v22011_v61 }
 0x9ea   : > { %18255 = vmatmul.mubr.f32.gmra.mxu0 %v22090_v35  ;;  %18277 = vmatmul.mubr.f32.gmra.mxu1 %v15002_v36 }
 0x9eb   : > { %18257 = vmatprep.mubr.f32.mxu0 %v22097_v39  ;;  %18299 = vmatprep.mubr.f32.mxu1 %v22041_v55 }
 0x9ec   : > { %18282 = vmatpush3.msra.mxu0 %v22011_v61 }
 0x9ee   : > { %18258 = vmatmul.mubr.f32.gmra.mxu0 %v22111_v54  ;;  %18300 = vmatmul.mubr.f32.vlgmr.msra.gmra.mxu1 %v22052_v59 }
 0x9ef   : > { %18260 = vmatprep.mubr.f32.mxu0 %v14991_v5  ;;  %18302 = vmatprep.mubr.f32.mxu1 %v22059_v16 }
 0x9f2   : > { %18261 = vmatmul.mubr.f32.gmra.mxu0 %v15001_v32  ;;  %18303 = vmatmul.mubr.f32.gmra.mxu1 %v22071_v47 }
 0x9f3   : > { %18283 = vmatprep.mubr.f32.mxu0 %v22041_v55  ;;  %18305 = vmatprep.mubr.f32.mxu1 %v22080_v52 }
 0x9f6   : > { %18284 = vmatmul.mubr.f32.vlgmr.msra.gmra.mxu0 %v22052_v59  ;;  %18306 = vmatmul.mubr.f32.gmra.mxu1 %v22092_v24 }
 0x9f7   : > { %18286 = vmatprep.mubr.f32.mxu0 %v22059_v16  ;;  %18308 = vmatprep.mubr.f32.mxu1 %v22101_v37 }
 0x9fa   : > { %18287 = vmatmul.mubr.f32.gmra.mxu0 %v22071_v47  ;;  %18309 = vmatmul.mubr.f32.gmra.mxu1 %v22113_v20 }
 0x9fb   : > { %18289 = vmatprep.mubr.f32.mxu0 %v22080_v52 }
 0x9fe   : > { %18290 = vmatmul.mubr.f32.gmra.mxu0 %v22092_v24 }
 0x9ff   : > { %18292 = vmatprep.mubr.f32.mxu0 %v22101_v37 }
 0xa02   : > { %18293 = vmatmul.mubr.f32.gmra.mxu0 %v22113_v20 }
 0xa24   : > { %v18141_v48 = vpop.f32.mrf.mxu1 }
 0xa26   : > { %v14303_v63 = vpop.f32.mrf.mxu1 }
 0xa2c   : > { %v18125_v2 = vpop.f32.mrf.mxu0 }
 0xa2d   : > { %v14310_v23 = vadd.f32 %v18141_v48, %v18125_v2 }
 0xa2e   : > { %v14152_v38 = vpop.f32.mrf.mxu0 }
 0xa2f   : > { %v14304_v45 = vadd.f32 %v14303_v63, %v14152_v38 }
 0xa3c   : > { %v22166_v7 = vpop.f32.mrf.mxu1 }
 0xa3e   : > { %v22168_v61 = vpop.f32.mrf.mxu1 }
 0xa44   : > { %v18128_v55 = vpop.f32.mrf.mxu0 }
 0xa46   : > { %v14172_v17 = vpop.f32.mrf.mxu0 }
 0xa54   : > { %v22170_v42 = vpop.f32.mrf.mxu1 }
 0xa56   : > { %v22172_v56 = vpop.f32.mrf.mxu1 }
 0xa5c   : > { %v22176_v22 = vpop.f32.mrf.mxu0 }
 0xa5e   : > { %v22180_v4 = vpop.f32.mrf.mxu0 }
 0xa6a   : > { %v22174_v12 = vpop.f32.mrf.mxu1 }
 0xa6c   : > { %v22178_v27 = vpop.f32.mrf.mxu1 }
 0xa6e   : > { %v18173_v9 = vpop.f32.mrf.mxu1 }
 0xa70   : > { %v22182_v59 = vpop.f32.mrf.mxu1 }
 0xa72   : > { %v22184_v26 = vpop.f32.mrf.mxu0  ;;  %v22186_v1 = vpop.f32.mrf.mxu1 }
 0xa74   : > { %v22188_v49 = vpop.f32.mrf.mxu0  ;;  %v22190_v16 = vpop.f32.mrf.mxu1 }
 0xa76   : > { %v18157_v25 = vpop.f32.mrf.mxu0  ;;  %v22192_v62 = vpop.f32.mrf.mxu1 }
 0xa78   : > { %v14421_v11 = vpop.f32.mrf.mxu0  ;;  %v22194_v13 = vpop.f32.mrf.mxu1 }
 0xa7a   : > { %v18160_v47 = vpop.f32.mrf.mxu0  ;;  %v22196_v31 = vpop.f32.mrf.mxu1 }
 0xa7c   : > { %v14435_v28 = vpop.f32.mrf.mxu0  ;;  %v22198_v19 = vpop.f32.mrf.mxu1 }
 0xa7e   : > { %v18163_v57 = vpop.f32.mrf.mxu0  ;;  %v22200_v52 = vpop.f32.mrf.mxu1 }
 0xa80   : > { %v14449_v10 = vpop.f32.mrf.mxu0  ;;  %v22202_v51 = vpop.f32.mrf.mxu1 }
 0xa82   : > { %v18166_v35 = vpop.f32.mrf.mxu0  ;;  %v22204_v24 = vpop.f32.mrf.mxu1 }
 0xa84   : > { %v22206_v29 = vpop.f32.mrf.mxu0  ;;  %v22208_v39 = vpop.f32.mrf.mxu1 }
 0xa86   : > { %v18189_v33 = vpop.f32.mrf.mxu0  ;;  %v22210_v44 = vpop.f32.mrf.mxu1 }
 0xa88   : > { %v14678_v37 = vpop.f32.mrf.mxu0  ;;  %v22212_v40 = vpop.f32.mrf.mxu1 }
 0xa8a   : > { %v18192_v58 = vpop.f32.mrf.mxu0  ;;  %v22214_v54 = vpop.f32.mrf.mxu1 }
 0xa8b   : > { %22703 = vst [vmem:[#allocation42_spill] sm:$0xff] %v22214_v54 }
 0xa8c   : > { %v14690_v20 = vpop.f32.mrf.mxu0  ;;  %v22216_v8 = vpop.f32.mrf.mxu1 }
 0xa8d   : > { %22704 = vst [vmem:[#allocation20_spill] sm:$0xff] %v22216_v8  ;;  %v14429_v8 = vadd.f32 %v18157_v25, %v14310_v23 }
 0xa8e   : > { %v18195_v5 = vpop.f32.mrf.mxu0  ;;  %v22218_v15 = vpop.f32.mrf.mxu1 }
 0xa8f   : > { %v14554_v2 = vadd.f32 %v18173_v9, %v14429_v8 }
 0xa90   : > { %v14702_v50 = vpop.f32.mrf.mxu0  ;;  %v22220_v6 = vpop.f32.mrf.mxu1 }
 0xa91   : > { %v14685_v23 = vadd.f32 %v18189_v33, %v14554_v2 }
 0xa92   : > { %v22222_v21 = vpop.f32.mrf.mxu0  ;;  %v22224_v32 = vpop.f32.mrf.mxu1 }
 0xa93   : > { %22705 = vst [vmem:[#allocation28_spill] sm:$0xff] %v22224_v32  ;;  %v14800_v33 = vadd.f32 %v22200_v52, %v14685_v23  ;;  %v22714_v23 = vld [vmem:[#allocation42_spill] sm:$0xff] }
 0xa94   : > { %v22226_v41 = vpop.f32.mrf.mxu0  ;;  %v22228_v34 = vpop.f32.mrf.mxu1 }
 0xa95   : > { %22706 = vst [vmem:[#allocation14_spill] sm:$0xff] %v22228_v34 }
 0xa96   : > { %v18221_v3 = vpop.f32.mrf.mxu0  ;;  %v22230_v30 = vpop.f32.mrf.mxu1 }
 0xa97   : > { %22707 = vst [vmem:[#allocation16_spill] sm:$0xff] %v22230_v30  ;;  %v14322_v30 = vadd.f32 %v22166_v7, %v18128_v55  ;;  %v14328_v55 = vadd.f32 %v22172_v56, %v22180_v4  ;;  %v14340_v56 = vadd.f32 %v22178_v27, %v22188_v49 }
 0xa98   : > { %v14936_v14 = vpop.f32.mrf.mxu0  ;;  %v22232_v18 = vpop.f32.mrf.mxu1 }
 0xa99   : > { %22708 = vst [vmem:[#allocation22_spill] sm:$0xff] %v22232_v18  ;;  %v14422_v18 = vadd.f32 %v14421_v11, %v14304_v45  ;;  %v14443_v48 = vadd.f32 %v18160_v47, %v14322_v30 }
 0xa9a   : > { %v18224_v53 = vpop.f32.mrf.mxu0  ;;  %v22234_v36 = vpop.f32.mrf.mxu1 }
 0xa9b   : > { %22709 = vst [vmem:[#allocation41_spill] sm:$0xff] %v22234_v36  ;;  %v14546_v7 = vadd.f32 %v22182_v59, %v14422_v18 }
 0xa9c   : > { %v14956_v43 = vpop.f32.mrf.mxu0  ;;  %v22236_v0 = vpop.f32.mrf.mxu1 }
 0xa9d   : > { %22710 = vst [vmem:[#allocation27_spill] sm:$0xff] %v22236_v0  ;;  %v14316_v0 = vadd.f32 %v22168_v61, %v14172_v17  ;;  %v14679_v61 = vadd.f32 %v14678_v37, %v14546_v7  ;;  %v14570_v17 = vadd.f32 %v22186_v1, %v14443_v48 }
 0xa9e   : > { %v22238_v46 = vpop.f32.mrf.mxu0  ;;  %v22240_v60 = vpop.f32.mrf.mxu1 }
 0xa9f   : > { %22711 = vst [vmem:[#allocation26_spill] sm:$0xff] %v22240_v60  ;;  %v14334_v60 = vadd.f32 %v22170_v42, %v22176_v22  ;;  %v14436_v25 = vadd.f32 %v14435_v28, %v14316_v0  ;;  %v14346_v42 = vadd.f32 %v22174_v12, %v22184_v26  ;;  %v14450_v22 = vadd.f32 %v14449_v10, %v14328_v55 }
 0xaa0   : > { %v22242_v34 = vpop.f32.mrf.mxu0  ;;  %v22244_v54 = vpop.f32.mrf.mxu1  ;;  %v14697_v28 = vadd.f32 %v18192_v58, %v14570_v17  ;;  %v14947_v12 = vadd.f32 %v18221_v3, %v14800_v33  ;;  %v14794_v26 = vadd.f32 %v22202_v51, %v14679_v61  ;;  %v14464_v10 = vadd.f32 %v22206_v29, %v14340_v56  ;;  %v22718_v17 = vld [vmem:[#allocation16_spill] sm:$0xff] }
 0xaa1   : > { %v14457_v11 = vadd.f32 %v18163_v57, %v14334_v60  ;;  %v14562_v59 = vadd.f32 %v22190_v16, %v14436_v25  ;;  %v14471_v4 = vadd.f32 %v18166_v35, %v14346_v42  ;;  %v14578_v16 = vadd.f32 %v22194_v13, %v14450_v22 }
 0xaa2   : > { %v22247_v32 = vpop.f32.mrf.mxu0  ;;  %v22249_v36 = vpop.f32.mrf.mxu1  ;;  %v14937_v18 = vadd.f32 %v14936_v14, %v14794_v26  ;;  %v14812_v27 = vadd.f32 %v22204_v24, %v14697_v28  ;;  %v15094_v51 = vadd.f32 %v22218_v15, %v14947_v12  ;;  %v14594_v13 = vadd.f32 %v22198_v19, %v14464_v10  ;;  %v22713_v19 = vld [vmem:[#allocation28_spill] sm:$0xff] }
 0xaa3   : > { %22712 = vst [vmem:[#allocation23_spill] sm:$0xff] %v22249_v36  ;;  %v14586_v57 = vadd.f32 %v22192_v62, %v14457_v11  ;;  %v14691_v8 = vadd.f32 %v14690_v20, %v14562_v59  ;;  %v14703_v49 = vadd.f32 %v14702_v50, %v14578_v16  ;;  %v14602_v62 = vadd.f32 %v22196_v31, %v14471_v4  ;;  %v22719_v4 = vld [vmem:[#allocation22_spill] sm:$0xff]  ;;  %v22721_v16 = vld [vmem:[#allocation41_spill] sm:$0xff] }
 0xaa4   : > { %v22254_v63 = vpop.f32.mrf.mxu0  ;;  %v22256_v38 = vpop.f32.mrf.mxu1  ;;  %v14967_v20 = vadd.f32 %v18224_v53, %v14812_v27  ;;  %v15088_v31 = vadd.f32 %v22220_v6, %v14937_v18  ;;  %v14715_v48 = vadd.f32 %v22226_v41, %v14594_v13  ;;  %v22715_v6 = vld [vmem:[#allocation14_spill] sm:$0xff] }
 0xaa5   : > { %v14709_v58 = vadd.f32 %v18195_v5, %v14586_v57  ;;  %v14806_v3 = vadd.f32 %v22208_v39, %v14691_v8  ;;  %v14721_v29 = vadd.f32 %v22222_v21, %v14602_v62  ;;  %v14818_v39 = vadd.f32 %v22212_v40, %v14703_v49  ;;  %v22717_v40 = vld [vmem:[#allocation20_spill] sm:$0xff] }
 0xaa6   : > { %v18253_v45 = vpop.f32.mrf.mxu0  ;;  %v22261_v36 = vpop.f32.mrf.mxu1  ;;  %v15106_v25 = vadd.f32 %v22713_v19, %v14967_v20  ;;  %v22716_v41 = vld [vmem:[#allocation26_spill] sm:$0xff]  ;;  %v14830_v61 = vadd.f32 %v22717_v40, %v14715_v48 }
 0xaa7   : > { %v14824_v5 = vadd.f32 %v22210_v44, %v14709_v58  ;;  %v14957_v24 = vadd.f32 %v14956_v43, %v14806_v3  ;;  %v15213_v50 = vadd.f32 %v18253_v45, %v15094_v51  ;;  %v14977_v44 = vadd.f32 %v22242_v34, %v14818_v39 }
 0xaa8   : > { %v15205_v9 = vpop.f32.mrf.mxu0  ;;  %v22266_v47 = vpop.f32.mrf.mxu1  ;;  %v14836_v7 = vadd.f32 %v22714_v23, %v14721_v29  ;;  %v14997_v33 = vadd.f32 %v22254_v63, %v14830_v61 }
 0xaa9   : > { %v14987_v53 = vadd.f32 %v22238_v46, %v14824_v5  ;;  %v15206_v21 = vadd.f32 %v15205_v9, %v15088_v31  ;;  %v15100_v11 = vadd.f32 %v22715_v6, %v14957_v24  ;;  %v15338_v45 = vadd.f32 %v22716_v41, %v15213_v50 }
 0xaaa   : > { %v18256_v37 = vpop.f32.mrf.mxu0  ;;  %v22273_v1 = vpop.f32.mrf.mxu1  ;;  %v15007_v46 = vadd.f32 %v22247_v32, %v14836_v7  ;;  %v15112_v57 = vadd.f32 %v22719_v4, %v14977_v44  ;;  %v15784_v32 = vld [vmem:[%s22392_s7] ss:$0 sm:$0xff] }
 0xaab   : > { %v15227_v55 = vadd.f32 %v18256_v37, %v15106_v25  ;;  %v15118_v42 = vadd.f32 %v22718_v17, %v14987_v53  ;;  %v15330_v59 = vadd.f32 %v22244_v54, %v15206_v21  ;;  %v22720_v26 = vld [vmem:[#allocation23_spill] sm:$0xff] }
 0xaac   : > { %v15219_v30 = vpop.f32.mrf.mxu0  ;;  %v22278_v52 = vpop.f32.mrf.mxu1 }
 0xaad   : > { %v15220_v28 = vadd.f32 %v15219_v30, %v15100_v11  ;;  %v15354_v10 = vadd.f32 %v22720_v26, %v15227_v55  ;;  %v15130_v30 = vadd.f32 %v22721_v16, %v15007_v46 }
 0xaae   : > { %v18259_v35 = vpop.f32.mrf.mxu0  ;;  %v18301_v0 = vpop.f32.mrf.mxu1 }
 0xaaf   : > { %v15241_v56 = vadd.f32 %v18259_v35, %v15118_v42  ;;  %v15346_v62 = vadd.f32 %v22256_v38, %v15220_v28  ;;  %v22722_v35 = vld [vmem:[#allocation27_spill] sm:$0xff] }
 0xab0   : > { %v15233_v14 = vpop.f32.mrf.mxu0  ;;  %v15577_v60 = vpop.f32.mrf.mxu1  ;;  %v15124_v20 = vadd.f32 %v22722_v35, %v14997_v33 }
 0xab1   : > { %v15234_v58 = vadd.f32 %v15233_v14, %v15112_v57  ;;  %v15370_v51 = vadd.f32 %v22261_v36, %v15241_v56 }
 0xab2   : > { %v18262_v15 = vpop.f32.mrf.mxu0  ;;  %v18304_v2 = vpop.f32.mrf.mxu1 }
 0xab3   : > { %v15255_v29 = vadd.f32 %v18262_v15, %v15130_v30  ;;  %v15362_v38 = vadd.f32 %v22266_v47, %v15234_v58 }
 0xab4   : > { %v15247_v43 = vpop.f32.mrf.mxu0  ;;  %v15589_v22 = vpop.f32.mrf.mxu1 }
 0xab5   : > { %v15248_v24 = vadd.f32 %v15247_v43, %v15124_v20 }
 0xab6   : > { %v18285_v9 = vpop.f32.mrf.mxu0  ;;  %v18307_v18 = vpop.f32.mrf.mxu1 }
 0xab7   : > { %v15469_v34 = vadd.f32 %v18285_v9, %v15338_v45  ;;  %v15378_v23 = vadd.f32 %v22278_v52, %v15248_v24 }
 0xab8   : > { %v15462_v37 = vpop.f32.mrf.mxu0  ;;  %v15601_v14 = vpop.f32.mrf.mxu1 }
 0xab9   : > { %v15584_v8 = vadd.f32 %v18301_v0, %v15469_v34  ;;  %v15463_v12 = vadd.f32 %v15462_v37, %v15330_v59 }
 0xaba   : > { %v18288_v27 = vpop.f32.mrf.mxu0  ;;  %v18310_v21 = vpop.f32.mrf.mxu1 }
 0xabb   : > { %v15631_v54 = vadd.f32 %v15784_v32, %v15584_v8  ;;  %v15578_v49 = vadd.f32 %v15577_v60, %v15463_v12  ;;  %v15481_v63 = vadd.f32 %v18288_v27, %v15354_v10 }
 0xabc   : > { %v15474_v3 = vpop.f32.mrf.mxu0  ;;  %v15613_v6 = vpop.f32.mrf.mxu1 }
 0xabd   : > { %15639 = vst.msk [vmem:[%s22313_s25 + $0x8] sm:$0xff] %vm409_vm0, %v15631_v54  ;;  %v15630_v0 = vadd.f32 %v15784_v32, %v15578_v49  ;;  %v15596_v13 = vadd.f32 %v18304_v2, %v15481_v63  ;;  %v15475_v5 = vadd.f32 %v15474_v3, %v15346_v62  ;;  %v15386_v2 = vadd.f32 %v22273_v1, %v15255_v29 }
 0xabe   : > { %v18291_v60 = vpop.f32.mrf.mxu0 }
 0xabf   : > { %15638 = vst.msk [vmem:[%s22313_s25] sm:$0xff] %vm409_vm0, %v15630_v0  ;;  %v15633_v36 = vadd.f32 %v15784_v32, %v15596_v13  ;;  %v15590_v50 = vadd.f32 %v15589_v22, %v15475_v5  ;;  %v15493_v31 = vadd.f32 %v18291_v60, %v15370_v51 }
 0xac0   : > { %v15486_v48 = vpop.f32.mrf.mxu0 }
 0xac1   : > { %15641 = vst.msk [vmem:[%s22313_s25 + $0x18] sm:$0xff] %vm409_vm0, %v15633_v36  ;;  %v15632_v53 = vadd.f32 %v15784_v32, %v15590_v50  ;;  %v15608_v39 = vadd.f32 %v18307_v18, %v15493_v31  ;;  %v15487_v15 = vadd.f32 %v15486_v48, %v15362_v38 }
 0xac2   : > { %v18294_v47 = vpop.f32.mrf.mxu0 }
 0xac3   : > { %15640 = vst.msk [vmem:[%s22313_s25 + $0x10] sm:$0xff] %vm409_vm0, %v15632_v53  ;;  %v15635_v19 = vadd.f32 %v15784_v32, %v15608_v39  ;;  %v15602_v25 = vadd.f32 %v15601_v14, %v15487_v15  ;;  %v15505_v44 = vadd.f32 %v18294_v47, %v15386_v2 }
 0xac4   : > { %v15498_v7 = vpop.f32.mrf.mxu0 }
 0xac5   : > { %15643 = vst.msk [vmem:[%s22313_s25 + $0x28] sm:$0xff] %vm409_vm0, %v15635_v19  ;;  %v15634_v43 = vadd.f32 %v15784_v32, %v15602_v25  ;;  %v15620_v55 = vadd.f32 %v18310_v21, %v15505_v44  ;;  %v15499_v1 = vadd.f32 %v15498_v7, %v15378_v23 }
 0xac7   : > { %15642 = vst.msk [vmem:[%s22313_s25 + $0x20] sm:$0xff] %vm409_vm0, %v15634_v43  ;;  %v15637_v11 = vadd.f32 %v15784_v32, %v15620_v55  ;;  %v15614_v41 = vadd.f32 %v15613_v6, %v15499_v1 }
 0xac9   : > { %15645 = vst.msk [vmem:[%s22313_s25 + $0x38] sm:$0xff] %vm409_vm0, %v15637_v11  ;;  %v15636_v52 = vadd.f32 %v15784_v32, %v15614_v41 }
 0xacb   : > { %15644 = vst.msk [vmem:[%s22313_s25 + $0x30] sm:$0xff] %vm409_vm0, %v15636_v52 }
 0xacc   : > { %18622 = shalt.err (!%p18619_p3)
}
 0xacd   : > { %s18623_s28 = scalar_lea.hbm %s22335_s21, 1024  ;;  %s18627_s18 = scalar_lea.hbm %s22395_s10, 2048 }
 0xace   : > { %p18624_p2 = scmp.ne.s32.totalorder %s22335_s21, %s18623_s28  ;;  %p18628_p13 = scmp.lt.s32.totalorder %s22335_s21, %s22395_s10 }
 0xacf   : > { %p18629_p6 = scmp.lt.s32.totalorder %s18627_s18, %s18623_s28 }
 0xad0   : > { %p18625_p4 = pnand %p18624_p2, %p18779_p5 }
 0xad1   : > { %p18630_p9 = por %p18629_p6, %p18628_p13 }
 0xad2   : > { %p18626_p7 = pneg %p18625_p4 }
 0xad4   : > { %p18631_p10 = pnand %p18630_p9, %p18626_p7 }
 0xad6   : > { %18634 = shalt.err (!%p18631_p10)
}
 0xad7   : > { %s18684_s26 = smov 128   ;;  %s18685_s27 = smov 8  }
 0xad8   : > { %18319 = dma.vmem_to_hbm [thread:$0]  (%p18779_p5), %s22337_s11, 1024, %s22335_s21, %s22345_s17, %s18684_s26, %s18684_s26, %s18685_s27  }
 0xad9 PF: > { %p18336_p12 = scmp.ge.s32.totalorder %s18677_s16, 2  ;;  %s15675_s12 = sand.u32 1, %s18665_s13  }
 0xada   : > { %p22723_p8 = scmp.ne.s32.totalorder %s22473_s24, 0  ;;  %s15676_s28 = scalar_lea.sflag [#allocation4], %s15675_s12 }
 0xadc   : > { %p18329_p11 = pnand %p18336_p12, %p22723_p8 }
 0xade   : > { %p18330_p0 = pneg %p18329_p11 }
 0xae0   : > { %18660 = dma.done.wait (%p18330_p0), %s15676_s28, 1024  }
 0xae1   : > { %18662 = vsyncadd (%p18330_p0), %s15676_s28, 4294966272  ;;  %p22_p1 = scmp.ge.s32.totalorder %s18766_s19, 4   ;;  %s22724_s13 = smov %s18669_s14 }
 0xae2   : > { %s22725_s14 = smov %s18673_s15  ;;  %s22726_s15 = smov %s18777_s22 }
 0xae3   : > { %s22727_s16 = smov %s18766_s19  ;;  %24 = sbr.rel (!%p22_p1) target bundleno = 5 (0x5), region = 112 }
 0xae8   :  { %15681 = vsyncpa [#allocation3], 1 }
 0xae9   :  { %15683 = vsyncpa [#allocation3 + $0x1], 1 }
 0xaea   :  { %15684 = vsyncpa [#allocation4], 1 }
 0xaeb   :  { %15686 = vsyncpa [#allocation4 + $0x1], 1 }
 0xaec   :  { %15687 = vsyncpa [#allocation5], 1 }
 0xaed   :  { %15689 = vsyncpa [#allocation5 + $0x1], 1 }

</bundles_post_ra>
